<compile_context>
chip_gen: v6e
topology: v6e:2x2x1
jax: 0.10.0
libtpu: 0.0.40
codegen_flags: <defaults>
</compile_context>

<pallas_src>
import functools

import jax
import jax.numpy as jnp
from jax import lax
from jax.experimental import pallas as pl
from jax.experimental.pallas import tpu as pltpu


def _weights_dropout_kernel(w_ref, out_ref, *, k, n_valid, chunk):
    """w_ref / out_ref: (TB, N_pad).

    Drops the k smallest of the first `n_valid` lanes per row (stable
    index tie-break, matching argsort semantics) and re-softmaxes the
    survivors; dropped and pad lanes are written as exact zeros.
    """
    w = w_ref[...].astype(jnp.float32)                      # (TB, N_pad)
    tb, n_pad = w.shape
    n_chunks = n_pad // chunk
    padded = n_valid < n_pad                                 # static (Python) flag

    # rank[b, i] = #{ valid j : w[b,j] < w[b,i]  or (w[b,j] == w[b,i] and j < i) }
    # computed chunk-by-chunk over j to keep the working set O(TB*N*chunk).
    wi = w[:, :, None]                                       # (TB, N, 1)
    i_idx = lax.broadcasted_iota(jnp.int32, (n_pad, 1), 0)   # (N, 1) batch-invariant

    def rank_chunk(c, rank):
        j0 = pl.multiple_of(c * chunk, chunk)
        wj = w_ref[:, pl.ds(j0, chunk)].astype(jnp.float32)[:, None, :]   # (TB,1,C)
        j_idx = lax.broadcasted_iota(jnp.int32, (1, chunk), 1) + j0       # (1, C)
        tie = j_idx < i_idx                                               # (N, C)
        smaller = (wj < wi) | ((wj == wi) & tie[None, :, :])              # (TB,N,C)
        if padded:
            smaller = smaller & (j_idx < n_valid)[None, :, :]
        return rank + jnp.sum(smaller.astype(jnp.int32), axis=-1)

    rank = lax.fori_loop(
        0, n_chunks, rank_chunk,
        jnp.zeros((tb, n_pad), jnp.int32),
        unroll=(n_chunks <= 8))

    keep = rank >= k
    if padded:
        col = lax.broadcasted_iota(jnp.int32, (1, n_pad), 1)
        valid = col < n_valid
        keep = keep & valid
        m = jnp.max(jnp.where(valid, w, -jnp.inf), axis=1, keepdims=True)
    else:
        # the dropped values are the k smallest (k < N), so the max over the
        # kept values equals the global max -- no keep-masked select needed.
        m = jnp.max(w, axis=1, keepdims=True)

    e = jnp.where(keep, jnp.exp(w - m), jnp.float32(0.0))
    s = jnp.sum(e, axis=1, keepdims=True)
    out = e * pl.reciprocal(s, approx=False)   # exact; goes to the idle EUP slot
    out_ref[...] = out.astype(out_ref.dtype)


def weights_dropout(w, p=0.5):
    """Pallas implementation of WeightsDropout.forward.

    w: (B, 1, N) attention weights (e.g. a preceding softmax output).
    """
    if p == 0:
        return w
    b, c, n = w.shape
    assert c == 1, "WeightsDropout is used with a single attention head (C=1)"
    k = int(n * p)
    assert k < n, "p too large: every weight would be dropped (k == N)"

    TB = 8                                      # sublane tile for f32
    n_pad = ((n + 127) // 128) * 128            # lane-dense output width
    b_pad = ((b + TB - 1) // TB) * TB
    chunk = 256 if n_pad % 256 == 0 else 128    # rank-phase lane chunk (128-512)

    w2 = w.reshape(b, n)
    if b_pad != b or n_pad != n:
        w2 = jnp.pad(w2, ((0, b_pad - b), (0, n_pad - n)))

    out = pl.pallas_call(
        functools.partial(_weights_dropout_kernel, k=k, n_valid=n, chunk=chunk),
        out_shape=jax.ShapeDtypeStruct((b_pad, n_pad), w.dtype),
        grid_spec=pltpu.PrefetchScalarGridSpec(
            num_scalar_prefetch=0,
            grid=(b_pad // TB,),
            in_specs=[pl.BlockSpec((TB, n_pad), lambda i: (i, 0))],
            out_specs=pl.BlockSpec((TB, n_pad), lambda i: (i, 0)),
        ),
        compiler_params=pltpu.CompilerParams(
            dimension_semantics=("parallel",),
            # Per-block working set ~= TB * n_pad * chunk * 4B (a few MiB):
            # comfortably inside the default scoped VMEM on v5e/v6e/v7x.
            vmem_limit_bytes=32 * 1024 * 1024,
        ),
    )(w2)
    return out[:b, :n].reshape(b, c, n)


def _reference(w, p):
    """Pure-JAX reference of the PyTorch semantics (for distinct values)."""
    if p == 0:
        return w
    _, _, n = w.shape
    k = int(n * p)
    rank = jnp.argsort(jnp.argsort(w, axis=2), axis=2)
    keep = rank >= k
    masked = jnp.where(keep, w, -jnp.inf)
    sm = jax.nn.softmax(masked, axis=2)
    return jnp.where(keep, sm, 0.0).astype(w.dtype)


if __name__ == "__main__":
    key = jax.random.PRNGKey(0)
    # (batch, heads=1, n_instances), as used in the miqsar attention nets.
    configs = [
        (2, 1, 8, 0.5),     # tiny case, as before
        (5, 1, 40, 0.3),    # exercises the batch- and lane-padding masks
        (20, 1, 12, 0.25),  # exercises the batch grid (b_pad // 8 = 3 blocks)
    ]
    for (B, C, N, p) in configs:
        key, sub = jax.random.split(key)
        logits = jax.random.normal(sub, (B, C, N), dtype=jnp.float32)
        w = jax.nn.softmax(logits, axis=2)      # positive attention weights

        out = jax.block_until_ready(weights_dropout(w, p=p))
        ref = _reference(w, p)
        k = int(N * p)

        # Note: ties between exactly-equal weights use a stable index
        # tie-break (matches the argsort reference; torch's sort order for
        # exact ties may differ, which only matters for exact duplicates).
        assert out.shape == w.shape
        assert jnp.allclose(out, ref, atol=1e-6), (B, N, p)
        assert int(jnp.sum(out == 0.0)) == B * C * k
        assert jnp.allclose(jnp.sum(out, axis=2), 1.0, atol=1e-6)

    print("KERNEL_OK")
</pallas_src>

<mosaic_0001>
module attributes {stable_mosaic.version = 11 : i64} {
  func.func @_weights_dropout_kernel(%arg0: i32, %arg1: memref<8x128xf32, #tpu.memory_space<vmem>>, %arg2: memref<8x128xf32, #tpu.memory_space<vmem>>) attributes {dimension_semantics = [#tpu.dimension_semantics<parallel>], iteration_bounds = array<i64: 1>, scalar_prefetch = 0 : i64, scratch_operands = 0 : i64, tpu.core_type = #tpu.core_type<tc>, window_params = [{transform_indices = @transform_0, window_bounds = array<i64: 8, 128>}, {transform_indices = @transform_1, window_bounds = array<i64: 8, 128>}]} {
    %c0 = arith.constant 0 : index
    %c0_0 = arith.constant 0 : index
    %0 = vector.load %arg1[%c0, %c0_0] : memref<8x128xf32, #tpu.memory_space<vmem>>, vector<8x128xf32>
    %1 = vector.shape_cast %0 : vector<8x128xf32> to vector<8x128x1xf32>
    %2 = tpu.iota {dimensions = array<i32: 0>} : vector<128x1xi32>
    %c0_i32 = arith.constant 0 : i32
    %3 = vector.broadcast %c0_i32 : i32 to vector<8x128xi32>
    %c0_i32_1 = arith.constant 0 : i32
    %c128_i32 = arith.constant 128 : i32
    %4 = arith.muli %c0_i32_1, %c128_i32 : i32
    %5 = tpu.assume_multiple %4, 128 : i32
    %c0_2 = arith.constant 0 : index
    %6 = arith.index_cast %5 : i32 to index
    %7 = vector.load %arg1[%c0_2, %6] : memref<8x128xf32, #tpu.memory_space<vmem>>, vector<8x128xf32>
    %8 = vector.shape_cast %7 : vector<8x128xf32> to vector<8x1x128xf32>
    %9 = tpu.iota {dimensions = array<i32: 1>} : vector<1x128xi32>
    %10 = vector.broadcast %5 : i32 to vector<1x128xi32>
    %11 = arith.addi %9, %10 : vector<1x128xi32>
    %12 = vector.broadcast %11 : vector<1x128xi32> to vector<128x128xi32>
    %13 = vector.broadcast %2 : vector<128x1xi32> to vector<128x128xi32>
    %14 = arith.cmpi slt, %12, %13 : vector<128x128xi32>
    %15 = vector.broadcast %8 : vector<8x1x128xf32> to vector<8x128x128xf32>
    %16 = vector.broadcast %1 : vector<8x128x1xf32> to vector<8x128x128xf32>
    %17 = arith.cmpf olt, %15, %16 : vector<8x128x128xf32>
    %18 = vector.broadcast %8 : vector<8x1x128xf32> to vector<8x128x128xf32>
    %19 = vector.broadcast %1 : vector<8x128x1xf32> to vector<8x128x128xf32>
    %20 = arith.cmpf oeq, %18, %19 : vector<8x128x128xf32>
    %21 = vector.shape_cast %14 : vector<128x128xi1> to vector<1x128x128xi1>
    %22 = vector.broadcast %21 : vector<1x128x128xi1> to vector<8x128x128xi1>
    %23 = arith.andi %20, %22 : vector<8x128x128xi1>
    %24 = arith.ori %17, %23 : vector<8x128x128xi1>
    %c8_i32 = arith.constant 8 : i32
    %25 = vector.broadcast %c8_i32 : i32 to vector<1x128xi32>
    %26 = arith.cmpi slt, %11, %25 : vector<1x128xi32>
    %27 = vector.shape_cast %26 : vector<1x128xi1> to vector<1x1x128xi1>
    %28 = vector.broadcast %27 : vector<1x1x128xi1> to vector<8x128x128xi1>
    %29 = arith.andi %24, %28 : vector<8x128x128xi1>
    %30 = arith.extui %29 : vector<8x128x128xi1> to vector<8x128x128xi32>
    %cst = arith.constant dense<0> : vector<8x128xi32>
    %31 = vector.multi_reduction <add>, %30, %cst [2] : vector<8x128x128xi32> to vector<8x128xi32>
    %32 = arith.addi %3, %31 : vector<8x128xi32>
    %c1_i32 = arith.constant 1 : i32
    %c4_i32 = arith.constant 4 : i32
    %33 = vector.broadcast %c4_i32 : i32 to vector<8x128xi32>
    %34 = arith.cmpi sge, %32, %33 : vector<8x128xi32>
    %35 = tpu.iota {dimensions = array<i32: 1>} : vector<1x128xi32>
    %c8_i32_3 = arith.constant 8 : i32
    %36 = vector.broadcast %c8_i32_3 : i32 to vector<1x128xi32>
    %37 = arith.cmpi slt, %35, %36 : vector<1x128xi32>
    %38 = vector.broadcast %37 : vector<1x128xi1> to vector<8x128xi1>
    %39 = arith.andi %34, %38 : vector<8x128xi1>
    %cst_4 = arith.constant 0xFF800000 : f32
    %40 = vector.shape_cast %37 : vector<1x128xi1> to vector<1x128xi1>
    %41 = vector.broadcast %40 : vector<1x128xi1> to vector<8x128xi1>
    %42 = vector.broadcast %cst_4 : f32 to vector<8x128xf32>
    %43 = arith.select %41, %0, %42 : vector<8x128xi1>, vector<8x128xf32>
    %cst_5 = arith.constant dense<0xFF800000> : vector<8xf32>
    %44 = vector.multi_reduction <maximumf>, %43, %cst_5 [1] : vector<8x128xf32> to vector<8xf32>
    %45 = vector.shape_cast %44 : vector<8xf32> to vector<8x1xf32>
    %46 = vector.broadcast %45 : vector<8x1xf32> to vector<8x128xf32>
    %47 = arith.subf %0, %46 : vector<8x128xf32>
    %48 = math.exp %47 : vector<8x128xf32>
    %cst_6 = arith.constant 0.000000e+00 : f32
    %49 = vector.broadcast %cst_6 : f32 to vector<8x128xf32>
    %50 = arith.select %39, %48, %49 : vector<8x128xi1>, vector<8x128xf32>
    %cst_7 = arith.constant dense<0.000000e+00> : vector<8xf32>
    %51 = vector.multi_reduction <add>, %50, %cst_7 [1] : vector<8x128xf32> to vector<8xf32>
    %52 = vector.shape_cast %51 : vector<8xf32> to vector<8x1xf32>
    %53 = tpu.reciprocal %52 : vector<8x1xf32> -> vector<8x1xf32>
    %54 = vector.broadcast %53 : vector<8x1xf32> to vector<8x128xf32>
    %55 = arith.mulf %50, %54 : vector<8x128xf32>
    %c0_8 = arith.constant 0 : index
    %c0_9 = arith.constant 0 : index
    %56 = vector.load %arg2[%c0_8, %c0_9] : memref<8x128xf32, #tpu.memory_space<vmem>>, vector<8x128xf32>
    tpu.vector_store %arg2[%c0_8, %c0_9], %55 {strides = array<i32>} : memref<8x128xf32, #tpu.memory_space<vmem>>, vector<8x128xf32>,
    return
  }
  func.func @transform_0(%arg0: i32) -> (i32, i32) {
    %c0_i32 = arith.constant 0 : i32
    %c0_i32_0 = arith.constant 0 : i32
    return %arg0, %c0_i32 : i32, i32
  }
  func.func @transform_1(%arg0: i32) -> (i32, i32) {
    %c0_i32 = arith.constant 0 : i32
    %c0_i32_0 = arith.constant 0 : i32
    return %arg0, %c0_i32 : i32, i32
  }
}

</mosaic_0001>

<bundles_post_ra>
// kernel: tpu_custom_call.1
= control target key start
LH: loop header
LB: loop body
LE: loop exit
PB: predicated region body
PF: predicated region fallthrough
CT: control target
= control target key end

     0   :  { %6 = vsyncpa [#allocation3], 0  ;;  %s12267_s0 = inlined_call_operand.hbm [shape: f32[8,128], index: 0, kind: input, shape index: {}]   ;;  %s12268_s1 = inlined_call_operand.hbm [shape: f32[8,128], index: 1, kind: output, shape index: {}]  }
   0x1   :  { %7 = vsyncpa [#allocation4], 0  ;;  %s6749_s6 = smov [#allocation2]  }
   0x2   :  { %s14_s7 = sshll.u32 %s6749_s6, 4  ;;  %s15_s7 = int_to_ptr.vmem [resolvable:$true] %s14_s7 }
   0x3   :  { %s6713_s8 = scalar_lea.vmem %s15_s7, 128  ;;  %p6718_p1 = scmp.lt.s32.totalorder %s15_s7, %s15_s7 }
   0x4   :  { %p6714_p0 = scmp.ne.s32.totalorder %s15_s7, %s6713_s8  ;;  %p6719_p2 = scmp.lt.s32.totalorder %s6713_s8, %s6713_s8 }
   0x6   :  { %p6720_p3 = por %p6719_p2, %p6718_p1 }
   0x8   :  { %p6721_p4 = pnand %p6720_p3, %p6714_p0 }
   0xa   :  { %6724 = shalt.err (!%p6721_p4)
}
   0xb   :  { %17 = dma.hbm_to_vmem [thread:$0]  %s12267_s0, 128, %s15_s7, [#allocation3]  }
   0xc   :  { %6745 = dma.done.wait [#allocation3], 128  }
   0xd   :  { %6746 = vsyncadd [#allocation3], 4294967168  ;;  %v12271_v0 = vlaneseq  ;;  %v6772_v3 = vld [vmem:[#allocation2] sm:$0xff]  ;;  %v12269_v7 = vmov 0   ;;  %s6752_s0 = smov [#allocation5]  }
   0xe   :  { %6697 = vset.pattern.permute.xlu0 %v12269_v7  ;;  %6696 = vset.pattern.permute.xlu1 %v12269_v7  ;;  %s6683_s11 = sshll.u32 %s6752_s0, 4  ;;  %s6684_s11 = int_to_ptr.vmem [resolvable:$true] %s6683_s11 }
   0xf   :  { %v6767_v1 = vshrl.u32 %v12271_v0, 7  ;;  %s6725_s12 = scalar_lea.vmem %s6684_s11, 128  ;;  %p6730_p6 = scmp.lt.s32.totalorder %s6684_s11, %s6684_s11 }
  0x10   :  { %p6726_p5 = scmp.ne.s32.totalorder %s6684_s11, %s6725_s12  ;;  %p6731_p7 = scmp.lt.s32.totalorder %s6725_s12, %s6725_s12 }
  0x11   :  { %12547 = vst [vmem:[#allocation8_spill] sm:$0xff] %v6767_v1  ;;  %v6770_v2 = vsub.s32 0, %v6767_v1  ;;  %v6777_v5 = vsub.s32 1, %v6767_v1  ;;  %v6784_v8 = vsub.s32 2, %v6767_v1  ;;  %v6789_v10 = vsub.s32 3, %v6767_v1 }
  0x12   :  { %v6802_v16 = vsub.s32 4, %v6767_v1  ;;  %v6839_v34 = vsub.s32 5, %v6767_v1  ;;  %v6876_v52 = vsub.s32 6, %v6767_v1  ;;  %v6913_v7 = vsub.s32 7, %v6767_v1  ;;  %p6732_p8 = por %p6731_p7, %p6730_p6 }
  0x13   :  { %12548 = vst [vmem:[#allocation9_spill] sm:$0xff] %v6770_v2  ;;  %v25_v4 = vrot.slane %v6772_v3, %v6770_v2  ;;  %12549 = vst [vmem:[#allocation10_spill] sm:$0xff] %v6777_v5  ;;  %v92_v6 = vrot.slane %v6772_v3, %v6777_v5  ;;  %v159_v9 = vrot.slane %v6772_v3, %v6784_v8 }
  0x14   :  { %12550 = vst [vmem:[#allocation11_spill] sm:$0xff] %v6784_v8  ;;  %12551 = vst [vmem:[#allocation12_spill] sm:$0xff] %v6789_v10  ;;  %v226_v11 = vrot.slane %v6772_v3, %v6789_v10  ;;  %v293_v19 = vrot.slane %v6772_v3, %v6802_v16  ;;  %v360_v37 = vrot.slane %v6772_v3, %v6839_v34  ;;  %p6733_p9 = pnand %p6732_p8, %p6726_p5 }
  0x15   :  { %35 = vbcast.lane.b32.xlu1 %v25_v4, 272  ;;  %27 = vbcast.lane.b32.xlu0 %v25_v4, 256  ;;  %12552 = vst [vmem:[#allocation13_spill] sm:$0xff] %v6802_v16  ;;  %12553 = vst [vmem:[#allocation14_spill] sm:$0xff] %v6839_v34  ;;  %v427_v55 = vrot.slane %v6772_v3, %v6876_v52  ;;  %v494_v34 = vrot.slane %v6772_v3, %v6913_v7 }
  0x16   :  { %12554 = vst [vmem:[#allocation15_spill] sm:$0xff] %v6876_v52  ;;  %12567 = vst [vmem:[#allocation28_spill] sm:$0xff] %v6913_v7 }
  0x19   :  { %39 = vbcast.lane.b32.xlu1 %v25_v4, 280  ;;  %31 = vbcast.lane.b32.xlu0 %v25_v4, 264 }
  0x1d   :  { %47 = vbcast.lane.b32.xlu1 %v25_v4, 296  ;;  %43 = vbcast.lane.b32.xlu0 %v25_v4, 288 }
  0x21   :  { %55 = vbcast.lane.b32.xlu1 %v25_v4, 312  ;;  %51 = vbcast.lane.b32.xlu0 %v25_v4, 304 }
  0x25   :  { %63 = vbcast.lane.b32.xlu1 %v25_v4, 328  ;;  %59 = vbcast.lane.b32.xlu0 %v25_v4, 320 }
  0x29   :  { %71 = vbcast.lane.b32.xlu1 %v25_v4, 344  ;;  %67 = vbcast.lane.b32.xlu0 %v25_v4, 336 }
  0x2d   :  { %79 = vbcast.lane.b32.xlu1 %v25_v4, 360  ;;  %75 = vbcast.lane.b32.xlu0 %v25_v4, 352 }
  0x31   :  { %87 = vbcast.lane.b32.xlu1 %v25_v4, 376  ;;  %83 = vbcast.lane.b32.xlu0 %v25_v4, 368 }
  0x35   :  { %98 = vbcast.lane.b32.xlu1 %v92_v6, 264  ;;  %94 = vbcast.lane.b32.xlu0 %v92_v6, 256 }
  0x39   :  { %106 = vbcast.lane.b32.xlu1 %v92_v6, 280  ;;  %102 = vbcast.lane.b32.xlu0 %v92_v6, 272 }
  0x3d   :  { %114 = vbcast.lane.b32.xlu1 %v92_v6, 296  ;;  %110 = vbcast.lane.b32.xlu0 %v92_v6, 288 }
  0x41   :  { %122 = vbcast.lane.b32.xlu1 %v92_v6, 312  ;;  %118 = vbcast.lane.b32.xlu0 %v92_v6, 304 }
  0x45   :  { %130 = vbcast.lane.b32.xlu1 %v92_v6, 328  ;;  %126 = vbcast.lane.b32.xlu0 %v92_v6, 320 }
  0x49   :  { %138 = vbcast.lane.b32.xlu1 %v92_v6, 344  ;;  %134 = vbcast.lane.b32.xlu0 %v92_v6, 336 }
  0x4d   :  { %146 = vbcast.lane.b32.xlu1 %v92_v6, 360  ;;  %142 = vbcast.lane.b32.xlu0 %v92_v6, 352 }
  0x51   :  { %154 = vbcast.lane.b32.xlu1 %v92_v6, 376  ;;  %150 = vbcast.lane.b32.xlu0 %v92_v6, 368 }
  0x55   :  { %165 = vbcast.lane.b32.xlu1 %v159_v9, 264  ;;  %161 = vbcast.lane.b32.xlu0 %v159_v9, 256 }
  0x59   :  { %173 = vbcast.lane.b32.xlu1 %v159_v9, 280  ;;  %169 = vbcast.lane.b32.xlu0 %v159_v9, 272 }
  0x5d   :  { %181 = vbcast.lane.b32.xlu1 %v159_v9, 296  ;;  %177 = vbcast.lane.b32.xlu0 %v159_v9, 288 }
  0x61   :  { %189 = vbcast.lane.b32.xlu1 %v159_v9, 312  ;;  %185 = vbcast.lane.b32.xlu0 %v159_v9, 304 }
  0x65   :  { %197 = vbcast.lane.b32.xlu1 %v159_v9, 328  ;;  %193 = vbcast.lane.b32.xlu0 %v159_v9, 320 }
  0x69   :  { %205 = vbcast.lane.b32.xlu1 %v159_v9, 344  ;;  %201 = vbcast.lane.b32.xlu0 %v159_v9, 336 }
  0x6d   :  { %213 = vbcast.lane.b32.xlu1 %v159_v9, 360  ;;  %209 = vbcast.lane.b32.xlu0 %v159_v9, 352 }
  0x71   :  { %221 = vbcast.lane.b32.xlu1 %v159_v9, 376  ;;  %217 = vbcast.lane.b32.xlu0 %v159_v9, 368 }
  0x75   :  { %232 = vbcast.lane.b32.xlu1 %v226_v11, 264  ;;  %228 = vbcast.lane.b32.xlu0 %v226_v11, 256 }
  0x79   :  { %240 = vbcast.lane.b32.xlu1 %v226_v11, 280  ;;  %236 = vbcast.lane.b32.xlu0 %v226_v11, 272 }
  0x7d   :  { %248 = vbcast.lane.b32.xlu1 %v226_v11, 296  ;;  %244 = vbcast.lane.b32.xlu0 %v226_v11, 288 }
  0x81   :  { %256 = vbcast.lane.b32.xlu1 %v226_v11, 312  ;;  %252 = vbcast.lane.b32.xlu0 %v226_v11, 304 }
  0x85   :  { %264 = vbcast.lane.b32.xlu1 %v226_v11, 328  ;;  %260 = vbcast.lane.b32.xlu0 %v226_v11, 320 }
  0x87   :  { %v6793_v12 = vpop.permute.xlu0 %27  ;;  %v6795_v13 = vpop.permute.xlu1 %35 }
  0x89   :  { %272 = vbcast.lane.b32.xlu1 %v226_v11, 344  ;;  %268 = vbcast.lane.b32.xlu0 %v226_v11, 336 }
  0x8b   :  { %v6797_v14 = vpop.permute.xlu1 %39  ;;  %v6799_v15 = vpop.permute.xlu0 %31 }
  0x8d   :  { %280 = vbcast.lane.b32.xlu1 %v226_v11, 360  ;;  %276 = vbcast.lane.b32.xlu0 %v226_v11, 352 }
  0x8f   :  { %v6804_v17 = vpop.permute.xlu1 %47  ;;  %v6806_v18 = vpop.permute.xlu0 %43 }
  0x91   :  { %288 = vbcast.lane.b32.xlu1 %v226_v11, 376  ;;  %284 = vbcast.lane.b32.xlu0 %v226_v11, 368 }
  0x93   :  { %v6810_v20 = vpop.permute.xlu1 %55  ;;  %v6812_v21 = vpop.permute.xlu0 %51 }
  0x95   :  { %299 = vbcast.lane.b32.xlu1 %v293_v19, 264  ;;  %295 = vbcast.lane.b32.xlu0 %v293_v19, 256 }
  0x97   :  { %v6814_v22 = vpop.permute.xlu1 %63  ;;  %v6816_v23 = vpop.permute.xlu0 %59 }
  0x99   :  { %307 = vbcast.lane.b32.xlu1 %v293_v19, 280  ;;  %303 = vbcast.lane.b32.xlu0 %v293_v19, 272 }
  0x9b   :  { %v6818_v24 = vpop.permute.xlu1 %71  ;;  %v6820_v25 = vpop.permute.xlu0 %67 }
  0x9d   :  { %315 = vbcast.lane.b32.xlu1 %v293_v19, 296  ;;  %311 = vbcast.lane.b32.xlu0 %v293_v19, 288 }
  0x9f   :  { %v6822_v26 = vpop.permute.xlu1 %79  ;;  %v6824_v27 = vpop.permute.xlu0 %75 }
  0xa1   :  { %323 = vbcast.lane.b32.xlu1 %v293_v19, 312  ;;  %319 = vbcast.lane.b32.xlu0 %v293_v19, 304 }
  0xa3   :  { %v6826_v28 = vpop.permute.xlu1 %87  ;;  %v6828_v29 = vpop.permute.xlu0 %83 }
  0xa5   :  { %331 = vbcast.lane.b32.xlu1 %v293_v19, 328  ;;  %327 = vbcast.lane.b32.xlu0 %v293_v19, 320 }
  0xa7   :  { %v6830_v30 = vpop.permute.xlu1 %98  ;;  %v6832_v31 = vpop.permute.xlu0 %94 }
  0xa9   :  { %339 = vbcast.lane.b32.xlu1 %v293_v19, 344  ;;  %335 = vbcast.lane.b32.xlu0 %v293_v19, 336 }
  0xab   :  { %v6834_v32 = vpop.permute.xlu1 %106  ;;  %v6836_v33 = vpop.permute.xlu0 %102 }
  0xad   :  { %347 = vbcast.lane.b32.xlu1 %v293_v19, 360  ;;  %343 = vbcast.lane.b32.xlu0 %v293_v19, 352 }
  0xaf   :  { %v6841_v35 = vpop.permute.xlu1 %114  ;;  %v6843_v36 = vpop.permute.xlu0 %110 }
  0xb1   :  { %355 = vbcast.lane.b32.xlu1 %v293_v19, 376  ;;  %351 = vbcast.lane.b32.xlu0 %v293_v19, 368 }
  0xb3   :  { %v6847_v38 = vpop.permute.xlu1 %122  ;;  %v6849_v39 = vpop.permute.xlu0 %118 }
  0xb5   :  { %366 = vbcast.lane.b32.xlu1 %v360_v37, 264  ;;  %362 = vbcast.lane.b32.xlu0 %v360_v37, 256 }
  0xb7   :  { %v6851_v40 = vpop.permute.xlu1 %130  ;;  %v6853_v41 = vpop.permute.xlu0 %126 }
  0xb9   :  { %374 = vbcast.lane.b32.xlu1 %v360_v37, 280  ;;  %370 = vbcast.lane.b32.xlu0 %v360_v37, 272 }
  0xbb   :  { %v6855_v42 = vpop.permute.xlu1 %138  ;;  %v6857_v43 = vpop.permute.xlu0 %134 }
  0xbd   :  { %382 = vbcast.lane.b32.xlu1 %v360_v37, 296  ;;  %378 = vbcast.lane.b32.xlu0 %v360_v37, 288 }
  0xbf   :  { %v6859_v44 = vpop.permute.xlu1 %146  ;;  %v6861_v45 = vpop.permute.xlu0 %142 }
  0xc1   :  { %390 = vbcast.lane.b32.xlu1 %v360_v37, 312  ;;  %386 = vbcast.lane.b32.xlu0 %v360_v37, 304 }
  0xc3   :  { %v6863_v46 = vpop.permute.xlu1 %154  ;;  %v6865_v47 = vpop.permute.xlu0 %150 }
  0xc5   :  { %398 = vbcast.lane.b32.xlu1 %v360_v37, 328  ;;  %394 = vbcast.lane.b32.xlu0 %v360_v37, 320 }
  0xc7   :  { %v6867_v48 = vpop.permute.xlu1 %165  ;;  %v6869_v49 = vpop.permute.xlu0 %161 }
  0xc9   :  { %406 = vbcast.lane.b32.xlu1 %v360_v37, 344  ;;  %402 = vbcast.lane.b32.xlu0 %v360_v37, 336 }
  0xcb   :  { %v6871_v50 = vpop.permute.xlu1 %173  ;;  %v6873_v51 = vpop.permute.xlu0 %169 }
  0xcd   :  { %414 = vbcast.lane.b32.xlu1 %v360_v37, 360  ;;  %410 = vbcast.lane.b32.xlu0 %v360_v37, 352 }
  0xcf   :  { %v6878_v53 = vpop.permute.xlu1 %181  ;;  %v6880_v54 = vpop.permute.xlu0 %177 }
  0xd1   :  { %422 = vbcast.lane.b32.xlu1 %v360_v37, 376  ;;  %418 = vbcast.lane.b32.xlu0 %v360_v37, 368 }
  0xd3   :  { %v6884_v56 = vpop.permute.xlu1 %189  ;;  %v6886_v57 = vpop.permute.xlu0 %185 }
  0xd5   :  { %433 = vbcast.lane.b32.xlu1 %v427_v55, 264  ;;  %429 = vbcast.lane.b32.xlu0 %v427_v55, 256 }
  0xd7   :  { %v6888_v58 = vpop.permute.xlu1 %197  ;;  %v6890_v59 = vpop.permute.xlu0 %193 }
  0xd8   :  { %12555 = vst [vmem:[#allocation16_spill] sm:$0xff] %v6888_v58  ;;  %12556 = vst [vmem:[#allocation17_spill] sm:$0xff] %v6890_v59 }
  0xd9   :  { %441 = vbcast.lane.b32.xlu1 %v427_v55, 280  ;;  %437 = vbcast.lane.b32.xlu0 %v427_v55, 272 }
  0xdb   :  { %v6892_v60 = vpop.permute.xlu1 %205  ;;  %v6894_v61 = vpop.permute.xlu0 %201 }
  0xdc   :  { %12557 = vst [vmem:[#allocation18_spill] sm:$0xff] %v6892_v60  ;;  %12558 = vst [vmem:[#allocation19_spill] sm:$0xff] %v6894_v61 }
  0xdd   :  { %449 = vbcast.lane.b32.xlu1 %v427_v55, 296  ;;  %445 = vbcast.lane.b32.xlu0 %v427_v55, 288 }
  0xdf   :  { %v6896_v62 = vpop.permute.xlu1 %213  ;;  %v6898_v63 = vpop.permute.xlu0 %209 }
  0xe0   :  { %12559 = vst [vmem:[#allocation20_spill] sm:$0xff] %v6896_v62  ;;  %12560 = vst [vmem:[#allocation21_spill] sm:$0xff] %v6898_v63 }
  0xe1   :  { %457 = vbcast.lane.b32.xlu1 %v427_v55, 312  ;;  %453 = vbcast.lane.b32.xlu0 %v427_v55, 304 }
  0xe3   :  { %v6900_v4 = vpop.permute.xlu1 %221  ;;  %v6902_v6 = vpop.permute.xlu0 %217 }
  0xe4   :  { %12561 = vst [vmem:[#allocation22_spill] sm:$0xff] %v6900_v4  ;;  %12562 = vst [vmem:[#allocation23_spill] sm:$0xff] %v6902_v6  ;;  %v12612_v4 = vmov 0 }
  0xe5   :  { %465 = vbcast.lane.b32.xlu1 %v427_v55, 328  ;;  %461 = vbcast.lane.b32.xlu0 %v427_v55, 320 }
  0xe7   :  { %v6904_v9 = vpop.permute.xlu1 %232  ;;  %v6906_v11 = vpop.permute.xlu0 %228 }
  0xe8   :  { %12563 = vst [vmem:[#allocation24_spill] sm:$0xff] %v6904_v9  ;;  %12564 = vst [vmem:[#allocation25_spill] sm:$0xff] %v6906_v11 }
  0xe9   :  { %473 = vbcast.lane.b32.xlu1 %v427_v55, 344  ;;  %469 = vbcast.lane.b32.xlu0 %v427_v55, 336 }
  0xeb   :  { %v6908_v19 = vpop.permute.xlu1 %240  ;;  %v6910_v37 = vpop.permute.xlu0 %236 }
  0xec   :  { %12565 = vst [vmem:[#allocation26_spill] sm:$0xff] %v6908_v19  ;;  %12566 = vst [vmem:[#allocation27_spill] sm:$0xff] %v6910_v37  ;;  %v12592_v37 = vmov 0 }
  0xed   :  { %481 = vbcast.lane.b32.xlu1 %v427_v55, 360  ;;  %477 = vbcast.lane.b32.xlu0 %v427_v55, 352 }
  0xef   :  { %v6915_v0 = vpop.permute.xlu1 %248  ;;  %v6917_v52 = vpop.permute.xlu0 %244 }
  0xf0   :  { %12568 = vst [vmem:[#allocation29_spill] sm:$0xff] %v6915_v0  ;;  %12569 = vst [vmem:[#allocation30_spill] sm:$0xff] %v6917_v52 }
  0xf1   :  { %489 = vbcast.lane.b32.xlu1 %v427_v55, 376  ;;  %485 = vbcast.lane.b32.xlu0 %v427_v55, 368 }
  0xf3   :  { %v6921_v16 = vpop.permute.xlu1 %256  ;;  %v6923_v10 = vpop.permute.xlu0 %252 }
  0xf4   :  { %12570 = vst [vmem:[#allocation31_spill] sm:$0xff] %v6921_v16  ;;  %12571 = vst [vmem:[#allocation32_spill] sm:$0xff] %v6923_v10  ;;  %v6751_v16 = vmov 1966171168  }
  0xf5   :  { %500 = vbcast.lane.b32.xlu1 %v494_v34, 264  ;;  %496 = vbcast.lane.b32.xlu0 %v494_v34, 256  ;;  %v579_v10 = vunpack.c.l.s4 %v6751_v16 }
  0xf7   :  { %v6925_v8 = vpop.permute.xlu1 %264  ;;  %v6927_v5 = vpop.permute.xlu0 %260 }
  0xf8   :  { %12572 = vst [vmem:[#allocation33_spill] sm:$0xff] %v6925_v8  ;;  %12573 = vst [vmem:[#allocation34_spill] sm:$0xff] %v6927_v5  ;;  %v580_v5 = vunpack.c.0.s8 %v579_v10 }
  0xf9   :  { %508 = vbcast.lane.b32.xlu1 %v494_v34, 280  ;;  %504 = vbcast.lane.b32.xlu0 %v494_v34, 272 }
  0xfb   :  { %v6929_v0 = vpop.permute.xlu1 %272  ;;  %v6931_v52 = vpop.permute.xlu0 %268 }
  0xfc   :  { %12574 = vst [vmem:[#allocation35_spill] sm:$0xff] %v6929_v0  ;;  %12575 = vst [vmem:[#allocation36_spill] sm:$0xff] %v6931_v52 }
  0xfd   :  { %516 = vbcast.lane.b32.xlu1 %v494_v34, 296  ;;  %512 = vbcast.lane.b32.xlu0 %v494_v34, 288 }
  0xff   :  { %v6933_v7 = vpop.permute.xlu1 %280  ;;  %v6935_v55 = vpop.permute.xlu0 %276 }
 0x100   :  { %12576 = vst [vmem:[#allocation37_spill] sm:$0xff] %v6933_v7  ;;  %12577 = vst [vmem:[#allocation38_spill] sm:$0xff] %v6935_v55  ;;  %v6946_v7 = vsub.s32 %v580_v5, %v6767_v1 }
 0x101   :  { %524 = vbcast.lane.b32.xlu1 %v494_v34, 312  ;;  %520 = vbcast.lane.b32.xlu0 %v494_v34, 304 }
 0x103   :  { %v6937_v19 = vpop.permute.xlu1 %288  ;;  %v6939_v8 = vpop.permute.xlu0 %284 }
 0x104   :  { %12578 = vst [vmem:[#allocation39_spill] sm:$0xff] %v6937_v19  ;;  %12579 = vst [vmem:[#allocation40_spill] sm:$0xff] %v6939_v8  ;;  %v6954_v19 = vrot.slane %v6772_v3, %v6946_v7  ;;  %v12588_v3 = vlaneseq }
 0x105   :  { %532 = vbcast.lane.b32.xlu1 %v494_v34, 328  ;;  %528 = vbcast.lane.b32.xlu0 %v494_v34, 320 }
 0x106   :  { %v6962_v5 = vrot.slane %v6954_v19, %v6946_v7  ;;  %v6973_v8 = vand.u32 127, %v12588_v3  ;;  %v12596_v3 = vmov 0 }
 0x107   :  { %v6941_v0 = vpop.permute.xlu1 %299  ;;  %v6943_v52 = vpop.permute.xlu0 %295 }
 0x108   :  { %12580 = vst [vmem:[#allocation41_spill] sm:$0xff] %v6941_v0  ;;  %12581 = vst [vmem:[#allocation42_spill] sm:$0xff] %v6943_v52  ;;  %vm6981_vm0 = vcmp.lt.s32.totalorder %v6973_v8, %v6767_v1  ;;  %vm12349_vm6 = vcmp.lt.s32.totalorder %v6973_v8, 8 }
 0x109   :  { %540 = vbcast.lane.b32.xlu1 %v494_v34, 344  ;;  %536 = vbcast.lane.b32.xlu0 %v494_v34, 336  ;;  %12589 = vst [vmem:[#allocation49_spill] sm:$0xff] %v6973_v8  ;;  %v12593_v37 = vsel %vm6981_vm0, 4294967295, %v12592_v37 }
 0x10b   :  { %v6948_v55 = vpop.permute.xlu1 %307  ;;  %v6950_v16 = vpop.permute.xlu0 %303 }
 0x10c   :  { %12582 = vst [vmem:[#allocation43_spill] sm:$0xff] %v6948_v55  ;;  %12583 = vst [vmem:[#allocation44_spill] sm:$0xff] %v6950_v16  ;;  %v6970_v16 = vrot.slane %v6962_v5, %v6770_v2 }
 0x10d   :  { %548 = vbcast.lane.b32.xlu1 %v494_v34, 360  ;;  %544 = vbcast.lane.b32.xlu0 %v494_v34, 352 }
 0x10e   :  { %vm814_vm1 = vcmp.eq.f32.partialorder %v6970_v16, %v6793_v12  ;;  %vm686_vm2 = vcmp.lt.f32.partialorder %v6970_v16, %v6793_v12  ;;  %vm815_vm5 = vcmp.eq.f32.partialorder %v6970_v16, %v6799_v15  ;;  %vm816_vm8 = vcmp.eq.f32.partialorder %v6970_v16, %v6795_v13 }
 0x10f   :  { %v6956_v10 = vpop.permute.xlu1 %315  ;;  %v6958_v0 = vpop.permute.xlu0 %311  ;;  %vm974_vm3 = vmand %vm814_vm1, %vm6981_vm0  ;;  %vm687_vm9 = vcmp.lt.f32.partialorder %v6970_v16, %v6799_v15  ;;  %v562_v12 = vadd.s32 24, %v6767_v1  ;;  %vm688_vm13 = vcmp.lt.f32.partialorder %v6970_v16, %v6795_v13  ;;  %v12602_v15 = vmov 0 }
 0x110   :  { %12584 = vst [vmem:[#allocation45_spill] sm:$0xff] %v6956_v10  ;;  %12585 = vst [vmem:[#allocation46_spill] sm:$0xff] %v6958_v0  ;;  %v12605_v13 = vmov 0  }
 0x111   :  { %556 = vbcast.lane.b32.xlu1 %v494_v34, 376  ;;  %552 = vbcast.lane.b32.xlu0 %v494_v34, 368  ;;  %v560_v34 = vadd.s32 8, %v6767_v1  ;;  %vm1102_vm7 = vmor %vm686_vm2, %vm974_vm3  ;;  %vm7028_vm1 = vcmp.lt.s32.totalorder %v6973_v8, %v562_v12  ;;  %vm817_vm2 = vcmp.eq.f32.partialorder %v6970_v16, %v6797_v14  ;;  %v564_v12 = vadd.s32 40, %v6767_v1 }
 0x112   :  { %vm1233_vm11 = vmand %vm1102_vm7, %vm12349_vm6  ;;  %v12603_v15 = vsel %vm7028_vm1, 4294967295, %v12602_v15  ;;  %vm689_vm7 = vcmp.lt.f32.partialorder %v6970_v16, %v6797_v14 }
 0x113   :  { %v6964_v52 = vpop.permute.xlu1 %323  ;;  %v6966_v55 = vpop.permute.xlu0 %319  ;;  %vm6997_vm4 = vcmp.lt.s32.totalorder %v6973_v8, %v560_v34 }
 0x114   :  { %12586 = vst [vmem:[#allocation47_spill] sm:$0xff] %v6964_v52  ;;  %12587 = vst [vmem:[#allocation48_spill] sm:$0xff] %v6966_v55  ;;  %v12597_v3 = vsel %vm6997_vm4, 4294967295, %v12596_v3 }
 0x115   :  { %vm975_vm10 = vmand %vm815_vm5, %vm6997_vm4 }
 0x116   :  { %vm1103_vm15 = vmor %vm687_vm9, %vm975_vm10  ;;  %vm818_vm10 = vcmp.eq.f32.partialorder %v6970_v16, %v6806_v18 }
 0x117   :  { %v6975_v10 = vpop.permute.xlu1 %331  ;;  %v6977_v0 = vpop.permute.xlu0 %327  ;;  %vm1234_vm5 = vmand %vm1103_vm15, %vm12349_vm6  ;;  %vm7067_vm15 = vcmp.lt.s32.totalorder %v6973_v8, %v564_v12 }
 0x118   :  { %12590 = vst [vmem:[#allocation50_spill] sm:$0xff] %v6975_v10  ;;  %12591 = vst [vmem:[#allocation51_spill] sm:$0xff] %v6977_v0  ;;  %v561_v10 = vadd.s32 16, %v6767_v1  ;;  %v1362_v14 = vsel %vm1234_vm5, 1, %v12605_v13  ;;  %v12613_v4 = vsel %vm7067_vm15, 4294967295, %v12612_v4 }
 0x119   :  { %v1501_v63 = vand.u32 65535, %v1362_v14  ;;  %v1502_v61 = vshrl.u32 %v1362_v14, 16 }
 0x11a   :  { %vm7019_vm12 = vcmp.lt.s32.totalorder %v6973_v8, %v561_v10  ;;  %v563_v10 = vadd.s32 32, %v6767_v1 }
 0x11b   :  { %v6988_v52 = vpop.permute.xlu0 %335  ;;  %v6990_v55 = vpop.permute.xlu1 %339  ;;  %vm976_vm14 = vmand %vm816_vm8, %vm7019_vm12 }
 0x11c   :  { %12594 = vst [vmem:[#allocation52_spill] sm:$0xff] %v6988_v52  ;;  %12595 = vst [vmem:[#allocation53_spill] sm:$0xff] %v6990_v55  ;;  %v12600_v52 = vmov 0  ;;  %vm7048_vm9 = vcmp.lt.s32.totalorder %v6973_v8, %v563_v10  ;;  %v565_v10 = vadd.s32 48, %v6767_v1 }
 0x11d   :  { %v12601_v52 = vsel %vm7019_vm12, 4294967295, %v12600_v52  ;;  %vm1104_vm3 = vmor %vm688_vm13, %vm976_vm14 }
 0x11e   :  { %vm977_vm8 = vmand %vm817_vm2, %vm7028_vm1  ;;  %vm819_vm2 = vcmp.eq.f32.partialorder %v6970_v16, %v6804_v17 }
 0x11f   :  { %v7005_v55 = vpop.permute.xlu0 %343  ;;  %v7014_v34 = vpop.permute.xlu1 %347  ;;  %vm1105_vm13 = vmor %vm689_vm7, %vm977_vm8  ;;  %vm691_vm7 = vcmp.lt.f32.partialorder %v6970_v16, %v6804_v17  ;;  %v1503_v17 = vcvt.s32.f32 %v1501_v63  ;;  %v567_v63 = vadd.s32 64, %v6767_v1 }
 0x120   :  { %12598 = vst [vmem:[#allocation54_spill] sm:$0xff] %v7005_v55  ;;  %12599 = vst [vmem:[#allocation55_spill] sm:$0xff] %v7014_v34  ;;  %v1361_v55 = vsel %vm1233_vm11, 1, %v12605_v13 }
 0x121   :  { %vm1235_vm11 = vmand %vm1104_vm3, %vm12349_vm6  ;;  %vm690_vm3 = vcmp.lt.f32.partialorder %v6970_v16, %v6806_v18  ;;  %v1490_v60 = vshrl.u32 %v1361_v55, 16  ;;  %v12615_v18 = vmov 0 }
 0x122   :  { %vm7061_vm14 = vmand %vm818_vm10, %vm7048_vm9 }
 0x123   :  { %v7034_v34 = vpop.permute.xlu0 %351  ;;  %v7040_v0 = vpop.permute.xlu1 %355  ;;  %vm1236_vm5 = vmand %vm1105_vm13, %vm12349_vm6  ;;  %vm820_vm13 = vcmp.eq.f32.partialorder %v6970_v16, %v6812_v21 }
 0x124   :  { %12604 = vst [vmem:[#allocation56_spill] sm:$0xff] %v7034_v34  ;;  %12606 = vst [vmem:[#allocation57_spill] sm:$0xff] %v7040_v0  ;;  %v12607_v34 = vmov 0  ;;  %v1489_v0 = vand.u32 65535, %v1361_v55  ;;  %v1364_v55 = vsel %vm1236_vm5, 1, %v12605_v13 }
 0x125   :  { %v12608_v34 = vsel %vm7048_vm9, 4294967295, %v12607_v34  ;;  %vm979_vm8 = vmand %vm819_vm2, %vm7067_vm15  ;;  %v1525_v59 = vand.u32 65535, %v1364_v55 }
 0x126   :  { %v1491_v62 = vcvt.s32.f32 %v1489_v0  ;;  %vm1106_vm10 = vmor %vm690_vm3, %vm7061_vm14  ;;  %v566_v0 = vadd.s32 56, %v6767_v1 }
 0x127   :  { %v7056_v9 = vpop.permute.xlu0 %362  ;;  %v7074_v6 = vpop.permute.xlu1 %366  ;;  %vm1107_vm2 = vmor %vm691_vm7, %vm979_vm8  ;;  %vm821_vm7 = vcmp.eq.f32.partialorder %v6970_v16, %v6810_v20  ;;  %vm692_vm8 = vcmp.lt.f32.partialorder %v6970_v16, %v6812_v21  ;;  %v1527_v21 = vcvt.s32.f32 %v1525_v59 }
 0x128   :  { %12609 = vst [vmem:[#allocation58_spill] sm:$0xff] %v7056_v9  ;;  %v1363_v9 = vsel %vm1235_vm11, 1, %v12605_v13  ;;  %12614 = vst [vmem:[#allocation59_spill] sm:$0xff] %v7074_v6  ;;  %vm7087_vm11 = vcmp.lt.s32.totalorder %v6973_v8, %v565_v10  ;;  %vm7108_vm5 = vcmp.lt.s32.totalorder %v6973_v8, %v566_v0 }
 0x129   :  { %v1513_v12 = vand.u32 65535, %v1363_v9  ;;  %v12616_v18 = vsel %vm7087_vm11, 4294967295, %v12615_v18  ;;  %vm1237_vm14 = vmand %vm1106_vm10, %vm12349_vm6  ;;  %v1514_v58 = vshrl.u32 %v1363_v9, 16  ;;  %v1504_v9 = vcvt.s32.f32 %v1502_v61 }
 0x12a   :  { %vm7103_vm3 = vmand %vm820_vm13, %vm7087_vm11  ;;  %vm693_vm13 = vcmp.lt.f32.partialorder %v6970_v16, %v6810_v20  ;;  %v568_v61 = vadd.s32 72, %v6767_v1  ;;  %v12624_v20 = vmov 0 }
 0x12b   :  { %v7092_v6 = vpop.permute.xlu0 %370  ;;  %v7097_v11 = vpop.permute.xlu1 %374  ;;  %v1515_v10 = vcvt.s32.f32 %v1513_v12  ;;  %vm1238_vm10 = vmand %vm1107_vm2, %vm12349_vm6  ;;  %v1365_v12 = vsel %vm1237_vm14, 1, %v12605_v13  ;;  %v1516_v0 = vcvt.s32.f32 %v1514_v58  ;;  %vm7133_vm2 = vcmp.lt.s32.totalorder %v6973_v8, %v567_v63 }
 0x12c   :  { %12617 = vst [vmem:[#allocation60_spill] sm:$0xff] %v7092_v6  ;;  %vm981_vm11 = vmand %vm821_vm7, %vm7108_vm5  ;;  %v12625_v20 = vsel %vm7133_vm2, 4294967295, %v12624_v20  ;;  %vm822_vm14 = vcmp.eq.f32.partialorder %v6970_v16, %v6816_v23  ;;  %v1537_v58 = vand.u32 65535, %v1365_v12 }
 0x12d   :  { %vm1108_vm15 = vmor %vm692_vm8, %vm7103_vm3  ;;  %vm7148_vm8 = vcmp.lt.s32.totalorder %v6973_v8, %v568_v61 }
 0x12e   :  { %vm1109_vm7 = vmor %vm693_vm13, %vm981_vm11  ;;  %vm823_vm11 = vcmp.eq.f32.partialorder %v6970_v16, %v6814_v22  ;;  %vm695_vm13 = vcmp.lt.f32.partialorder %v6970_v16, %v6814_v22 }
 0x12f   :  { %v7119_v14 = vpop.permute.xlu0 %378  ;;  %vm7143_vm3 = vmand %vm822_vm14, %vm7133_vm2 }
 0x130   :  { %1493 = vadd.xlane.f32.xlu0 %v1491_v62  ;;  %v1492_v62 = vcvt.s32.f32 %v1490_v60  ;;  %v12620_v60 = vmov 0  ;;  %12622 = vst [vmem:[#allocation61_spill] sm:$0xff] %v7119_v14  ;;  %v7130_v14 = vpop.permute.xlu1 %382  ;;  %vm983_vm14 = vmand %vm823_vm11, %vm7148_vm8 }
 0x131   :  { %v12621_v60 = vsel %vm7108_vm5, 4294967295, %v12620_v60  ;;  %12623 = vst [vmem:[#allocation62_spill] sm:$0xff] %v7130_v14  ;;  %vm1239_vm5 = vmand %vm1108_vm15, %vm12349_vm6  ;;  %vm694_vm15 = vcmp.lt.f32.partialorder %v6970_v16, %v6816_v23 }
 0x132   :  { %vm1110_vm2 = vmor %vm694_vm15, %vm7143_vm3 }
 0x133   :  { %v7154_v63 = vpop.permute.xlu0 %386  ;;  %vm1111_vm11 = vmor %vm695_vm13, %vm983_vm14  ;;  %vm825_vm13 = vcmp.eq.f32.partialorder %v6970_v16, %v6818_v24 }
 0x134   :  { %1505 = vadd.xlane.f32.xlu0 %v1503_v17  ;;  %v1526_v17 = vshrl.u32 %v1364_v55, 16  ;;  %12630 = vst [vmem:[#allocation63_spill] sm:$0xff] %v7154_v63  ;;  %v7162_v61 = vpop.permute.xlu1 %390  ;;  %vm1241_vm3 = vmand %vm1110_vm2, %vm12349_vm6  ;;  %vm696_vm2 = vcmp.lt.f32.partialorder %v6970_v16, %v6820_v25 }
 0x135   :  { %1495 = vadd.xlane.f32.xlu1 %v1492_v62  ;;  %v1366_v62 = vsel %vm1238_vm10, 1, %v12605_v13  ;;  %vm1240_vm10 = vmand %vm1109_vm7, %vm12349_vm6  ;;  %12631 = vst [vmem:[#allocation64_spill] sm:$0xff] %v7162_v61  ;;  %v12632_v61 = vmov 0  ;;  %vm824_vm7 = vcmp.eq.f32.partialorder %v6970_v16, %v6820_v25 }
 0x136   :  { %v1528_v59 = vcvt.s32.f32 %v1526_v17  ;;  %v1549_v6 = vand.u32 65535, %v1366_v62  ;;  %v1367_v17 = vsel %vm1239_vm5, 1, %v12605_v13  ;;  %v1550_v63 = vshrl.u32 %v1366_v62, 16  ;;  %vm1242_vm14 = vmand %vm1111_vm11, %vm12349_vm6 }
 0x138   :  { %1507 = vadd.xlane.f32.xlu0 %v1504_v9  ;;  %v569_v9 = vadd.s32 80, %v6767_v1  ;;  %v1551_v23 = vcvt.s32.f32 %v1549_v6  ;;  %v7179_v6 = vpop.permute.xlu0 %394  ;;  %v1552_v62 = vcvt.s32.f32 %v1550_v63  ;;  %v571_v63 = vadd.s32 96, %v6767_v1 }
 0x139   :  { %1517 = vadd.xlane.f32.xlu1 %v1515_v10  ;;  %v12628_v10 = vmov 0  ;;  %12634 = vst [vmem:[#allocation65_spill] sm:$0xff] %v7179_v6 }
 0x13a   :  { %v12629_v10 = vsel %vm7148_vm8, 4294967295, %v12628_v10  ;;  %vm7173_vm5 = vcmp.lt.s32.totalorder %v6973_v8, %v569_v9  ;;  %vm7214_vm11 = vcmp.lt.s32.totalorder %v6973_v8, %v571_v63 }
 0x13b   :  { %v12633_v61 = vsel %vm7173_vm5, 4294967295, %v12632_v61  ;;  %vm7185_vm15 = vmand %vm824_vm7, %vm7173_vm5  ;;  %vm697_vm7 = vcmp.lt.f32.partialorder %v6970_v16, %v6818_v24 }
 0x13c   :  { %1519 = vadd.xlane.f32.xlu0 %v1516_v0  ;;  %v1539_v0 = vcvt.s32.f32 %v1537_v58  ;;  %v570_v58 = vadd.s32 88, %v6767_v1  ;;  %vm1112_vm8 = vmor %vm696_vm2, %vm7185_vm15  ;;  %v7210_v25 = vpop.permute.xlu0 %402 }
 0x13d   :  { %1529 = vadd.xlane.f32.xlu1 %v1527_v21  ;;  %v1538_v21 = vshrl.u32 %v1365_v12, 16  ;;  %v1368_v12 = vsel %vm1240_vm10, 1, %v12605_v13  ;;  %12640 = vst [vmem:[#allocation67_spill] sm:$0xff] %v7210_v25  ;;  %vm1243_vm15 = vmand %vm1112_vm8, %vm12349_vm6 }
 0x13e   :  { %v1573_v55 = vand.u32 65535, %v1368_v12  ;;  %vm7190_vm10 = vcmp.lt.s32.totalorder %v6973_v8, %v570_v58  ;;  %v1369_v58 = vsel %vm1241_vm3, 1, %v12605_v13  ;;  %v1574_v6 = vshrl.u32 %v1368_v12, 16 }
 0x13f   :  { %v1540_v22 = vcvt.s32.f32 %v1538_v21  ;;  %v7196_v21 = vpop.permute.xlu1 %398  ;;  %vm985_vm5 = vmand %vm825_vm13, %vm7190_vm10  ;;  %vm826_vm3 = vcmp.eq.f32.partialorder %v6970_v16, %v6824_v27  ;;  %v572_v12 = vadd.s32 104, %v6767_v1 }
 0x140   :  { %1531 = vadd.xlane.f32.xlu0 %v1528_v59  ;;  %v1561_v59 = vand.u32 65535, %v1367_v17  ;;  %12639 = vst [vmem:[#allocation66_spill] sm:$0xff] %v7196_v21  ;;  %v1575_v21 = vcvt.s32.f32 %v1573_v55  ;;  %vm1113_vm13 = vmor %vm697_vm7, %vm985_vm5  ;;  %v1576_v9 = vcvt.s32.f32 %v1574_v6  ;;  %vm698_vm5 = vcmp.lt.f32.partialorder %v6970_v16, %v6824_v27  ;;  %v7245_v25 = vpop.permute.xlu0 %410 }
 0x141   :  { %1541 = vadd.xlane.f32.xlu1 %v1539_v0  ;;  %v12637_v0 = vmov 0  ;;  %vm7227_vm2 = vmand %vm826_vm3, %vm7214_vm11  ;;  %v573_v6 = vadd.s32 112, %v6767_v1  ;;  %vm7239_vm8 = vcmp.lt.s32.totalorder %v6973_v8, %v572_v12  ;;  %vm827_vm7 = vcmp.eq.f32.partialorder %v6970_v16, %v6822_v26  ;;  %12648 = vst [vmem:[#allocation69_spill] sm:$0xff] %v7245_v25 }
 0x142   :  { %v12638_v0 = vsel %vm7190_vm10, 4294967295, %v12637_v0  ;;  %vm1114_vm3 = vmor %vm698_vm5, %vm7227_vm2  ;;  %vm828_vm2 = vcmp.eq.f32.partialorder %v6970_v16, %v6828_v29  ;;  %vm12651_vm5 = vcmp.lt.s32.totalorder %v6973_v8, 8 }
 0x143   :  { %v7221_v55 = vpop.permute.xlu1 %406 }
 0x144   :  { %1543 = vadd.xlane.f32.xlu0 %v1540_v22  ;;  %v1562_v22 = vshrl.u32 %v1367_v17, 16  ;;  %v12641_v17 = vmov 0  ;;  %12643 = vst [vmem:[#allocation68_spill] sm:$0xff] %v7221_v55 }
 0x145   :  { %1553 = vadd.xlane.f32.xlu1 %v1551_v23  ;;  %v1563_v23 = vcvt.s32.f32 %v1561_v59  ;;  %v1370_v59 = vsel %vm1242_vm14, 1, %v12605_v13  ;;  %v12642_v17 = vsel %vm7214_vm11, 4294967295, %v12641_v17  ;;  %vm1244_vm14 = vmand %vm1113_vm13, %vm12349_vm6  ;;  %vm699_vm13 = vcmp.lt.f32.partialorder %v6970_v16, %v6822_v26 }
 0x146   :  { %v1564_v24 = vcvt.s32.f32 %v1562_v22  ;;  %v1597_v63 = vand.u32 65535, %v1370_v59  ;;  %v592_v22 = vcombine.high %v6954_v19, %v6954_v19  ;;  %v1371_v19 = vsel %vm1243_vm15, 1, %v12605_v13  ;;  %vm987_vm6 = vmand %vm827_vm7, %vm7239_vm8 }
 0x147   :  { %v1598_v14 = vshrl.u32 %v1370_v59, 16  ;;  %v1609_v25 = vand.u32 65535, %v1371_v19  ;;  %vm7261_vm15 = vcmp.lt.s32.totalorder %v6973_v8, %v573_v6  ;;  %v12649_v59 = vmov 0  ;;  %vm1115_vm7 = vmor %vm699_vm13, %vm987_vm6 }
 0x148   :  { %1555 = vadd.xlane.f32.xlu0 %v1552_v62  ;;  %v1585_v62 = vand.u32 65535, %v1369_v58  ;;  %v1599_v27 = vcvt.s32.f32 %v1597_v63  ;;  %v12650_v59 = vsel %vm7261_vm15, 4294967295, %v12649_v59  ;;  %vm988_vm11 = vmand %vm828_vm2, %vm7261_vm15  ;;  %vm829_vm6 = vcmp.eq.f32.partialorder %v6970_v16, %v6826_v28 }
 0x149   :  { %1565 = vadd.xlane.f32.xlu1 %v1563_v23  ;;  %v1600_v26 = vcvt.s32.f32 %v1598_v14  ;;  %v7270_v23 = vpop.permute.xlu0 %418  ;;  %vm12655_vm13 = vmmov %vm12651_vm5  ;;  %vm701_vm15 = vcmp.lt.f32.partialorder %v6970_v16, %v6826_v28 }
 0x14a   :  { %v1587_v55 = vcvt.s32.f32 %v1585_v62  ;;  %v7251_v62 = vpop.permute.xlu1 %414  ;;  %vm1246_vm2 = vmand %vm1115_vm7, %vm12655_vm13 }
 0x14b   :  { %vm12656_vm7 = vmmov %vm12655_vm13 }
 0x14c   :  { %1567 = vadd.xlane.f32.xlu0 %v1564_v24  ;;  %v1586_v24 = vshrl.u32 %v1369_v58, 16  ;;  %v1372_v58 = vsel %vm1244_vm14, 1, %v12605_v13  ;;  %vm1245_vm14 = vmand %vm1114_vm3, %vm12651_vm5 }
 0x14d   :  { %1577 = vadd.xlane.f32.xlu1 %v1575_v21  ;;  %v12646_v21 = vmov 0  ;;  %v1621_v63 = vand.u32 65535, %v1372_v58  ;;  %v1373_v14 = vsel %vm1245_vm14, 1, %v12605_v13 }
 0x14e   :  { %v12647_v21 = vsel %vm7239_vm8, 4294967295, %v12646_v21  ;;  %v1588_v12 = vcvt.s32.f32 %v1586_v24  ;;  %vm700_vm8 = vcmp.lt.f32.partialorder %v6970_v16, %v6828_v29  ;;  %v1610_v24 = vshrl.u32 %v1371_v19, 16  ;;  %v7288_v29 = vpop.permute.xlu1 %422 }
 0x14f   :  { %12654 = vst [vmem:[#allocation70_spill] sm:$0xff] %v7288_v29  ;;  %vm1116_vm5 = vmor %vm700_vm8, %vm988_vm11  ;;  %v1374_v29 = vsel %vm1246_vm2, 1, %v12605_v13  ;;  %v1634_v28 = vshrl.u32 %v1373_v14, 16 }
 0x150   :  { %1579 = vadd.xlane.f32.xlu0 %v1576_v9  ;;  %v7258_v9 = vrot.slane %v592_v22, %v6946_v7  ;;  %v1611_v22 = vcvt.s32.f32 %v1609_v25  ;;  %v1623_v25 = vcvt.s32.f32 %v1621_v63  ;;  %v1612_v19 = vcvt.s32.f32 %v1610_v24  ;;  %vm1247_vm13 = vmand %vm1116_vm5, %vm12656_vm7 }
 0x151   :  { %1589 = vadd.xlane.f32.xlu1 %v1587_v55  ;;  %v574_v55 = vadd.s32 120, %v6767_v1  ;;  %v7298_v1 = vpop.permute.xlu0 %429  ;;  %v1645_v63 = vand.u32 65535, %v1374_v29  ;;  %vm12657_vm5 = vmmov %vm12656_vm7  ;;  %v1636_v24 = vcvt.s32.f32 %v1634_v28 }
 0x152   :  { %v7278_v6 = vrot.slane %v7258_v9, %v6770_v2  ;;  %v7303_v16 = vpop.permute.xlu1 %433 }
 0x153   :  { %vm7281_vm3 = vcmp.lt.s32.totalorder %v6973_v8, %v574_v55  ;;  %v1633_v55 = vand.u32 65535, %v1373_v14  ;;  %v1647_v14 = vcvt.s32.f32 %v1645_v63 }
 0x154   :  { %1591 = vadd.xlane.f32.xlu0 %v1588_v12  ;;  %vm989_vm10 = vmand %vm829_vm6, %vm7281_vm3  ;;  %v1622_v12 = vshrl.u32 %v1372_v58, 16  ;;  %vm830_vm14 = vcmp.eq.f32.partialorder %v7278_v6, %v6832_v31  ;;  %vm702_vm8 = vcmp.lt.f32.partialorder %v7278_v6, %v6832_v31  ;;  %vm831_vm2 = vcmp.eq.f32.partialorder %v7278_v6, %v6830_v30 }
 0x155   :  { %1601 = vadd.xlane.f32.xlu1 %v1599_v27  ;;  %vm1117_vm11 = vmor %vm701_vm15, %vm989_vm10  ;;  %vm703_vm7 = vcmp.lt.f32.partialorder %v7278_v6, %v6830_v30  ;;  %v7316_v31 = vpop.permute.xlu0 %437 }
 0x156   :  { %vm990_vm6 = vmand %vm830_vm14, %vm6981_vm0  ;;  %v1624_v58 = vcvt.s32.f32 %v1622_v12 }
 0x157   :  { %vm1248_vm10 = vmand %vm1117_vm11, %vm12657_vm5 }
 0x158   :  { %1603 = vadd.xlane.f32.xlu0 %v1600_v26  ;;  %v1635_v26 = vcvt.s32.f32 %v1633_v55  ;;  %vm1118_vm15 = vmor %vm702_vm8, %vm990_vm6  ;;  %v1376_v12 = vsel %vm1248_vm10, 1, %v12605_v13  ;;  %v7323_v55 = vpop.permute.xlu1 %441  ;;  %vm833_vm10 = vcmp.eq.f32.partialorder %v7278_v6, %v6834_v32 }
 0x159   :  { %1613 = vadd.xlane.f32.xlu1 %v1611_v22  ;;  %v1375_v22 = vsel %vm1247_vm13, 1, %v12605_v13  ;;  %vm991_vm14 = vmand %vm831_vm2, %vm6997_vm4  ;;  %vm832_vm13 = vcmp.eq.f32.partialorder %v7278_v6, %v6836_v33  ;;  %vm704_vm2 = vcmp.lt.f32.partialorder %v7278_v6, %v6836_v33 }
 0x15a   :  { %vm12658_vm11 = vmmov %vm12657_vm5  ;;  %v1658_v30 = vshrl.u32 %v1375_v22, 16 }
 0x15b   :  { %vm1249_vm8 = vmand %vm1118_vm15, %vm12658_vm11 }
 0x15c   :  { %1615 = vadd.xlane.f32.xlu0 %v1612_v19  ;;  %v1657_v19 = vand.u32 65535, %v1375_v22  ;;  %vm1119_vm6 = vmor %vm703_vm7, %vm991_vm14  ;;  %v1377_v63 = vsel %vm1249_vm8, 1, %v12605_v13  ;;  %v7340_v33 = vpop.permute.xlu1 %449  ;;  %v1660_v22 = vcvt.s32.f32 %v1658_v30  ;;  %vm834_vm8 = vcmp.eq.f32.partialorder %v7278_v6, %v6843_v36 }
 0x15d   :  { %1625 = vadd.xlane.f32.xlu1 %v1623_v25  ;;  %v1646_v25 = vshrl.u32 %v1374_v29, 16  ;;  %vm992_vm5 = vmand %vm832_vm13, %vm7019_vm12 }
 0x15e   :  { %v1659_v28 = vcvt.s32.f32 %v1657_v19  ;;  %vm12659_vm15 = vmmov %vm12658_vm11  ;;  %vm705_vm11 = vcmp.lt.f32.partialorder %v7278_v6, %v6834_v32 }
 0x15f   :  { %v1648_v29 = vcvt.s32.f32 %v1646_v25  ;;  %vm1250_vm7 = vmand %vm1119_vm6, %vm12659_vm15  ;;  %v1681_v25 = vand.u32 65535, %v1377_v63 }
 0x160   :  { %1627 = vadd.xlane.f32.xlu0 %v1624_v58  ;;  %v1669_v58 = vand.u32 65535, %v1376_v12  ;;  %vm1120_vm14 = vmor %vm704_vm2, %vm992_vm5  ;;  %v1378_v19 = vsel %vm1250_vm7, 1, %v12605_v13  ;;  %vm835_vm7 = vcmp.eq.f32.partialorder %v7278_v6, %v6841_v35 }
 0x161   :  { %1637 = vadd.xlane.f32.xlu1 %v1635_v26  ;;  %v7333_v26 = vpop.permute.xlu0 %445  ;;  %vm993_vm13 = vmand %vm833_vm10, %vm7028_vm1  ;;  %vm706_vm10 = vcmp.lt.f32.partialorder %v7278_v6, %v6843_v36  ;;  %v1683_v30 = vcvt.s32.f32 %v1681_v25 }
 0x162   :  { %vm12660_vm6 = vmmov %vm12659_vm15 }
 0x163   :  { %vm1251_vm2 = vmand %vm1120_vm14, %vm12660_vm6 }
 0x164   :  { %1639 = vadd.xlane.f32.xlu0 %v1636_v24  ;;  %v1671_v24 = vcvt.s32.f32 %v1669_v58  ;;  %vm1121_vm5 = vmor %vm705_vm11, %vm993_vm13  ;;  %v1379_v58 = vsel %vm1251_vm2, 1, %v12605_v13  ;;  %vm836_vm2 = vcmp.eq.f32.partialorder %v7278_v6, %v6849_v39 }
 0x165   :  { %1649 = vadd.xlane.f32.xlu1 %v1647_v14  ;;  %v1670_v14 = vshrl.u32 %v1376_v12, 16  ;;  %v7349_v32 = vpop.permute.xlu0 %453  ;;  %vm994_vm15 = vmand %vm834_vm8, %vm7048_vm9  ;;  %vm12663_vm8 = vnez %v12613_v4 }
 0x166   :  { %vm12662_vm14 = vmmov %vm12660_vm6  ;;  %vm707_vm6 = vcmp.lt.f32.partialorder %v7278_v6, %v6841_v35  ;;  %v1706_v35 = vshrl.u32 %v1379_v58, 16 }
 0x167   :  { %v1672_v12 = vcvt.s32.f32 %v1670_v14  ;;  %vm1252_vm11 = vmand %vm1121_vm5, %vm12662_vm14  ;;  %v1705_v14 = vand.u32 65535, %v1379_v58 }
 0x168   :  { %1651 = vadd.xlane.f32.xlu0 %v1648_v29  ;;  %v1682_v29 = vshrl.u32 %v1377_v63, 16  ;;  %vm1122_vm13 = vmor %vm706_vm10, %vm994_vm15  ;;  %v1708_v58 = vcvt.s32.f32 %v1706_v35 }
 0x169   :  { %1661 = vadd.xlane.f32.xlu1 %v1659_v28  ;;  %v1693_v28 = vand.u32 65535, %v1378_v19  ;;  %vm995_vm9 = vmand %vm835_vm7, %vm12663_vm8  ;;  %v7368_v25 = vpop.permute.xlu0 %461  ;;  %vm708_vm7 = vcmp.lt.f32.partialorder %v7278_v6, %v6849_v39 }
 0x16a   :  { %v1684_v36 = vcvt.s32.f32 %v1682_v29  ;;  %vm12664_vm5 = vmmov %vm12662_vm14  ;;  %vm12665_vm14 = vnez %v12616_v18  ;;  %v1707_v29 = vcvt.s32.f32 %v1705_v14 }
 0x16b   :  { %v1695_v63 = vcvt.s32.f32 %v1693_v28  ;;  %vm1253_vm10 = vmand %vm1122_vm13, %vm12664_vm5 }
 0x16c   :  { %1663 = vadd.xlane.f32.xlu0 %v1660_v22  ;;  %v7358_v22 = vpop.permute.xlu1 %457  ;;  %vm1123_vm15 = vmor %vm707_vm6, %vm995_vm9  ;;  %v1381_v28 = vsel %vm1253_vm10, 1, %v12605_v13  ;;  %vm838_vm10 = vcmp.eq.f32.partialorder %v7278_v6, %v6853_v41 }
 0x16d   :  { %1673 = vadd.xlane.f32.xlu1 %v1671_v24  ;;  %12661 = vst [vmem:[#allocation71_spill] sm:$0xff] %v7358_v22  ;;  %v1694_v24 = vshrl.u32 %v1378_v19, 16  ;;  %v1380_v22 = vsel %vm1252_vm11, 1, %v12605_v13  ;;  %vm996_vm8 = vmand %vm836_vm2, %vm12665_vm14  ;;  %vm837_vm11 = vcmp.eq.f32.partialorder %v7278_v6, %v6847_v38  ;;  %v7386_v39 = vpop.permute.xlu0 %469  ;;  %vm12667_vm2 = vnez %v12621_v60 }
 0x16e   :  { %vm12666_vm13 = vmmov %vm12664_vm5  ;;  %vm709_vm5 = vcmp.lt.f32.partialorder %v7278_v6, %v6847_v38  ;;  %v1730_v38 = vshrl.u32 %v1381_v28, 16 }
 0x16f   :  { %v1696_v19 = vcvt.s32.f32 %v1694_v24  ;;  %vm1254_vm9 = vmand %vm1123_vm15, %vm12666_vm13  ;;  %v1729_v24 = vand.u32 65535, %v1381_v28 }
 0x170   :  { %1675 = vadd.xlane.f32.xlu0 %v1672_v12  ;;  %v7373_v12 = vpop.permute.xlu1 %465  ;;  %vm1124_vm6 = vmor %vm708_vm7, %vm996_vm8  ;;  %v1382_v14 = vsel %vm1254_vm9, 1, %v12605_v13  ;;  %vm839_vm9 = vcmp.eq.f32.partialorder %v7278_v6, %v6851_v40  ;;  %v1732_v28 = vcvt.s32.f32 %v1730_v38 }
 0x171   :  { %1685 = vadd.xlane.f32.xlu1 %v1683_v30  ;;  %v1717_v30 = vand.u32 65535, %v1380_v22  ;;  %vm997_vm14 = vmand %vm837_vm11, %vm12667_vm2  ;;  %vm710_vm11 = vcmp.lt.f32.partialorder %v7278_v6, %v6853_v41  ;;  %v1731_v35 = vcvt.s32.f32 %v1729_v24 }
 0x172   :  { %vm12669_vm8 = vmmov %vm12666_vm13  ;;  %vm12670_vm13 = vnez %v12625_v20 }
 0x173   :  { %vm1255_vm15 = vmand %vm1124_vm6, %vm12669_vm8 }
 0x174   :  { %1687 = vadd.xlane.f32.xlu0 %v1684_v36  ;;  %v1719_v36 = vcvt.s32.f32 %v1717_v30  ;;  %vm1125_vm7 = vmor %vm709_vm5, %vm997_vm14  ;;  %v7403_v30 = vpop.permute.xlu0 %477 }
 0x175   :  { %1697 = vadd.xlane.f32.xlu1 %v1695_v63  ;;  %v1718_v63 = vshrl.u32 %v1380_v22, 16  ;;  %vm998_vm2 = vmand %vm838_vm10, %vm12670_vm13  ;;  %vm12672_vm10 = vnez %v12629_v10 }
 0x176   :  { %vm12671_vm6 = vmmov %vm12669_vm8  ;;  %vm711_vm8 = vcmp.lt.f32.partialorder %v7278_v6, %v6851_v40 }
 0x177   :  { %v1720_v22 = vcvt.s32.f32 %v1718_v63  ;;  %vm1256_vm14 = vmand %vm1125_vm7, %vm12671_vm6 }
 0x178   :  { %1699 = vadd.xlane.f32.xlu0 %v1696_v19  ;;  %v7393_v19 = vpop.permute.xlu1 %473  ;;  %vm1126_vm5 = vmor %vm710_vm11, %vm998_vm2  ;;  %v1384_v24 = vsel %vm1256_vm14, 1, %v12605_v13  ;;  %v7419_v40 = vpop.permute.xlu0 %485  ;;  %vm841_vm14 = vcmp.eq.f32.partialorder %v7278_v6, %v6855_v42 }
 0x179   :  { %1709 = vadd.xlane.f32.xlu1 %v1707_v29  ;;  %12668 = vst [vmem:[#allocation72_spill] sm:$0xff] %v7393_v19  ;;  %v1741_v29 = vand.u32 65535, %v1382_v14  ;;  %v1383_v19 = vsel %vm1255_vm15, 1, %v12605_v13  ;;  %vm999_vm13 = vmand %vm839_vm9, %vm12672_vm10  ;;  %vm840_vm15 = vcmp.eq.f32.partialorder %v7278_v6, %v6857_v43  ;;  %vm712_vm9 = vcmp.lt.f32.partialorder %v7278_v6, %v6857_v43 }
 0x17a   :  { %v1753_v63 = vand.u32 65535, %v1383_v19  ;;  %vm12673_vm7 = vmmov %vm12671_vm6  ;;  %vm12674_vm6 = vnez %v12633_v61 }
 0x17b   :  { %vm1257_vm2 = vmand %vm1126_vm5, %vm12673_vm7 }
 0x17c   :  { %1711 = vadd.xlane.f32.xlu0 %v1708_v58  ;;  %v7410_v41 = vpop.permute.xlu1 %481  ;;  %v1743_v58 = vcvt.s32.f32 %v1741_v29  ;;  %vm1127_vm11 = vmor %vm711_vm8, %vm999_vm13  ;;  %v1755_v38 = vcvt.s32.f32 %v1753_v63  ;;  %v1385_v29 = vsel %vm1257_vm2, 1, %v12605_v13  ;;  %vm842_vm2 = vcmp.eq.f32.partialorder %v7278_v6, %v6861_v45  ;;  %v7438_v63 = vpop.permute.xlu0 %496 }
 0x17d   :  { %1721 = vadd.xlane.f32.xlu1 %v1719_v36  ;;  %v1742_v36 = vshrl.u32 %v1382_v14, 16  ;;  %vm1000_vm10 = vmand %vm840_vm15, %vm12674_vm6  ;;  %vm12677_vm15 = vnez %v12638_v0 }
 0x17e   :  { %vm12676_vm13 = vmmov %vm12673_vm7  ;;  %vm713_vm7 = vcmp.lt.f32.partialorder %v7278_v6, %v6855_v42  ;;  %v1778_v42 = vshrl.u32 %v1385_v29, 16 }
 0x17f   :  { %v1744_v14 = vcvt.s32.f32 %v1742_v36  ;;  %vm1258_vm5 = vmand %vm1127_vm11, %vm12676_vm13  ;;  %v1777_v36 = vand.u32 65535, %v1385_v29 }
 0x180   :  { %1723 = vadd.xlane.f32.xlu0 %v1720_v22  ;;  %v1754_v22 = vshrl.u32 %v1383_v19, 16  ;;  %vm1128_vm8 = vmor %vm712_vm9, %vm1000_vm10  ;;  %v1780_v29 = vcvt.s32.f32 %v1778_v42 }
 0x181   :  { %1733 = vadd.xlane.f32.xlu1 %v1731_v35  ;;  %v1765_v35 = vand.u32 65535, %v1384_v24  ;;  %vm1001_vm6 = vmand %vm841_vm14, %vm12677_vm15  ;;  %vm714_vm14 = vcmp.lt.f32.partialorder %v7278_v6, %v6861_v45  ;;  %v7456_v45 = vpop.permute.xlu0 %504 }
 0x182   :  { %v1756_v43 = vcvt.s32.f32 %v1754_v22  ;;  %vm12678_vm11 = vmmov %vm12676_vm13  ;;  %vm12679_vm13 = vnez %v12642_v17  ;;  %v1779_v22 = vcvt.s32.f32 %v1777_v36  ;;  %12681 = vst [vmem:[#allocation74_spill] sm:$0xff] %v7456_v45  ;;  %v622_v36 = vcombine.high %v6962_v5, %v6962_v5 }
 0x183   :  { %v1767_v19 = vcvt.s32.f32 %v1765_v35  ;;  %vm1259_vm10 = vmand %vm1128_vm8, %vm12678_vm11 }
 0x184   :  { %1735 = vadd.xlane.f32.xlu0 %v1732_v28  ;;  %v7428_v28 = vpop.permute.xlu1 %489  ;;  %vm1129_vm9 = vmor %vm713_vm7, %vm1001_vm6  ;;  %v1387_v35 = vsel %vm1259_vm10, 1, %v12605_v13  ;;  %vm844_vm10 = vcmp.eq.f32.partialorder %v7278_v6, %v6865_v47 }
 0x185   :  { %1745 = vadd.xlane.f32.xlu1 %v1743_v58  ;;  %12675 = vst [vmem:[#allocation73_spill] sm:$0xff] %v7428_v28  ;;  %v1766_v58 = vshrl.u32 %v1384_v24, 16  ;;  %v1386_v28 = vsel %vm1258_vm5, 1, %v12605_v13  ;;  %vm1002_vm15 = vmand %vm842_vm2, %vm12679_vm13  ;;  %vm843_vm5 = vcmp.eq.f32.partialorder %v7278_v6, %v6859_v44  ;;  %vm12682_vm2 = vnez %v12647_v21 }
 0x186   :  { %vm12680_vm8 = vmmov %vm12678_vm11  ;;  %vm715_vm11 = vcmp.lt.f32.partialorder %v7278_v6, %v6859_v44  ;;  %v1802_v44 = vshrl.u32 %v1387_v35, 16 }
 0x187   :  { %v1768_v24 = vcvt.s32.f32 %v1766_v58  ;;  %vm1260_vm6 = vmand %vm1129_vm9, %vm12680_vm8  ;;  %v1801_v58 = vand.u32 65535, %v1387_v35 }
 0x188   :  { %1747 = vadd.xlane.f32.xlu0 %v1744_v14  ;;  %v7443_v14 = vpop.permute.xlu1 %500  ;;  %vm1130_vm7 = vmor %vm714_vm14, %vm1002_vm15  ;;  %v1804_v35 = vcvt.s32.f32 %v1802_v44 }
 0x189   :  { %1757 = vadd.xlane.f32.xlu1 %v1755_v38  ;;  %v1789_v38 = vand.u32 65535, %v1386_v28  ;;  %vm1003_vm13 = vmand %vm843_vm5, %vm12682_vm2  ;;  %vm716_vm5 = vcmp.lt.f32.partialorder %v7278_v6, %v6865_v47 }
 0x18a   :  { %vm12684_vm15 = vmmov %vm12680_vm8  ;;  %vm12685_vm8 = vnez %v12650_v59 }
 0x18b   :  { %vm1261_vm9 = vmand %vm1130_vm7, %vm12684_vm15 }
 0x18c   :  { %1759 = vadd.xlane.f32.xlu0 %v1756_v43  ;;  %v1791_v43 = vcvt.s32.f32 %v1789_v38  ;;  %vm1131_vm14 = vmor %vm715_vm11, %vm1003_vm13  ;;  %v7474_v38 = vrot.slane %v622_v36, %v6770_v2 }
 0x18d   :  { %1769 = vadd.xlane.f32.xlu1 %v1767_v19  ;;  %v1790_v19 = vshrl.u32 %v1386_v28, 16  ;;  %vm1004_vm2 = vmand %vm844_vm10, %vm12685_vm8  ;;  %v1803_v28 = vcvt.s32.f32 %v1801_v58  ;;  %vm717_vm10 = vcmp.lt.f32.partialorder %v7278_v6, %v6863_v46 }
 0x18e   :  { %vm12687_vm13 = vmmov %vm12684_vm15 }
 0x18f   :  { %v1792_v5 = vcvt.s32.f32 %v1790_v19  ;;  %vm1262_vm7 = vmand %vm1131_vm14, %vm12687_vm13 }
 0x190   :  { %1771 = vadd.xlane.f32.xlu0 %v1768_v24  ;;  %v1388_v24 = vsel %vm1260_vm6, 1, %v12605_v13  ;;  %vm845_vm6 = vcmp.eq.f32.partialorder %v7278_v6, %v6863_v46  ;;  %vm1132_vm11 = vmor %vm716_vm5, %vm1004_vm2  ;;  %v1390_v36 = vsel %vm1262_vm7, 1, %v12605_v13  ;;  %vm847_vm7 = vcmp.eq.f32.partialorder %v7474_v38, %v6867_v48 }
 0x191   :  { %1781 = vadd.xlane.f32.xlu1 %v1779_v22  ;;  %v7465_v22 = vpop.permute.xlu1 %508  ;;  %v1813_v42 = vand.u32 65535, %v1388_v24  ;;  %vm1005_vm15 = vmand %vm845_vm6, %vm7281_vm3  ;;  %v1814_v19 = vshrl.u32 %v1388_v24, 16  ;;  %vm718_vm6 = vcmp.lt.f32.partialorder %v7474_v38, %v6869_v49 }
 0x192   :  { %12683 = vst [vmem:[#allocation75_spill] sm:$0xff] %v7465_v22  ;;  %v7478_v22 = vpop.permute.xlu0 %512  ;;  %vm12689_vm14 = vmmov %vm12687_vm13 }
 0x193   :  { %12686 = vst [vmem:[#allocation76_spill] sm:$0xff] %v7478_v22  ;;  %vm1263_vm2 = vmand %vm1132_vm11, %vm12689_vm14  ;;  %v1816_v24 = vcvt.s32.f32 %v1814_v19 }
 0x194   :  { %1783 = vadd.xlane.f32.xlu0 %v1780_v29  ;;  %v1389_v29 = vsel %vm1261_vm9, 1, %v12605_v13  ;;  %vm846_vm9 = vcmp.eq.f32.partialorder %v7474_v38, %v6869_v49  ;;  %vm1133_vm5 = vmor %vm717_vm10, %vm1005_vm15 }
 0x195   :  { %1793 = vadd.xlane.f32.xlu1 %v1791_v43  ;;  %v7485_v47 = vpop.permute.xlu1 %516  ;;  %v1815_v43 = vcvt.s32.f32 %v1813_v42  ;;  %v1825_v58 = vand.u32 65535, %v1389_v29  ;;  %v1826_v6 = vshrl.u32 %v1389_v29, 16  ;;  %vm1006_vm13 = vmand %vm846_vm9, %vm6981_vm0 }
 0x196   :  { %12688 = vst [vmem:[#allocation77_spill] sm:$0xff] %v7485_v47  ;;  %v7494_v46 = vpop.permute.xlu0 %520  ;;  %vm12692_vm11 = vmmov %vm12689_vm14  ;;  %vm719_vm14 = vcmp.lt.f32.partialorder %v7474_v38, %v6867_v48 }
 0x197   :  { %12690 = vst [vmem:[#allocation78_spill] sm:$0xff] %v7494_v46  ;;  %v1827_v44 = vcvt.s32.f32 %v1825_v58  ;;  %vm1264_vm10 = vmand %vm1133_vm5, %vm12692_vm11  ;;  %v1828_v49 = vcvt.s32.f32 %v1826_v6 }
 0x198   :  { %1795 = vadd.xlane.f32.xlu0 %v1792_v5  ;;  %v1837_v5 = vand.u32 65535, %v1390_v36  ;;  %vm1134_vm15 = vmor %vm718_vm6, %vm1006_vm13  ;;  %v1392_v58 = vsel %vm1264_vm10, 1, %v12605_v13  ;;  %vm849_vm10 = vcmp.eq.f32.partialorder %v7474_v38, %v6871_v50 }
 0x199   :  { %1805 = vadd.xlane.f32.xlu1 %v1803_v28  ;;  %v1391_v28 = vsel %vm1263_vm2, 1, %v12605_v13  ;;  %v7503_v42 = vpop.permute.xlu1 %524  ;;  %vm1007_vm9 = vmand %vm847_vm7, %vm6997_vm4  ;;  %vm848_vm2 = vcmp.eq.f32.partialorder %v7474_v38, %v6873_v51  ;;  %vm720_vm7 = vcmp.lt.f32.partialorder %v7474_v38, %v6873_v51  ;;  %vm851_vm4 = vcmp.eq.f32.partialorder %v7474_v38, %v6878_v53 }
 0x19a   :  { %12691 = vst [vmem:[#allocation79_spill] sm:$0xff] %v7503_v42  ;;  %v1839_v29 = vcvt.s32.f32 %v1837_v5  ;;  %v7513_v19 = vpop.permute.xlu0 %528  ;;  %vm12694_vm5 = vmmov %vm12692_vm11  ;;  %v1850_v48 = vshrl.u32 %v1391_v28, 16 }
 0x19b   :  { %12693 = vst [vmem:[#allocation80_spill] sm:$0xff] %v7513_v19  ;;  %vm1265_vm6 = vmand %vm1134_vm15, %vm12694_vm5  ;;  %vm850_vm15 = vcmp.eq.f32.partialorder %v7474_v38, %v6880_v54 }
 0x19c   :  { %1807 = vadd.xlane.f32.xlu0 %v1804_v35  ;;  %v1838_v35 = vshrl.u32 %v1390_v36, 16  ;;  %vm1135_vm13 = vmor %vm719_vm14, %vm1007_vm9  ;;  %v1393_v5 = vsel %vm1265_vm6, 1, %v12605_v13  ;;  %vm722_vm6 = vcmp.lt.f32.partialorder %v7474_v38, %v6880_v54 }
 0x19d   :  { %1817 = vadd.xlane.f32.xlu1 %v1815_v43  ;;  %v1849_v43 = vand.u32 65535, %v1391_v28  ;;  %vm1008_vm11 = vmand %vm848_vm2, %vm7019_vm12  ;;  %vm721_vm2 = vcmp.lt.f32.partialorder %v7474_v38, %v6871_v50  ;;  %v1852_v28 = vcvt.s32.f32 %v1850_v48  ;;  %v1874_v48 = vshrl.u32 %v1393_v5, 16 }
 0x19e   :  { %v1840_v36 = vcvt.s32.f32 %v1838_v35  ;;  %vm12696_vm14 = vmmov %vm12694_vm5  ;;  %v7533_v51 = vpop.permute.xlu0 %536  ;;  %v1873_v35 = vand.u32 65535, %v1393_v5 }
 0x19f   :  { %v1851_v6 = vcvt.s32.f32 %v1849_v43  ;;  %vm1266_vm9 = vmand %vm1135_vm13, %vm12696_vm14  ;;  %12697 = vst [vmem:[#allocation82_spill] sm:$0xff] %v7533_v51  ;;  %vm12698_vm13 = vnez %v12608_v34 }
 0x1a0   :  { %1819 = vadd.xlane.f32.xlu0 %v1816_v24  ;;  %v7518_v24 = vpop.permute.xlu1 %532  ;;  %vm1136_vm5 = vmor %vm720_vm7, %vm1008_vm11  ;;  %vm12700_vm7 = vcmp.lt.s32.totalorder %v6973_v8, 8 }
 0x1a1   :  { %1829 = vadd.xlane.f32.xlu1 %v1827_v44  ;;  %12695 = vst [vmem:[#allocation81_spill] sm:$0xff] %v7518_v24  ;;  %v1861_v44 = vand.u32 65535, %v1392_v58  ;;  %vm1009_vm12 = vmand %vm849_vm10, %vm7028_vm1  ;;  %v12719_v24 = vld [vmem:[#allocation19_spill] sm:$0xff] }
 0x1a2   :  { %vm1010_vm14 = vmand %vm850_vm15, %vm12698_vm13  ;;  %v7548_v54 = vpop.permute.xlu0 %544  ;;  %vm852_vm15 = vcmp.eq.f32.partialorder %v7474_v38, %v6886_v57 }
 0x1a3   :  { %vm1267_vm11 = vmand %vm1136_vm5, %vm12700_vm7  ;;  %12701 = vst [vmem:[#allocation84_spill] sm:$0xff] %v7548_v54 }
 0x1a4   :  { %1831 = vadd.xlane.f32.xlu0 %v1828_v49  ;;  %v1863_v49 = vcvt.s32.f32 %v1861_v44  ;;  %v7541_v43 = vpop.permute.xlu1 %540  ;;  %vm1137_vm10 = vmor %vm721_vm2, %vm1009_vm12  ;;  %v1395_v44 = vsel %vm1267_vm11, 1, %v12605_v13  ;;  %vm724_vm11 = vcmp.lt.f32.partialorder %v7474_v38, %v6886_v57 }
 0x1a5   :  { %1841 = vadd.xlane.f32.xlu1 %v1839_v29  ;;  %v1862_v29 = vshrl.u32 %v1392_v58, 16  ;;  %12699 = vst [vmem:[#allocation83_spill] sm:$0xff] %v7541_v43  ;;  %vm1138_vm1 = vmor %vm722_vm6, %vm1010_vm14  ;;  %v1875_v58 = vcvt.s32.f32 %v1873_v35  ;;  %vm723_vm6 = vcmp.lt.f32.partialorder %v7474_v38, %v6878_v53  ;;  %vm12707_vm14 = vnez %v12613_v4  ;;  %v12711_v43 = vld [vmem:[#allocation17_spill] sm:$0xff] }
 0x1a6   :  { %vm12703_vm12 = vmmov %vm12700_vm7  ;;  %v1897_v54 = vand.u32 65535, %v1395_v44  ;;  %v7572_v53 = vpop.permute.xlu0 %552 }
 0x1a7   :  { %v1864_v50 = vcvt.s32.f32 %v1862_v29  ;;  %vm7557_vm2 = vmand %vm1138_vm1, %vm12703_vm12  ;;  %vm12708_vm1 = vnez %v12616_v18  ;;  %12709 = vst [vmem:[#allocation86_spill] sm:$0xff] %v7572_v53 }
 0x1a8   :  { %1843 = vadd.xlane.f32.xlu0 %v1840_v36  ;;  %v1394_v36 = vsel %vm1266_vm9, 1, %v12605_v13  ;;  %vm12702_vm9 = vmmov %vm12700_vm7 }
 0x1a9   :  { %1853 = vadd.xlane.f32.xlu1 %v1851_v6  ;;  %v1885_v6 = vand.u32 65535, %v1394_v36  ;;  %vm1268_vm5 = vmand %vm1137_vm10, %vm12702_vm9  ;;  %v1886_v35 = vshrl.u32 %v1394_v36, 16  ;;  %v1397_v36 = vsel %vm7557_vm2, 1, %v12605_v13  ;;  %vm725_vm2 = vcmp.lt.f32.partialorder %v7474_v38, %v6884_v56 }
 0x1aa   :  { %vm1011_vm7 = vmand %vm851_vm4, %vm12707_vm14  ;;  %vm853_vm4 = vcmp.eq.f32.partialorder %v7474_v38, %v6884_v56  ;;  %v1921_v5 = vand.u32 65535, %v1397_v36  ;;  %v1922_v53 = vshrl.u32 %v1397_v36, 16 }
 0x1ab   :  { %v1887_v29 = vcvt.s32.f32 %v1885_v6  ;;  %vm1012_vm10 = vmand %vm852_vm15, %vm12708_vm1  ;;  %vm854_vm15 = vcmp.eq.f32.partialorder %v7474_v38, %v12711_v43 }
 0x1ac   :  { %1855 = vadd.xlane.f32.xlu0 %v1852_v28  ;;  %v7563_v28 = vpop.permute.xlu1 %548  ;;  %vm1139_vm9 = vmor %vm723_vm6, %vm1011_vm7  ;;  %v1923_v56 = vcvt.s32.f32 %v1921_v5 }
 0x1ad   :  { %1865 = vadd.xlane.f32.xlu1 %v1863_v49  ;;  %12706 = vst [vmem:[#allocation85_spill] sm:$0xff] %v7563_v28  ;;  %v1876_v49 = vcvt.s32.f32 %v1874_v48  ;;  %vm1140_vm12 = vmor %vm724_vm11, %vm1012_vm10  ;;  %v1888_v28 = vcvt.s32.f32 %v1886_v35  ;;  %v1899_v48 = vcvt.s32.f32 %v1897_v54  ;;  %vm12716_vm10 = vnez %v12621_v60 }
 0x1ae   :  { %vm1013_vm1 = vmand %vm853_vm4, %vm12716_vm10 }
 0x1b0   :  { %1867 = vadd.xlane.f32.xlu0 %v1864_v50  ;;  %v1396_v50 = vsel %vm1268_vm5, 1, %v12605_v13  ;;  %v7579_v57 = vpop.permute.xlu1 %556  ;;  %vm12712_vm5 = vcmp.lt.s32.totalorder %v6973_v8, 8 }
 0x1b1   :  { %1877 = vadd.xlane.f32.xlu1 %v1875_v58  ;;  %v1898_v58 = vshrl.u32 %v1395_v44, 16  ;;  %v1909_v6 = vand.u32 65535, %v1396_v50  ;;  %12710 = vst [vmem:[#allocation87_spill] sm:$0xff] %v7579_v57  ;;  %vm1270_vm6 = vmand %vm1139_vm9, %vm12712_vm5  ;;  %v1910_v35 = vshrl.u32 %v1396_v50, 16  ;;  %vm726_vm9 = vcmp.lt.f32.partialorder %v7474_v38, %v12711_v43  ;;  %v12718_v50 = vld [vmem:[#allocation16_spill] sm:$0xff] }
 0x1b2   :  { %vm12713_vm7 = vmmov %vm12712_vm5  ;;  %vm12717_vm5 = vnez %v12625_v20  ;;  %vm855_vm4 = vcmp.eq.f32.partialorder %v7474_v38, %v12718_v50 }
 0x1b3   :  { %vm7587_vm11 = vmand %vm1140_vm12, %vm12713_vm7 }
 0x1b4   :  { %1879 = vadd.xlane.f32.xlu0 %v1876_v49  ;;  %v1900_v49 = vcvt.s32.f32 %v1898_v58  ;;  %vm1014_vm12 = vmand %vm854_vm15, %vm12717_vm5  ;;  %v1912_v58 = vcvt.s32.f32 %v1910_v35  ;;  %v1399_v43 = vsel %vm7587_vm11, 1, %v12605_v13  ;;  %vm856_vm15 = vcmp.eq.f32.partialorder %v7474_v38, %v12719_v24 }
 0x1b5   :  { %1889 = vadd.xlane.f32.xlu1 %v1887_v29  ;;  %v1911_v29 = vcvt.s32.f32 %v1909_v6  ;;  %vm1141_vm7 = vmor %vm725_vm2, %vm1013_vm1  ;;  %vm12720_vm1 = vcmp.lt.s32.totalorder %v6973_v8, 8  ;;  %vm727_vm11 = vcmp.lt.f32.partialorder %v7474_v38, %v12718_v50  ;;  %v1945_v35 = vand.u32 65535, %v1399_v43  ;;  %v12731_v50 = vld [vmem:[#allocation21_spill] sm:$0xff] }
 0x1b6   :  { %vm1142_vm14 = vmor %vm726_vm9, %vm1014_vm12  ;;  %vm12726_vm12 = vnez %v12629_v10  ;;  %v1946_v47 = vshrl.u32 %v1399_v43, 16 }
 0x1b7   :  { %vm12723_vm2 = vmmov %vm12720_vm1 }
 0x1b8   :  { %1891 = vadd.xlane.f32.xlu0 %v1888_v28  ;;  %v1398_v28 = vsel %vm1270_vm6, 1, %v12605_v13  ;;  %vm7609_vm6 = vmand %vm1141_vm7, %vm12720_vm1  ;;  %vm12727_vm1 = vnez %v12633_v61 }
 0x1b9   :  { %1901 = vadd.xlane.f32.xlu1 %v1899_v48  ;;  %v1494_v44 = vpop.xlane.xlu0 %1493  ;;  %v1933_v6 = vand.u32 65535, %v1398_v28  ;;  %vm7615_vm9 = vmand %vm1142_vm14, %vm12723_vm2  ;;  %vm728_vm14 = vcmp.lt.f32.partialorder %v7474_v38, %v12719_v24 }
 0x1ba   :  { %v1497_v54 = vcvt.f32.s32 %v1494_v44  ;;  %vm1015_vm7 = vmand %vm855_vm4, %vm12726_vm12  ;;  %v1400_v44 = vsel %vm7609_vm6, 1, %v12605_v13  ;;  %vm858_vm6 = vcmp.eq.f32.partialorder %v7474_v38, %v12731_v50 }
 0x1bb   :  { %vm1016_vm2 = vmand %vm856_vm15, %vm12727_vm1  ;;  %v1957_v45 = vand.u32 65535, %v1400_v44 }
 0x1bc   :  { %1903 = vadd.xlane.f32.xlu0 %v1900_v49  ;;  %vm1143_vm4 = vmor %vm727_vm11, %vm1015_vm7  ;;  %v1401_v49 = vsel %vm7615_vm9, 1, %v12605_v13  ;;  %vm12732_vm11 = vcmp.lt.s32.totalorder %v6973_v8, 8 }
 0x1bd   :  { %1913 = vadd.xlane.f32.xlu1 %v1911_v29  ;;  %v1506_v48 = vpop.xlane.xlu0 %1505  ;;  %vm1144_vm12 = vmor %vm728_vm14, %vm1016_vm2 }
 0x1be   :  { %v1496_v57 = vpop.xlane.xlu1 %1495  ;;  %vm7649_vm7 = vmand %vm1143_vm4, %vm12732_vm11  ;;  %vm12738_vm4 = vnez %v12638_v0 }
 0x1bf   :  { %v1498_v51 = vcvt.f32.s32 %v1496_v57  ;;  %vm12735_vm14 = vmmov %vm12732_vm11 }
 0x1c0   :  { %1915 = vadd.xlane.f32.xlu0 %v1912_v58  ;;  %v1935_v58 = vcvt.s32.f32 %v1933_v6  ;;  %vm7655_vm9 = vmand %vm1144_vm12, %vm12735_vm14  ;;  %vm730_vm12 = vcmp.lt.f32.partialorder %v7474_v38, %v12731_v50  ;;  %vm12739_vm14 = vnez %v12642_v17 }
 0x1c1   :  { %v1499_v36 = vshll.u32 %v1498_v51, 16  ;;  %1925 = vadd.xlane.f32.xlu1 %v1923_v56  ;;  %v1508_v5 = vpop.xlane.xlu0 %1507  ;;  %v1924_v51 = vcvt.s32.f32 %v1922_v53  ;;  %v1934_v56 = vshrl.u32 %v1398_v28, 16  ;;  %v1509_v53 = vcvt.f32.s32 %v1506_v48  ;;  %vm1018_vm2 = vmand %vm858_vm6, %vm12739_vm14 }
 0x1c2   :  { %v1518_v29 = vpop.xlane.xlu1 %1517  ;;  %v1510_v19 = vcvt.f32.s32 %v1508_v5  ;;  %v1947_v5 = vcvt.s32.f32 %v1945_v35  ;;  %vm1146_vm6 = vmor %vm730_vm12, %vm1018_vm2  ;;  %vm12747_vm2 = vcmp.lt.s32.totalorder %v6973_v8, 8 }
 0x1c3   :  { %v7633_v42 = vadd.s32 %v1499_v36, %v1497_v54  ;;  %v1936_v22 = vcvt.s32.f32 %v1934_v56  ;;  %v1948_v56 = vcvt.s32.f32 %v1946_v47 }
 0x1c4   :  { %v1511_v46 = vshll.u32 %v1510_v19, 16  ;;  %1927 = vadd.xlane.f32.xlu0 %v1924_v51  ;;  %v12729_v19 = vld [vmem:[#allocation18_spill] sm:$0xff]  ;;  %v1969_v51 = vand.u32 65535, %v1401_v49 }
 0x1c5   :  { %12728 = vst [vmem:[#allocation17_spill] sm:$0xff] %v7633_v42  ;;  %1937 = vadd.xlane.f32.xlu1 %v1935_v58  ;;  %v1520_v28 = vpop.xlane.xlu0 %1519  ;;  %vm857_vm15 = vcmp.eq.f32.partialorder %v7474_v38, %v12729_v19 }
 0x1c6   :  { %v1530_v6 = vpop.xlane.xlu1 %1529  ;;  %v1522_v24 = vcvt.f32.s32 %v1520_v28  ;;  %v7643_v36 = vadd.s32 %v1511_v46, %v1509_v53  ;;  %v1521_v46 = vcvt.f32.s32 %v1518_v29  ;;  %vm1017_vm11 = vmand %vm857_vm15, %vm12738_vm4  ;;  %v1958_v53 = vshrl.u32 %v1400_v44, 16 }
 0x1c7   :  { %v1402_v29 = vsel %vm7649_vm7, 1, %v12605_v13  ;;  %vm12741_vm15 = vcmp.lt.f32.partialorder %v7474_v38, %v12729_v19  ;;  %v1533_v47 = vcvt.f32.s32 %v1530_v6  ;;  %v1971_v50 = vcvt.s32.f32 %v1969_v51 }
 0x1c8   :  { %12730 = vst [vmem:[#allocation16_spill] sm:$0xff] %v7643_v36  ;;  %v1523_v43 = vshll.u32 %v1522_v24, 16  ;;  %1939 = vadd.xlane.f32.xlu0 %v1936_v22  ;;  %v1959_v22 = vcvt.s32.f32 %v1957_v45  ;;  %vm7678_vm4 = vmor %vm12741_vm15, %vm1017_vm11  ;;  %v1960_v42 = vcvt.s32.f32 %v1958_v53  ;;  %v624_v6 = vcombine.high %v7258_v9, %v7258_v9 }
 0x1c9   :  { %1949 = vadd.xlane.f32.xlu1 %v1947_v5  ;;  %v1532_v54 = vpop.xlane.xlu0 %1531  ;;  %vm7697_vm12 = vmand %vm7678_vm4, %vm12747_vm2  ;;  %vm12753_vm4 = vnez %v12647_v21 }
 0x1ca   :  { %v1542_v35 = vpop.xlane.xlu1 %1541  ;;  %v1534_v58 = vcvt.f32.s32 %v1532_v54  ;;  %v7673_v28 = vadd.s32 %v1523_v43, %v1521_v46  ;;  %v1970_v54 = vshrl.u32 %v1401_v49, 16  ;;  %v1981_v43 = vand.u32 65535, %v1402_v29 }
 0x1cb   :  { %v1403_v46 = vsel %vm7655_vm9, 1, %v12605_v13  ;;  %vm12750_vm9 = vmmov %vm12747_vm2  ;;  %v1545_v9 = vcvt.f32.s32 %v1542_v35  ;;  %v1404_v35 = vsel %vm7697_vm12, 1, %v12605_v13 }
 0x1cc   :  { %12740 = vst [vmem:[#allocation19_spill] sm:$0xff] %v7673_v28  ;;  %v1535_v5 = vshll.u32 %v1534_v58, 16  ;;  %1951 = vadd.xlane.f32.xlu0 %v1948_v56  ;;  %v12744_v58 = vld [vmem:[#allocation20_spill] sm:$0xff]  ;;  %v12746_v56 = vld [vmem:[#allocation23_spill] sm:$0xff]  ;;  %vm7703_vm15 = vmand %vm1146_vm6, %vm12750_vm9 }
 0x1cd   :  { %1961 = vadd.xlane.f32.xlu1 %v1959_v22  ;;  %v1544_v44 = vpop.xlane.xlu0 %1543  ;;  %vm859_vm7 = vcmp.eq.f32.partialorder %v7474_v38, %v12744_v58  ;;  %vm732_vm6 = vcmp.lt.f32.partialorder %v7474_v38, %v12746_v56  ;;  %vm12754_vm9 = vcmp.eq.f32.partialorder %v7474_v38, %v12746_v56 }
 0x1ce   :  { %v1554_v24 = vpop.xlane.xlu1 %1553  ;;  %v1546_v48 = vcvt.f32.s32 %v1544_v44  ;;  %v7687_v19 = vadd.s32 %v1535_v5, %v1533_v47  ;;  %v1993_v5 = vand.u32 65535, %v1403_v46  ;;  %vm1019_vm2 = vmand %vm859_vm7, %vm12753_vm4  ;;  %v1972_v47 = vcvt.s32.f32 %v1970_v54 }
 0x1cf   :  { %v1982_v44 = vshrl.u32 %v1402_v29, 16  ;;  %vm1020_vm11 = vmand %vm12754_vm9, %vm12685_vm8  ;;  %vm12756_vm7 = vcmp.lt.f32.partialorder %v7474_v38, %v12744_v58  ;;  %v1557_v29 = vcvt.f32.s32 %v1554_v24  ;;  %v12759_v58 = vld [vmem:[#allocation25_spill] sm:$0xff] }
 0x1d0   :  { %12745 = vst [vmem:[#allocation18_spill] sm:$0xff] %v7687_v19  ;;  %v1547_v57 = vshll.u32 %v1546_v48, 16  ;;  %1963 = vadd.xlane.f32.xlu0 %v1960_v42  ;;  %v1983_v42 = vcvt.s32.f32 %v1981_v43  ;;  %v7724_v48 = vrot.slane %v624_v6, %v6770_v2  ;;  %vm1147_vm4 = vmor %vm12756_vm7, %vm1019_vm2  ;;  %v1994_v19 = vshrl.u32 %v1403_v46, 16 }
 0x1d1   :  { %1973 = vadd.xlane.f32.xlu1 %v1971_v50  ;;  %v1556_v22 = vpop.xlane.xlu0 %1555  ;;  %vm1148_vm9 = vmor %vm732_vm6, %vm1020_vm11  ;;  %v1984_v28 = vcvt.s32.f32 %v1982_v44  ;;  %v1405_v6 = vsel %vm7703_vm15, 1, %v12605_v13  ;;  %vm12760_vm7 = vcmp.lt.s32.totalorder %v6973_v8, 8 }
 0x1d2   :  { %v1566_v53 = vpop.xlane.xlu1 %1565  ;;  %v1558_v45 = vcvt.f32.s32 %v1556_v22  ;;  %v7721_v50 = vadd.s32 %v1547_v57, %v1545_v9  ;;  %v1995_v22 = vcvt.s32.f32 %v1993_v5  ;;  %v2005_v57 = vand.u32 65535, %v1404_v35  ;;  %v12757_v9 = vld [vmem:[#allocation22_spill] sm:$0xff]  ;;  %vm7740_vm8 = vmand %vm1147_vm4, %vm12760_vm7 }
 0x1d3   :  { %vm861_vm12 = vcmp.eq.f32.partialorder %v7474_v38, %v12757_v9  ;;  %vm862_vm2 = vcmp.eq.f32.partialorder %v7724_v48, %v12759_v58  ;;  %vm12763_vm11 = vmmov %vm12760_vm7  ;;  %vm733_vm6 = vcmp.lt.f32.partialorder %v7474_v38, %v12757_v9  ;;  %v1569_v5 = vcvt.f32.s32 %v1566_v53  ;;  %v12769_v38 = vld [vmem:[#allocation27_spill] sm:$0xff] }
 0x1d4   :  { %12755 = vst [vmem:[#allocation21_spill] sm:$0xff] %v7721_v50  ;;  %v1559_v54 = vshll.u32 %v1558_v45, 16  ;;  %1975 = vadd.xlane.f32.xlu0 %v1972_v47  ;;  %vm7746_vm15 = vmand %vm1148_vm9, %vm12763_vm11  ;;  %v2017_v44 = vand.u32 65535, %v1405_v6  ;;  %vm734_vm9 = vcmp.lt.f32.partialorder %v7724_v48, %v12759_v58  ;;  %v1406_v53 = vsel %vm7740_vm8, 1, %v12605_v13 }
 0x1d5   :  { %1985 = vadd.xlane.f32.xlu1 %v1983_v42  ;;  %v1568_v43 = vpop.xlane.xlu0 %1567  ;;  %vm1021_vm4 = vmand %vm861_vm12, %vm7281_vm3  ;;  %v2029_v36 = vand.u32 65535, %v1406_v53  ;;  %v1407_v24 = vsel %vm7746_vm15, 1, %v12605_v13 }
 0x1d6   :  { %v1578_v56 = vpop.xlane.xlu1 %1577  ;;  %v1570_v49 = vcvt.f32.s32 %v1568_v43  ;;  %v7734_v45 = vadd.s32 %v1559_v54, %v1557_v29  ;;  %v1996_v29 = vcvt.s32.f32 %v1994_v19  ;;  %v2006_v43 = vshrl.u32 %v1404_v35, 16  ;;  %vm1022_vm7 = vmand %vm862_vm2, %vm6981_vm0 }
 0x1d7   :  { %vm1149_vm12 = vmor %vm733_vm6, %vm1021_vm4  ;;  %v1581_v19 = vcvt.f32.s32 %v1578_v56  ;;  %vm864_vm2 = vcmp.eq.f32.partialorder %v7724_v48, %v12769_v38  ;;  %vm12770_vm6 = vcmp.lt.s32.totalorder %v6973_v8, 8 }
 0x1d8   :  { %12758 = vst [vmem:[#allocation20_spill] sm:$0xff] %v7734_v45  ;;  %v1571_v46 = vshll.u32 %v1570_v49, 16  ;;  %1987 = vadd.xlane.f32.xlu0 %v1984_v28  ;;  %v2007_v28 = vcvt.s32.f32 %v2005_v57  ;;  %v2018_v45 = vshrl.u32 %v1405_v6, 16  ;;  %vm1150_vm11 = vmor %vm734_vm9, %vm1022_vm7  ;;  %v2008_v50 = vcvt.s32.f32 %v2006_v43 }
 0x1d9   :  { %1997 = vadd.xlane.f32.xlu1 %v1995_v22  ;;  %v1580_v47 = vpop.xlane.xlu0 %1579  ;;  %vm7780_vm4 = vmand %vm1149_vm12, %vm12770_vm6  ;;  %vm12776_vm12 = vnez %v12597_v3 }
 0x1da   :  { %v1590_v42 = vpop.xlane.xlu1 %1589  ;;  %v1582_v54 = vcvt.f32.s32 %v1580_v47  ;;  %v7764_v22 = vadd.s32 %v1571_v46, %v1569_v5  ;;  %v2019_v47 = vcvt.s32.f32 %v2017_v44  ;;  %v12767_v46 = vld [vmem:[#allocation24_spill] sm:$0xff]  ;;  %vm12773_vm9 = vmmov %vm12770_vm6  ;;  %v2020_v43 = vcvt.s32.f32 %v2018_v45 }
 0x1db   :  { %vm863_vm8 = vcmp.eq.f32.partialorder %v7724_v48, %v12767_v46  ;;  %vm7786_vm15 = vmand %vm1150_vm11, %vm12773_vm9  ;;  %v1593_v51 = vcvt.f32.s32 %v1590_v42  ;;  %vm736_vm11 = vcmp.lt.f32.partialorder %v7724_v48, %v12769_v38  ;;  %vm12777_vm9 = vnez %v12601_v52 }
 0x1dc   :  { %12766 = vst [vmem:[#allocation23_spill] sm:$0xff] %v7764_v22  ;;  %v1583_v49 = vshll.u32 %v1582_v54, 16  ;;  %1999 = vadd.xlane.f32.xlu0 %v1996_v29  ;;  %v2041_v29 = vand.u32 65535, %v1407_v24  ;;  %vm1023_vm6 = vmand %vm863_vm8, %vm12776_vm12  ;;  %v1408_v42 = vsel %vm7780_vm4, 1, %v12605_v13  ;;  %vm12779_vm8 = vcmp.lt.f32.partialorder %v7724_v48, %v12767_v46  ;;  %v12782_v46 = vld [vmem:[#allocation30_spill] sm:$0xff] }
 0x1dd   :  { %2009 = vadd.xlane.f32.xlu1 %v2007_v28  ;;  %v1592_v35 = vpop.xlane.xlu0 %1591  ;;  %vm1024_vm7 = vmand %vm864_vm2, %vm12777_vm9  ;;  %v1409_v56 = vsel %vm7786_vm15, 1, %v12605_v13  ;;  %vm866_vm4 = vcmp.eq.f32.partialorder %v7724_v48, %v12782_v46 }
 0x1de   :  { %v1602_v57 = vpop.xlane.xlu1 %1601  ;;  %v1594_v58 = vcvt.f32.s32 %v1592_v35  ;;  %v7774_v5 = vadd.s32 %v1583_v49, %v1581_v19  ;;  %v2030_v49 = vshrl.u32 %v1406_v53, 16  ;;  %vm1151_vm12 = vmor %vm12779_vm8, %vm1023_vm6  ;;  %vm12783_vm6 = vcmp.lt.s32.totalorder %v6973_v8, 8 }
 0x1df   :  { %vm1152_vm0 = vmor %vm736_vm11, %vm1024_vm7 }
 0x1e0   :  { %12768 = vst [vmem:[#allocation22_spill] sm:$0xff] %v7774_v5  ;;  %v1595_v6 = vshll.u32 %v1594_v58, 16  ;;  %2011 = vadd.xlane.f32.xlu0 %v2008_v50  ;;  %v2031_v50 = vcvt.s32.f32 %v2029_v36  ;;  %v1605_v36 = vcvt.f32.s32 %v1602_v57  ;;  %v2042_v58 = vshrl.u32 %v1407_v24, 16  ;;  %vm7820_vm8 = vmand %vm1151_vm12, %vm12783_vm6 }
 0x1e1   :  { %2021 = vadd.xlane.f32.xlu1 %v2019_v47  ;;  %v1604_v44 = vpop.xlane.xlu0 %1603  ;;  %v2043_v47 = vcvt.s32.f32 %v2041_v29  ;;  %v2053_v5 = vand.u32 65535, %v1408_v42  ;;  %vm12786_vm7 = vmmov %vm12783_vm6  ;;  %vm12789_vm12 = vnez %v12603_v15 }
 0x1e2   :  { %v1614_v54 = vpop.xlane.xlu1 %1613  ;;  %v1606_v28 = vcvt.f32.s32 %v1604_v44  ;;  %v7804_v19 = vadd.s32 %v1595_v6, %v1593_v51  ;;  %v2032_v44 = vcvt.s32.f32 %v2030_v49  ;;  %v12780_v6 = vld [vmem:[#allocation26_spill] sm:$0xff]  ;;  %vm7826_vm15 = vmand %vm1152_vm0, %vm12786_vm7  ;;  %vm738_vm0 = vcmp.lt.f32.partialorder %v7724_v48, %v12782_v46 }
 0x1e3   :  { %vm865_vm2 = vcmp.eq.f32.partialorder %v7724_v48, %v12780_v6  ;;  %vm737_vm11 = vcmp.lt.f32.partialorder %v7724_v48, %v12780_v6  ;;  %v1617_v29 = vcvt.f32.s32 %v1614_v54  ;;  %vm1026_vm7 = vmand %vm866_vm4, %vm12698_vm13  ;;  %v1410_v54 = vsel %vm7820_vm8, 1, %v12605_v13  ;;  %v12793_v6 = vld [vmem:[#allocation32_spill] sm:$0xff] }
 0x1e4   :  { %12778 = vst [vmem:[#allocation25_spill] sm:$0xff] %v7804_v19  ;;  %v1607_v35 = vshll.u32 %v1606_v28, 16  ;;  %2023 = vadd.xlane.f32.xlu0 %v2020_v43  ;;  %vm1025_vm6 = vmand %vm865_vm2, %vm12789_vm12  ;;  %v2077_v22 = vand.u32 65535, %v1410_v54  ;;  %v1411_v57 = vsel %vm7826_vm15, 1, %v12605_v13  ;;  %vm868_vm8 = vcmp.eq.f32.partialorder %v7724_v48, %v12793_v6 }
 0x1e5   :  { %2033 = vadd.xlane.f32.xlu1 %v2031_v50  ;;  %v1616_v45 = vpop.xlane.xlu0 %1615  ;;  %v2065_v50 = vand.u32 65535, %v1409_v56  ;;  %vm1153_vm2 = vmor %vm737_vm11, %vm1025_vm6  ;;  %vm12794_vm11 = vcmp.lt.s32.totalorder %v6973_v8, 8 }
 0x1e6   :  { %v1626_v53 = vpop.xlane.xlu1 %1625  ;;  %v1618_v38 = vcvt.f32.s32 %v1616_v45  ;;  %v7814_v51 = vadd.s32 %v1607_v35, %v1605_v36  ;;  %v2044_v35 = vcvt.s32.f32 %v2042_v58  ;;  %v2055_v36 = vcvt.s32.f32 %v2053_v5  ;;  %vm1154_vm12 = vmor %vm738_vm0, %vm1026_vm7 }
 0x1e7   :  { %v2054_v45 = vshrl.u32 %v1408_v42, 16  ;;  %v1629_v5 = vcvt.f32.s32 %v1626_v53  ;;  %vm7860_vm6 = vmand %vm1153_vm2, %vm12794_vm11  ;;  %vm12800_vm2 = vnez %v12613_v4 }
 0x1e8   :  { %12781 = vst [vmem:[#allocation24_spill] sm:$0xff] %v7814_v51  ;;  %v1619_v24 = vshll.u32 %v1618_v38, 16  ;;  %2035 = vadd.xlane.f32.xlu0 %v2032_v44  ;;  %v2067_v44 = vcvt.s32.f32 %v2065_v50  ;;  %vm12797_vm0 = vmmov %vm12794_vm11 }
 0x1e9   :  { %2045 = vadd.xlane.f32.xlu1 %v2043_v47  ;;  %v1628_v28 = vpop.xlane.xlu0 %1627  ;;  %v2056_v51 = vcvt.s32.f32 %v2054_v45  ;;  %vm7866_vm15 = vmand %vm1154_vm12, %vm12797_vm0  ;;  %vm740_vm12 = vcmp.lt.f32.partialorder %v7724_v48, %v12793_v6  ;;  %vm12801_vm0 = vnez %v12616_v18 }
 0x1ea   :  { %v1638_v43 = vpop.xlane.xlu1 %1637  ;;  %v1630_v49 = vcvt.f32.s32 %v1628_v28  ;;  %v7844_v47 = vadd.s32 %v1619_v24, %v1617_v29  ;;  %v2066_v28 = vshrl.u32 %v1409_v56, 16  ;;  %v12791_v24 = vld [vmem:[#allocation29_spill] sm:$0xff]  ;;  %vm1028_vm7 = vmand %vm868_vm8, %vm12801_vm0  ;;  %v1413_v53 = vsel %vm7866_vm15, 1, %v12605_v13 }
 0x1eb   :  { %vm867_vm4 = vcmp.eq.f32.partialorder %v7724_v48, %v12791_v24  ;;  %v1641_v50 = vcvt.f32.s32 %v1638_v43  ;;  %v1412_v43 = vsel %vm7860_vm6, 1, %v12605_v13  ;;  %vm1156_vm13 = vmor %vm740_vm12, %vm1028_vm7 }
 0x1ec   :  { %12790 = vst [vmem:[#allocation27_spill] sm:$0xff] %v7844_v47  ;;  %v1631_v38 = vshll.u32 %v1630_v49, 16  ;;  %2047 = vadd.xlane.f32.xlu0 %v2044_v35  ;;  %vm1027_vm11 = vmand %vm867_vm4, %vm12800_vm2  ;;  %vm12803_vm4 = vcmp.lt.f32.partialorder %v7724_v48, %v12791_v24  ;;  %v2101_v47 = vand.u32 65535, %v1412_v43  ;;  %v12806_v24 = vld [vmem:[#allocation34_spill] sm:$0xff] }
 0x1ed   :  { %2057 = vadd.xlane.f32.xlu1 %v2055_v36  ;;  %v1640_v42 = vpop.xlane.xlu0 %1639  ;;  %v2089_v36 = vand.u32 65535, %v1411_v57  ;;  %vm1155_vm2 = vmor %vm12803_vm4, %vm1027_vm11  ;;  %vm870_vm6 = vcmp.eq.f32.partialorder %v7724_v48, %v12806_v24  ;;  %vm12807_vm11 = vcmp.lt.s32.totalorder %v6973_v8, 8 }
 0x1ee   :  { %v1650_v58 = vpop.xlane.xlu1 %1649  ;;  %v1642_v46 = vcvt.f32.s32 %v1640_v42  ;;  %v7854_v29 = vadd.s32 %v1631_v38, %v1629_v5  ;;  %v2068_v38 = vcvt.s32.f32 %v2066_v28  ;;  %v2078_v5 = vshrl.u32 %v1410_v54, 16  ;;  %vm7900_vm4 = vmand %vm1155_vm2, %vm12807_vm11 }
 0x1ef   :  { %vm12810_vm7 = vmmov %vm12807_vm11 }
 0x1f0   :  { %12792 = vst [vmem:[#allocation26_spill] sm:$0xff] %v7854_v29  ;;  %v1643_v56 = vshll.u32 %v1642_v46, 16  ;;  %2059 = vadd.xlane.f32.xlu0 %v2056_v51  ;;  %v2079_v51 = vcvt.s32.f32 %v2077_v22  ;;  %v1653_v22 = vcvt.f32.s32 %v1650_v58  ;;  %v2091_v46 = vcvt.s32.f32 %v2089_v36  ;;  %vm7906_vm15 = vmand %vm1156_vm13, %vm12810_vm7 }
 0x1f1   :  { %2069 = vadd.xlane.f32.xlu1 %v2067_v44  ;;  %v1652_v49 = vpop.xlane.xlu0 %1651  ;;  %v2080_v29 = vcvt.s32.f32 %v2078_v5  ;;  %vm742_vm13 = vcmp.lt.f32.partialorder %v7724_v48, %v12806_v24  ;;  %vm1030_vm11 = vmand %vm870_vm6, %vm12717_vm5  ;;  %v1415_v58 = vsel %vm7906_vm15, 1, %v12605_v13 }
 0x1f2   :  { %v1662_v35 = vpop.xlane.xlu1 %1661  ;;  %v1654_v45 = vcvt.f32.s32 %v1652_v49  ;;  %v7884_v42 = vadd.s32 %v1643_v56, %v1641_v50  ;;  %v2090_v49 = vshrl.u32 %v1411_v57, 16  ;;  %v12804_v56 = vld [vmem:[#allocation31_spill] sm:$0xff]  ;;  %vm1158_vm7 = vmor %vm742_vm13, %vm1030_vm11 }
 0x1f3   :  { %vm869_vm8 = vcmp.eq.f32.partialorder %v7724_v48, %v12804_v56  ;;  %vm741_vm12 = vcmp.lt.f32.partialorder %v7724_v48, %v12804_v56  ;;  %v1665_v36 = vcvt.f32.s32 %v1662_v35  ;;  %v1414_v35 = vsel %vm7900_vm4, 1, %v12605_v13  ;;  %v12816_v56 = vld [vmem:[#allocation36_spill] sm:$0xff] }
 0x1f4   :  { %12802 = vst [vmem:[#allocation30_spill] sm:$0xff] %v7884_v42  ;;  %v1655_v44 = vshll.u32 %v1654_v45, 16  ;;  %2071 = vadd.xlane.f32.xlu0 %v2068_v38  ;;  %vm1029_vm2 = vmand %vm869_vm8, %vm12716_vm10  ;;  %v2125_v42 = vand.u32 65535, %v1414_v35  ;;  %vm872_vm4 = vcmp.eq.f32.partialorder %v7724_v48, %v12816_v56 }
 0x1f5   :  { %2081 = vadd.xlane.f32.xlu1 %v2079_v51  ;;  %v1664_v54 = vpop.xlane.xlu0 %1663  ;;  %v2113_v51 = vand.u32 65535, %v1413_v53  ;;  %vm1157_vm8 = vmor %vm741_vm12, %vm1029_vm2  ;;  %vm12817_vm12 = vcmp.lt.s32.totalorder %v6973_v8, 8 }
 0x1f6   :  { %v1674_v28 = vpop.xlane.xlu1 %1673  ;;  %v1666_v6 = vcvt.f32.s32 %v1664_v54  ;;  %v7894_v50 = vadd.s32 %v1655_v44, %v1653_v22  ;;  %v2092_v44 = vcvt.s32.f32 %v2090_v49  ;;  %v2102_v22 = vshrl.u32 %v1412_v43, 16  ;;  %vm7940_vm2 = vmand %vm1157_vm8, %vm12817_vm12 }
 0x1f7   :  { %vm12820_vm13 = vmmov %vm12817_vm12  ;;  %vm12823_vm8 = vnez %v12629_v10 }
 0x1f8   :  { %12805 = vst [vmem:[#allocation29_spill] sm:$0xff] %v7894_v50  ;;  %v1667_v57 = vshll.u32 %v1666_v6, 16  ;;  %2083 = vadd.xlane.f32.xlu0 %v2080_v29  ;;  %v2103_v29 = vcvt.s32.f32 %v2101_v47  ;;  %v1677_v47 = vcvt.f32.s32 %v1674_v28  ;;  %v2115_v6 = vcvt.s32.f32 %v2113_v51  ;;  %vm7946_vm15 = vmand %vm1158_vm7, %vm12820_vm13 }
 0x1f9   :  { %2093 = vadd.xlane.f32.xlu1 %v2091_v46  ;;  %v1676_v45 = vpop.xlane.xlu0 %1675  ;;  %v2104_v50 = vcvt.s32.f32 %v2102_v22  ;;  %vm744_vm7 = vcmp.lt.f32.partialorder %v7724_v48, %v12816_v56  ;;  %vm1032_vm13 = vmand %vm872_vm4, %vm12727_vm1 }
 0x1fa   :  { %v1686_v38 = vpop.xlane.xlu1 %1685  ;;  %v1678_v5 = vcvt.f32.s32 %v1676_v45  ;;  %v7924_v54 = vadd.s32 %v1667_v57, %v1665_v36  ;;  %v2114_v45 = vshrl.u32 %v1413_v53, 16  ;;  %v12814_v57 = vld [vmem:[#allocation33_spill] sm:$0xff]  ;;  %vm1160_vm4 = vmor %vm744_vm7, %vm1032_vm13 }
 0x1fb   :  { %vm871_vm6 = vcmp.eq.f32.partialorder %v7724_v48, %v12814_v57  ;;  %vm743_vm11 = vcmp.lt.f32.partialorder %v7724_v48, %v12814_v57  ;;  %v1689_v51 = vcvt.f32.s32 %v1686_v38  ;;  %v1416_v38 = vsel %vm7940_vm2, 1, %v12605_v13 }
 0x1fc   :  { %12813 = vst [vmem:[#allocation32_spill] sm:$0xff] %v7924_v54  ;;  %v1679_v46 = vshll.u32 %v1678_v5, 16  ;;  %2095 = vadd.xlane.f32.xlu0 %v2092_v44  ;;  %vm1031_vm12 = vmand %vm871_vm6, %vm12823_vm8 }
 0x1fd   :  { %2105 = vadd.xlane.f32.xlu1 %v2103_v29  ;;  %v1688_v43 = vpop.xlane.xlu0 %1687  ;;  %v2137_v29 = vand.u32 65535, %v1415_v58  ;;  %vm7969_vm6 = vmor %vm743_vm11, %vm1031_vm12  ;;  %vm12830_vm12 = vcmp.lt.s32.totalorder %v6973_v8, 8 }
 0x1fe   :  { %v1698_v49 = vpop.xlane.xlu1 %1697  ;;  %v1690_v24 = vcvt.f32.s32 %v1688_v43  ;;  %v7934_v36 = vadd.s32 %v1679_v46, %v1677_v47  ;;  %v2116_v46 = vcvt.s32.f32 %v2114_v45  ;;  %v2126_v47 = vshrl.u32 %v1414_v35, 16  ;;  %vm7986_vm7 = vmand %vm7969_vm6, %vm12830_vm12 }
 0x1ff   :  { %v1701_v35 = vcvt.f32.s32 %v1698_v49  ;;  %v2139_v56 = vcvt.s32.f32 %v2137_v29  ;;  %v12829_v49 = vld [vmem:[#allocation38_spill] sm:$0xff]  ;;  %vm12836_vm6 = vnez %v12638_v0 }
 0x200   :  { %12815 = vst [vmem:[#allocation31_spill] sm:$0xff] %v7934_v36  ;;  %v1691_v53 = vshll.u32 %v1690_v24, 16  ;;  %2107 = vadd.xlane.f32.xlu0 %v2104_v50  ;;  %v2127_v50 = vcvt.s32.f32 %v2125_v42  ;;  %v2128_v36 = vcvt.s32.f32 %v2126_v47 }
 0x201   :  { %2117 = vadd.xlane.f32.xlu1 %v2115_v6  ;;  %v1700_v5 = vpop.xlane.xlu0 %1699 }
 0x202   :  { %v1710_v44 = vpop.xlane.xlu1 %1709  ;;  %v1702_v22 = vcvt.f32.s32 %v1700_v5  ;;  %v7964_v43 = vadd.s32 %v1691_v53, %v1689_v51  ;;  %v2138_v5 = vshrl.u32 %v1415_v58, 16  ;;  %v2149_v53 = vand.u32 65535, %v1416_v38 }
 0x203   :  { %v1417_v51 = vsel %vm7946_vm15, 1, %v12605_v13  ;;  %vm12833_vm15 = vmmov %vm12830_vm12  ;;  %v1713_v47 = vcvt.f32.s32 %v1710_v44  ;;  %v1418_v44 = vsel %vm7986_vm7, 1, %v12605_v13 }
 0x204   :  { %12824 = vst [vmem:[#allocation34_spill] sm:$0xff] %v7964_v43  ;;  %v1703_v6 = vshll.u32 %v1702_v22, 16  ;;  %2119 = vadd.xlane.f32.xlu0 %v2116_v46  ;;  %v12827_v22 = vld [vmem:[#allocation35_spill] sm:$0xff]  ;;  %v6703_v46 = vld [vmem:[#allocation2] sm:$0xff]  ;;  %vm7992_vm13 = vmand %vm1160_vm4, %vm12833_vm15  ;;  %v2161_v42 = vand.u32 65535, %v1417_v51  ;;  %vm746_vm4 = vcmp.lt.f32.partialorder %v7724_v48, %v12829_v49  ;;  %vm12837_vm15 = vcmp.eq.f32.partialorder %v7724_v48, %v12829_v49 }
 0x205   :  { %2129 = vadd.xlane.f32.xlu1 %v2127_v50  ;;  %v1712_v45 = vpop.xlane.xlu0 %1711  ;;  %vm873_vm2 = vcmp.eq.f32.partialorder %v7724_v48, %v12827_v22  ;;  %v577_v50 = vcombine.high %v6703_v46, %v6703_v46  ;;  %vm1034_vm11 = vmand %vm12837_vm15, %vm12739_vm14  ;;  %v2162_v43 = vshrl.u32 %v1417_v51, 16 }
 0x206   :  { %v1722_v24 = vpop.xlane.xlu1 %1721  ;;  %v1714_v28 = vcvt.f32.s32 %v1712_v45  ;;  %v7978_v57 = vadd.s32 %v1703_v6, %v1701_v35  ;;  %vm1033_vm12 = vmand %vm873_vm2, %vm12836_vm6  ;;  %v2140_v45 = vcvt.s32.f32 %v2138_v5  ;;  %vm12839_vm2 = vcmp.lt.f32.partialorder %v7724_v48, %v12827_v22 }
 0x207   :  { %vm8021_vm6 = vmor %vm12839_vm2, %vm1033_vm12  ;;  %v2163_v58 = vcvt.s32.f32 %v2161_v42 }
 0x208   :  { %12828 = vst [vmem:[#allocation33_spill] sm:$0xff] %v7978_v57  ;;  %v1715_v9 = vshll.u32 %v1714_v28, 16  ;;  %2131 = vadd.xlane.f32.xlu0 %v2128_v36  ;;  %v2150_v28 = vshrl.u32 %v1416_v38, 16  ;;  %vm1162_vm7 = vmor %vm746_vm4, %vm1034_vm11  ;;  %vm12845_vm11 = vcmp.lt.s32.totalorder %v6973_v8, 8 }
 0x209   :  { %2141 = vadd.xlane.f32.xlu1 %v2139_v56  ;;  %v1724_v6 = vpop.xlane.xlu0 %1723  ;;  %v2151_v56 = vcvt.s32.f32 %v2149_v53  ;;  %v1725_v53 = vcvt.f32.s32 %v1722_v24  ;;  %vm8042_vm4 = vmand %vm8021_vm6, %vm12845_vm11  ;;  %vm12851_vm6 = vnez %v12647_v21 }
 0x20a   :  { %v1734_v35 = vpop.xlane.xlu1 %1733  ;;  %v1726_v36 = vcvt.f32.s32 %v1724_v6  ;;  %v8013_v46 = vadd.s32 %v1715_v9, %v1713_v47  ;;  %v8016_v6 = vrot.slane %v577_v50, %v6946_v7  ;;  %v2152_v47 = vcvt.s32.f32 %v2150_v28 }
 0x20b   :  { %v2173_v50 = vand.u32 65535, %v1418_v44  ;;  %v1737_v28 = vcvt.f32.s32 %v1734_v35  ;;  %v1420_v35 = vsel %vm8042_vm4, 1, %v12605_v13 }
 0x20c   :  { %12838 = vst [vmem:[#allocation36_spill] sm:$0xff] %v8013_v46  ;;  %v1727_v5 = vshll.u32 %v1726_v36, 16  ;;  %2143 = vadd.xlane.f32.xlu0 %v2140_v45  ;;  %v1419_v36 = vsel %vm7992_vm13, 1, %v12605_v13  ;;  %v12842_v45 = vld [vmem:[#allocation37_spill] sm:$0xff]  ;;  %v8034_v24 = vrot.slane %v8016_v6, %v6946_v7  ;;  %vm12848_vm13 = vmmov %vm12845_vm11 }
 0x20d   :  { %2153 = vadd.xlane.f32.xlu1 %v2151_v56  ;;  %v1736_v49 = vpop.xlane.xlu0 %1735  ;;  %vm875_vm15 = vcmp.eq.f32.partialorder %v7724_v48, %v12842_v45  ;;  %v12844_v56 = vld [vmem:[#allocation40_spill] sm:$0xff]  ;;  %vm8048_vm2 = vmand %vm1162_vm7, %vm12848_vm13  ;;  %v2185_v38 = vand.u32 65535, %v1419_v36  ;;  %vm12852_vm13 = vnez %v12650_v59  ;;  %v2186_v19 = vshrl.u32 %v1419_v36, 16 }
 0x20e   :  { %v1746_v57 = vpop.xlane.xlu1 %1745  ;;  %v1738_v9 = vcvt.f32.s32 %v1736_v49  ;;  %v8030_v22 = vadd.s32 %v1727_v5, %v1725_v53  ;;  %vm1035_vm11 = vmand %vm875_vm15, %vm12851_vm6  ;;  %vm12853_vm14 = vcmp.eq.f32.partialorder %v7724_v48, %v12844_v56  ;;  %vm12855_vm15 = vcmp.lt.f32.partialorder %v7724_v48, %v12842_v45  ;;  %v12859_v45 = vld [vmem:[#allocation42_spill] sm:$0xff] }
 0x20f   :  { %vm1036_vm12 = vmand %vm12853_vm14, %vm12852_vm13  ;;  %v2187_v54 = vcvt.s32.f32 %v2185_v38  ;;  %v1421_v51 = vsel %vm8048_vm2, 1, %v12605_v13  ;;  %vm12856_vm14 = vcmp.lt.f32.partialorder %v7724_v48, %v12844_v56  ;;  %vm12860_vm13 = vcmp.lt.s32.totalorder %v6973_v8, 8 }
 0x210   :  { %12843 = vst [vmem:[#allocation35_spill] sm:$0xff] %v8030_v22  ;;  %v1739_v29 = vshll.u32 %v1738_v9, 16  ;;  %2155 = vadd.xlane.f32.xlu0 %v2152_v47  ;;  %v2164_v9 = vcvt.s32.f32 %v2162_v43  ;;  %v2175_v47 = vcvt.s32.f32 %v2173_v50  ;;  %v8070_v43 = vrot.slane %v8034_v24, %v6770_v2  ;;  %vm1163_vm7 = vmor %vm12855_vm15, %vm1035_vm11 }
 0x211   :  { %2165 = vadd.xlane.f32.xlu1 %v2163_v58  ;;  %v1748_v5 = vpop.xlane.xlu0 %1747  ;;  %v2174_v58 = vshrl.u32 %v1418_v44, 16  ;;  %v1749_v44 = vcvt.f32.s32 %v1746_v57  ;;  %vm1164_vm4 = vmor %vm12856_vm14, %vm1036_vm12 }
 0x212   :  { %v1758_v53 = vpop.xlane.xlu1 %1757  ;;  %v1750_v49 = vcvt.f32.s32 %v1748_v5  ;;  %v8066_v22 = vadd.s32 %v1739_v29, %v1737_v28  ;;  %v2197_v28 = vand.u32 65535, %v1420_v35  ;;  %vm878_vm15 = vcmp.eq.f32.partialorder %v8070_v43, %v12859_v45  ;;  %vm8089_vm6 = vmand %vm1163_vm7, %vm12860_vm13 }
 0x213   :  { %v2176_v29 = vcvt.s32.f32 %v2174_v58  ;;  %vm12863_vm12 = vmmov %vm12860_vm13  ;;  %v1761_v38 = vcvt.f32.s32 %v1758_v53  ;;  %vm750_vm13 = vcmp.lt.f32.partialorder %v8070_v43, %v12859_v45  ;;  %v1422_v53 = vsel %vm8089_vm6, 1, %v12605_v13 }
 0x214   :  { %12854 = vst [vmem:[#allocation38_spill] sm:$0xff] %v8066_v22  ;;  %v1751_v50 = vshll.u32 %v1750_v49, 16  ;;  %2167 = vadd.xlane.f32.xlu0 %v2164_v9  ;;  %v12858_v9 = vld [vmem:[#allocation39_spill] sm:$0xff]  ;;  %vm8095_vm2 = vmand %vm1164_vm4, %vm12863_vm12  ;;  %vm12866_vm4 = vnez %v12593_v37  ;;  %v2210_v22 = vshrl.u32 %v1421_v51, 16 }
 0x215   :  { %2177 = vadd.xlane.f32.xlu1 %v2175_v47  ;;  %v1760_v5 = vpop.xlane.xlu0 %1759  ;;  %vm877_vm11 = vcmp.eq.f32.partialorder %v7724_v48, %v12858_v9  ;;  %vm749_vm14 = vcmp.lt.f32.partialorder %v7724_v48, %v12858_v9  ;;  %vm1038_vm12 = vmand %vm878_vm15, %vm12866_vm4  ;;  %v1423_v45 = vsel %vm8095_vm2, 1, %v12605_v13 }
 0x216   :  { %v1770_v46 = vpop.xlane.xlu1 %1769  ;;  %v1762_v57 = vcvt.f32.s32 %v1760_v5  ;;  %v8081_v49 = vadd.s32 %v1751_v50, %v1749_v44  ;;  %v2209_v44 = vand.u32 65535, %v1421_v51  ;;  %vm1037_vm7 = vmand %vm877_vm11, %vm7281_vm3  ;;  %v2188_v5 = vcvt.s32.f32 %v2186_v19 }
 0x217   :  { %vm1165_vm11 = vmor %vm749_vm14, %vm1037_vm7  ;;  %vm12870_vm7 = vcmp.lt.s32.totalorder %v6973_v8, 8 }
 0x218   :  { %12857 = vst [vmem:[#allocation37_spill] sm:$0xff] %v8081_v49  ;;  %v1763_v42 = vshll.u32 %v1762_v57, 16  ;;  %2179 = vadd.xlane.f32.xlu0 %v2176_v29  ;;  %v2199_v57 = vcvt.s32.f32 %v2197_v28  ;;  %v1773_v49 = vcvt.f32.s32 %v1770_v46  ;;  %v2211_v28 = vcvt.s32.f32 %v2209_v44  ;;  %vm1166_vm15 = vmor %vm750_vm13, %vm1038_vm12 }
 0x219   :  { %2189 = vadd.xlane.f32.xlu1 %v2187_v54  ;;  %v1772_v47 = vpop.xlane.xlu0 %1771  ;;  %v2198_v54 = vshrl.u32 %v1420_v35, 16  ;;  %vm8129_vm4 = vmand %vm1165_vm11, %vm12870_vm7  ;;  %vm12876_vm11 = vnez %v12597_v3 }
 0x21a   :  { %v1782_v58 = vpop.xlane.xlu1 %1781  ;;  %v1774_v50 = vcvt.f32.s32 %v1772_v47  ;;  %v8113_v29 = vadd.s32 %v1763_v42, %v1761_v38  ;;  %v2221_v38 = vand.u32 65535, %v1422_v53  ;;  %vm12873_vm2 = vmmov %vm12870_vm7 }
 0x21b   :  { %v2200_v42 = vcvt.s32.f32 %v2198_v54  ;;  %v1785_v51 = vcvt.f32.s32 %v1782_v58  ;;  %vm8135_vm13 = vmand %vm1166_vm15, %vm12873_vm2  ;;  %v2233_v54 = vand.u32 65535, %v1423_v45 }
 0x21c   :  { %v1775_v47 = vshll.u32 %v1774_v50, 16  ;;  %2191 = vadd.xlane.f32.xlu0 %v2188_v5  ;;  %v12868_v50 = vld [vmem:[#allocation41_spill] sm:$0xff]  ;;  %v12869_v5 = vld [vmem:[#allocation44_spill] sm:$0xff] }
 0x21d   :  { %2201 = vadd.xlane.f32.xlu1 %v2199_v57  ;;  %v1784_v19 = vpop.xlane.xlu0 %1783  ;;  %vm879_vm6 = vcmp.eq.f32.partialorder %v8070_v43, %v12868_v50  ;;  %vm880_vm14 = vcmp.eq.f32.partialorder %v8070_v43, %v12869_v5  ;;  %vm751_vm12 = vcmp.lt.f32.partialorder %v8070_v43, %v12868_v50  ;;  %v2212_v57 = vcvt.s32.f32 %v2210_v22 }
 0x21e   :  { %v1794_v35 = vpop.xlane.xlu1 %1793  ;;  %v1786_v36 = vcvt.f32.s32 %v1784_v19  ;;  %v8121_v46 = vadd.s32 %v1775_v47, %v1773_v49  ;;  %vm1039_vm7 = vmand %vm879_vm6, %vm12876_vm11  ;;  %v2223_v47 = vcvt.s32.f32 %v2221_v38  ;;  %v2222_v19 = vshrl.u32 %v1422_v53, 16 }
 0x21f   :  { %vm752_vm15 = vcmp.lt.f32.partialorder %v8070_v43, %v12869_v5  ;;  %vm1040_vm2 = vmand %vm880_vm14, %vm12777_vm9  ;;  %v1424_v22 = vsel %vm8129_vm4, 1, %v12605_v13  ;;  %v1425_v5 = vsel %vm8135_vm13, 1, %v12605_v13 }
 0x220   :  { %12867 = vst [vmem:[#allocation40_spill] sm:$0xff] %v8121_v46  ;;  %v1787_v9 = vshll.u32 %v1786_v36, 16  ;;  %2203 = vadd.xlane.f32.xlu0 %v2200_v42  ;;  %v1797_v36 = vcvt.f32.s32 %v1794_v35  ;;  %vm1167_vm6 = vmor %vm751_vm12, %vm1039_vm7  ;;  %v2224_v48 = vcvt.s32.f32 %v2222_v19  ;;  %v2245_v46 = vand.u32 65535, %v1424_v22 }
 0x221   :  { %2213 = vadd.xlane.f32.xlu1 %v2211_v28  ;;  %v1796_v56 = vpop.xlane.xlu0 %1795  ;;  %vm1168_vm14 = vmor %vm752_vm15, %vm1040_vm2  ;;  %vm12880_vm7 = vcmp.lt.s32.totalorder %v6973_v8, 8 }
 0x222   :  { %v1806_v44 = vpop.xlane.xlu1 %1805  ;;  %v1798_v58 = vcvt.f32.s32 %v1796_v56  ;;  %v8143_v28 = vadd.s32 %v1787_v9, %v1785_v51  ;;  %v2235_v51 = vcvt.s32.f32 %v2233_v54  ;;  %v2234_v9 = vshrl.u32 %v1423_v45, 16  ;;  %vm8169_vm9 = vmand %vm1167_vm6, %vm12880_vm7 }
 0x223   :  { %v1809_v50 = vcvt.f32.s32 %v1806_v44  ;;  %vm12883_vm13 = vmmov %vm12880_vm7  ;;  %vm12886_vm6 = vnez %v12603_v15 }
 0x224   :  { %v1799_v42 = vshll.u32 %v1798_v58, 16  ;;  %2215 = vadd.xlane.f32.xlu0 %v2212_v57  ;;  %v12878_v57 = vld [vmem:[#allocation43_spill] sm:$0xff]  ;;  %v12879_v58 = vld [vmem:[#allocation46_spill] sm:$0xff]  ;;  %vm8175_vm15 = vmand %vm1168_vm14, %vm12883_vm13  ;;  %vm12888_vm13 = vnez %v12608_v34 }
 0x225   :  { %2225 = vadd.xlane.f32.xlu1 %v2223_v47  ;;  %v1808_v53 = vpop.xlane.xlu0 %1807  ;;  %vm881_vm4 = vcmp.eq.f32.partialorder %v8070_v43, %v12878_v57  ;;  %vm882_vm12 = vcmp.eq.f32.partialorder %v8070_v43, %v12879_v58  ;;  %vm754_vm14 = vcmp.lt.f32.partialorder %v8070_v43, %v12879_v58  ;;  %v1427_v58 = vsel %vm8175_vm15, 1, %v12605_v13 }
 0x226   :  { %v1818_v38 = vpop.xlane.xlu1 %1817  ;;  %v1810_v56 = vcvt.f32.s32 %v1808_v53  ;;  %v8161_v35 = vadd.s32 %v1799_v42, %v1797_v36  ;;  %v2236_v36 = vcvt.s32.f32 %v2234_v9  ;;  %v2257_v42 = vand.u32 65535, %v1425_v5  ;;  %vm1041_vm7 = vmand %vm881_vm4, %vm12886_vm6 }
 0x227   :  { %v2247_v53 = vcvt.s32.f32 %v2245_v46  ;;  %vm1042_vm2 = vmand %vm882_vm12, %vm12888_vm13  ;;  %v1426_v9 = vsel %vm8169_vm9, 1, %v12605_v13  ;;  %vm12889_vm4 = vcmp.lt.f32.partialorder %v8070_v43, %v12878_v57 }
 0x228   :  { %12877 = vst [vmem:[#allocation39_spill] sm:$0xff] %v8161_v35  ;;  %v1811_v49 = vshll.u32 %v1810_v56, 16  ;;  %2227 = vadd.xlane.f32.xlu0 %v2224_v48  ;;  %v2246_v56 = vshrl.u32 %v1424_v22, 16  ;;  %v1821_v48 = vcvt.f32.s32 %v1818_v38  ;;  %vm1169_vm6 = vmor %vm12889_vm4, %vm1041_vm7  ;;  %vm12893_vm4 = vcmp.lt.s32.totalorder %v6973_v8, 8 }
 0x229   :  { %2237 = vadd.xlane.f32.xlu1 %v2235_v51  ;;  %v1820_v47 = vpop.xlane.xlu0 %1819  ;;  %vm1170_vm12 = vmor %vm754_vm14, %vm1042_vm2 }
 0x22a   :  { %v1830_v19 = vpop.xlane.xlu1 %1829  ;;  %v1822_v44 = vcvt.f32.s32 %v1820_v47  ;;  %v8183_v51 = vadd.s32 %v1811_v49, %v1809_v50  ;;  %v2259_v50 = vcvt.s32.f32 %v2257_v42  ;;  %v2258_v49 = vshrl.u32 %v1425_v5, 16  ;;  %vm8209_vm13 = vmand %vm1169_vm6, %vm12893_vm4 }
 0x22b   :  { %v2248_v45 = vcvt.s32.f32 %v2246_v56  ;;  %v1833_v57 = vcvt.f32.s32 %v1830_v19  ;;  %vm12896_vm15 = vmmov %vm12893_vm4  ;;  %vm12899_vm6 = vnez %v12613_v4 }
 0x22c   :  { %12887 = vst [vmem:[#allocation42_spill] sm:$0xff] %v8183_v51  ;;  %v1823_v35 = vshll.u32 %v1822_v44, 16  ;;  %2239 = vadd.xlane.f32.xlu0 %v2236_v36  ;;  %v2269_v51 = vand.u32 65535, %v1426_v9  ;;  %v12891_v36 = vld [vmem:[#allocation45_spill] sm:$0xff]  ;;  %v12892_v44 = vld [vmem:[#allocation48_spill] sm:$0xff]  ;;  %vm8215_vm2 = vmand %vm1170_vm12, %vm12896_vm15  ;;  %v2260_v56 = vcvt.s32.f32 %v2258_v49  ;;  %v1428_v49 = vsel %vm8209_vm13, 1, %v12605_v13 }
 0x22d   :  { %2249 = vadd.xlane.f32.xlu1 %v2247_v53  ;;  %v1832_v46 = vpop.xlane.xlu0 %1831  ;;  %vm883_vm9 = vcmp.eq.f32.partialorder %v8070_v43, %v12891_v36  ;;  %vm884_vm7 = vcmp.eq.f32.partialorder %v8070_v43, %v12892_v44  ;;  %vm755_vm14 = vcmp.lt.f32.partialorder %v8070_v43, %v12891_v36  ;;  %vm756_vm12 = vcmp.lt.f32.partialorder %v8070_v43, %v12892_v44 }
 0x22e   :  { %v1842_v22 = vpop.xlane.xlu1 %1841  ;;  %v1834_v47 = vcvt.f32.s32 %v1832_v46  ;;  %v8201_v38 = vadd.s32 %v1823_v35, %v1821_v48  ;;  %v2281_v48 = vand.u32 65535, %v1427_v58  ;;  %vm1043_vm4 = vmand %vm883_vm9, %vm12899_vm6  ;;  %v2271_v46 = vcvt.s32.f32 %v2269_v51 }
 0x22f   :  { %vm1044_vm15 = vmand %vm884_vm7, %vm12801_vm0  ;;  %v1429_v44 = vsel %vm8215_vm2, 1, %v12605_v13 }
 0x230   :  { %12890 = vst [vmem:[#allocation41_spill] sm:$0xff] %v8201_v38  ;;  %v1835_v54 = vshll.u32 %v1834_v47, 16  ;;  %2251 = vadd.xlane.f32.xlu0 %v2248_v45  ;;  %v2270_v47 = vshrl.u32 %v1426_v9, 16  ;;  %v1845_v45 = vcvt.f32.s32 %v1842_v22  ;;  %vm1171_vm9 = vmor %vm755_vm14, %vm1043_vm4  ;;  %vm12904_vm4 = vcmp.lt.s32.totalorder %v6973_v8, 8 }
 0x231   :  { %2261 = vadd.xlane.f32.xlu1 %v2259_v50  ;;  %v1844_v42 = vpop.xlane.xlu0 %1843  ;;  %vm1172_vm7 = vmor %vm756_vm12, %vm1044_vm15 }
 0x232   :  { %v1854_v53 = vpop.xlane.xlu1 %1853  ;;  %v1846_v19 = vcvt.f32.s32 %v1844_v42  ;;  %v8223_v50 = vadd.s32 %v1835_v54, %v1833_v57  ;;  %v2283_v57 = vcvt.s32.f32 %v2281_v48  ;;  %v2282_v54 = vshrl.u32 %v1427_v58, 16  ;;  %vm8249_vm0 = vmand %vm1171_vm9, %vm12904_vm4 }
 0x233   :  { %v2272_v5 = vcvt.s32.f32 %v2270_v47  ;;  %v1857_v36 = vcvt.f32.s32 %v1854_v53  ;;  %vm12907_vm2 = vmmov %vm12904_vm4 }
 0x234   :  { %12900 = vst [vmem:[#allocation44_spill] sm:$0xff] %v8223_v50  ;;  %v1847_v38 = vshll.u32 %v1846_v19, 16  ;;  %2263 = vadd.xlane.f32.xlu0 %v2260_v56  ;;  %v2293_v50 = vand.u32 65535, %v1428_v49  ;;  %v12902_v56 = vld [vmem:[#allocation47_spill] sm:$0xff]  ;;  %vm8255_vm12 = vmand %vm1172_vm7, %vm12907_vm2  ;;  %v2284_v47 = vcvt.s32.f32 %v2282_v54  ;;  %v1430_v54 = vsel %vm8249_vm0, 1, %v12605_v13 }
 0x235   :  { %2273 = vadd.xlane.f32.xlu1 %v2271_v46  ;;  %v1856_v51 = vpop.xlane.xlu0 %1855  ;;  %vm885_vm13 = vcmp.eq.f32.partialorder %v8070_v43, %v12902_v56  ;;  %v12903_v19 = vld [vmem:[#allocation51_spill] sm:$0xff]  ;;  %vm757_vm15 = vcmp.lt.f32.partialorder %v8070_v43, %v12902_v56 }
 0x236   :  { %v1866_v9 = vpop.xlane.xlu1 %1865  ;;  %v1858_v42 = vcvt.f32.s32 %v1856_v51  ;;  %v8241_v22 = vadd.s32 %v1847_v38, %v1845_v45  ;;  %vm886_vm14 = vcmp.eq.f32.partialorder %v8070_v43, %v12903_v19  ;;  %v2305_v45 = vand.u32 65535, %v1429_v44  ;;  %vm1045_vm9 = vmand %vm885_vm13, %vm12716_vm10 }
 0x237   :  { %v2295_v51 = vcvt.s32.f32 %v2293_v50  ;;  %vm758_vm7 = vcmp.lt.f32.partialorder %v8070_v43, %v12903_v19  ;;  %vm1046_vm4 = vmand %vm886_vm14, %vm12717_vm5  ;;  %v1431_v19 = vsel %vm8255_vm12, 1, %v12605_v13 }
 0x238   :  { %12901 = vst [vmem:[#allocation43_spill] sm:$0xff] %v8241_v22  ;;  %v1859_v35 = vshll.u32 %v1858_v42, 16  ;;  %2275 = vadd.xlane.f32.xlu0 %v2272_v5  ;;  %v2294_v42 = vshrl.u32 %v1428_v49, 16  ;;  %v1869_v5 = vcvt.f32.s32 %v1866_v9  ;;  %vm1173_vm13 = vmor %vm757_vm15, %vm1045_vm9  ;;  %vm12914_vm15 = vcmp.lt.s32.totalorder %v6973_v8, 8 }
 0x239   :  { %2285 = vadd.xlane.f32.xlu1 %v2283_v57  ;;  %v1868_v48 = vpop.xlane.xlu0 %1867  ;;  %vm1174_vm14 = vmor %vm758_vm7, %vm1046_vm4 }
 0x23a   :  { %v1878_v46 = vpop.xlane.xlu1 %1877  ;;  %v1870_v53 = vcvt.f32.s32 %v1868_v48  ;;  %v8263_v57 = vadd.s32 %v1859_v35, %v1857_v36  ;;  %v2307_v36 = vcvt.s32.f32 %v2305_v45  ;;  %v2306_v35 = vshrl.u32 %v1429_v44, 16  ;;  %vm8289_vm9 = vmand %vm1173_vm13, %vm12914_vm15 }
 0x23b   :  { %v2296_v58 = vcvt.s32.f32 %v2294_v42  ;;  %v1881_v56 = vcvt.f32.s32 %v1878_v46  ;;  %vm12917_vm12 = vmmov %vm12914_vm15 }
 0x23c   :  { %12910 = vst [vmem:[#allocation46_spill] sm:$0xff] %v8263_v57  ;;  %v1871_v22 = vshll.u32 %v1870_v53, 16  ;;  %2287 = vadd.xlane.f32.xlu0 %v2284_v47  ;;  %v2317_v57 = vand.u32 65535, %v1430_v54  ;;  %v12912_v47 = vld [vmem:[#allocation50_spill] sm:$0xff]  ;;  %v12913_v53 = vld [vmem:[#allocation52_spill] sm:$0xff]  ;;  %vm8295_vm7 = vmand %vm1174_vm14, %vm12917_vm12  ;;  %v2308_v42 = vcvt.s32.f32 %v2306_v35  ;;  %v1432_v35 = vsel %vm8289_vm9, 1, %v12605_v13 }
 0x23d   :  { %2297 = vadd.xlane.f32.xlu1 %v2295_v51  ;;  %v1880_v50 = vpop.xlane.xlu0 %1879  ;;  %vm887_vm0 = vcmp.eq.f32.partialorder %v8070_v43, %v12912_v47  ;;  %vm888_vm2 = vcmp.eq.f32.partialorder %v8070_v43, %v12913_v53  ;;  %vm759_vm4 = vcmp.lt.f32.partialorder %v8070_v43, %v12912_v47  ;;  %vm760_vm14 = vcmp.lt.f32.partialorder %v8070_v43, %v12913_v53 }
 0x23e   :  { %v1890_v49 = vpop.xlane.xlu1 %1889  ;;  %v1882_v48 = vcvt.f32.s32 %v1880_v50  ;;  %v8281_v9 = vadd.s32 %v1871_v22, %v1869_v5  ;;  %v2329_v5 = vand.u32 65535, %v1431_v19  ;;  %vm1047_vm13 = vmand %vm887_vm0, %vm12823_vm8  ;;  %v2319_v50 = vcvt.s32.f32 %v2317_v57 }
 0x23f   :  { %vm1048_vm15 = vmand %vm888_vm2, %vm12727_vm1  ;;  %v1433_v53 = vsel %vm8295_vm7, 1, %v12605_v13 }
 0x240   :  { %12911 = vst [vmem:[#allocation45_spill] sm:$0xff] %v8281_v9  ;;  %v1883_v38 = vshll.u32 %v1882_v48, 16  ;;  %2299 = vadd.xlane.f32.xlu0 %v2296_v58  ;;  %v2318_v48 = vshrl.u32 %v1430_v54, 16  ;;  %v1893_v58 = vcvt.f32.s32 %v1890_v49  ;;  %vm1175_vm0 = vmor %vm759_vm4, %vm1047_vm13  ;;  %vm12924_vm4 = vcmp.lt.s32.totalorder %v6973_v8, 8 }
 0x241   :  { %2309 = vadd.xlane.f32.xlu1 %v2307_v36  ;;  %v1892_v45 = vpop.xlane.xlu0 %1891  ;;  %vm1176_vm2 = vmor %vm760_vm14, %vm1048_vm15 }
 0x242   :  { %v1902_v51 = vpop.xlane.xlu1 %1901  ;;  %v1894_v46 = vcvt.f32.s32 %v1892_v45  ;;  %v8303_v36 = vadd.s32 %v1883_v38, %v1881_v56  ;;  %v2331_v56 = vcvt.s32.f32 %v2329_v5  ;;  %v2330_v38 = vshrl.u32 %v1431_v19, 16  ;;  %vm8329_vm13 = vmand %vm1175_vm0, %vm12924_vm4 }
 0x243   :  { %v2320_v44 = vcvt.s32.f32 %v2318_v48  ;;  %v1905_v47 = vcvt.f32.s32 %v1902_v51  ;;  %vm12927_vm7 = vmmov %vm12924_vm4  ;;  %vm12930_vm0 = vnez %v12638_v0 }
 0x244   :  { %12920 = vst [vmem:[#allocation48_spill] sm:$0xff] %v8303_v36  ;;  %v1895_v9 = vshll.u32 %v1894_v46, 16  ;;  %2311 = vadd.xlane.f32.xlu0 %v2308_v42  ;;  %v2341_v36 = vand.u32 65535, %v1432_v35  ;;  %v12922_v42 = vld [vmem:[#allocation53_spill] sm:$0xff]  ;;  %v12923_v46 = vld [vmem:[#allocation54_spill] sm:$0xff]  ;;  %vm8335_vm14 = vmand %vm1176_vm2, %vm12927_vm7  ;;  %v2332_v48 = vcvt.s32.f32 %v2330_v38  ;;  %vm12932_vm7 = vnez %v12642_v17 }
 0x245   :  { %2321 = vadd.xlane.f32.xlu1 %v2319_v50  ;;  %v1904_v57 = vpop.xlane.xlu0 %1903  ;;  %vm889_vm9 = vcmp.eq.f32.partialorder %v8070_v43, %v12922_v42  ;;  %vm890_vm12 = vcmp.eq.f32.partialorder %v8070_v43, %v12923_v46  ;;  %vm762_vm2 = vcmp.lt.f32.partialorder %v8070_v43, %v12923_v46  ;;  %v1434_v38 = vsel %vm8329_vm13, 1, %v12605_v13 }
 0x246   :  { %v1914_v54 = vpop.xlane.xlu1 %1913  ;;  %v1906_v45 = vcvt.f32.s32 %v1904_v57  ;;  %v8321_v49 = vadd.s32 %v1895_v9, %v1893_v58  ;;  %v2353_v58 = vand.u32 65535, %v1433_v53  ;;  %vm1049_vm4 = vmand %vm889_vm9, %vm12930_vm0  ;;  %v2343_v57 = vcvt.s32.f32 %v2341_v36 }
 0x247   :  { %vm1050_vm15 = vmand %vm890_vm12, %vm12932_vm7  ;;  %v1917_v36 = vcvt.f32.s32 %v1914_v54  ;;  %vm12933_vm9 = vcmp.lt.f32.partialorder %v8070_v43, %v12922_v42  ;;  %v2354_v46 = vshrl.u32 %v1433_v53, 16  ;;  %v1435_v19 = vsel %vm8335_vm14, 1, %v12605_v13 }
 0x248   :  { %12921 = vst [vmem:[#allocation47_spill] sm:$0xff] %v8321_v49  ;;  %v1907_v22 = vshll.u32 %v1906_v45, 16  ;;  %2323 = vadd.xlane.f32.xlu0 %v2320_v44  ;;  %v2342_v45 = vshrl.u32 %v1432_v35, 16  ;;  %v593_v44 = vcombine.high %v8016_v6, %v8016_v6  ;;  %vm1177_vm0 = vmor %vm12933_vm9, %vm1049_vm4  ;;  %v2365_v6 = vand.u32 65535, %v1434_v38 }
 0x249   :  { %2333 = vadd.xlane.f32.xlu1 %v2331_v56  ;;  %v1916_v5 = vpop.xlane.xlu0 %1915  ;;  %vm1178_vm12 = vmor %vm762_vm2, %vm1050_vm15  ;;  %vm12937_vm9 = vcmp.lt.s32.totalorder %v6973_v8, 8 }
 0x24a   :  { %v1926_v50 = vpop.xlane.xlu1 %1925  ;;  %v1918_v51 = vcvt.f32.s32 %v1916_v5  ;;  %v8343_v56 = vadd.s32 %v1907_v22, %v1905_v47  ;;  %v2355_v5 = vcvt.s32.f32 %v2353_v58  ;;  %v8368_v42 = vrot.slane %v593_v44, %v6946_v7  ;;  %vm8374_vm7 = vmand %vm1177_vm0, %vm12937_vm9 }
 0x24b   :  { %v1929_v9 = vcvt.f32.s32 %v1926_v50  ;;  %vm12940_vm14 = vmmov %vm12937_vm9  ;;  %v2356_v44 = vcvt.s32.f32 %v2354_v46  ;;  %vm12943_vm0 = vnez %v12647_v21 }
 0x24c   :  { %12931 = vst [vmem:[#allocation51_spill] sm:$0xff] %v8343_v56  ;;  %v1919_v35 = vshll.u32 %v1918_v51, 16  ;;  %2335 = vadd.xlane.f32.xlu0 %v2332_v48  ;;  %v2344_v56 = vcvt.s32.f32 %v2342_v45  ;;  %v12935_v48 = vld [vmem:[#allocation55_spill] sm:$0xff]  ;;  %v12936_v51 = vld [vmem:[#allocation56_spill] sm:$0xff]  ;;  %vm8380_vm15 = vmand %vm1178_vm12, %vm12940_vm14  ;;  %vm12945_vm14 = vnez %v12650_v59 }
 0x24d   :  { %2345 = vadd.xlane.f32.xlu1 %v2343_v57  ;;  %v1928_v47 = vpop.xlane.xlu0 %1927  ;;  %vm891_vm13 = vcmp.eq.f32.partialorder %v8070_v43, %v12935_v48  ;;  %vm892_vm4 = vcmp.eq.f32.partialorder %v8070_v43, %v12936_v51  ;;  %vm764_vm12 = vcmp.lt.f32.partialorder %v8070_v43, %v12936_v51  ;;  %v1437_v53 = vsel %vm8380_vm15, 1, %v12605_v13 }
 0x24e   :  { %v1938_v22 = vpop.xlane.xlu1 %1937  ;;  %v1930_v49 = vcvt.f32.s32 %v1928_v47  ;;  %v8363_v54 = vadd.s32 %v1919_v35, %v1917_v36  ;;  %v2377_v36 = vand.u32 65535, %v1435_v19  ;;  %vm1051_vm9 = vmand %vm891_vm13, %vm12943_vm0  ;;  %v1436_v47 = vsel %vm8374_vm7, 1, %v12605_v13 }
 0x24f   :  { %vm1052_vm2 = vmand %vm892_vm4, %vm12945_vm14  ;;  %vm12946_vm13 = vcmp.lt.f32.partialorder %v8070_v43, %v12935_v48 }
 0x250   :  { %12934 = vst [vmem:[#allocation50_spill] sm:$0xff] %v8363_v54  ;;  %v1931_v58 = vshll.u32 %v1930_v49, 16  ;;  %2347 = vadd.xlane.f32.xlu0 %v2344_v56  ;;  %v2367_v49 = vcvt.s32.f32 %v2365_v6  ;;  %v2366_v56 = vshrl.u32 %v1434_v38, 16  ;;  %v1941_v38 = vcvt.f32.s32 %v1938_v22  ;;  %vm1179_vm0 = vmor %vm12946_vm13, %vm1051_vm9 }
 0x251   :  { %2357 = vadd.xlane.f32.xlu1 %v2355_v5  ;;  %v1940_v7 = vpop.xlane.xlu0 %1939  ;;  %v8402_v5 = vrot.slane %v8368_v42, %v6770_v2  ;;  %v2379_v51 = vcvt.s32.f32 %v2377_v36  ;;  %vm1180_vm7 = vmor %vm764_vm12, %vm1052_vm2  ;;  %vm12950_vm13 = vcmp.lt.s32.totalorder %v6973_v8, 8 }
 0x252   :  { %v1950_v45 = vpop.xlane.xlu1 %1949  ;;  %v1942_v50 = vcvt.f32.s32 %v1940_v7  ;;  %v8388_v35 = vadd.s32 %v1931_v58, %v1929_v9  ;;  %v2378_v58 = vshrl.u32 %v1435_v19, 16  ;;  %v2368_v54 = vcvt.s32.f32 %v2366_v56  ;;  %vm8418_vm14 = vmand %vm1179_vm0, %vm12950_vm13 }
 0x253   :  { %v1953_v48 = vcvt.f32.s32 %v1950_v45  ;;  %vm12953_vm15 = vmmov %vm12950_vm13  ;;  %vm12957_vm13 = vnez %v12593_v37 }
 0x254   :  { %12944 = vst [vmem:[#allocation52_spill] sm:$0xff] %v8388_v35  ;;  %v1943_v46 = vshll.u32 %v1942_v50, 16  ;;  %2359 = vadd.xlane.f32.xlu0 %v2356_v44  ;;  %v2389_v35 = vand.u32 65535, %v1436_v47  ;;  %v12948_v44 = vld [vmem:[#allocation57_spill] sm:$0xff]  ;;  %v12949_v50 = vld [vmem:[#allocation58_spill] sm:$0xff]  ;;  %vm8424_vm2 = vmand %vm1180_vm7, %vm12953_vm15 }
 0x255   :  { %2369 = vadd.xlane.f32.xlu1 %v2367_v49  ;;  %v1952_v6 = vpop.xlane.xlu0 %1951  ;;  %vm893_vm4 = vcmp.eq.f32.partialorder %v8070_v43, %v12948_v44  ;;  %vm894_vm9 = vcmp.eq.f32.partialorder %v8402_v5, %v12949_v50  ;;  %vm765_vm12 = vcmp.lt.f32.partialorder %v8070_v43, %v12948_v44  ;;  %vm766_vm7 = vcmp.lt.f32.partialorder %v8402_v5, %v12949_v50 }
 0x256   :  { %v1962_v9 = vpop.xlane.xlu1 %1961  ;;  %v1954_v7 = vcvt.f32.s32 %v1952_v6  ;;  %v8410_v22 = vadd.s32 %v1943_v46, %v1941_v38  ;;  %v2380_v38 = vcvt.s32.f32 %v2378_v58  ;;  %v2401_v46 = vand.u32 65535, %v1437_v53  ;;  %vm1053_vm0 = vmand %vm893_vm4, %vm7281_vm3 }
 0x257   :  { %v2391_v6 = vcvt.s32.f32 %v2389_v35  ;;  %vm1054_vm15 = vmand %vm894_vm9, %vm12957_vm13  ;;  %v1438_v58 = vsel %vm8418_vm14, 1, %v12605_v13  ;;  %v1439_v50 = vsel %vm8424_vm2, 1, %v12605_v13 }
 0x258   :  { %12947 = vst [vmem:[#allocation53_spill] sm:$0xff] %v8410_v22  ;;  %v1955_v57 = vshll.u32 %v1954_v7, 16  ;;  %2371 = vadd.xlane.f32.xlu0 %v2368_v54  ;;  %v2390_v54 = vshrl.u32 %v1436_v47, 16  ;;  %v1965_v7 = vcvt.f32.s32 %v1962_v9  ;;  %vm1181_vm4 = vmor %vm765_vm12, %vm1053_vm0  ;;  %vm12961_vm0 = vcmp.lt.s32.totalorder %v6973_v8, 8 }
 0x259   :  { %2381 = vadd.xlane.f32.xlu1 %v2379_v51  ;;  %v1964_v49 = vpop.xlane.xlu0 %1963  ;;  %vm1182_vm9 = vmor %vm766_vm7, %vm1054_vm15 }
 0x25a   :  { %v1974_v56 = vpop.xlane.xlu1 %1973  ;;  %v1966_v45 = vcvt.f32.s32 %v1964_v49  ;;  %v8432_v51 = vadd.s32 %v1955_v57, %v1953_v48  ;;  %v2403_v48 = vcvt.s32.f32 %v2401_v46  ;;  %v2402_v57 = vshrl.u32 %v1437_v53, 16  ;;  %vm8458_vm13 = vmand %vm1181_vm4, %vm12961_vm0 }
 0x25b   :  { %v2392_v19 = vcvt.s32.f32 %v2390_v54  ;;  %v1977_v53 = vcvt.f32.s32 %v1974_v56  ;;  %vm12964_vm2 = vmmov %vm12961_vm0  ;;  %v2425_v54 = vand.u32 65535, %v1439_v50  ;;  %vm12967_vm0 = vnez %v12601_v52 }
 0x25c   :  { %12956 = vst [vmem:[#allocation54_spill] sm:$0xff] %v8432_v51  ;;  %v1967_v22 = vshll.u32 %v1966_v45, 16  ;;  %2383 = vadd.xlane.f32.xlu0 %v2380_v38  ;;  %v2413_v51 = vand.u32 65535, %v1438_v58  ;;  %v12959_v38 = vld [vmem:[#allocation59_spill] sm:$0xff]  ;;  %v12960_v45 = vld [vmem:[#allocation60_spill] sm:$0xff]  ;;  %vm8464_vm7 = vmand %vm1182_vm9, %vm12964_vm2 }
 0x25d   :  { %2393 = vadd.xlane.f32.xlu1 %v2391_v6  ;;  %v1976_v35 = vpop.xlane.xlu0 %1975  ;;  %vm895_vm14 = vcmp.eq.f32.partialorder %v8402_v5, %v12959_v38  ;;  %vm896_vm12 = vcmp.eq.f32.partialorder %v8402_v5, %v12960_v45  ;;  %vm767_vm15 = vcmp.lt.f32.partialorder %v8402_v5, %v12959_v38  ;;  %v2404_v6 = vcvt.s32.f32 %v2402_v57 }
 0x25e   :  { %v1986_v47 = vpop.xlane.xlu1 %1985  ;;  %v1978_v49 = vcvt.f32.s32 %v1976_v35  ;;  %v8450_v9 = vadd.s32 %v1967_v22, %v1965_v7  ;;  %vm1055_vm4 = vmand %vm895_vm14, %vm12876_vm11  ;;  %v2415_v7 = vcvt.s32.f32 %v2413_v51  ;;  %v2414_v35 = vshrl.u32 %v1438_v58, 16 }
 0x25f   :  { %vm768_vm9 = vcmp.lt.f32.partialorder %v8402_v5, %v12960_v45  ;;  %vm1056_vm2 = vmand %vm896_vm12, %vm12967_vm0  ;;  %v1440_v57 = vsel %vm8458_vm13, 1, %v12605_v13  ;;  %v1441_v45 = vsel %vm8464_vm7, 1, %v12605_v13  ;;  %vm897_vm13 = vcmp.eq.f32.partialorder %v8402_v5, %v7097_v11 }
 0x260   :  { %12958 = vst [vmem:[#allocation55_spill] sm:$0xff] %v8450_v9  ;;  %v1979_v44 = vshll.u32 %v1978_v49, 16  ;;  %2395 = vadd.xlane.f32.xlu0 %v2392_v19  ;;  %v1989_v49 = vcvt.f32.s32 %v1986_v47  ;;  %vm1183_vm14 = vmor %vm767_vm15, %vm1055_vm4  ;;  %v2416_v43 = vcvt.s32.f32 %v2414_v35  ;;  %v2437_v9 = vand.u32 65535, %v1440_v57 }
 0x261   :  { %2405 = vadd.xlane.f32.xlu1 %v2403_v48  ;;  %v1988_v36 = vpop.xlane.xlu0 %1987  ;;  %vm1184_vm12 = vmor %vm768_vm9, %vm1056_vm2  ;;  %vm12970_vm4 = vcmp.lt.s32.totalorder %v6973_v8, 8 }
 0x262   :  { %v1998_v46 = vpop.xlane.xlu1 %1997  ;;  %v1990_v56 = vcvt.f32.s32 %v1988_v36  ;;  %v8472_v48 = vadd.s32 %v1979_v44, %v1977_v53  ;;  %v2427_v53 = vcvt.s32.f32 %v2425_v54  ;;  %v2426_v44 = vshrl.u32 %v1439_v50, 16  ;;  %vm8498_vm0 = vmand %vm1183_vm14, %vm12970_vm4 }
 0x263   :  { %v2001_v38 = vcvt.f32.s32 %v1998_v46  ;;  %vm12973_vm7 = vmmov %vm12970_vm4  ;;  %vm12976_vm14 = vnez %v12603_v15 }
 0x264   :  { %v1991_v19 = vshll.u32 %v1990_v56, 16  ;;  %2407 = vadd.xlane.f32.xlu0 %v2404_v6  ;;  %v12969_v6 = vld [vmem:[#allocation61_spill] sm:$0xff]  ;;  %vm8504_vm9 = vmand %vm1184_vm12, %vm12973_vm7  ;;  %v2428_v35 = vcvt.s32.f32 %v2426_v44  ;;  %vm12977_vm7 = vnez %v12608_v34  ;;  %v1442_v44 = vsel %vm8498_vm0, 1, %v12605_v13 }
 0x265   :  { %2417 = vadd.xlane.f32.xlu1 %v2415_v7  ;;  %v2000_v51 = vpop.xlane.xlu0 %1999  ;;  %vm898_vm15 = vcmp.eq.f32.partialorder %v8402_v5, %v12969_v6  ;;  %vm1057_vm4 = vmand %vm897_vm13, %vm12976_vm14  ;;  %vm770_vm12 = vcmp.lt.f32.partialorder %v8402_v5, %v12969_v6  ;;  %vm12978_vm13 = vcmp.lt.f32.partialorder %v8402_v5, %v7097_v11  ;;  %v1443_v6 = vsel %vm8504_vm9, 1, %v12605_v13 }
 0x266   :  { %v2010_v58 = vpop.xlane.xlu1 %2009  ;;  %v2002_v36 = vcvt.f32.s32 %v2000_v51  ;;  %v8490_v47 = vadd.s32 %v1991_v19, %v1989_v49  ;;  %v2449_v49 = vand.u32 65535, %v1441_v45  ;;  %v2439_v19 = vcvt.s32.f32 %v2437_v9  ;;  %vm1058_vm2 = vmand %vm898_vm15, %vm12977_vm7 }
 0x267   :  { %v2438_v51 = vshrl.u32 %v1440_v57, 16  ;;  %vm1185_vm14 = vmor %vm12978_vm13, %vm1057_vm4  ;;  %vm12982_vm13 = vcmp.lt.s32.totalorder %v6973_v8, 8 }
 0x268   :  { %12968 = vst [vmem:[#allocation56_spill] sm:$0xff] %v8490_v47  ;;  %v2003_v22 = vshll.u32 %v2002_v36, 16  ;;  %2419 = vadd.xlane.f32.xlu0 %v2416_v43  ;;  %v2013_v36 = vcvt.f32.s32 %v2010_v58  ;;  %vm1186_vm15 = vmor %vm770_vm12, %vm1058_vm2  ;;  %v2461_v47 = vand.u32 65535, %v1442_v44 }
 0x269   :  { %2429 = vadd.xlane.f32.xlu1 %v2427_v53  ;;  %v2012_v56 = vpop.xlane.xlu0 %2011  ;;  %v2440_v50 = vcvt.s32.f32 %v2438_v51  ;;  %vm8538_vm7 = vmand %vm1185_vm14, %vm12982_vm13 }
 0x26a   :  { %v2022_v7 = vpop.xlane.xlu1 %2021  ;;  %v2014_v46 = vcvt.f32.s32 %v2012_v56  ;;  %v8512_v53 = vadd.s32 %v2003_v22, %v2001_v38  ;;  %v2451_v38 = vcvt.s32.f32 %v2449_v49  ;;  %v2450_v22 = vshrl.u32 %v1441_v45, 16  ;;  %vm12985_vm9 = vmmov %vm12982_vm13 }
 0x26b   :  { %v2025_v45 = vcvt.f32.s32 %v2022_v7  ;;  %vm8544_vm2 = vmand %vm1186_vm15, %vm12985_vm9  ;;  %vm12989_vm13 = vnez %v12616_v18 }
 0x26c   :  { %v2015_v43 = vshll.u32 %v2014_v46, 16  ;;  %2431 = vadd.xlane.f32.xlu0 %v2428_v35  ;;  %v12980_v35 = vld [vmem:[#allocation62_spill] sm:$0xff]  ;;  %v12981_v46 = vld [vmem:[#allocation63_spill] sm:$0xff] }
 0x26d   :  { %2441 = vadd.xlane.f32.xlu1 %v2439_v19  ;;  %v2024_v9 = vpop.xlane.xlu0 %2023  ;;  %vm899_vm0 = vcmp.eq.f32.partialorder %v8402_v5, %v12980_v35  ;;  %vm900_vm4 = vcmp.eq.f32.partialorder %v8402_v5, %v12981_v46  ;;  %vm771_vm12 = vcmp.lt.f32.partialorder %v8402_v5, %v12980_v35  ;;  %vm772_vm15 = vcmp.lt.f32.partialorder %v8402_v5, %v12981_v46 }
 0x26e   :  { %v2034_v57 = vpop.xlane.xlu1 %2033  ;;  %v2026_v56 = vcvt.f32.s32 %v2024_v9  ;;  %v8530_v58 = vadd.s32 %v2015_v43, %v2013_v36  ;;  %v2452_v36 = vcvt.s32.f32 %v2450_v22  ;;  %v2473_v43 = vand.u32 65535, %v1443_v6  ;;  %vm1059_vm14 = vmand %vm899_vm0, %vm12899_vm6 }
 0x26f   :  { %v2463_v9 = vcvt.s32.f32 %v2461_v47  ;;  %vm1060_vm9 = vmand %vm900_vm4, %vm12989_vm13  ;;  %v1444_v22 = vsel %vm8538_vm7, 1, %v12605_v13  ;;  %v1445_v46 = vsel %vm8544_vm2, 1, %v12605_v13 }
 0x270   :  { %12979 = vst [vmem:[#allocation57_spill] sm:$0xff] %v8530_v58  ;;  %v2027_v54 = vshll.u32 %v2026_v56, 16  ;;  %2443 = vadd.xlane.f32.xlu0 %v2440_v50  ;;  %v2462_v56 = vshrl.u32 %v1442_v44, 16  ;;  %v2037_v50 = vcvt.f32.s32 %v2034_v57  ;;  %vm1187_vm0 = vmor %vm771_vm12, %vm1059_vm14  ;;  %vm12993_vm14 = vcmp.lt.s32.totalorder %v6973_v8, 8 }
 0x271   :  { %2453 = vadd.xlane.f32.xlu1 %v2451_v38  ;;  %v2036_v19 = vpop.xlane.xlu0 %2035  ;;  %vm1188_vm4 = vmor %vm772_vm15, %vm1060_vm9 }
 0x272   :  { %v2046_v51 = vpop.xlane.xlu1 %2045  ;;  %v2038_v7 = vcvt.f32.s32 %v2036_v19  ;;  %v8552_v38 = vadd.s32 %v2027_v54, %v2025_v45  ;;  %v2475_v45 = vcvt.s32.f32 %v2473_v43  ;;  %v2474_v54 = vshrl.u32 %v1443_v6, 16  ;;  %vm8578_vm13 = vmand %vm1187_vm0, %vm12993_vm14 }
 0x273   :  { %v2464_v11 = vcvt.s32.f32 %v2462_v56  ;;  %v2049_v35 = vcvt.f32.s32 %v2046_v51  ;;  %vm12996_vm2 = vmmov %vm12993_vm14 }
 0x274   :  { %12988 = vst [vmem:[#allocation58_spill] sm:$0xff] %v8552_v38  ;;  %v2039_v58 = vshll.u32 %v2038_v7, 16  ;;  %2455 = vadd.xlane.f32.xlu0 %v2452_v36  ;;  %v2485_v38 = vand.u32 65535, %v1444_v22  ;;  %v12991_v36 = vld [vmem:[#allocation64_spill] sm:$0xff]  ;;  %v12992_v7 = vld [vmem:[#allocation65_spill] sm:$0xff]  ;;  %vm8584_vm15 = vmand %vm1188_vm4, %vm12996_vm2  ;;  %v2476_v56 = vcvt.s32.f32 %v2474_v54  ;;  %v1446_v54 = vsel %vm8578_vm13, 1, %v12605_v13 }
 0x275   :  { %2465 = vadd.xlane.f32.xlu1 %v2463_v9  ;;  %v2048_v47 = vpop.xlane.xlu0 %2047  ;;  %vm901_vm7 = vcmp.eq.f32.partialorder %v8402_v5, %v12991_v36  ;;  %vm902_vm12 = vcmp.eq.f32.partialorder %v8402_v5, %v12992_v7  ;;  %vm773_vm9 = vcmp.lt.f32.partialorder %v8402_v5, %v12991_v36  ;;  %vm774_vm4 = vcmp.lt.f32.partialorder %v8402_v5, %v12992_v7 }
 0x276   :  { %v2058_v44 = vpop.xlane.xlu1 %2057  ;;  %v2050_v19 = vcvt.f32.s32 %v2048_v47  ;;  %v8570_v57 = vadd.s32 %v2039_v58, %v2037_v50  ;;  %v2497_v50 = vand.u32 65535, %v1445_v46  ;;  %vm1061_vm0 = vmand %vm901_vm7, %vm12716_vm10  ;;  %v2487_v47 = vcvt.s32.f32 %v2485_v38 }
 0x277   :  { %vm1062_vm14 = vmand %vm902_vm12, %vm12717_vm5  ;;  %v1447_v7 = vsel %vm8584_vm15, 1, %v12605_v13 }
 0x278   :  { %12990 = vst [vmem:[#allocation59_spill] sm:$0xff] %v8570_v57  ;;  %v2051_v49 = vshll.u32 %v2050_v19, 16  ;;  %2467 = vadd.xlane.f32.xlu0 %v2464_v11  ;;  %v2486_v19 = vshrl.u32 %v1444_v22, 16  ;;  %v2061_v11 = vcvt.f32.s32 %v2058_v44  ;;  %vm1189_vm7 = vmor %vm773_vm9, %vm1061_vm0  ;;  %vm13003_vm9 = vcmp.lt.s32.totalorder %v6973_v8, 8 }
 0x279   :  { %2477 = vadd.xlane.f32.xlu1 %v2475_v45  ;;  %v2060_v43 = vpop.xlane.xlu0 %2059  ;;  %vm1190_vm12 = vmor %vm774_vm4, %vm1062_vm14 }
 0x27a   :  { %v2070_v9 = vpop.xlane.xlu1 %2069  ;;  %v2062_v51 = vcvt.f32.s32 %v2060_v43  ;;  %v8592_v45 = vadd.s32 %v2051_v49, %v2049_v35  ;;  %v2499_v35 = vcvt.s32.f32 %v2497_v50  ;;  %v2498_v49 = vshrl.u32 %v1445_v46, 16  ;;  %vm8618_vm0 = vmand %vm1189_vm7, %vm13003_vm9 }
 0x27b   :  { %v2488_v6 = vcvt.s32.f32 %v2486_v19  ;;  %v2073_v36 = vcvt.f32.s32 %v2070_v9  ;;  %vm13006_vm15 = vmmov %vm13003_vm9 }
 0x27c   :  { %12999 = vst [vmem:[#allocation60_spill] sm:$0xff] %v8592_v45  ;;  %v2063_v57 = vshll.u32 %v2062_v51, 16  ;;  %2479 = vadd.xlane.f32.xlu0 %v2476_v56  ;;  %v2509_v45 = vand.u32 65535, %v1446_v54  ;;  %v13001_v56 = vld [vmem:[#allocation66_spill] sm:$0xff]  ;;  %v13002_v51 = vld [vmem:[#allocation67_spill] sm:$0xff]  ;;  %vm8624_vm4 = vmand %vm1190_vm12, %vm13006_vm15  ;;  %v2500_v19 = vcvt.s32.f32 %v2498_v49  ;;  %v1448_v49 = vsel %vm8618_vm0, 1, %v12605_v13 }
 0x27d   :  { %2489 = vadd.xlane.f32.xlu1 %v2487_v47  ;;  %v2072_v38 = vpop.xlane.xlu0 %2071  ;;  %vm903_vm13 = vcmp.eq.f32.partialorder %v8402_v5, %v13001_v56  ;;  %vm904_vm2 = vcmp.eq.f32.partialorder %v8402_v5, %v13002_v51  ;;  %vm775_vm14 = vcmp.lt.f32.partialorder %v8402_v5, %v13001_v56  ;;  %vm776_vm12 = vcmp.lt.f32.partialorder %v8402_v5, %v13002_v51 }
 0x27e   :  { %v2082_v22 = vpop.xlane.xlu1 %2081  ;;  %v2074_v43 = vcvt.f32.s32 %v2072_v38  ;;  %v8610_v44 = vadd.s32 %v2063_v57, %v2061_v11  ;;  %v2521_v11 = vand.u32 65535, %v1447_v7  ;;  %vm1063_vm7 = vmand %vm903_vm13, %vm12823_vm8  ;;  %v2511_v38 = vcvt.s32.f32 %v2509_v45 }
 0x27f   :  { %vm1064_vm9 = vmand %vm904_vm2, %vm12727_vm1  ;;  %v1449_v51 = vsel %vm8624_vm4, 1, %v12605_v13 }
 0x280   :  { %13000 = vst [vmem:[#allocation61_spill] sm:$0xff] %v8610_v44  ;;  %v2075_v58 = vshll.u32 %v2074_v43, 16  ;;  %2491 = vadd.xlane.f32.xlu0 %v2488_v6  ;;  %v2510_v43 = vshrl.u32 %v1446_v54, 16  ;;  %v2085_v6 = vcvt.f32.s32 %v2082_v22  ;;  %vm1191_vm13 = vmor %vm775_vm14, %vm1063_vm7  ;;  %vm13013_vm14 = vcmp.lt.s32.totalorder %v6973_v8, 8 }
 0x281   :  { %2501 = vadd.xlane.f32.xlu1 %v2499_v35  ;;  %v2084_v50 = vpop.xlane.xlu0 %2083  ;;  %vm1192_vm2 = vmor %vm776_vm12, %vm1064_vm9 }
 0x282   :  { %v2094_v47 = vpop.xlane.xlu1 %2093  ;;  %v2086_v9 = vcvt.f32.s32 %v2084_v50  ;;  %v8632_v35 = vadd.s32 %v2075_v58, %v2073_v36  ;;  %v2523_v36 = vcvt.s32.f32 %v2521_v11  ;;  %v2522_v58 = vshrl.u32 %v1447_v7, 16  ;;  %vm8658_vm7 = vmand %vm1191_vm13, %vm13013_vm14 }
 0x283   :  { %v2512_v46 = vcvt.s32.f32 %v2510_v43  ;;  %v2097_v56 = vcvt.f32.s32 %v2094_v47  ;;  %vm13016_vm4 = vmmov %vm13013_vm14  ;;  %vm13019_vm13 = vnez %v12638_v0 }
 0x284   :  { %13009 = vst [vmem:[#allocation62_spill] sm:$0xff] %v8632_v35  ;;  %v2087_v44 = vshll.u32 %v2086_v9, 16  ;;  %2503 = vadd.xlane.f32.xlu0 %v2500_v19  ;;  %v2533_v35 = vand.u32 65535, %v1448_v49  ;;  %v13011_v19 = vld [vmem:[#allocation68_spill] sm:$0xff]  ;;  %v13012_v9 = vld [vmem:[#allocation69_spill] sm:$0xff]  ;;  %vm8664_vm12 = vmand %vm1192_vm2, %vm13016_vm4  ;;  %v2524_v43 = vcvt.s32.f32 %v2522_v58  ;;  %vm13021_vm4 = vnez %v12642_v17 }
 0x285   :  { %2513 = vadd.xlane.f32.xlu1 %v2511_v38  ;;  %v2096_v45 = vpop.xlane.xlu0 %2095  ;;  %vm905_vm0 = vcmp.eq.f32.partialorder %v8402_v5, %v13011_v19  ;;  %vm906_vm15 = vcmp.eq.f32.partialorder %v8402_v5, %v13012_v9  ;;  %vm778_vm2 = vcmp.lt.f32.partialorder %v8402_v5, %v13012_v9  ;;  %v1450_v58 = vsel %vm8658_vm7, 1, %v12605_v13 }
 0x286   :  { %v2106_v54 = vpop.xlane.xlu1 %2105  ;;  %v2098_v50 = vcvt.f32.s32 %v2096_v45  ;;  %v8650_v22 = vadd.s32 %v2087_v44, %v2085_v6  ;;  %v2545_v6 = vand.u32 65535, %v1449_v51  ;;  %vm1065_vm14 = vmand %vm905_vm0, %vm13019_vm13  ;;  %v2535_v45 = vcvt.s32.f32 %v2533_v35 }
 0x287   :  { %vm1066_vm9 = vmand %vm906_vm15, %vm13021_vm4  ;;  %vm13022_vm0 = vcmp.lt.f32.partialorder %v8402_v5, %v13011_v19  ;;  %v1451_v9 = vsel %vm8664_vm12, 1, %v12605_v13  ;;  %vm907_vm7 = vcmp.eq.f32.partialorder %v8402_v5, %v7251_v62  ;;  %v623_v19 = vcombine.high %v8034_v24, %v8034_v24 }
 0x288   :  { %13010 = vst [vmem:[#allocation63_spill] sm:$0xff] %v8650_v22  ;;  %v2099_v57 = vshll.u32 %v2098_v50, 16  ;;  %2515 = vadd.xlane.f32.xlu0 %v2512_v46  ;;  %v2534_v50 = vshrl.u32 %v1448_v49, 16  ;;  %v2109_v46 = vcvt.f32.s32 %v2106_v54  ;;  %vm1193_vm13 = vmor %vm13022_vm0, %vm1065_vm14  ;;  %vm908_vm14 = vcmp.eq.f32.partialorder %v8402_v5, %v7270_v23 }
 0x289   :  { %2525 = vadd.xlane.f32.xlu1 %v2523_v36  ;;  %v2108_v11 = vpop.xlane.xlu0 %2107  ;;  %vm1194_vm15 = vmor %vm778_vm2, %vm1066_vm9  ;;  %vm13024_vm0 = vcmp.lt.s32.totalorder %v6973_v8, 8 }
 0x28a   :  { %v2118_v38 = vpop.xlane.xlu1 %2117  ;;  %v2110_v47 = vcvt.f32.s32 %v2108_v11  ;;  %v8672_v36 = vadd.s32 %v2099_v57, %v2097_v56  ;;  %v2547_v56 = vcvt.s32.f32 %v2545_v6  ;;  %v2546_v57 = vshrl.u32 %v1449_v51, 16  ;;  %vm8700_vm4 = vmand %vm1193_vm13, %vm13024_vm0 }
 0x28b   :  { %v2536_v7 = vcvt.s32.f32 %v2534_v50  ;;  %v2121_v44 = vcvt.f32.s32 %v2118_v38  ;;  %vm13027_vm12 = vmmov %vm13024_vm0  ;;  %vm13030_vm13 = vnez %v12647_v21 }
 0x28c   :  { %13020 = vst [vmem:[#allocation64_spill] sm:$0xff] %v8672_v36  ;;  %v2111_v22 = vshll.u32 %v2110_v47, 16  ;;  %2527 = vadd.xlane.f32.xlu0 %v2524_v43  ;;  %v2557_v36 = vand.u32 65535, %v1450_v58  ;;  %vm8706_vm9 = vmand %vm1194_vm15, %vm13027_vm12  ;;  %v2548_v47 = vcvt.s32.f32 %v2546_v57  ;;  %vm780_vm15 = vcmp.lt.f32.partialorder %v8402_v5, %v7270_v23 }
 0x28d   :  { %2537 = vadd.xlane.f32.xlu1 %v2535_v45  ;;  %v2120_v35 = vpop.xlane.xlu0 %2119  ;;  %v2569_v45 = vand.u32 65535, %v1451_v9  ;;  %vm1067_vm0 = vmand %vm907_vm7, %vm13030_vm13  ;;  %vm13031_vm12 = vnez %v12650_v59  ;;  %v8727_v57 = vrot.slane %v623_v19, %v6770_v2  ;;  %vm13032_vm7 = vcmp.lt.f32.partialorder %v8402_v5, %v7251_v62 }
 0x28e   :  { %v2130_v49 = vpop.xlane.xlu1 %2129  ;;  %v2122_v11 = vcvt.f32.s32 %v2120_v35  ;;  %v8690_v54 = vadd.s32 %v2111_v22, %v2109_v46  ;;  %v2559_v50 = vcvt.s32.f32 %v2557_v36  ;;  %v2558_v46 = vshrl.u32 %v1450_v58, 16  ;;  %vm1068_vm2 = vmand %vm908_vm14, %vm13031_vm12 }
 0x28f   :  { %v2133_v36 = vcvt.f32.s32 %v2130_v49  ;;  %vm1195_vm13 = vmor %vm13032_vm7, %vm1067_vm0  ;;  %v2570_v23 = vshrl.u32 %v1451_v9, 16  ;;  %v1453_v51 = vsel %vm8706_vm9, 1, %v12605_v13  ;;  %vm910_vm0 = vcmp.eq.f32.partialorder %v8727_v57, %v7298_v1 }
 0x290   :  { %13023 = vst [vmem:[#allocation65_spill] sm:$0xff] %v8690_v54  ;;  %v2123_v43 = vshll.u32 %v2122_v11, 16  ;;  %2539 = vadd.xlane.f32.xlu0 %v2536_v7  ;;  %v2560_v19 = vcvt.s32.f32 %v2558_v46  ;;  %vm13035_vm7 = vcmp.lt.s32.totalorder %v6973_v8, 8 }
 0x291   :  { %2549 = vadd.xlane.f32.xlu1 %v2547_v56  ;;  %v2132_v24 = vpop.xlane.xlu0 %2131  ;;  %v1452_v56 = vsel %vm8700_vm4, 1, %v12605_v13  ;;  %vm1196_vm4 = vmor %vm780_vm15, %vm1068_vm2  ;;  %v2572_v46 = vcvt.s32.f32 %v2570_v23 }
 0x292   :  { %v2142_v6 = vpop.xlane.xlu1 %2141  ;;  %v2134_v38 = vcvt.f32.s32 %v2132_v24  ;;  %v8714_v35 = vadd.s32 %v2123_v43, %v2121_v44  ;;  %v2571_v44 = vcvt.s32.f32 %v2569_v45  ;;  %v2581_v24 = vand.u32 65535, %v1452_v56  ;;  %vm8743_vm12 = vmand %vm1195_vm13, %vm13035_vm7 }
 0x293   :  { %v2145_v9 = vcvt.f32.s32 %v2142_v6  ;;  %vm13038_vm9 = vmmov %vm13035_vm7  ;;  %vm13042_vm7 = vnez %v12593_v37  ;;  %v1454_v23 = vsel %vm8743_vm12, 1, %v12605_v13  ;;  %vm911_vm12 = vcmp.eq.f32.partialorder %v8727_v57, %v7303_v16 }
 0x294   :  { %v2135_v58 = vshll.u32 %v2134_v38, 16  ;;  %2551 = vadd.xlane.f32.xlu0 %v2548_v47  ;;  %v13034_v47 = vld [vmem:[#allocation70_spill] sm:$0xff]  ;;  %vm8749_vm2 = vmand %vm1196_vm4, %vm13038_vm9  ;;  %vm782_vm4 = vcmp.lt.f32.partialorder %v8727_v57, %v7298_v1 }
 0x295   :  { %2561 = vadd.xlane.f32.xlu1 %v2559_v50  ;;  %v2144_v11 = vpop.xlane.xlu0 %2143  ;;  %vm909_vm14 = vcmp.eq.f32.partialorder %v8402_v5, %v13034_v47  ;;  %vm781_vm15 = vcmp.lt.f32.partialorder %v8402_v5, %v13034_v47  ;;  %vm1070_vm9 = vmand %vm910_vm0, %vm13042_vm7  ;;  %v1455_v1 = vsel %vm8749_vm2, 1, %v12605_v13 }
 0x296   :  { %v2154_v7 = vpop.xlane.xlu1 %2153  ;;  %v2146_v43 = vcvt.f32.s32 %v2144_v11  ;;  %v8735_v49 = vadd.s32 %v2135_v58, %v2133_v36  ;;  %v2593_v36 = vand.u32 65535, %v1453_v51  ;;  %vm1069_vm13 = vmand %vm909_vm14, %vm7281_vm3  ;;  %v2583_v58 = vcvt.s32.f32 %v2581_v24 }
 0x297   :  { %v2582_v11 = vshrl.u32 %v1452_v56, 16  ;;  %vm1197_vm14 = vmor %vm781_vm15, %vm1069_vm13  ;;  %vm912_vm15 = vcmp.eq.f32.partialorder %v8727_v57, %v7316_v31  ;;  %vm13044_vm13 = vcmp.lt.s32.totalorder %v6973_v8, 8 }
 0x298   :  { %13033 = vst [vmem:[#allocation66_spill] sm:$0xff] %v8735_v49  ;;  %v2147_v22 = vshll.u32 %v2146_v43, 16  ;;  %2563 = vadd.xlane.f32.xlu0 %v2560_v19  ;;  %v2157_v43 = vcvt.f32.s32 %v2154_v7  ;;  %vm1198_vm0 = vmor %vm782_vm4, %vm1070_vm9  ;;  %v2605_v49 = vand.u32 65535, %v1454_v23  ;;  %vm783_vm9 = vcmp.lt.f32.partialorder %v8727_v57, %v7303_v16 }
 0x299   :  { %2573 = vadd.xlane.f32.xlu1 %v2571_v44  ;;  %v2156_v38 = vpop.xlane.xlu0 %2155  ;;  %v2584_v62 = vcvt.s32.f32 %v2582_v11  ;;  %vm8783_vm7 = vmand %vm1197_vm14, %vm13044_vm13 }
 0x29a   :  { %v2166_v50 = vpop.xlane.xlu1 %2165  ;;  %v2158_v6 = vcvt.f32.s32 %v2156_v38  ;;  %v8757_v44 = vadd.s32 %v2147_v22, %v2145_v9  ;;  %v2595_v9 = vcvt.s32.f32 %v2593_v36  ;;  %v2594_v22 = vshrl.u32 %v1453_v51, 16  ;;  %vm13047_vm2 = vmmov %vm13044_vm13 }
 0x29b   :  { %v2169_v51 = vcvt.f32.s32 %v2166_v50  ;;  %vm8789_vm4 = vmand %vm1198_vm0, %vm13047_vm2  ;;  %v2607_v11 = vcvt.s32.f32 %v2605_v49  ;;  %vm784_vm0 = vcmp.lt.f32.partialorder %v8727_v57, %v7316_v31  ;;  %vm13051_vm13 = vnez %v12601_v52 }
 0x29c   :  { %13041 = vst [vmem:[#allocation67_spill] sm:$0xff] %v8757_v44  ;;  %v2159_v19 = vshll.u32 %v2158_v6, 16  ;;  %2575 = vadd.xlane.f32.xlu0 %v2572_v46  ;;  %v2596_v6 = vcvt.s32.f32 %v2594_v22  ;;  %vm1071_vm14 = vmand %vm911_vm12, %vm12876_vm11  ;;  %v1457_v31 = vsel %vm8789_vm4, 1, %v12605_v13  ;;  %v13316_v44 = vld [vmem:[#allocation21_spill] sm:$0xff] }
 0x29d   :  { %2585 = vadd.xlane.f32.xlu1 %v2583_v58  ;;  %v2168_v56 = vpop.xlane.xlu0 %2167  ;;  %v2617_v58 = vand.u32 65535, %v1455_v1  ;;  %vm1072_vm2 = vmand %vm912_vm15, %vm13051_vm13 }
 0x29e   :  { %v2178_v24 = vpop.xlane.xlu1 %2177  ;;  %v2170_v38 = vcvt.f32.s32 %v2168_v56  ;;  %v8775_v7 = vadd.s32 %v2159_v19, %v2157_v43  ;;  %v2606_v43 = vshrl.u32 %v1454_v23, 16  ;;  %v1456_v56 = vsel %vm8783_vm7, 1, %v12605_v13  ;;  %vm1199_vm12 = vmor %vm783_vm9, %vm1071_vm14 }
 0x29f   :  { %vm1200_vm15 = vmor %vm784_vm0, %vm1072_vm2  ;;  %vm913_vm7 = vcmp.eq.f32.partialorder %v8727_v57, %v7323_v55  ;;  %vm914_vm9 = vcmp.eq.f32.partialorder %v8727_v57, %v7333_v26  ;;  %vm13053_vm14 = vcmp.lt.s32.totalorder %v6973_v8, 8 }
 0x2a0   :  { %13043 = vst [vmem:[#allocation68_spill] sm:$0xff] %v8775_v7  ;;  %v2171_v47 = vshll.u32 %v2170_v38, 16  ;;  %2587 = vadd.xlane.f32.xlu0 %v2584_v62  ;;  %v2619_v38 = vcvt.s32.f32 %v2617_v58  ;;  %v2618_v62 = vshrl.u32 %v1455_v1, 16  ;;  %v2608_v5 = vcvt.s32.f32 %v2606_v43  ;;  %vm8823_vm13 = vmand %vm1199_vm12, %vm13053_vm14 }
 0x2a1   :  { %2597 = vadd.xlane.f32.xlu1 %v2595_v9  ;;  %v2180_v46 = vpop.xlane.xlu0 %2179  ;;  %v2181_v9 = vcvt.f32.s32 %v2178_v24  ;;  %vm13056_vm4 = vmmov %vm13053_vm14  ;;  %vm13059_vm12 = vnez %v12603_v15 }
 0x2a2   :  { %v2190_v36 = vpop.xlane.xlu1 %2189  ;;  %v2182_v50 = vcvt.f32.s32 %v2180_v46  ;;  %v8797_v19 = vadd.s32 %v2171_v47, %v2169_v51  ;;  %v2629_v47 = vand.u32 65535, %v1456_v56  ;;  %vm8829_vm0 = vmand %vm1200_vm15, %vm13056_vm4  ;;  %vm786_vm15 = vcmp.lt.f32.partialorder %v8727_v57, %v7333_v26 }
 0x2a3   :  { %v2193_v1 = vcvt.f32.s32 %v2190_v36  ;;  %vm1073_vm14 = vmand %vm913_vm7, %vm13059_vm12  ;;  %vm13061_vm4 = vnez %v12608_v34  ;;  %vm13062_vm7 = vcmp.lt.f32.partialorder %v8727_v57, %v7323_v55  ;;  %v1459_v26 = vsel %vm8829_vm0, 1, %v12605_v13 }
 0x2a4   :  { %13050 = vst [vmem:[#allocation69_spill] sm:$0xff] %v8797_v19  ;;  %v2183_v22 = vshll.u32 %v2182_v50, 16  ;;  %2599 = vadd.xlane.f32.xlu0 %v2596_v6  ;;  %v2620_v50 = vcvt.s32.f32 %v2618_v62  ;;  %v2631_v43 = vcvt.s32.f32 %v2629_v47  ;;  %vm1074_vm2 = vmand %vm914_vm9, %vm13061_vm4  ;;  %v2642_v47 = vshrl.u32 %v1457_v31, 16 }
 0x2a5   :  { %2609 = vadd.xlane.f32.xlu1 %v2607_v11  ;;  %v2192_v49 = vpop.xlane.xlu0 %2191  ;;  %v2641_v11 = vand.u32 65535, %v1457_v31  ;;  %vm1201_vm12 = vmor %vm13062_vm7, %vm1073_vm14  ;;  %vm916_vm14 = vcmp.eq.f32.partialorder %v8727_v57, %v7349_v32  ;;  %vm13064_vm7 = vcmp.lt.s32.totalorder %v6973_v8, 8 }
 0x2a6   :  { %v2202_v23 = vpop.xlane.xlu1 %2201  ;;  %v2194_v51 = vcvt.f32.s32 %v2192_v49  ;;  %v8815_v24 = vadd.s32 %v2183_v22, %v2181_v9  ;;  %v2630_v9 = vshrl.u32 %v1456_v56, 16  ;;  %v1458_v49 = vsel %vm8823_vm13, 1, %v12605_v13  ;;  %vm1202_vm9 = vmor %vm786_vm15, %vm1074_vm2 }
 0x2a7   :  { %vm915_vm13 = vcmp.eq.f32.partialorder %v8727_v57, %v7340_v33  ;;  %vm8863_vm4 = vmand %vm1201_vm12, %vm13064_vm7  ;;  %vm787_vm15 = vcmp.lt.f32.partialorder %v8727_v57, %v7340_v33 }
 0x2a8   :  { %13052 = vst [vmem:[#allocation70_spill] sm:$0xff] %v8815_v24  ;;  %v2195_v45 = vshll.u32 %v2194_v51, 16  ;;  %2611 = vadd.xlane.f32.xlu0 %v2608_v5  ;;  %v2643_v5 = vcvt.s32.f32 %v2641_v11  ;;  %v2632_v16 = vcvt.s32.f32 %v2630_v9  ;;  %vm13067_vm0 = vmmov %vm13064_vm7  ;;  %vm13071_vm7 = vnez %v12616_v18 }
 0x2a9   :  { %2621 = vadd.xlane.f32.xlu1 %v2619_v38  ;;  %v2204_v6 = vpop.xlane.xlu0 %2203  ;;  %v2205_v38 = vcvt.f32.s32 %v2202_v23  ;;  %vm8869_vm2 = vmand %vm1202_vm9, %vm13067_vm0  ;;  %vm788_vm9 = vcmp.lt.f32.partialorder %v8727_v57, %v7349_v32 }
 0x2aa   :  { %v2214_v58 = vpop.xlane.xlu1 %2213  ;;  %v2206_v36 = vcvt.f32.s32 %v2204_v6  ;;  %v8837_v22 = vadd.s32 %v2195_v45, %v2193_v1  ;;  %v2653_v45 = vand.u32 65535, %v1458_v49  ;;  %vm1075_vm12 = vmand %vm915_vm13, %vm12899_vm6  ;;  %v1461_v32 = vsel %vm8869_vm2, 1, %v12605_v13 }
 0x2ab   :  { %v2217_v31 = vcvt.f32.s32 %v2214_v58  ;;  %vm1076_vm0 = vmand %vm916_vm14, %vm13071_vm7 }
 0x2ac   :  { %13060 = vst [vmem:[#allocation88_spill] sm:$0xff] %v8837_v22  ;;  %v2207_v62 = vshll.u32 %v2206_v36, 16  ;;  %2623 = vadd.xlane.f32.xlu0 %v2620_v50  ;;  %v2644_v36 = vcvt.s32.f32 %v2642_v47  ;;  %v2655_v9 = vcvt.s32.f32 %v2653_v45  ;;  %vm1203_vm13 = vmor %vm787_vm15, %vm1075_vm12  ;;  %v2666_v45 = vshrl.u32 %v1459_v26, 16 }
 0x2ad   :  { %2633 = vadd.xlane.f32.xlu1 %v2631_v43  ;;  %v2216_v56 = vpop.xlane.xlu0 %2215  ;;  %v2665_v43 = vand.u32 65535, %v1459_v26  ;;  %vm1204_vm14 = vmor %vm788_vm9, %vm1076_vm0  ;;  %vm918_vm15 = vcmp.eq.f32.partialorder %v8727_v57, %v7368_v25  ;;  %vm13074_vm12 = vcmp.lt.s32.totalorder %v6973_v8, 8 }
 0x2ae   :  { %v2226_v51 = vpop.xlane.xlu1 %2225  ;;  %v2218_v1 = vcvt.f32.s32 %v2216_v56  ;;  %v8855_v23 = vadd.s32 %v2207_v62, %v2205_v38  ;;  %v2654_v38 = vshrl.u32 %v1458_v49, 16  ;;  %v1460_v56 = vsel %vm8863_vm4, 1, %v12605_v13  ;;  %vm8903_vm7 = vmand %vm1203_vm13, %vm13074_vm12 }
 0x2af   :  { %vm13077_vm2 = vmmov %vm13074_vm12 }
 0x2b0   :  { %13063 = vst [vmem:[#allocation89_spill] sm:$0xff] %v8855_v23  ;;  %v2219_v46 = vshll.u32 %v2218_v1, 16  ;;  %2635 = vadd.xlane.f32.xlu0 %v2632_v16  ;;  %v2667_v16 = vcvt.s32.f32 %v2665_v43  ;;  %v2656_v55 = vcvt.s32.f32 %v2654_v38  ;;  %vm8909_vm9 = vmand %vm1204_vm14, %vm13077_vm2  ;;  %v2689_v38 = vand.u32 65535, %v1461_v32  ;;  %v13287_v23 = vld [vmem:[#allocation14_spill] sm:$0xff] }
 0x2b1   :  { %2645 = vadd.xlane.f32.xlu1 %v2643_v5  ;;  %v2228_v50 = vpop.xlane.xlu0 %2227  ;;  %v2229_v5 = vcvt.f32.s32 %v2226_v51  ;;  %vm790_vm14 = vcmp.lt.f32.partialorder %v8727_v57, %v7368_v25  ;;  %vm1078_vm12 = vmand %vm918_vm15, %vm12717_vm5  ;;  %v1463_v25 = vsel %vm8909_vm9, 1, %v12605_v13  ;;  %vm920_vm2 = vcmp.eq.f32.partialorder %v8727_v57, %v7386_v39 }
 0x2b2   :  { %v2238_v11 = vpop.xlane.xlu1 %2237  ;;  %v2230_v58 = vcvt.f32.s32 %v2228_v50  ;;  %v8877_v62 = vadd.s32 %v2219_v46, %v2217_v31  ;;  %v2677_v46 = vand.u32 65535, %v1460_v56  ;;  %v13073_v50 = vld [vmem:[#allocation71_spill] sm:$0xff]  ;;  %vm1206_vm15 = vmor %vm790_vm14, %vm1078_vm12  ;;  %vm791_vm12 = vcmp.lt.f32.partialorder %v8727_v57, %v7373_v12 }
 0x2b3   :  { %vm917_vm4 = vcmp.eq.f32.partialorder %v8727_v57, %v13073_v50  ;;  %v2241_v26 = vcvt.f32.s32 %v2238_v11  ;;  %vm789_vm0 = vcmp.lt.f32.partialorder %v8727_v57, %v13073_v50 }
 0x2b4   :  { %13070 = vst [vmem:[#allocation90_spill] sm:$0xff] %v8877_v62  ;;  %v2231_v47 = vshll.u32 %v2230_v58, 16  ;;  %2647 = vadd.xlane.f32.xlu0 %v2644_v36  ;;  %vm1077_vm13 = vmand %vm917_vm4, %vm12716_vm10 }
 0x2b5   :  { %2657 = vadd.xlane.f32.xlu1 %v2655_v9  ;;  %v2240_v49 = vpop.xlane.xlu0 %2239  ;;  %v2668_v9 = vcvt.s32.f32 %v2666_v45  ;;  %vm1205_vm4 = vmor %vm789_vm0, %vm1077_vm13  ;;  %vm13082_vm0 = vcmp.lt.s32.totalorder %v6973_v8, 8 }
 0x2b6   :  { %v2250_v1 = vpop.xlane.xlu1 %2249  ;;  %v2242_v31 = vcvt.f32.s32 %v2240_v49  ;;  %v8895_v51 = vadd.s32 %v2231_v47, %v2229_v5  ;;  %v2679_v5 = vcvt.s32.f32 %v2677_v46  ;;  %v2678_v47 = vshrl.u32 %v1460_v56, 16  ;;  %vm8943_vm13 = vmand %vm1205_vm4, %vm13082_vm0 }
 0x2b7   :  { %v2253_v45 = vcvt.f32.s32 %v2250_v1  ;;  %v2691_v46 = vcvt.s32.f32 %v2689_v38  ;;  %vm13085_vm9 = vmmov %vm13082_vm0 }
 0x2b8   :  { %13072 = vst [vmem:[#allocation91_spill] sm:$0xff] %v8895_v51  ;;  %v2243_v6 = vshll.u32 %v2242_v31, 16  ;;  %2659 = vadd.xlane.f32.xlu0 %v2656_v55  ;;  %v2680_v33 = vcvt.s32.f32 %v2678_v47  ;;  %vm8949_vm14 = vmand %vm1206_vm15, %vm13085_vm9  ;;  %v2713_v47 = vand.u32 65535, %v1463_v25  ;;  %vm792_vm15 = vcmp.lt.f32.partialorder %v8727_v57, %v7386_v39 }
 0x2b9   :  { %2669 = vadd.xlane.f32.xlu1 %v2667_v16  ;;  %v2252_v43 = vpop.xlane.xlu0 %2251  ;;  %v1462_v16 = vsel %vm8903_vm7, 1, %v12605_v13  ;;  %vm919_vm7 = vcmp.eq.f32.partialorder %v8727_v57, %v7373_v12  ;;  %vm1080_vm0 = vmand %vm920_vm2, %vm12727_vm1  ;;  %v1465_v39 = vsel %vm8949_vm14, 1, %v12605_v13  ;;  %vm922_vm9 = vcmp.eq.f32.partialorder %v8727_v57, %v7403_v30 }
 0x2ba   :  { %v2262_v58 = vpop.xlane.xlu1 %2261  ;;  %v2254_v11 = vcvt.f32.s32 %v2252_v43  ;;  %v8917_v49 = vadd.s32 %v2243_v6, %v2241_v26  ;;  %v2690_v26 = vshrl.u32 %v1461_v32, 16  ;;  %v2701_v43 = vand.u32 65535, %v1462_v16  ;;  %vm1079_vm4 = vmand %vm919_vm7, %vm12823_vm8 }
 0x2bb   :  { %v2265_v50 = vcvt.f32.s32 %v2262_v58  ;;  %vm1207_vm7 = vmor %vm791_vm12, %vm1079_vm4  ;;  %vm13091_vm12 = vcmp.lt.s32.totalorder %v6973_v8, 8 }
 0x2bc   :  { %13080 = vst [vmem:[#allocation71_spill] sm:$0xff] %v8917_v49  ;;  %v2255_v31 = vshll.u32 %v2254_v11, 16  ;;  %2671 = vadd.xlane.f32.xlu0 %v2668_v9  ;;  %vm1208_vm2 = vmor %vm792_vm15, %vm1080_vm0 }
 0x2bd   :  { %2681 = vadd.xlane.f32.xlu1 %v2679_v5  ;;  %v2264_v56 = vpop.xlane.xlu0 %2263  ;;  %v2692_v5 = vcvt.s32.f32 %v2690_v26  ;;  %vm8983_vm4 = vmand %vm1207_vm7, %vm13091_vm12  ;;  %vm13097_vm7 = vnez %v12638_v0 }
 0x2be   :  { %v2274_v55 = vpop.xlane.xlu1 %2273  ;;  %v2266_v6 = vcvt.f32.s32 %v2264_v56  ;;  %v8935_v1 = vadd.s32 %v2255_v31, %v2253_v45  ;;  %v2703_v45 = vcvt.s32.f32 %v2701_v43  ;;  %v2702_v31 = vshrl.u32 %v1462_v16, 16  ;;  %vm13094_vm14 = vmmov %vm13091_vm12 }
 0x2bf   :  { %v2277_v26 = vcvt.f32.s32 %v2274_v55  ;;  %v2715_v43 = vcvt.s32.f32 %v2713_v47  ;;  %vm8989_vm15 = vmand %vm1208_vm2, %vm13094_vm14  ;;  %vm794_vm2 = vcmp.lt.f32.partialorder %v8727_v57, %v7403_v30  ;;  %vm13099_vm14 = vnez %v12642_v17 }
 0x2c0   :  { %13081 = vst [vmem:[#allocation92_spill] sm:$0xff] %v8935_v1  ;;  %v2267_v36 = vshll.u32 %v2266_v6, 16  ;;  %2683 = vadd.xlane.f32.xlu0 %v2680_v33  ;;  %v2704_v32 = vcvt.s32.f32 %v2702_v31  ;;  %vm1082_vm0 = vmand %vm922_vm9, %vm13099_vm14  ;;  %v1467_v30 = vsel %vm8989_vm15, 1, %v12605_v13 }
 0x2c1   :  { %2693 = vadd.xlane.f32.xlu1 %v2691_v46  ;;  %v2276_v38 = vpop.xlane.xlu0 %2275  ;;  %v1464_v46 = vsel %vm8943_vm13, 1, %v12605_v13  ;;  %vm1210_vm9 = vmor %vm794_vm2, %vm1082_vm0 }
 0x2c2   :  { %v2286_v11 = vpop.xlane.xlu1 %2285  ;;  %v2278_v58 = vcvt.f32.s32 %v2276_v38  ;;  %v8957_v56 = vadd.s32 %v2267_v36, %v2265_v50  ;;  %v2714_v50 = vshrl.u32 %v1463_v25, 16  ;;  %v2725_v38 = vand.u32 65535, %v1464_v46 }
 0x2c3   :  { %v2289_v25 = vcvt.f32.s32 %v2286_v11 }
 0x2c4   :  { %13088 = vst [vmem:[#allocation93_spill] sm:$0xff] %v8957_v56  ;;  %v2279_v6 = vshll.u32 %v2278_v58, 16  ;;  %2695 = vadd.xlane.f32.xlu0 %v2692_v5  ;;  %v13090_v5 = vld [vmem:[#allocation72_spill] sm:$0xff]  ;;  %v2716_v31 = vcvt.s32.f32 %v2714_v50  ;;  %v1466_v50 = vsel %vm8983_vm4, 1, %v12605_v13  ;;  %vm923_vm4 = vcmp.eq.f32.partialorder %v8727_v57, %v7410_v41 }
 0x2c5   :  { %2705 = vadd.xlane.f32.xlu1 %v2703_v45  ;;  %v2288_v16 = vpop.xlane.xlu0 %2287  ;;  %vm921_vm13 = vcmp.eq.f32.partialorder %v8727_v57, %v13090_v5 }
 0x2c6   :  { %v2298_v33 = vpop.xlane.xlu1 %2297  ;;  %v2290_v36 = vcvt.f32.s32 %v2288_v16  ;;  %v8975_v55 = vadd.s32 %v2279_v6, %v2277_v26  ;;  %v2737_v26 = vand.u32 65535, %v1465_v39  ;;  %vm1081_vm12 = vmand %vm921_vm13, %vm13097_vm7  ;;  %v2727_v6 = vcvt.s32.f32 %v2725_v38 }
 0x2c7   :  { %v2726_v16 = vshrl.u32 %v1464_v46, 16  ;;  %vm13100_vm13 = vcmp.lt.f32.partialorder %v8727_v57, %v13090_v5  ;;  %v625_v5 = vcombine.high %v8368_v42, %v8368_v42 }
 0x2c8   :  { %13089 = vst [vmem:[#allocation94_spill] sm:$0xff] %v8975_v55  ;;  %v2291_v9 = vshll.u32 %v2290_v36, 16  ;;  %2707 = vadd.xlane.f32.xlu0 %v2704_v32  ;;  %v2301_v36 = vcvt.f32.s32 %v2298_v33  ;;  %vm1209_vm7 = vmor %vm13100_vm13, %vm1081_vm12  ;;  %v2749_v55 = vand.u32 65535, %v1466_v50  ;;  %vm924_vm12 = vcmp.eq.f32.partialorder %v8727_v57, %v7419_v40 }
 0x2c9   :  { %2717 = vadd.xlane.f32.xlu1 %v2715_v43  ;;  %v2300_v58 = vpop.xlane.xlu0 %2299  ;;  %v2728_v12 = vcvt.s32.f32 %v2726_v16  ;;  %vm13102_vm13 = vcmp.lt.s32.totalorder %v6973_v8, 8  ;;  %v2761_v16 = vand.u32 65535, %v1467_v30 }
 0x2ca   :  { %v2310_v45 = vpop.xlane.xlu1 %2309  ;;  %v2302_v11 = vcvt.f32.s32 %v2300_v58  ;;  %v8997_v43 = vadd.s32 %v2291_v9, %v2289_v25  ;;  %v2739_v25 = vcvt.s32.f32 %v2737_v26  ;;  %v2738_v9 = vshrl.u32 %v1465_v39, 16  ;;  %vm9025_vm14 = vmand %vm1209_vm7, %vm13102_vm13 }
 0x2cb   :  { %v2313_v47 = vcvt.f32.s32 %v2310_v45  ;;  %vm13105_vm15 = vmmov %vm13102_vm13  ;;  %vm13108_vm7 = vnez %v12647_v21 }
 0x2cc   :  { %13098 = vst [vmem:[#allocation72_spill] sm:$0xff] %v8997_v43  ;;  %v2303_v32 = vshll.u32 %v2302_v11, 16  ;;  %2719 = vadd.xlane.f32.xlu0 %v2716_v31  ;;  %vm9031_vm0 = vmand %vm1210_vm9, %vm13105_vm15  ;;  %vm796_vm9 = vcmp.lt.f32.partialorder %v8727_v57, %v7419_v40  ;;  %vm13110_vm15 = vnez %v12650_v59  ;;  %v2762_v40 = vshrl.u32 %v1467_v30, 16 }
 0x2cd   :  { %2729 = vadd.xlane.f32.xlu1 %v2727_v6  ;;  %v2312_v46 = vpop.xlane.xlu0 %2311  ;;  %v2740_v6 = vcvt.s32.f32 %v2738_v9  ;;  %vm1083_vm13 = vmand %vm923_vm4, %vm13108_vm7  ;;  %v9052_v9 = vrot.slane %v625_v5, %v6770_v2  ;;  %vm13111_vm4 = vcmp.lt.f32.partialorder %v8727_v57, %v7410_v41  ;;  %v1469_v39 = vsel %vm9031_vm0, 1, %v12605_v13 }
 0x2ce   :  { %v2322_v38 = vpop.xlane.xlu1 %2321  ;;  %v2314_v58 = vcvt.f32.s32 %v2312_v46  ;;  %v9015_v33 = vadd.s32 %v2303_v32, %v2301_v36  ;;  %v2751_v36 = vcvt.s32.f32 %v2749_v55  ;;  %v2750_v32 = vshrl.u32 %v1466_v50, 16  ;;  %vm1084_vm2 = vmand %vm924_vm12, %vm13110_vm15 }
 0x2cf   :  { %v2325_v55 = vcvt.f32.s32 %v2322_v38  ;;  %vm1211_vm7 = vmor %vm13111_vm4, %vm1083_vm13  ;;  %vm926_vm13 = vcmp.eq.f32.partialorder %v9052_v9, %v7438_v63  ;;  %vm13114_vm4 = vcmp.lt.s32.totalorder %v6973_v8, 8 }
 0x2d0   :  { %13101 = vst [vmem:[#allocation95_spill] sm:$0xff] %v9015_v33  ;;  %v2315_v31 = vshll.u32 %v2314_v58, 16  ;;  %2731 = vadd.xlane.f32.xlu0 %v2728_v12  ;;  %v2752_v5 = vcvt.s32.f32 %v2750_v32  ;;  %vm9068_vm15 = vmand %vm1211_vm7, %vm13114_vm4  ;;  %v2764_v32 = vcvt.s32.f32 %v2762_v40 }
 0x2d1   :  { %2741 = vadd.xlane.f32.xlu1 %v2739_v25  ;;  %v2324_v42 = vpop.xlane.xlu0 %2323  ;;  %v1468_v25 = vsel %vm9025_vm14, 1, %v12605_v13  ;;  %vm1212_vm14 = vmor %vm796_vm9, %vm1084_vm2  ;;  %v1470_v40 = vsel %vm9068_vm15, 1, %v12605_v13  ;;  %vm927_vm15 = vcmp.eq.f32.partialorder %v9052_v9, %v7443_v14 }
 0x2d2   :  { %v2334_v11 = vpop.xlane.xlu1 %2333  ;;  %v2326_v45 = vcvt.f32.s32 %v2324_v42  ;;  %v9039_v46 = vadd.s32 %v2315_v31, %v2313_v47  ;;  %v2763_v47 = vcvt.s32.f32 %v2761_v16  ;;  %v2773_v42 = vand.u32 65535, %v1468_v25  ;;  %vm13117_vm0 = vmmov %vm13114_vm4 }
 0x2d3   :  { %v2337_v30 = vcvt.f32.s32 %v2334_v11  ;;  %vm9074_vm2 = vmand %vm1212_vm14, %vm13117_vm0  ;;  %vm798_vm14 = vcmp.lt.f32.partialorder %v9052_v9, %v7438_v63  ;;  %vm13121_vm4 = vnez %v12593_v37  ;;  %v2786_v37 = vshrl.u32 %v1469_v39, 16 }
 0x2d4   :  { %13109 = vst [vmem:[#allocation96_spill] sm:$0xff] %v9039_v46  ;;  %v2327_v50 = vshll.u32 %v2326_v45, 16  ;;  %2743 = vadd.xlane.f32.xlu0 %v2740_v6  ;;  %v13113_v6 = vld [vmem:[#allocation73_spill] sm:$0xff]  ;;  %vm1086_vm0 = vmand %vm926_vm13, %vm13121_vm4  ;;  %v1471_v63 = vsel %vm9074_vm2, 1, %v12605_v13 }
 0x2d5   :  { %2753 = vadd.xlane.f32.xlu1 %v2751_v36  ;;  %v2336_v58 = vpop.xlane.xlu0 %2335  ;;  %vm925_vm12 = vcmp.eq.f32.partialorder %v8727_v57, %v13113_v6  ;;  %vm797_vm9 = vcmp.lt.f32.partialorder %v8727_v57, %v13113_v6  ;;  %vm1214_vm13 = vmor %vm798_vm14, %vm1086_vm0  ;;  %vm799_vm0 = vcmp.lt.f32.partialorder %v9052_v9, %v7443_v14 }
 0x2d6   :  { %v2346_v12 = vpop.xlane.xlu1 %2345  ;;  %v2338_v31 = vcvt.f32.s32 %v2336_v58  ;;  %v9060_v38 = vadd.s32 %v2327_v50, %v2325_v55  ;;  %v2785_v55 = vand.u32 65535, %v1469_v39  ;;  %vm1085_vm7 = vmand %vm925_vm12, %vm7281_vm3  ;;  %v2775_v50 = vcvt.s32.f32 %v2773_v42 }
 0x2d7   :  { %v2774_v58 = vshrl.u32 %v1468_v25, 16  ;;  %vm1213_vm12 = vmor %vm797_vm9, %vm1085_vm7  ;;  %vm13124_vm7 = vcmp.lt.s32.totalorder %v6973_v8, 8 }
 0x2d8   :  { %13112 = vst [vmem:[#allocation97_spill] sm:$0xff] %v9060_v38  ;;  %v2339_v26 = vshll.u32 %v2338_v31, 16  ;;  %2755 = vadd.xlane.f32.xlu0 %v2752_v5  ;;  %v2349_v31 = vcvt.f32.s32 %v2346_v12  ;;  %vm9108_vm4 = vmand %vm1213_vm12, %vm13124_vm7 }
 0x2d9   :  { %2765 = vadd.xlane.f32.xlu1 %v2763_v47  ;;  %v2348_v45 = vpop.xlane.xlu0 %2347  ;;  %v2776_v41 = vcvt.s32.f32 %v2774_v58  ;;  %vm13127_vm2 = vmmov %vm13124_vm7  ;;  %v2809_v58 = vand.u32 65535, %v1471_v63  ;;  %vm13131_vm7 = vnez %v12601_v52  ;;  %v2810_v52 = vshrl.u32 %v1471_v63, 16 }
 0x2da   :  { %v2358_v36 = vpop.xlane.xlu1 %2357  ;;  %v2350_v11 = vcvt.f32.s32 %v2348_v45  ;;  %v9082_v47 = vadd.s32 %v2339_v26, %v2337_v30  ;;  %v2787_v30 = vcvt.s32.f32 %v2785_v55  ;;  %v2797_v45 = vand.u32 65535, %v1470_v40  ;;  %vm9114_vm14 = vmand %vm1214_vm13, %vm13127_vm2 }
 0x2db   :  { %v2361_v39 = vcvt.f32.s32 %v2358_v36  ;;  %vm1087_vm12 = vmand %vm927_vm15, %vm12876_vm11 }
 0x2dc   :  { %13120 = vst [vmem:[#allocation73_spill] sm:$0xff] %v9082_v47  ;;  %v2351_v5 = vshll.u32 %v2350_v11, 16  ;;  %2767 = vadd.xlane.f32.xlu0 %v2764_v32  ;;  %v13123_v32 = vld [vmem:[#allocation74_spill] sm:$0xff]  ;;  %vm1215_vm11 = vmor %vm799_vm0, %vm1087_vm12 }
 0x2dd   :  { %2777 = vadd.xlane.f32.xlu1 %v2775_v50  ;;  %v2360_v25 = vpop.xlane.xlu0 %2359  ;;  %vm928_vm9 = vcmp.eq.f32.partialorder %v9052_v9, %v13123_v32  ;;  %v2788_v50 = vcvt.s32.f32 %v2786_v37  ;;  %vm800_vm13 = vcmp.lt.f32.partialorder %v9052_v9, %v13123_v32 }
 0x2de   :  { %v2370_v42 = vpop.xlane.xlu1 %2369  ;;  %v2362_v26 = vcvt.f32.s32 %v2360_v25  ;;  %v9100_v12 = vadd.s32 %v2351_v5, %v2349_v31  ;;  %v2799_v31 = vcvt.s32.f32 %v2797_v45  ;;  %v2798_v5 = vshrl.u32 %v1470_v40, 16  ;;  %vm1088_vm2 = vmand %vm928_vm9, %vm13131_vm7 }
 0x2df   :  { %v2373_v3 = vcvt.f32.s32 %v2370_v42  ;;  %v1473_v45 = vsel %vm9114_vm14, 1, %v12605_v13  ;;  %vm1216_vm15 = vmor %vm800_vm13, %vm1088_vm2  ;;  %vm13140_vm7 = vnez %v12603_v15 }
 0x2e0   :  { %13122 = vst [vmem:[#allocation98_spill] sm:$0xff] %v9100_v12  ;;  %v2363_v6 = vshll.u32 %v2362_v26, 16  ;;  %2779 = vadd.xlane.f32.xlu0 %v2776_v41  ;;  %v2811_v41 = vcvt.s32.f32 %v2809_v58  ;;  %v2800_v57 = vcvt.s32.f32 %v2798_v5 }
 0x2e1   :  { %2789 = vadd.xlane.f32.xlu1 %v2787_v30  ;;  %v2372_v55 = vpop.xlane.xlu0 %2371  ;;  %v1472_v30 = vsel %vm9108_vm4, 1, %v12605_v13  ;;  %vm13134_vm4 = vcmp.lt.s32.totalorder %v6973_v8, 8 }
 0x2e2   :  { %v2382_v11 = vpop.xlane.xlu1 %2381  ;;  %v2374_v36 = vcvt.f32.s32 %v2372_v55  ;;  %v9122_v25 = vadd.s32 %v2363_v6, %v2361_v39  ;;  %v2821_v39 = vand.u32 65535, %v1472_v30  ;;  %v13133_v6 = vld [vmem:[#allocation75_spill] sm:$0xff]  ;;  %vm9146_vm0 = vmand %vm1215_vm11, %vm13134_vm4 }
 0x2e3   :  { %vm929_vm9 = vcmp.eq.f32.partialorder %v9052_v9, %v13133_v6  ;;  %v2385_v63 = vcvt.f32.s32 %v2382_v11  ;;  %vm13137_vm14 = vmmov %vm13134_vm4  ;;  %vm801_vm13 = vcmp.lt.f32.partialorder %v9052_v9, %v13133_v6  ;;  %vm13143_vm4 = vnez %v12608_v34 }
 0x2e4   :  { %13130 = vst [vmem:[#allocation74_spill] sm:$0xff] %v9122_v25  ;;  %v2375_v37 = vshll.u32 %v2374_v36, 16  ;;  %2791 = vadd.xlane.f32.xlu0 %v2788_v50  ;;  %vm9152_vm12 = vmand %vm1216_vm15, %vm13137_vm14  ;;  %v2812_v36 = vcvt.s32.f32 %v2810_v52  ;;  %v2823_v5 = vcvt.s32.f32 %v2821_v39  ;;  %v2834_v52 = vshrl.u32 %v1473_v45, 16 }
 0x2e5   :  { %2801 = vadd.xlane.f32.xlu1 %v2799_v31  ;;  %v2384_v40 = vpop.xlane.xlu0 %2383  ;;  %v2833_v31 = vand.u32 65535, %v1473_v45  ;;  %vm1089_vm2 = vmand %vm929_vm9, %vm13140_vm7  ;;  %v1475_v39 = vsel %vm9152_vm12, 1, %v12605_v13 }
 0x2e6   :  { %v2394_v26 = vpop.xlane.xlu1 %2393  ;;  %v2386_v32 = vcvt.f32.s32 %v2384_v40  ;;  %v9140_v42 = vadd.s32 %v2375_v37, %v2373_v3  ;;  %v2822_v3 = vshrl.u32 %v1472_v30, 16  ;;  %v13142_v40 = vld [vmem:[#allocation76_spill] sm:$0xff]  ;;  %vm1217_vm9 = vmor %vm801_vm13, %vm1089_vm2  ;;  %vm13146_vm13 = vcmp.lt.s32.totalorder %v6973_v8, 8 }
 0x2e7   :  { %vm930_vm11 = vcmp.eq.f32.partialorder %v9052_v9, %v13142_v40  ;;  %vm802_vm15 = vcmp.lt.f32.partialorder %v9052_v9, %v13142_v40  ;;  %v2835_v30 = vcvt.s32.f32 %v2833_v31  ;;  %vm9183_vm7 = vmand %vm1217_vm9, %vm13146_vm13  ;;  %v2836_v31 = vcvt.s32.f32 %v2834_v52 }
 0x2e8   :  { %13132 = vst [vmem:[#allocation99_spill] sm:$0xff] %v9140_v42  ;;  %v2387_v55 = vshll.u32 %v2386_v32, 16  ;;  %2803 = vadd.xlane.f32.xlu0 %v2800_v57  ;;  %v2397_v32 = vcvt.f32.s32 %v2394_v26  ;;  %v2824_v14 = vcvt.s32.f32 %v2822_v3  ;;  %v1476_v40 = vsel %vm9183_vm7, 1, %v12605_v13 }
 0x2e9   :  { %2813 = vadd.xlane.f32.xlu1 %v2811_v41  ;;  %v2396_v50 = vpop.xlane.xlu0 %2395  ;;  %v1474_v41 = vsel %vm9146_vm0, 1, %v12605_v13  ;;  %vm1090_vm0 = vmand %vm930_vm11, %vm13143_vm4 }
 0x2ea   :  { %v2406_v58 = vpop.xlane.xlu1 %2405  ;;  %v2398_v11 = vcvt.f32.s32 %v2396_v50  ;;  %v9160_v37 = vadd.s32 %v2387_v55, %v2385_v63  ;;  %v2845_v63 = vand.u32 65535, %v1474_v41  ;;  %v13145_v50 = vld [vmem:[#allocation77_spill] sm:$0xff]  ;;  %vm1218_vm12 = vmor %vm802_vm15, %vm1090_vm0 }
 0x2eb   :  { %vm931_vm14 = vcmp.eq.f32.partialorder %v9052_v9, %v13145_v50  ;;  %v2409_v16 = vcvt.f32.s32 %v2406_v58  ;;  %vm803_vm2 = vcmp.lt.f32.partialorder %v9052_v9, %v13145_v50  ;;  %vm13151_vm15 = vmmov %vm13146_vm13 }
 0x2ec   :  { %13141 = vst [vmem:[#allocation75_spill] sm:$0xff] %v9160_v37  ;;  %v2399_v57 = vshll.u32 %v2398_v11, 16  ;;  %2815 = vadd.xlane.f32.xlu0 %v2812_v36  ;;  %v2857_v11 = vand.u32 65535, %v1475_v39  ;;  %vm1091_vm11 = vmand %vm931_vm14, %vm12899_vm6  ;;  %v2847_v3 = vcvt.s32.f32 %v2845_v63  ;;  %vm13154_vm14 = vnez %v12616_v18  ;;  %v13296_v37 = vld [vmem:[#allocation15_spill] sm:$0xff] }
 0x2ed   :  { %2825 = vadd.xlane.f32.xlu1 %v2823_v5  ;;  %v2408_v15 = vpop.xlane.xlu0 %2407  ;;  %vm9203_vm4 = vmand %vm1218_vm12, %vm13151_vm15 }
 0x2ee   :  { %v2410_v26 = vcvt.f32.s32 %v2408_v15  ;;  %v9177_v55 = vadd.s32 %v2399_v57, %v2397_v32  ;;  %v2418_v6 = vpop.xlane.xlu1 %2417  ;;  %v2846_v32 = vshrl.u32 %v1474_v41, 16  ;;  %v13150_v57 = vld [vmem:[#allocation78_spill] sm:$0xff]  ;;  %vm1219_vm0 = vmor %vm803_vm2, %vm1091_vm11  ;;  %v1477_v50 = vsel %vm9203_vm4, 1, %v12605_v13  ;;  %v13160_v15 = vld [vmem:[#allocation80_spill] sm:$0xff] }
 0x2ef   :  { %vm932_vm9 = vcmp.eq.f32.partialorder %v9052_v9, %v13150_v57  ;;  %v2421_v4 = vcvt.f32.s32 %v2418_v6  ;;  %vm804_vm6 = vcmp.lt.f32.partialorder %v9052_v9, %v13150_v57  ;;  %v2869_v6 = vand.u32 65535, %v1476_v40  ;;  %vm13157_vm12 = vmmov %vm13151_vm15 }
 0x2f0   :  { %13144 = vst [vmem:[#allocation76_spill] sm:$0xff] %v9177_v55  ;;  %v2411_v36 = vshll.u32 %v2410_v26, 16  ;;  %2827 = vadd.xlane.f32.xlu0 %v2824_v14  ;;  %v2859_v26 = vcvt.s32.f32 %v2857_v11  ;;  %v2858_v14 = vshrl.u32 %v1475_v39, 16  ;;  %vm1092_vm13 = vmand %vm932_vm9, %vm13154_vm14  ;;  %v2848_v45 = vcvt.s32.f32 %v2846_v32 }
 0x2f1   :  { %2837 = vadd.xlane.f32.xlu1 %v2835_v30  ;;  %v2420_v34 = vpop.xlane.xlu0 %2419  ;;  %vm1350_vm2 = vmand %vm1219_vm0, %vm13157_vm12  ;;  %v2871_v11 = vcvt.s32.f32 %v2869_v6  ;;  %vm934_vm4 = vcmp.eq.f32.partialorder %v9052_v9, %v13160_v15  ;;  %vm806_vm14 = vcmp.lt.f32.partialorder %v9052_v9, %v13160_v15 }
 0x2f2   :  { %v2422_v5 = vcvt.f32.s32 %v2420_v34  ;;  %v9194_v58 = vadd.s32 %v2411_v36, %v2409_v16  ;;  %v2430_v41 = vpop.xlane.xlu1 %2429  ;;  %v13156_v36 = vld [vmem:[#allocation79_spill] sm:$0xff]  ;;  %vm1220_vm11 = vmor %vm804_vm6, %vm1092_vm13  ;;  %v1478_v57 = vsel %vm1350_vm2, 1, %v12605_v13 }
 0x2f3   :  { %vm933_vm7 = vcmp.eq.f32.partialorder %v9052_v9, %v13156_v36  ;;  %v2433_v34 = vcvt.f32.s32 %v2430_v41  ;;  %vm805_vm9 = vcmp.lt.f32.partialorder %v9052_v9, %v13156_v36  ;;  %vm13161_vm6 = vmmov %vm13157_vm12  ;;  %v2893_v41 = vand.u32 65535, %v1478_v57  ;;  %v13166_v36 = vld [vmem:[#allocation82_spill] sm:$0xff] }
 0x2f4   :  { %13149 = vst [vmem:[#allocation77_spill] sm:$0xff] %v9194_v58  ;;  %v2423_v30 = vshll.u32 %v2422_v5, 16  ;;  %2839 = vadd.xlane.f32.xlu0 %v2836_v31  ;;  %v2860_v31 = vcvt.s32.f32 %v2858_v14  ;;  %vm1093_vm15 = vmand %vm933_vm7, %vm12716_vm10  ;;  %v2870_v5 = vshrl.u32 %v1476_v40, 16 }
 0x2f5   :  { %2849 = vadd.xlane.f32.xlu1 %v2847_v3  ;;  %v2432_v52 = vpop.xlane.xlu0 %2431  ;;  %v2881_v3 = vand.u32 65535, %v1477_v50  ;;  %vm1351_vm0 = vmand %vm1220_vm11, %vm13161_vm6 }
 0x2f6   :  { %v2434_v63 = vcvt.f32.s32 %v2432_v52  ;;  %v9214_v16 = vadd.s32 %v2423_v30, %v2421_v4  ;;  %vm1221_vm13 = vmor %vm805_vm9, %vm1093_vm15  ;;  %v2872_v40 = vcvt.s32.f32 %v2870_v5  ;;  %v2882_v30 = vshrl.u32 %v1477_v50, 16  ;;  %v13163_v52 = vld [vmem:[#allocation81_spill] sm:$0xff]  ;;  %v13169_v5 = vld [vmem:[#allocation83_spill] sm:$0xff] }
 0x2f7   :  { %vm1094_vm10 = vmand %vm934_vm4, %vm12717_vm5  ;;  %v2883_v4 = vcvt.s32.f32 %v2881_v3  ;;  %vm935_vm7 = vcmp.eq.f32.partialorder %v9052_v9, %v13163_v52  ;;  %vm807_vm9 = vcmp.lt.f32.partialorder %v9052_v9, %v13163_v52  ;;  %vm936_vm15 = vcmp.eq.f32.partialorder %v9052_v9, %v13166_v36 }
 0x2f8   :  { %13155 = vst [vmem:[#allocation78_spill] sm:$0xff] %v9214_v16  ;;  %v2435_v39 = vshll.u32 %v2434_v63, 16  ;;  %2851 = vadd.xlane.f32.xlu0 %v2848_v45  ;;  %vm13164_vm12 = vmmov %vm13161_vm6  ;;  %v2884_v14 = vcvt.s32.f32 %v2882_v30  ;;  %v2895_v63 = vcvt.s32.f32 %v2893_v41  ;;  %v2894_v45 = vshrl.u32 %v1478_v57, 16  ;;  %v13173_v30 = vld [vmem:[#allocation84_spill] sm:$0xff] }
 0x2f9   :  { %2861 = vadd.xlane.f32.xlu1 %v2859_v26  ;;  %v9228_v18 = vpop.xlane.xlu0 %2443  ;;  %v1479_v26 = vsel %vm1351_vm0, 1, %v12605_v13  ;;  %vm1352_vm2 = vmand %vm1221_vm13, %vm13164_vm12  ;;  %vm808_vm0 = vcmp.lt.f32.partialorder %v9052_v9, %v13166_v36  ;;  %vm937_vm13 = vcmp.eq.f32.partialorder %v9052_v9, %v13169_v5 }
 0x2fa   :  { %13158 = vst [vmem:[#allocation79_spill] sm:$0xff] %v9228_v18  ;;  %v9232_v32 = vadd.s32 %v2435_v39, %v2433_v34  ;;  %vm1222_vm11 = vmor %vm806_vm14, %vm1094_vm10  ;;  %v2905_v6 = vand.u32 65535, %v1479_v26  ;;  %v1480_v50 = vsel %vm1352_vm2, 1, %v12605_v13  ;;  %v2896_v34 = vcvt.s32.f32 %v2894_v45  ;;  %v13177_v45 = vld [vmem:[#allocation85_spill] sm:$0xff] }
 0x2fb   :  { %vm1095_vm5 = vmand %vm935_vm7, %vm12823_vm8  ;;  %vm809_vm2 = vcmp.lt.f32.partialorder %v9052_v9, %v13169_v5 }
 0x2fc   :  { %13159 = vst [vmem:[#allocation100_spill] sm:$0xff] %v9232_v32  ;;  %2863 = vadd.xlane.f32.xlu0 %v2860_v31  ;;  %vm13167_vm4 = vmmov %vm13161_vm6  ;;  %v2907_v39 = vcvt.s32.f32 %v2905_v6  ;;  %v2906_v31 = vshrl.u32 %v1479_v26, 16 }
 0x2fd   :  { %2873 = vadd.xlane.f32.xlu1 %v2871_v11  ;;  %v9241_v60 = vpop.xlane.xlu0 %2455  ;;  %vm1353_vm6 = vmand %vm1222_vm11, %vm13167_vm4  ;;  %v2917_v11 = vand.u32 65535, %v1480_v50 }
 0x2fe   :  { %13162 = vst [vmem:[#allocation80_spill] sm:$0xff] %v9241_v60  ;;  %vm1223_vm14 = vmor %vm807_vm9, %vm1095_vm5  ;;  %v1481_v3 = vsel %vm1353_vm6, 1, %v12605_v13  ;;  %v2908_v15 = vcvt.s32.f32 %v2906_v31  ;;  %vm938_vm9 = vcmp.eq.f32.partialorder %v9052_v9, %v13173_v30  ;;  %v13181_v31 = vld [vmem:[#allocation86_spill] sm:$0xff] }
 0x2ff   :  { %vm1096_vm8 = vmand %vm936_vm15, %vm12727_vm1  ;;  %vm13172_vm1 = vnez %v12638_v0  ;;  %v2919_v57 = vcvt.s32.f32 %v2917_v11 }
 0x300   :  { %2875 = vadd.xlane.f32.xlu0 %v2872_v40  ;;  %vm13170_vm10 = vmmov %vm13167_vm4  ;;  %v2918_v40 = vshrl.u32 %v1480_v50, 16 }
 0x301   :  { %2885 = vadd.xlane.f32.xlu1 %v2883_v4  ;;  %v9252_v20 = vpop.xlane.xlu0 %2467  ;;  %vm1354_vm7 = vmand %vm1223_vm14, %vm13170_vm10  ;;  %v2929_v4 = vand.u32 65535, %v1481_v3 }
 0x302   :  { %13165 = vst [vmem:[#allocation81_spill] sm:$0xff] %v9252_v20  ;;  %vm1224_vm12 = vmor %vm808_vm0, %vm1096_vm8  ;;  %v1482_v41 = vsel %vm1354_vm7, 1, %v12605_v13  ;;  %vm13176_vm0 = vnez %v12642_v17  ;;  %v2920_v52 = vcvt.s32.f32 %v2918_v40  ;;  %vm939_vm8 = vcmp.eq.f32.partialorder %v9052_v9, %v13177_v45  ;;  %v13185_v40 = vld [vmem:[#allocation87_spill] sm:$0xff] }
 0x303   :  { %vm1097_vm11 = vmand %vm937_vm13, %vm13172_vm1  ;;  %v2931_v26 = vcvt.s32.f32 %v2929_v4 }
 0x304   :  { %2887 = vadd.xlane.f32.xlu0 %v2884_v14  ;;  %vm13174_vm5 = vmmov %vm13167_vm4  ;;  %vm810_vm4 = vcmp.lt.f32.partialorder %v9052_v9, %v13173_v30  ;;  %v2930_v14 = vshrl.u32 %v1481_v3, 16 }
 0x305   :  { %2897 = vadd.xlane.f32.xlu1 %v2895_v63  ;;  %v9263_v10 = vpop.xlane.xlu0 %2479  ;;  %vm1355_vm15 = vmand %vm1224_vm12, %vm13174_vm5  ;;  %v2941_v63 = vand.u32 65535, %v1482_v41  ;;  %vm811_vm12 = vcmp.lt.f32.partialorder %v9052_v9, %v13177_v45 }
 0x306   :  { %13168 = vst [vmem:[#allocation82_spill] sm:$0xff] %v9263_v10  ;;  %vm1225_vm6 = vmor %vm809_vm2, %vm1097_vm11  ;;  %v1483_v6 = vsel %vm1355_vm15, 1, %v12605_v13  ;;  %vm13180_vm2 = vnez %v12647_v21  ;;  %v2932_v36 = vcvt.s32.f32 %v2930_v14  ;;  %vm940_vm11 = vcmp.eq.f32.partialorder %v9052_v9, %v13181_v31 }
 0x307   :  { %vm1098_vm14 = vmand %vm938_vm9, %vm13176_vm0  ;;  %v2943_v50 = vcvt.s32.f32 %v2941_v63  ;;  %vm812_vm15 = vcmp.lt.f32.partialorder %v9052_v9, %v13181_v31 }
 0x308   :  { %2899 = vadd.xlane.f32.xlu0 %v2896_v34  ;;  %vm13178_vm13 = vmmov %vm13174_vm5  ;;  %v2942_v34 = vshrl.u32 %v1482_v41, 16 }
 0x309   :  { %2909 = vadd.xlane.f32.xlu1 %v2907_v39  ;;  %v9274_v61 = vpop.xlane.xlu0 %2491  ;;  %vm1356_vm10 = vmand %vm1225_vm6, %vm13178_vm13  ;;  %v2953_v39 = vand.u32 65535, %v1483_v6  ;;  %vm13184_vm6 = vnez %v12650_v59 }
 0x30a   :  { %13171 = vst [vmem:[#allocation83_spill] sm:$0xff] %v9274_v61  ;;  %vm1226_vm7 = vmor %vm810_vm4, %vm1098_vm14  ;;  %v1484_v11 = vsel %vm1356_vm10, 1, %v12605_v13  ;;  %v2944_v5 = vcvt.s32.f32 %v2942_v34  ;;  %vm941_vm14 = vcmp.eq.f32.partialorder %v9052_v9, %v13185_v40 }
 0x30b   :  { %vm1099_vm1 = vmand %vm939_vm8, %vm13180_vm2  ;;  %v2955_v3 = vcvt.s32.f32 %v2953_v39 }
 0x30c   :  { %2911 = vadd.xlane.f32.xlu0 %v2908_v15  ;;  %vm13182_vm9 = vmmov %vm13174_vm5  ;;  %v2954_v15 = vshrl.u32 %v1483_v6, 16 }
 0x30d   :  { %2921 = vadd.xlane.f32.xlu1 %v2919_v57  ;;  %v9285_v0 = vpop.xlane.xlu0 %2503  ;;  %vm1357_vm5 = vmand %vm1226_vm7, %vm13182_vm9  ;;  %v2965_v57 = vand.u32 65535, %v1484_v11  ;;  %vm813_vm7 = vcmp.lt.f32.partialorder %v9052_v9, %v13185_v40 }
 0x30e   :  { %13175 = vst [vmem:[#allocation84_spill] sm:$0xff] %v9285_v0  ;;  %vm1227_vm4 = vmor %vm811_vm12, %vm1099_vm1  ;;  %v1485_v4 = vsel %vm1357_vm5, 1, %v12605_v13  ;;  %v2956_v30 = vcvt.s32.f32 %v2954_v15 }
 0x30f   :  { %vm1100_vm0 = vmand %vm940_vm11, %vm13184_vm6  ;;  %v2967_v41 = vcvt.s32.f32 %v2965_v57  ;;  %v2978_v6 = vshrl.u32 %v1485_v4, 16 }
 0x310   :  { %2923 = vadd.xlane.f32.xlu0 %v2920_v52  ;;  %vm13186_vm8 = vmmov %vm13182_vm9  ;;  %v2966_v52 = vshrl.u32 %v1484_v11, 16 }
 0x311   :  { %2933 = vadd.xlane.f32.xlu1 %v2931_v26  ;;  %v9296_v17 = vpop.xlane.xlu0 %2515  ;;  %vm1358_vm13 = vmand %vm1227_vm4, %vm13186_vm8  ;;  %v2977_v26 = vand.u32 65535, %v1485_v4  ;;  %v2980_v34 = vcvt.s32.f32 %v2978_v6 }
 0x312   :  { %13179 = vst [vmem:[#allocation85_spill] sm:$0xff] %v9296_v17  ;;  %vm1228_vm10 = vmor %vm812_vm15, %vm1100_vm0  ;;  %v1486_v14 = vsel %vm1358_vm13, 1, %v12605_v13  ;;  %v2968_v9 = vcvt.s32.f32 %v2966_v52 }
 0x313   :  { %vm1101_vm12 = vmand %vm941_vm14, %vm7281_vm3  ;;  %v2979_v45 = vcvt.s32.f32 %v2977_v26  ;;  %v2990_v31 = vshrl.u32 %v1486_v14, 16 }
 0x314   :  { %2935 = vadd.xlane.f32.xlu0 %v2932_v36  ;;  %vm13188_vm2 = vmmov %vm13186_vm8  ;;  %v2989_v36 = vand.u32 65535, %v1486_v14  ;;  %v9337_v14 = vpop.xlane.xlu1 %2441 }
 0x315   :  { %2945 = vadd.xlane.f32.xlu1 %v2943_v50  ;;  %v9307_v21 = vpop.xlane.xlu0 %2527  ;;  %vm1359_vm1 = vmand %vm1228_vm10, %vm13188_vm2  ;;  %v2992_v15 = vcvt.s32.f32 %v2990_v31  ;;  %13194 = vst [vmem:[#allocation105_spill] sm:$0xff] %v9337_v14 }
 0x316   :  { %13183 = vst [vmem:[#allocation86_spill] sm:$0xff] %v9307_v21  ;;  %vm1229_vm11 = vmor %vm813_vm7, %vm1101_vm12  ;;  %v1487_v27 = vsel %vm1359_vm1, 1, %v12605_v13  ;;  %v2991_v39 = vcvt.s32.f32 %v2989_v36  ;;  %vm3029_vm7 = vcmp.ge.s32.totalorder %v13316_v44, 4 }
 0x317   :  { %vm13190_vm3 = vmmov %vm13188_vm2  ;;  %v3001_v11 = vand.u32 65535, %v1487_v27  ;;  %v3002_v40 = vshrl.u32 %v1487_v27, 16 }
 0x318   :  { %2947 = vadd.xlane.f32.xlu0 %v2944_v5  ;;  %vm1360_vm9 = vmand %vm1229_vm11, %vm13190_vm3  ;;  %v9343_v36 = vpop.xlane.xlu1 %2453 }
 0x319   :  { %2957 = vadd.xlane.f32.xlu1 %v2955_v3  ;;  %v9318_v59 = vpop.xlane.xlu0 %2539  ;;  %v1488_v5 = vsel %vm1360_vm9, 1, %v12605_v13  ;;  %v3003_v57 = vcvt.s32.f32 %v3001_v11  ;;  %13197 = vst [vmem:[#allocation108_spill] sm:$0xff] %v9343_v36  ;;  %vm13201_vm5 = vmmov %vm13188_vm2 }
 0x31a   :  { %13187 = vst [vmem:[#allocation87_spill] sm:$0xff] %v9318_v59  ;;  %v3013_v4 = vand.u32 65535, %v1488_v5  ;;  %v3014_v26 = vshrl.u32 %v1488_v5, 16  ;;  %v3156_v31 = vsel %vm13201_vm5, 1, %v12605_v13  ;;  %vm13227_vm15 = vmmov %vm13188_vm2 }
 0x31c   :  { %2959 = vadd.xlane.f32.xlu0 %v2956_v30  ;;  %v3015_v52 = vcvt.s32.f32 %v3013_v4 }
 0x31d   :  { %2969 = vadd.xlane.f32.xlu1 %v2967_v41  ;;  %v9325_v63 = vpop.xlane.xlu0 %2551  ;;  %v3004_v41 = vcvt.s32.f32 %v3002_v40 }
 0x31e   :  { %13189 = vst [vmem:[#allocation101_spill] sm:$0xff] %v9325_v63 }
 0x320   :  { %2971 = vadd.xlane.f32.xlu0 %v2968_v9 }
 0x321   :  { %2981 = vadd.xlane.f32.xlu1 %v2979_v45  ;;  %v9330_v50 = vpop.xlane.xlu0 %2563  ;;  %v3016_v45 = vcvt.s32.f32 %v3014_v26 }
 0x322   :  { %13191 = vst [vmem:[#allocation102_spill] sm:$0xff] %v9330_v50 }
 0x324   :  { %2983 = vadd.xlane.f32.xlu0 %v2980_v34  ;;  %v9347_v34 = vpop.xlane.xlu1 %2465 }
 0x325   :  { %2993 = vadd.xlane.f32.xlu1 %v2991_v39  ;;  %v9333_v3 = vpop.xlane.xlu0 %2575  ;;  %13199 = vst [vmem:[#allocation110_spill] sm:$0xff] %v9347_v34 }
 0x326   :  { %13192 = vst [vmem:[#allocation103_spill] sm:$0xff] %v9333_v3 }
 0x328   :  { %2995 = vadd.xlane.f32.xlu0 %v2992_v15  ;;  %v9356_v5 = vpop.xlane.xlu1 %2477 }
 0x329   :  { %3005 = vadd.xlane.f32.xlu1 %v3003_v57  ;;  %v9335_v30 = vpop.xlane.xlu0 %2587  ;;  %13203 = vst [vmem:[#allocation113_spill] sm:$0xff] %v9356_v5 }
 0x32a   :  { %13193 = vst [vmem:[#allocation104_spill] sm:$0xff] %v9335_v30 }
 0x32c   :  { %3007 = vadd.xlane.f32.xlu0 %v3004_v41  ;;  %v9360_v57 = vpop.xlane.xlu1 %2489 }
 0x32d   :  { %3017 = vadd.xlane.f32.xlu1 %v3015_v52  ;;  %v9339_v9 = vpop.xlane.xlu0 %2599  ;;  %13205 = vst [vmem:[#allocation115_spill] sm:$0xff] %v9360_v57 }
 0x32e   :  { %13195 = vst [vmem:[#allocation106_spill] sm:$0xff] %v9339_v9 }
 0x330   :  { %3019 = vadd.xlane.f32.xlu0 %v3016_v45  ;;  %v9366_v41 = vpop.xlane.xlu1 %2501 }
 0x331   :  { %v9341_v6 = vpop.xlane.xlu0 %2611  ;;  %13208 = vst [vmem:[#allocation118_spill] sm:$0xff] %v9366_v41 }
 0x332   :  { %13196 = vst [vmem:[#allocation107_spill] sm:$0xff] %v9341_v6 }
 0x334   :  { %v9370_v52 = vpop.xlane.xlu1 %2513 }
 0x335   :  { %v9345_v27 = vpop.xlane.xlu0 %2623  ;;  %13210 = vst [vmem:[#allocation120_spill] sm:$0xff] %v9370_v52 }
 0x336   :  { %13198 = vst [vmem:[#allocation109_spill] sm:$0xff] %v9345_v27 }
 0x339   :  { %v9349_v39 = vpop.xlane.xlu0 %2635 }
 0x33a   :  { %13200 = vst [vmem:[#allocation111_spill] sm:$0xff] %v9349_v39 }
 0x33d   :  { %v9354_v11 = vpop.xlane.xlu0 %2647 }
 0x33e   :  { %13202 = vst [vmem:[#allocation112_spill] sm:$0xff] %v9354_v11  ;;  %3158 = vbcast.lane.b32.xlu1 %v3156_v31, 256 }
 0x341   :  { %v9358_v15 = vpop.xlane.xlu0 %2659 }
 0x342   :  { %13204 = vst [vmem:[#allocation114_spill] sm:$0xff] %v9358_v15  ;;  %3166 = vbcast.lane.b32.xlu1 %v3156_v31, 272  ;;  %v9376_v15 = vpop.xlane.xlu1 %2525 }
 0x343   :  { %13213 = vst [vmem:[#allocation123_spill] sm:$0xff] %v9376_v15 }
 0x345   :  { %v9362_v40 = vpop.xlane.xlu0 %2671 }
 0x346   :  { %13206 = vst [vmem:[#allocation116_spill] sm:$0xff] %v9362_v40  ;;  %3170 = vbcast.lane.b32.xlu1 %v3156_v31, 280  ;;  %3162 = vbcast.lane.b32.xlu0 %v3156_v31, 264  ;;  %v9380_v39 = vpop.xlane.xlu1 %2537 }
 0x347   :  { %13215 = vst [vmem:[#allocation125_spill] sm:$0xff] %v9380_v39 }
 0x349   :  { %v9364_v4 = vpop.xlane.xlu0 %2683 }
 0x34a   :  { %13207 = vst [vmem:[#allocation117_spill] sm:$0xff] %v9364_v4  ;;  %3178 = vbcast.lane.b32.xlu1 %v3156_v31, 296  ;;  %3174 = vbcast.lane.b32.xlu0 %v3156_v31, 288  ;;  %v9388_v50 = vpop.xlane.xlu1 %2549 }
 0x34b   :  { %13219 = vst [vmem:[#allocation129_spill] sm:$0xff] %v9388_v50 }
 0x34d   :  { %v9368_v13 = vpop.xlane.xlu0 %2695 }
 0x34e   :  { %13209 = vst [vmem:[#allocation119_spill] sm:$0xff] %v9368_v13  ;;  %3186 = vbcast.lane.b32.xlu1 %v3156_v31, 312  ;;  %3182 = vbcast.lane.b32.xlu0 %v3156_v31, 304  ;;  %v9394_v57 = vpop.xlane.xlu1 %2561 }
 0x34f   :  { %13222 = vst [vmem:[#allocation132_spill] sm:$0xff] %v9394_v57 }
 0x351   :  { %v9372_v26 = vpop.xlane.xlu0 %2707 }
 0x352   :  { %13211 = vst [vmem:[#allocation121_spill] sm:$0xff] %v9372_v26  ;;  %3194 = vbcast.lane.b32.xlu1 %v3156_v31, 328  ;;  %3190 = vbcast.lane.b32.xlu0 %v3156_v31, 320  ;;  %v9398_v17 = vpop.xlane.xlu1 %2573 }
 0x353   :  { %13224 = vst [vmem:[#allocation134_spill] sm:$0xff] %v9398_v17 }
 0x355   :  { %v9374_v45 = vpop.xlane.xlu0 %2719 }
 0x356   :  { %13212 = vst [vmem:[#allocation122_spill] sm:$0xff] %v9374_v45  ;;  %3202 = vbcast.lane.b32.xlu1 %v3156_v31, 344  ;;  %3198 = vbcast.lane.b32.xlu0 %v3156_v31, 336  ;;  %v9406_v16 = vpop.xlane.xlu1 %2585 }
 0x357   :  { %13228 = vst [vmem:[#allocation137_spill] sm:$0xff] %v9406_v16 }
 0x359   :  { %v9378_v4 = vpop.xlane.xlu0 %2731 }
 0x35a   :  { %13214 = vst [vmem:[#allocation124_spill] sm:$0xff] %v9378_v4  ;;  %3210 = vbcast.lane.b32.xlu1 %v3156_v31, 360  ;;  %3206 = vbcast.lane.b32.xlu0 %v3156_v31, 352  ;;  %v9410_v61 = vpop.xlane.xlu1 %2597 }
 0x35b   :  { %13230 = vst [vmem:[#allocation139_spill] sm:$0xff] %v9410_v61 }
 0x35d   :  { %v9382_v6 = vpop.xlane.xlu0 %2743 }
 0x35e   :  { %13216 = vst [vmem:[#allocation126_spill] sm:$0xff] %v9382_v6  ;;  %3218 = vbcast.lane.b32.xlu1 %v3156_v31, 376  ;;  %3214 = vbcast.lane.b32.xlu0 %v3156_v31, 368  ;;  %v6704_v31 = vld [vmem:[#allocation2] sm:$0xff] }
 0x361   :  { %v9384_v30 = vpop.xlane.xlu0 %2755 }
 0x362   :  { %13217 = vst [vmem:[#allocation127_spill] sm:$0xff] %v9384_v30  ;;  %v3364_v30 = vsel %vm13227_vm15, %v6704_v31, -inf }
 0x365   :  { %v9386_v26 = vpop.xlane.xlu0 %2767 }
 0x366   :  { %13218 = vst [vmem:[#allocation128_spill] sm:$0xff] %v9386_v26 }
 0x369   :  { %v9390_v52 = vpop.xlane.xlu0 %2779 }
 0x36a   :  { %13220 = vst [vmem:[#allocation130_spill] sm:$0xff] %v9390_v52 }
 0x36d   :  { %v9392_v59 = vpop.xlane.xlu0 %2791 }
 0x36e   :  { %13221 = vst [vmem:[#allocation131_spill] sm:$0xff] %v9392_v59 }
 0x371   :  { %v9396_v4 = vpop.xlane.xlu0 %2803 }
 0x372   :  { %13223 = vst [vmem:[#allocation133_spill] sm:$0xff] %v9396_v4  ;;  %v9414_v4 = vpop.xlane.xlu1 %2609 }
 0x373   :  { %13232 = vst [vmem:[#allocation141_spill] sm:$0xff] %v9414_v4 }
 0x375   :  { %v9400_v39 = vpop.xlane.xlu0 %2815 }
 0x376   :  { %13225 = vst [vmem:[#allocation135_spill] sm:$0xff] %v9400_v39  ;;  %v9418_v39 = vpop.xlane.xlu1 %2621 }
 0x377   :  { %13234 = vst [vmem:[#allocation143_spill] sm:$0xff] %v9418_v39 }
 0x379   :  { %v9402_v34 = vpop.xlane.xlu0 %2827 }
 0x37a   :  { %13226 = vst [vmem:[#allocation136_spill] sm:$0xff] %v9402_v34  ;;  %v9422_v59 = vpop.xlane.xlu1 %2633 }
 0x37b   :  { %13236 = vst [vmem:[#allocation145_spill] sm:$0xff] %v9422_v59 }
 0x37d   :  { %3365 = vmax.xlane.f32.xlu0 %v3364_v30  ;;  %v9408_v52 = vpop.xlane.xlu0 %2839 }
 0x37e   :  { %13229 = vst [vmem:[#allocation138_spill] sm:$0xff] %v9408_v52  ;;  %v9426_v16 = vpop.xlane.xlu1 %2645 }
 0x37f   :  { %13238 = vst [vmem:[#allocation147_spill] sm:$0xff] %v9426_v16  ;;  %v13285_v16 = vld [vmem:[#allocation25_spill] sm:$0xff] }
 0x380   :  { %vm3033_vm6 = vcmp.ge.s32.totalorder %v13285_v16, 4 }
 0x381   :  { %v9412_v57 = vpop.xlane.xlu0 %2851 }
 0x382   :  { %13231 = vst [vmem:[#allocation140_spill] sm:$0xff] %v9412_v57  ;;  %v9430_v52 = vpop.xlane.xlu1 %2657 }
 0x383   :  { %13240 = vst [vmem:[#allocation149_spill] sm:$0xff] %v9430_v52 }
 0x385   :  { %v9416_v14 = vpop.xlane.xlu0 %2863 }
 0x386   :  { %13233 = vst [vmem:[#allocation142_spill] sm:$0xff] %v9416_v14  ;;  %v9434_v57 = vpop.xlane.xlu1 %2669 }
 0x387   :  { %13242 = vst [vmem:[#allocation151_spill] sm:$0xff] %v9434_v57 }
 0x389   :  { %v9420_v34 = vpop.xlane.xlu0 %2875 }
 0x38a   :  { %13235 = vst [vmem:[#allocation144_spill] sm:$0xff] %v9420_v34  ;;  %v9438_v14 = vpop.xlane.xlu1 %2681 }
 0x38b   :  { %13244 = vst [vmem:[#allocation153_spill] sm:$0xff] %v9438_v14 }
 0x38d   :  { %v9424_v8 = vpop.xlane.xlu0 %2887 }
 0x38e   :  { %13237 = vst [vmem:[#allocation146_spill] sm:$0xff] %v9424_v8  ;;  %v9442_v34 = vpop.xlane.xlu1 %2693 }
 0x38f   :  { %13246 = vst [vmem:[#allocation155_spill] sm:$0xff] %v9442_v34 }
 0x391   :  { %v9428_v30 = vpop.xlane.xlu0 %2899 }
 0x392   :  { %13239 = vst [vmem:[#allocation148_spill] sm:$0xff] %v9428_v30  ;;  %v9446_v8 = vpop.xlane.xlu1 %2705 }
 0x393   :  { %13248 = vst [vmem:[#allocation157_spill] sm:$0xff] %v9446_v8 }
 0x395   :  { %v9432_v55 = vpop.xlane.xlu0 %2911 }
 0x396   :  { %13241 = vst [vmem:[#allocation150_spill] sm:$0xff] %v9432_v55  ;;  %v9450_v30 = vpop.xlane.xlu1 %2717 }
 0x397   :  { %13250 = vst [vmem:[#allocation159_spill] sm:$0xff] %v9450_v30 }
 0x399   :  { %v9436_v4 = vpop.xlane.xlu0 %2923 }
 0x39a   :  { %13243 = vst [vmem:[#allocation152_spill] sm:$0xff] %v9436_v4  ;;  %v9454_v55 = vpop.xlane.xlu1 %2729 }
 0x39b   :  { %13252 = vst [vmem:[#allocation161_spill] sm:$0xff] %v9454_v55 }
 0x39d   :  { %v9440_v20 = vpop.xlane.xlu0 %2935 }
 0x39e   :  { %13245 = vst [vmem:[#allocation154_spill] sm:$0xff] %v9440_v20  ;;  %v9458_v4 = vpop.xlane.xlu1 %2741 }
 0x39f   :  { %13254 = vst [vmem:[#allocation163_spill] sm:$0xff] %v9458_v4 }
 0x3a1   :  { %v9444_v59 = vpop.xlane.xlu0 %2947 }
 0x3a2   :  { %13247 = vst [vmem:[#allocation156_spill] sm:$0xff] %v9444_v59  ;;  %v9462_v20 = vpop.xlane.xlu1 %2753 }
 0x3a3   :  { %13256 = vst [vmem:[#allocation165_spill] sm:$0xff] %v9462_v20 }
 0x3a5   :  { %v9448_v26 = vpop.xlane.xlu0 %2959 }
 0x3a6   :  { %13249 = vst [vmem:[#allocation158_spill] sm:$0xff] %v9448_v26  ;;  %v9466_v59 = vpop.xlane.xlu1 %2765 }
 0x3a7   :  { %13258 = vst [vmem:[#allocation167_spill] sm:$0xff] %v9466_v59 }
 0x3a9   :  { %v9452_v52 = vpop.xlane.xlu0 %2971 }
 0x3aa   :  { %13251 = vst [vmem:[#allocation160_spill] sm:$0xff] %v9452_v52  ;;  %v9470_v26 = vpop.xlane.xlu1 %2777 }
 0x3ab   :  { %13260 = vst [vmem:[#allocation169_spill] sm:$0xff] %v9470_v26 }
 0x3ad   :  { %v9456_v42 = vpop.xlane.xlu0 %2983 }
 0x3ae   :  { %13253 = vst [vmem:[#allocation162_spill] sm:$0xff] %v9456_v42  ;;  %v9474_v52 = vpop.xlane.xlu1 %2789 }
 0x3af   :  { %13261 = vst [vmem:[#allocation170_spill] sm:$0xff] %v9474_v52 }
 0x3b1   :  { %v9460_v14 = vpop.xlane.xlu0 %2995 }
 0x3b2   :  { %13255 = vst [vmem:[#allocation164_spill] sm:$0xff] %v9460_v14  ;;  %v9478_v42 = vpop.xlane.xlu1 %2801 }
 0x3b3   :  { %13262 = vst [vmem:[#allocation171_spill] sm:$0xff] %v9478_v42 }
 0x3b5   :  { %v9464_v18 = vpop.xlane.xlu0 %3007 }
 0x3b6   :  { %13257 = vst [vmem:[#allocation166_spill] sm:$0xff] %v9464_v18  ;;  %v9482_v14 = vpop.xlane.xlu1 %2813 }
 0x3b7   :  { %13263 = vst [vmem:[#allocation172_spill] sm:$0xff] %v9482_v14 }
 0x3b9   :  { %v9468_v8 = vpop.xlane.xlu0 %3019 }
 0x3ba   :  { %13259 = vst [vmem:[#allocation168_spill] sm:$0xff] %v9468_v8  ;;  %v9486_v18 = vpop.xlane.xlu1 %2825 }
 0x3bb   :  { %13264 = vst [vmem:[#allocation173_spill] sm:$0xff] %v9486_v18 }
 0x3bd   :  { %v9472_v30 = vpop.permute.xlu0 %3162 }
 0x3be   :  { %v9490_v8 = vpop.xlane.xlu1 %2837  ;;  %vm3221_vm14 = vcmp.ne.s32.totalorder %v9472_v30, 0 }
 0x3bf   :  { %13265 = vst [vmem:[#allocation174_spill] sm:$0xff] %v9490_v8 }
 0x3c1   :  { %v9476_v55 = vpop.permute.xlu0 %3174 }
 0x3c2   :  { %v9494_v6 = vpop.xlane.xlu1 %2849  ;;  %vm12421_vm10 = vcmp.ne.s32.totalorder %v9476_v55, 0 }
 0x3c3   :  { %13266 = vst [vmem:[#allocation175_spill] sm:$0xff] %v9494_v6  ;;  %vm3240_vm12 = vmand %vm3029_vm7, %vm12421_vm10 }
 0x3c5   :  { %v9480_v4 = vpop.permute.xlu0 %3182 }
 0x3c6   :  { %v9498_v12 = vpop.xlane.xlu1 %2861  ;;  %vm12424_vm2 = vcmp.ne.s32.totalorder %v9480_v4, 0 }
 0x3c7   :  { %13267 = vst [vmem:[#allocation176_spill] sm:$0xff] %v9498_v12  ;;  %v13284_v12 = vld [vmem:[#allocation13_spill] sm:$0xff] }
 0x3c9   :  { %v9484_v20 = vpop.permute.xlu0 %3190 }
 0x3ca   :  { %v9500_v14 = vpop.xlane.xlu1 %2873  ;;  %vm12426_vm4 = vcmp.ne.s32.totalorder %v9484_v20, 0 }
 0x3cb   :  { %13268 = vst [vmem:[#allocation177_spill] sm:$0xff] %v9500_v14  ;;  %v13279_v14 = vld [vmem:[#allocation11_spill] sm:$0xff]  ;;  %vm3244_vm0 = vmand %vm3033_vm6, %vm12426_vm4 }
 0x3cd   :  { %v9488_v59 = vpop.permute.xlu0 %3198 }
 0x3ce   :  { %v9502_v38 = vpop.xlane.xlu1 %2885  ;;  %vm3230_vm3 = vcmp.ne.s32.totalorder %v9488_v59, 0 }
 0x3cf   :  { %13269 = vst [vmem:[#allocation178_spill] sm:$0xff] %v9502_v38 }
 0x3d1   :  { %v9492_v26 = vpop.permute.xlu0 %3206 }
 0x3d2   :  { %v9504_v18 = vpop.xlane.xlu1 %2897  ;;  %vm12430_vm15 = vcmp.ne.s32.totalorder %v9492_v26, 0 }
 0x3d3   :  { %13270 = vst [vmem:[#allocation179_spill] sm:$0xff] %v9504_v18 }
 0x3d5   :  { %v9496_v52 = vpop.permute.xlu0 %3214 }
 0x3d6   :  { %v9510_v6 = vpop.xlane.xlu1 %2909 }
 0x3d7   :  { %13271 = vst [vmem:[#allocation180_spill] sm:$0xff] %v9510_v6 }
 0x406   :  { %v3366_v42 = vpop.xlane.xlu0 %3365 }
 0x407   :  { %v3367_v34 = vsub.f32 %v6704_v31, %v3366_v42  ;;  %v13272_v42 = vld [vmem:[#allocation10_spill] sm:$0xff]  ;;  %v9514_v31 = vpop.xlane.xlu1 %2921 }
 0x408   :  { %13273 = vst [vmem:[#allocation181_spill] sm:$0xff] %v9514_v31 }
 0x409   :  { %v3368_v45 = vmul.f32 1.442695, %v3367_v34 }
 0x40b   :  { %6699 = vpow2.f32 %v3368_v45  ;;  %v9516_v45 = vpop.xlane.xlu1 %2933 }
 0x40c   :  { %13274 = vst [vmem:[#allocation182_spill] sm:$0xff] %v9516_v45 }
 0x40f   :  { %v13713_v30 = vld [vmem:[#allocation181_spill] sm:$0xff] }
 0x418   :  { %v9506_v57 = vpop.eup %6699 }
 0x419   :  { %v3374_v8 = vrot.slane %v9506_v57, %v6770_v2  ;;  %v3441_v34 = vrot.slane %v9506_v57, %v13272_v42  ;;  %v9518_v2 = vpop.xlane.xlu1 %2945  ;;  %v3508_v45 = vrot.slane %v9506_v57, %v13279_v14  ;;  %v9610_v50 = vrot.slane %v9506_v57, %v13287_v23 }
 0x41a   :  { %13275 = vst [vmem:[#allocation183_spill] sm:$0xff] %v9518_v2  ;;  %v9662_v60 = vrot.slane %v9506_v57, %v13296_v37 }
 0x41b   :  { %3408 = vbcast.lane.b32.xlu0 %v3374_v8, 320  ;;  %3376 = vbcast.lane.b32.xlu1 %v3374_v8, 256 }
 0x41d   :  { %v9520_v18 = vpop.xlane.xlu1 %2957 }
 0x41e   :  { %13276 = vst [vmem:[#allocation184_spill] sm:$0xff] %v9520_v18 }
 0x41f   :  { %3436 = vbcast.lane.b32.xlu0 %v3374_v8, 376  ;;  %3380 = vbcast.lane.b32.xlu1 %v3374_v8, 264 }
 0x421   :  { %v9522_v42 = vpop.xlane.xlu1 %2969 }
 0x422   :  { %13277 = vst [vmem:[#allocation185_spill] sm:$0xff] %v9522_v42 }
 0x423   :  { %3447 = vbcast.lane.b32.xlu0 %v3441_v34, 264  ;;  %3384 = vbcast.lane.b32.xlu1 %v3374_v8, 272 }
 0x425   :  { %v9524_v31 = vpop.xlane.xlu1 %2981 }
 0x426   :  { %13278 = vst [vmem:[#allocation186_spill] sm:$0xff] %v9524_v31 }
 0x427   :  { %3455 = vbcast.lane.b32.xlu0 %v3441_v34, 280  ;;  %3388 = vbcast.lane.b32.xlu1 %v3374_v8, 280 }
 0x429   :  { %v9528_v2 = vpop.xlane.xlu1 %2993 }
 0x42a   :  { %13280 = vst [vmem:[#allocation187_spill] sm:$0xff] %v9528_v2  ;;  %v13283_v2 = vld [vmem:[#allocation12_spill] sm:$0xff] }
 0x42b   :  { %3463 = vbcast.lane.b32.xlu0 %v3441_v34, 296  ;;  %3392 = vbcast.lane.b32.xlu1 %v3374_v8, 288  ;;  %v9540_v6 = vrot.slane %v9506_v57, %v13283_v2 }
 0x42d   :  { %v9530_v18 = vpop.xlane.xlu1 %3005 }
 0x42e   :  { %13281 = vst [vmem:[#allocation188_spill] sm:$0xff] %v9530_v18 }
 0x42f   :  { %3471 = vbcast.lane.b32.xlu0 %v3441_v34, 312  ;;  %3396 = vbcast.lane.b32.xlu1 %v3374_v8, 296 }
 0x431   :  { %v9532_v42 = vpop.xlane.xlu1 %3017 }
 0x432   :  { %13282 = vst [vmem:[#allocation189_spill] sm:$0xff] %v9532_v42 }
 0x433   :  { %3479 = vbcast.lane.b32.xlu0 %v3441_v34, 328  ;;  %3400 = vbcast.lane.b32.xlu1 %v3374_v8, 304 }
 0x435   :  { %v9534_v31 = vpop.permute.xlu1 %3158 }
 0x437   :  { %3487 = vbcast.lane.b32.xlu0 %v3441_v34, 344  ;;  %3404 = vbcast.lane.b32.xlu1 %v3374_v8, 312 }
 0x439   :  { %v9536_v14 = vpop.permute.xlu1 %3166 }
 0x43b   :  { %3495 = vbcast.lane.b32.xlu0 %v3441_v34, 360  ;;  %3412 = vbcast.lane.b32.xlu1 %v3374_v8, 328 }
 0x43f   :  { %3503 = vbcast.lane.b32.xlu0 %v3441_v34, 376  ;;  %3416 = vbcast.lane.b32.xlu1 %v3374_v8, 336 }
 0x443   :  { %3514 = vbcast.lane.b32.xlu0 %v3508_v45, 264  ;;  %3420 = vbcast.lane.b32.xlu1 %v3374_v8, 344 }
 0x447   :  { %3522 = vbcast.lane.b32.xlu0 %v3508_v45, 280  ;;  %3424 = vbcast.lane.b32.xlu1 %v3374_v8, 352 }
 0x44b   :  { %3530 = vbcast.lane.b32.xlu0 %v3508_v45, 296  ;;  %3428 = vbcast.lane.b32.xlu1 %v3374_v8, 360 }
 0x44f   :  { %3538 = vbcast.lane.b32.xlu0 %v3508_v45, 312  ;;  %3432 = vbcast.lane.b32.xlu1 %v3374_v8, 368  ;;  %v9543_v8 = vpop.permute.xlu1 %3170 }
 0x453   :  { %3546 = vbcast.lane.b32.xlu0 %v3508_v45, 328  ;;  %3443 = vbcast.lane.b32.xlu1 %v3441_v34, 256  ;;  %v9546_v42 = vpop.permute.xlu1 %3178 }
 0x457   :  { %3554 = vbcast.lane.b32.xlu0 %v3508_v45, 344  ;;  %3451 = vbcast.lane.b32.xlu1 %v3441_v34, 272  ;;  %v9550_v18 = vpop.permute.xlu1 %3186 }
 0x45b   :  { %3562 = vbcast.lane.b32.xlu0 %v3508_v45, 360  ;;  %3459 = vbcast.lane.b32.xlu1 %v3441_v34, 288  ;;  %v9553_v2 = vpop.permute.xlu1 %3194 }
 0x45f   :  { %3570 = vbcast.lane.b32.xlu0 %v3508_v45, 376  ;;  %3467 = vbcast.lane.b32.xlu1 %v3441_v34, 304  ;;  %v9557_v38 = vpop.permute.xlu1 %3202 }
 0x463   :  { %3581 = vbcast.lane.b32.xlu0 %v9540_v6, 264  ;;  %3475 = vbcast.lane.b32.xlu1 %v3441_v34, 320  ;;  %v9564_v13 = vpop.permute.xlu1 %3210 }
 0x467   :  { %3589 = vbcast.lane.b32.xlu0 %v9540_v6, 280  ;;  %3483 = vbcast.lane.b32.xlu1 %v3441_v34, 336  ;;  %v9568_v33 = vpop.permute.xlu1 %3218 }
 0x46b   :  { %3597 = vbcast.lane.b32.xlu0 %v9540_v6, 296  ;;  %3491 = vbcast.lane.b32.xlu1 %v3441_v34, 352 }
 0x46f   :  { %3605 = vbcast.lane.b32.xlu0 %v9540_v6, 312  ;;  %3499 = vbcast.lane.b32.xlu1 %v3441_v34, 368  ;;  %v9562_v34 = vrot.slane %v9506_v57, %v13284_v12 }
 0x473   :  { %3613 = vbcast.lane.b32.xlu0 %v9540_v6, 328  ;;  %3510 = vbcast.lane.b32.xlu1 %v3508_v45, 256 }
 0x477   :  { %3621 = vbcast.lane.b32.xlu0 %v9540_v6, 344  ;;  %3518 = vbcast.lane.b32.xlu1 %v3508_v45, 272 }
 0x47b   :  { %3629 = vbcast.lane.b32.xlu0 %v9540_v6, 360  ;;  %3526 = vbcast.lane.b32.xlu1 %v3508_v45, 288 }
 0x47f   :  { %3637 = vbcast.lane.b32.xlu0 %v9540_v6, 376  ;;  %3534 = vbcast.lane.b32.xlu1 %v3508_v45, 304 }
 0x483   :  { %3648 = vbcast.lane.b32.xlu0 %v9562_v34, 264  ;;  %3542 = vbcast.lane.b32.xlu1 %v3508_v45, 320 }
 0x487   :  { %3656 = vbcast.lane.b32.xlu0 %v9562_v34, 280  ;;  %3550 = vbcast.lane.b32.xlu1 %v3508_v45, 336 }
 0x48b   :  { %3664 = vbcast.lane.b32.xlu0 %v9562_v34, 296  ;;  %3558 = vbcast.lane.b32.xlu1 %v3508_v45, 352 }
 0x48d   :  { %v3409_v12 = vpop.permute.xlu0 %3408  ;;  %v9575_v40 = vpop.permute.xlu1 %3376 }
 0x48e   :  { %v9577_v39 = vsel %vm3244_vm0, %v3409_v12, 0.0 }
 0x48f   :  { %13286 = vst [vmem:[#allocation25_spill] sm:$0xff] %v9577_v39  ;;  %3672 = vbcast.lane.b32.xlu0 %v9562_v34, 312  ;;  %3566 = vbcast.lane.b32.xlu1 %v3508_v45, 368 }
 0x491   :  { %v9580_v11 = vpop.permute.xlu0 %3436  ;;  %v9582_v1 = vpop.permute.xlu1 %3380 }
 0x493   :  { %3680 = vbcast.lane.b32.xlu0 %v9562_v34, 328  ;;  %3577 = vbcast.lane.b32.xlu1 %v9540_v6, 256 }
 0x495   :  { %v9586_v16 = vpop.permute.xlu0 %3447  ;;  %v9588_v61 = vpop.permute.xlu1 %3384 }
 0x497   :  { %3688 = vbcast.lane.b32.xlu0 %v9562_v34, 344  ;;  %3585 = vbcast.lane.b32.xlu1 %v9540_v6, 272 }
 0x499   :  { %v9592_v12 = vpop.permute.xlu0 %3455  ;;  %v9594_v27 = vpop.permute.xlu1 %3388 }
 0x49b   :  { %3696 = vbcast.lane.b32.xlu0 %v9562_v34, 360  ;;  %3593 = vbcast.lane.b32.xlu1 %v9540_v6, 288 }
 0x49d   :  { %v9598_v45 = vpop.permute.xlu0 %3463  ;;  %v9600_v51 = vpop.permute.xlu1 %3392 }
 0x49f   :  { %3704 = vbcast.lane.b32.xlu0 %v9562_v34, 376  ;;  %3601 = vbcast.lane.b32.xlu1 %v9540_v6, 304 }
 0x4a1   :  { %v9604_v17 = vpop.permute.xlu0 %3471  ;;  %v9606_v9 = vpop.permute.xlu1 %3396 }
 0x4a3   :  { %3715 = vbcast.lane.b32.xlu0 %v9610_v50, 264  ;;  %3609 = vbcast.lane.b32.xlu1 %v9540_v6, 320 }
 0x4a5   :  { %v9614_v3 = vpop.permute.xlu0 %3479  ;;  %v9616_v24 = vpop.permute.xlu1 %3400 }
 0x4a6   :  { %13288 = vst [vmem:[#allocation190_spill] sm:$0xff] %v9614_v3 }
 0x4a7   :  { %3723 = vbcast.lane.b32.xlu0 %v9610_v50, 280  ;;  %3617 = vbcast.lane.b32.xlu1 %v9540_v6, 336 }
 0x4a9   :  { %v9620_v15 = vpop.permute.xlu0 %3487  ;;  %v9622_v63 = vpop.permute.xlu1 %3404 }
 0x4aa   :  { %13289 = vst [vmem:[#allocation191_spill] sm:$0xff] %v9620_v15 }
 0x4ab   :  { %3731 = vbcast.lane.b32.xlu0 %v9610_v50, 296  ;;  %3625 = vbcast.lane.b32.xlu1 %v9540_v6, 352 }
 0x4ad   :  { %v9626_v23 = vpop.permute.xlu0 %3495  ;;  %v9628_v7 = vpop.permute.xlu1 %3412 }
 0x4ae   :  { %13290 = vst [vmem:[#allocation192_spill] sm:$0xff] %v9626_v23 }
 0x4af   :  { %3739 = vbcast.lane.b32.xlu0 %v9610_v50, 312  ;;  %3633 = vbcast.lane.b32.xlu1 %v9540_v6, 368 }
 0x4b1   :  { %v9632_v41 = vpop.permute.xlu0 %3503  ;;  %v9634_v21 = vpop.permute.xlu1 %3416 }
 0x4b2   :  { %13291 = vst [vmem:[#allocation193_spill] sm:$0xff] %v9632_v41 }
 0x4b3   :  { %3747 = vbcast.lane.b32.xlu0 %v9610_v50, 328  ;;  %3644 = vbcast.lane.b32.xlu1 %v9562_v34, 256 }
 0x4b5   :  { %v9638_v5 = vpop.permute.xlu0 %3514  ;;  %v9640_v32 = vpop.permute.xlu1 %3420 }
 0x4b6   :  { %13292 = vst [vmem:[#allocation194_spill] sm:$0xff] %v9638_v5  ;;  %v13305_v5 = vld [vmem:[#allocation28_spill] sm:$0xff] }
 0x4b7   :  { %3755 = vbcast.lane.b32.xlu0 %v9610_v50, 344  ;;  %3652 = vbcast.lane.b32.xlu1 %v9562_v34, 272 }
 0x4b9   :  { %v9644_v0 = vpop.permute.xlu0 %3522  ;;  %v9646_v54 = vpop.permute.xlu1 %3424 }
 0x4ba   :  { %13293 = vst [vmem:[#allocation195_spill] sm:$0xff] %v9644_v0 }
 0x4bb   :  { %3763 = vbcast.lane.b32.xlu0 %v9610_v50, 360  ;;  %3660 = vbcast.lane.b32.xlu1 %v9562_v34, 288 }
 0x4bd   :  { %v9650_v6 = vpop.permute.xlu0 %3530  ;;  %v9652_v36 = vpop.permute.xlu1 %3428 }
 0x4be   :  { %13294 = vst [vmem:[#allocation196_spill] sm:$0xff] %v9650_v6 }
 0x4bf   :  { %3771 = vbcast.lane.b32.xlu0 %v9610_v50, 376  ;;  %3668 = vbcast.lane.b32.xlu1 %v9562_v34, 304 }
 0x4c1   :  { %v9656_v58 = vpop.permute.xlu0 %3538  ;;  %v9658_v10 = vpop.permute.xlu1 %3432 }
 0x4c2   :  { %13295 = vst [vmem:[#allocation197_spill] sm:$0xff] %v9656_v58 }
 0x4c3   :  { %3782 = vbcast.lane.b32.xlu0 %v9662_v60, 264  ;;  %3676 = vbcast.lane.b32.xlu1 %v9562_v34, 320 }
 0x4c5   :  { %v9666_v25 = vpop.permute.xlu0 %3546  ;;  %v9668_v47 = vpop.permute.xlu1 %3443 }
 0x4c6   :  { %13297 = vst [vmem:[#allocation198_spill] sm:$0xff] %v9666_v25 }
 0x4c7   :  { %3790 = vbcast.lane.b32.xlu0 %v9662_v60, 280  ;;  %3684 = vbcast.lane.b32.xlu1 %v9562_v34, 336 }
 0x4c9   :  { %v9672_v46 = vpop.permute.xlu0 %3554  ;;  %v9674_v58 = vpop.permute.xlu1 %3451 }
 0x4ca   :  { %13298 = vst [vmem:[#allocation199_spill] sm:$0xff] %v9672_v46 }
 0x4cb   :  { %3798 = vbcast.lane.b32.xlu0 %v9662_v60, 296  ;;  %3692 = vbcast.lane.b32.xlu1 %v9562_v34, 352 }
 0x4cd   :  { %v9678_v37 = vpop.permute.xlu0 %3562  ;;  %v9680_v43 = vpop.permute.xlu1 %3459 }
 0x4ce   :  { %13299 = vst [vmem:[#allocation200_spill] sm:$0xff] %v9678_v37 }
 0x4cf   :  { %3806 = vbcast.lane.b32.xlu0 %v9662_v60, 312  ;;  %3700 = vbcast.lane.b32.xlu1 %v9562_v34, 368 }
 0x4d1   :  { %v9684_v25 = vpop.permute.xlu0 %3570  ;;  %v9686_v6 = vpop.permute.xlu1 %3467 }
 0x4d2   :  { %13300 = vst [vmem:[#allocation201_spill] sm:$0xff] %v9684_v25 }
 0x4d3   :  { %3814 = vbcast.lane.b32.xlu0 %v9662_v60, 328  ;;  %3711 = vbcast.lane.b32.xlu1 %v9610_v50, 256 }
 0x4d5   :  { %v9690_v46 = vpop.permute.xlu0 %3581  ;;  %v9692_v56 = vpop.permute.xlu1 %3475 }
 0x4d6   :  { %13301 = vst [vmem:[#allocation202_spill] sm:$0xff] %v9690_v46 }
 0x4d7   :  { %3822 = vbcast.lane.b32.xlu0 %v9662_v60, 344  ;;  %3719 = vbcast.lane.b32.xlu1 %v9610_v50, 272 }
 0x4d9   :  { %v9696_v37 = vpop.permute.xlu0 %3589  ;;  %v9698_v0 = vpop.permute.xlu1 %3483 }
 0x4da   :  { %13302 = vst [vmem:[#allocation203_spill] sm:$0xff] %v9696_v37  ;;  %v9714_v37 = vrot.slane %v9506_v57, %v13305_v5 }
 0x4db   :  { %3830 = vbcast.lane.b32.xlu0 %v9662_v60, 360  ;;  %3727 = vbcast.lane.b32.xlu1 %v9610_v50, 288 }
 0x4dd   :  { %v9702_v34 = vpop.permute.xlu0 %3597  ;;  %v9704_v25 = vpop.permute.xlu1 %3491 }
 0x4de   :  { %13303 = vst [vmem:[#allocation204_spill] sm:$0xff] %v9702_v34 }
 0x4df   :  { %3838 = vbcast.lane.b32.xlu0 %v9662_v60, 376  ;;  %3735 = vbcast.lane.b32.xlu1 %v9610_v50, 304 }
 0x4e1   :  { %v9708_v46 = vpop.permute.xlu0 %3605  ;;  %v9710_v49 = vpop.permute.xlu1 %3499 }
 0x4e2   :  { %13304 = vst [vmem:[#allocation205_spill] sm:$0xff] %v9708_v46 }
 0x4e3   :  { %3849 = vbcast.lane.b32.xlu0 %v9714_v37, 264  ;;  %3743 = vbcast.lane.b32.xlu1 %v9610_v50, 320 }
 0x4e5   :  { %v9718_v62 = vpop.permute.xlu0 %3613  ;;  %v9720_v34 = vpop.permute.xlu1 %3510 }
 0x4e6   :  { %13306 = vst [vmem:[#allocation206_spill] sm:$0xff] %v9718_v62 }
 0x4e7   :  { %3857 = vbcast.lane.b32.xlu0 %v9714_v37, 280  ;;  %3751 = vbcast.lane.b32.xlu1 %v9610_v50, 336 }
 0x4e9   :  { %v9724_v41 = vpop.permute.xlu0 %3621  ;;  %v9726_v46 = vpop.permute.xlu1 %3518 }
 0x4ea   :  { %13307 = vst [vmem:[#allocation207_spill] sm:$0xff] %v9724_v41 }
 0x4eb   :  { %3865 = vbcast.lane.b32.xlu0 %v9714_v37, 296  ;;  %3759 = vbcast.lane.b32.xlu1 %v9610_v50, 352 }
 0x4ed   :  { %v9730_v57 = vpop.permute.xlu0 %3629  ;;  %v9732_v5 = vpop.permute.xlu1 %3526 }
 0x4ee   :  { %13308 = vst [vmem:[#allocation208_spill] sm:$0xff] %v9730_v57 }
 0x4ef   :  { %3873 = vbcast.lane.b32.xlu0 %v9714_v37, 312  ;;  %3767 = vbcast.lane.b32.xlu1 %v9610_v50, 368 }
 0x4f1   :  { %v9736_v62 = vpop.permute.xlu0 %3637  ;;  %v9738_v22 = vpop.permute.xlu1 %3534 }
 0x4f2   :  { %13309 = vst [vmem:[#allocation209_spill] sm:$0xff] %v9736_v62 }
 0x4f3   :  { %3881 = vbcast.lane.b32.xlu0 %v9714_v37, 328  ;;  %3778 = vbcast.lane.b32.xlu1 %v9662_v60, 256 }
 0x4f5   :  { %v9742_v41 = vpop.permute.xlu0 %3648  ;;  %v9744_v23 = vpop.permute.xlu1 %3542 }
 0x4f6   :  { %13310 = vst [vmem:[#allocation210_spill] sm:$0xff] %v9742_v41  ;;  %v13313_v41 = vld [vmem:[#allocation16_spill] sm:$0xff] }
 0x4f7   :  { %3889 = vbcast.lane.b32.xlu0 %v9714_v37, 344  ;;  %3786 = vbcast.lane.b32.xlu1 %v9662_v60, 272  ;;  %vm3026_vm8 = vcmp.ge.s32.totalorder %v13313_v41, 4 }
 0x4f8   :  { %vm3237_vm13 = vmand %vm3026_vm8, %vm3221_vm14  ;;  %vm12412_vm8 = vcmp.ne.s32.totalorder %v9496_v52, 0 }
 0x4f9   :  { %v9748_v57 = vpop.permute.xlu0 %3656  ;;  %v9750_v19 = vpop.permute.xlu1 %3550 }
 0x4fa   :  { %13311 = vst [vmem:[#allocation211_spill] sm:$0xff] %v9748_v57 }
 0x4fb   :  { %3897 = vbcast.lane.b32.xlu0 %v9714_v37, 360  ;;  %3794 = vbcast.lane.b32.xlu1 %v9662_v60, 288 }
 0x4fd   :  { %v9754_v50 = vpop.permute.xlu0 %3664  ;;  %v9756_v62 = vpop.permute.xlu1 %3558 }
 0x4fe   :  { %13312 = vst [vmem:[#allocation212_spill] sm:$0xff] %v9754_v50  ;;  %v9770_v50 = vsel %vm3237_vm13, %v9582_v1, 0.0  ;;  %v13319_v1 = vld [vmem:[#allocation23_spill] sm:$0xff] }
 0x4ff   :  { %3905 = vbcast.lane.b32.xlu0 %v9714_v37, 376  ;;  %3802 = vbcast.lane.b32.xlu1 %v9662_v60, 304  ;;  %13315 = vst [vmem:[#allocation213_spill] sm:$0xff] %v9770_v50  ;;  %vm3031_vm1 = vcmp.ge.s32.totalorder %v13319_v1, 4  ;;  %v13322_v1 = vld [vmem:[#allocation27_spill] sm:$0xff] }
 0x500   :  { %vm3242_vm11 = vmand %vm3031_vm1, %vm12424_vm2  ;;  %vm3035_vm9 = vcmp.ge.s32.totalorder %v13322_v1, 4 }
 0x501   :  { %v9764_v57 = vpop.permute.xlu0 %3672  ;;  %v9766_v15 = vpop.permute.xlu1 %3566  ;;  %vm3246_vm5 = vmand %vm3035_vm9, %vm3230_vm3  ;;  %vm12418_vm9 = vcmp.ne.s32.totalorder %v9536_v14, 0 }
 0x502   :  { %13314 = vst [vmem:[#allocation16_spill] sm:$0xff] %v9764_v57  ;;  %v9783_v57 = vsel %vm3240_vm12, %v9600_v51, 0.0  ;;  %vm3220_vm12 = vcmp.ne.s32.totalorder %v9534_v31, 0 }
 0x503   :  { %4295 = vperm.xlu0 %6697, %v9770_v50   ;;  %3810 = vbcast.lane.b32.xlu1 %v9662_v60, 320  ;;  %13318 = vst [vmem:[#allocation214_spill] sm:$0xff] %v9783_v57 }
 0x505   :  { %v9777_v41 = vpop.permute.xlu0 %3680  ;;  %v9779_v3 = vpop.permute.xlu1 %3577 }
 0x506   :  { %13317 = vst [vmem:[#allocation21_spill] sm:$0xff] %v9777_v41  ;;  %v9795_v41 = vsel %vm3242_vm11, %v9616_v24, 0.0 }
 0x507   :  { %4304 = vperm.xlu0 %6697, %v9783_v57   ;;  %3818 = vbcast.lane.b32.xlu1 %v9662_v60, 336  ;;  %13320 = vst [vmem:[#allocation23_spill] sm:$0xff] %v9795_v41 }
 0x509   :  { %v9790_v44 = vpop.permute.xlu0 %3688  ;;  %v9792_v50 = vpop.permute.xlu1 %3585 }
 0x50b   :  { %4310 = vperm.xlu0 %6697, %v9795_v41   ;;  %3826 = vbcast.lane.b32.xlu1 %v9662_v60, 352 }
 0x50d   :  { %v9799_v51 = vpop.permute.xlu0 %3696  ;;  %v9801_v57 = vpop.permute.xlu1 %3593 }
 0x50e   :  { %13321 = vst [vmem:[#allocation215_spill] sm:$0xff] %v9799_v51  ;;  %v9815_v51 = vsel %vm3246_vm5, %v9634_v21, 0.0  ;;  %v13328_v21 = vld [vmem:[#allocation32_spill] sm:$0xff] }
 0x50f   :  { %4316 = vperm.xlu0 %6697, %v9577_v39   ;;  %3834 = vbcast.lane.b32.xlu1 %v9662_v60, 368  ;;  %13324 = vst [vmem:[#allocation216_spill] sm:$0xff] %v9815_v51  ;;  %v13325_v39 = vld [vmem:[#allocation30_spill] sm:$0xff]  ;;  %vm3039_vm13 = vcmp.ge.s32.totalorder %v13328_v21, 4 }
 0x510   :  { %vm3037_vm6 = vcmp.ge.s32.totalorder %v13325_v39, 4  ;;  %vm3250_vm7 = vmand %vm3039_vm13, %vm12412_vm8 }
 0x511   :  { %v9809_v24 = vpop.permute.xlu0 %3704  ;;  %v9811_v41 = vpop.permute.xlu1 %3601  ;;  %vm3248_vm0 = vmand %vm3037_vm6, %vm12430_vm15 }
 0x512   :  { %13323 = vst [vmem:[#allocation27_spill] sm:$0xff] %v9809_v24  ;;  %v9828_v24 = vsel %vm3248_vm0, %v9646_v54, 0.0  ;;  %v13331_v54 = vld [vmem:[#allocation34_spill] sm:$0xff] }
 0x513   :  { %4322 = vperm.xlu0 %6697, %v9815_v51   ;;  %3845 = vbcast.lane.b32.xlu1 %v9714_v37, 256  ;;  %13327 = vst [vmem:[#allocation217_spill] sm:$0xff] %v9828_v24  ;;  %vm3041_vm1 = vcmp.ge.s32.totalorder %v13331_v54, 4 }
 0x514   :  { %vm3252_vm11 = vmand %vm3041_vm1, %vm3220_vm12 }
 0x515   :  { %v9822_v60 = vpop.permute.xlu0 %3715  ;;  %v9824_v1 = vpop.permute.xlu1 %3609 }
 0x516   :  { %13326 = vst [vmem:[#allocation30_spill] sm:$0xff] %v9822_v60  ;;  %v9841_v60 = vsel %vm3250_vm7, %v9658_v10, 0.0  ;;  %v13334_v10 = vld [vmem:[#allocation36_spill] sm:$0xff]  ;;  %vm3047_vm7 = vcmp.ge.s32.totalorder %v8113_v29, 4 }
 0x517   :  { %4328 = vperm.xlu0 %6697, %v9828_v24   ;;  %3853 = vbcast.lane.b32.xlu1 %v9714_v37, 272  ;;  %13330 = vst [vmem:[#allocation218_spill] sm:$0xff] %v9841_v60  ;;  %vm3043_vm5 = vcmp.ge.s32.totalorder %v13334_v10, 4  ;;  %vm3258_vm1 = vmand %vm3047_vm7, %vm12424_vm2 }
 0x518   :  { %vm3254_vm6 = vmand %vm3043_vm5, %vm12418_vm9 }
 0x519   :  { %v9835_v39 = vpop.permute.xlu0 %3723  ;;  %v9837_v51 = vpop.permute.xlu1 %3617 }
 0x51a   :  { %13329 = vst [vmem:[#allocation32_spill] sm:$0xff] %v9835_v39  ;;  %v9854_v39 = vsel %vm3252_vm11, %v9668_v47, 0.0  ;;  %v13337_v47 = vld [vmem:[#allocation38_spill] sm:$0xff]  ;;  %vm3049_vm11 = vcmp.ge.s32.totalorder %v8143_v28, 4 }
 0x51b   :  { %4334 = vperm.xlu0 %6697, %v9841_v60   ;;  %3861 = vbcast.lane.b32.xlu1 %v9714_v37, 288  ;;  %13333 = vst [vmem:[#allocation219_spill] sm:$0xff] %v9854_v39  ;;  %vm3045_vm0 = vcmp.ge.s32.totalorder %v13337_v47, 4  ;;  %vm3260_vm5 = vmand %vm3049_vm11, %vm12426_vm4  ;;  %v13343_v28 = vld [vmem:[#allocation42_spill] sm:$0xff] }
 0x51c   :  { %vm3256_vm13 = vmand %vm3045_vm0, %vm12421_vm10 }
 0x51d   :  { %v9848_v21 = vpop.permute.xlu0 %3731  ;;  %v9850_v24 = vpop.permute.xlu1 %3625 }
 0x51e   :  { %13332 = vst [vmem:[#allocation34_spill] sm:$0xff] %v9848_v21  ;;  %v9866_v21 = vsel %vm3254_vm6, %v9674_v58, 0.0 }
 0x51f   :  { %4340 = vperm.xlu0 %6697, %v9854_v39   ;;  %3869 = vbcast.lane.b32.xlu1 %v9714_v37, 304  ;;  %13336 = vst [vmem:[#allocation220_spill] sm:$0xff] %v9866_v21 }
 0x521   :  { %v9861_v54 = vpop.permute.xlu0 %3739  ;;  %v9863_v60 = vpop.permute.xlu1 %3633 }
 0x522   :  { %13335 = vst [vmem:[#allocation36_spill] sm:$0xff] %v9861_v54  ;;  %v9878_v54 = vsel %vm3256_vm13, %v9680_v43, 0.0  ;;  %vm3051_vm13 = vcmp.ge.s32.totalorder %v13343_v28, 4 }
 0x523   :  { %4346 = vperm.xlu0 %6697, %v9866_v21   ;;  %3877 = vbcast.lane.b32.xlu1 %v9714_v37, 320  ;;  %13338 = vst [vmem:[#allocation38_spill] sm:$0xff] %v9878_v54  ;;  %v9890_v21 = vsel %vm3258_vm1, %v9686_v6, 0.0  ;;  %vm3262_vm7 = vmand %vm3051_vm13, %vm3230_vm3 }
 0x524   :  { %13340 = vst [vmem:[#allocation222_spill] sm:$0xff] %v9890_v21 }
 0x525   :  { %v9873_v10 = vpop.permute.xlu0 %3747  ;;  %v9875_v39 = vpop.permute.xlu1 %3644 }
 0x527   :  { %4352 = vperm.xlu0 %6697, %v9878_v54   ;;  %3885 = vbcast.lane.b32.xlu1 %v9714_v37, 336  ;;  %v9902_v54 = vsel %vm3260_vm5, %v9692_v56, 0.0 }
 0x528   :  { %13341 = vst [vmem:[#allocation223_spill] sm:$0xff] %v9902_v54 }
 0x529   :  { %v9885_v58 = vpop.permute.xlu0 %3755  ;;  %v9887_v47 = vpop.permute.xlu1 %3652 }
 0x52a   :  { %13339 = vst [vmem:[#allocation221_spill] sm:$0xff] %v9885_v58  ;;  %v13342_v58 = vld [vmem:[#allocation17_spill] sm:$0xff] }
 0x52b   :  { %4358 = vperm.xlu0 %6697, %v9890_v21   ;;  %3893 = vbcast.lane.b32.xlu1 %v9714_v37, 352  ;;  %vm3025_vm6 = vcmp.ge.s32.totalorder %v13342_v58, 4  ;;  %v9920_v58 = vsel %vm3262_vm7, %v9698_v0, 0.0 }
 0x52c   :  { %vm3236_vm0 = vmand %vm3025_vm6, %vm3220_vm12  ;;  %13345 = vst [vmem:[#allocation42_spill] sm:$0xff] %v9920_v58  ;;  %vm3223_vm6 = vcmp.ne.s32.totalorder %v9543_v8, 0  ;;  %v13719_v8 = vld [vmem:[#allocation183_spill] sm:$0xff] }
 0x52d   :  { %v9897_v29 = vpop.permute.xlu0 %3763  ;;  %v9899_v43 = vpop.permute.xlu1 %3660  ;;  %v9917_v56 = vsel %vm3236_vm0, %v9575_v40, 0.0 }
 0x52e   :  { %13344 = vst [vmem:[#allocation17_spill] sm:$0xff] %v9917_v56 }
 0x52f   :  { %4364 = vperm.xlu0 %6697, %v9902_v54   ;;  %3901 = vbcast.lane.b32.xlu1 %v9714_v37, 368  ;;  %v13346_v54 = vld [vmem:[#allocation19_spill] sm:$0xff]  ;;  %v13347_v37 = vld [vmem:[#allocation44_spill] sm:$0xff] }
 0x530   :  { %vm3027_vm1 = vcmp.ge.s32.totalorder %v13346_v54, 4  ;;  %vm3053_vm5 = vcmp.ge.s32.totalorder %v13347_v37, 4  ;;  %v13351_v37 = vld [vmem:[#allocation46_spill] sm:$0xff] }
 0x531   :  { %v9912_v6 = vpop.permute.xlu0 %3771  ;;  %v9914_v21 = vpop.permute.xlu1 %3668  ;;  %vm3238_vm11 = vmand %vm3027_vm1, %vm12418_vm9  ;;  %vm3055_vm1 = vcmp.ge.s32.totalorder %v13351_v37, 4  ;;  %v13355_v37 = vld [vmem:[#allocation20_spill] sm:$0xff] }
 0x532   :  { %vm3264_vm0 = vmand %vm3053_vm5, %vm12430_vm15  ;;  %v9936_v54 = vsel %vm3238_vm11, %v9588_v61, 0.0  ;;  %vm12415_vm11 = vcmp.ne.s32.totalorder %v9546_v42, 0 }
 0x533   :  { %4370 = vperm.xlu0 %6697, %v9920_v58   ;;  %4292 = vperm.xlu1 %6696, %v9917_v56   ;;  %13348 = vst [vmem:[#allocation19_spill] sm:$0xff] %v9936_v54  ;;  %v9939_v28 = vsel %vm3264_vm0, %v9704_v25, 0.0  ;;  %v13350_v58 = vld [vmem:[#allocation18_spill] sm:$0xff]  ;;  %vm3266_vm5 = vmand %vm3055_vm1, %vm12412_vm8  ;;  %vm3227_vm8 = vcmp.ne.s32.totalorder %v9550_v18, 0  ;;  %v13728_v18 = vld [vmem:[#allocation187_spill] sm:$0xff] }
 0x534   :  { %13349 = vst [vmem:[#allocation44_spill] sm:$0xff] %v9939_v28  ;;  %vm3028_vm13 = vcmp.ge.s32.totalorder %v13350_v58, 4  ;;  %v9958_v58 = vsel %vm3266_vm5, %v9710_v49, 0.0 }
 0x535   :  { %v9931_v40 = vpop.permute.xlu0 %3782  ;;  %v9933_v0 = vpop.permute.xlu1 %3676  ;;  %vm3239_vm7 = vmand %vm3028_vm13, %vm3223_vm6  ;;  %13353 = vst [vmem:[#allocation46_spill] sm:$0xff] %v9958_v58  ;;  %vm3030_vm13 = vcmp.ge.s32.totalorder %v13355_v37, 4  ;;  %v13359_v37 = vld [vmem:[#allocation51_spill] sm:$0xff] }
 0x536   :  { %v9955_v25 = vsel %vm3239_vm7, %v9594_v27, 0.0  ;;  %vm3241_vm7 = vmand %vm3030_vm13, %vm12415_vm11  ;;  %vm3059_vm13 = vcmp.ge.s32.totalorder %v13359_v37, 4  ;;  %vm3229_vm11 = vcmp.ne.s32.totalorder %v9553_v2, 0  ;;  %v13363_v37 = vld [vmem:[#allocation52_spill] sm:$0xff] }
 0x537   :  { %4376 = vperm.xlu0 %6697, %v9939_v28   ;;  %4298 = vperm.xlu1 %6696, %v9936_v54   ;;  %13352 = vst [vmem:[#allocation18_spill] sm:$0xff] %v9955_v25  ;;  %v13354_v28 = vld [vmem:[#allocation48_spill] sm:$0xff]  ;;  %v13366_v54 = vld [vmem:[#allocation26_spill] sm:$0xff] }
 0x538   :  { %vm3057_vm0 = vcmp.ge.s32.totalorder %v13354_v28, 4  ;;  %v9974_v28 = vsel %vm3241_vm7, %v9606_v9, 0.0  ;;  %vm3270_vm7 = vmand %vm3059_vm13, %vm12418_vm9  ;;  %vm3061_vm13 = vcmp.ge.s32.totalorder %v13363_v37, 4  ;;  %vm3231_vm9 = vcmp.ne.s32.totalorder %v9557_v38, 0  ;;  %v13367_v37 = vld [vmem:[#allocation54_spill] sm:$0xff] }
 0x539   :  { %v9949_v56 = vpop.permute.xlu0 %3790  ;;  %v9951_v61 = vpop.permute.xlu1 %3684  ;;  %vm3268_vm1 = vmand %vm3057_vm0, %vm3220_vm12  ;;  %13356 = vst [vmem:[#allocation48_spill] sm:$0xff] %v9974_v28 }
 0x53b   :  { %4382 = vperm.xlu0 %6697, %v9958_v58   ;;  %4301 = vperm.xlu1 %6696, %v9955_v25   ;;  %v9977_v58 = vsel %vm3268_vm1, %v9720_v34, 0.0  ;;  %v13358_v25 = vld [vmem:[#allocation22_spill] sm:$0xff] }
 0x53c   :  { %13357 = vst [vmem:[#allocation20_spill] sm:$0xff] %v9977_v58  ;;  %vm3032_vm5 = vcmp.ge.s32.totalorder %v13358_v25, 4 }
 0x53d   :  { %v9969_v27 = vpop.permute.xlu0 %3798  ;;  %v9971_v49 = vpop.permute.xlu1 %3692  ;;  %vm3243_vm0 = vmand %vm3032_vm5, %vm3227_vm8 }
 0x53e   :  { %v9993_v25 = vsel %vm3243_vm0, %v9622_v63, 0.0  ;;  %vm3272_vm0 = vmand %vm3061_vm13, %vm12421_vm10  ;;  %vm3063_vm13 = vcmp.ge.s32.totalorder %v13367_v37, 4  ;;  %vm3233_vm10 = vcmp.ne.s32.totalorder %v9564_v13, 0 }
 0x53f   :  { %4388 = vperm.xlu0 %6697, %v9977_v58   ;;  %4307 = vperm.xlu1 %6696, %v9974_v28   ;;  %13360 = vst [vmem:[#allocation22_spill] sm:$0xff] %v9993_v25  ;;  %v9996_v58 = vsel %vm3270_vm7, %v9726_v46, 0.0  ;;  %v13362_v28 = vld [vmem:[#allocation24_spill] sm:$0xff]  ;;  %vm3036_vm7 = vcmp.ge.s32.totalorder %v13366_v54, 4 }
 0x540   :  { %13361 = vst [vmem:[#allocation51_spill] sm:$0xff] %v9996_v58  ;;  %vm3034_vm1 = vcmp.ge.s32.totalorder %v13362_v28, 4 }
 0x541   :  { %v9988_v9 = vpop.permute.xlu0 %3806  ;;  %v9990_v34 = vpop.permute.xlu1 %3700  ;;  %vm3245_vm5 = vmand %vm3034_vm1, %vm3229_vm11 }
 0x542   :  { %v10012_v28 = vsel %vm3245_vm5, %v9628_v7, 0.0  ;;  %vm3247_vm1 = vmand %vm3036_vm7, %vm3231_vm9 }
 0x543   :  { %4394 = vperm.xlu0 %6697, %v9996_v58   ;;  %4313 = vperm.xlu1 %6696, %v9993_v25   ;;  %13364 = vst [vmem:[#allocation24_spill] sm:$0xff] %v10012_v28  ;;  %v10015_v58 = vsel %vm3272_vm0, %v9732_v5, 0.0  ;;  %vm3274_vm5 = vmand %vm3063_vm13, %vm12424_vm2  ;;  %v10031_v54 = vsel %vm3247_vm1, %v9640_v32, 0.0  ;;  %vm3065_vm13 = vcmp.ge.s32.totalorder %v8472_v48, 4  ;;  %vm3235_vm2 = vcmp.ne.s32.totalorder %v9568_v33, 0 }
 0x544   :  { %13365 = vst [vmem:[#allocation52_spill] sm:$0xff] %v10015_v58  ;;  %13368 = vst [vmem:[#allocation26_spill] sm:$0xff] %v10031_v54 }
 0x545   :  { %v10007_v63 = vpop.permute.xlu0 %3814  ;;  %v10009_v46 = vpop.permute.xlu1 %3711  ;;  %vm3276_vm1 = vmand %vm3065_vm13, %vm12426_vm4  ;;  %vm3067_vm13 = vcmp.ge.s32.totalorder %v8512_v53, 4  ;;  %v13377_v53 = vld [vmem:[#allocation58_spill] sm:$0xff] }
 0x546   :  { %v10053_v37 = vsel %vm3276_vm1, %v9744_v23, 0.0  ;;  %vm3278_vm4 = vmand %vm3067_vm13, %vm3230_vm3 }
 0x547   :  { %4400 = vperm.xlu0 %6697, %v10015_v58   ;;  %4319 = vperm.xlu1 %6696, %v10012_v28   ;;  %v10034_v58 = vsel %vm3274_vm5, %v9738_v22, 0.0  ;;  %v13370_v28 = vld [vmem:[#allocation29_spill] sm:$0xff]  ;;  %13372 = vst [vmem:[#allocation224_spill] sm:$0xff] %v10053_v37 }
 0x548   :  { %13369 = vst [vmem:[#allocation54_spill] sm:$0xff] %v10034_v58  ;;  %vm3038_vm0 = vcmp.ge.s32.totalorder %v13370_v28, 4 }
 0x549   :  { %v10026_v7 = vpop.permute.xlu0 %3822  ;;  %v10028_v5 = vpop.permute.xlu1 %3719  ;;  %vm3249_vm7 = vmand %vm3038_vm0, %vm3233_vm10 }
 0x54a   :  { %v10050_v28 = vsel %vm3249_vm7, %v9652_v36, 0.0 }
 0x54b   :  { %4406 = vperm.xlu0 %6697, %v10034_v58   ;;  %4325 = vperm.xlu1 %6696, %v10031_v54   ;;  %13371 = vst [vmem:[#allocation29_spill] sm:$0xff] %v10050_v28  ;;  %v13373_v58 = vld [vmem:[#allocation31_spill] sm:$0xff] }
 0x54c   :  { %vm3040_vm5 = vcmp.ge.s32.totalorder %v13373_v58, 4  ;;  %v10071_v58 = vsel %vm3278_vm4, %v9750_v19, 0.0 }
 0x54d   :  { %v10045_v32 = vpop.permute.xlu0 %3830  ;;  %v10047_v22 = vpop.permute.xlu1 %3727  ;;  %vm3251_vm0 = vmand %vm3040_vm5, %vm3235_vm2  ;;  %13375 = vst [vmem:[#allocation225_spill] sm:$0xff] %v10071_v58  ;;  %vm3069_vm5 = vcmp.ge.s32.totalorder %v13377_v53, 4  ;;  %v13382_v53 = vld [vmem:[#allocation60_spill] sm:$0xff] }
 0x54e   :  { %v10068_v23 = vsel %vm3251_vm0, %v9580_v11, 0.0  ;;  %vm3280_vm13 = vmand %vm3069_vm5, %vm12430_vm15  ;;  %vm13383_vm5 = vcmp.ne.s32.totalorder %v9496_v52, 0 }
 0x54f   :  { %4412 = vperm.xlu0 %6697, %v10053_v37   ;;  %4331 = vperm.xlu1 %6696, %v10050_v28   ;;  %13374 = vst [vmem:[#allocation31_spill] sm:$0xff] %v10068_v23  ;;  %v13376_v37 = vld [vmem:[#allocation33_spill] sm:$0xff] }
 0x550   :  { %vm3042_vm7 = vcmp.ge.s32.totalorder %v13376_v37, 4  ;;  %v10089_v37 = vsel %vm3280_vm13, %v9756_v62, 0.0 }
 0x551   :  { %v10063_v48 = vpop.permute.xlu0 %3838  ;;  %v10065_v36 = vpop.permute.xlu1 %3735  ;;  %vm3253_vm1 = vmand %vm3042_vm7, %vm3221_vm14  ;;  %13380 = vst [vmem:[#allocation226_spill] sm:$0xff] %v10089_v37  ;;  %vm3071_vm7 = vcmp.ge.s32.totalorder %v13382_v53, 4  ;;  %v13388_v53 = vld [vmem:[#allocation37_spill] sm:$0xff] }
 0x552   :  { %v10086_v19 = vsel %vm3253_vm1, %v9586_v16, 0.0  ;;  %vm3282_vm15 = vmand %vm3071_vm7, %vm13383_vm5  ;;  %vm3046_vm13 = vcmp.ge.s32.totalorder %v13388_v53, 4  ;;  %vm13389_vm7 = vcmp.ne.s32.totalorder %v9546_v42, 0  ;;  %v13394_v53 = vld [vmem:[#allocation64_spill] sm:$0xff] }
 0x553   :  { %4418 = vperm.xlu0 %6697, %v10071_v58   ;;  %4337 = vperm.xlu1 %6696, %v10068_v23   ;;  %13379 = vst [vmem:[#allocation58_spill] sm:$0xff] %v10086_v19  ;;  %v13381_v58 = vld [vmem:[#allocation35_spill] sm:$0xff]  ;;  %vm3257_vm5 = vmand %vm3046_vm13, %vm13389_vm7  ;;  %vm13395_vm13 = vcmp.ne.s32.totalorder %v9536_v14, 0 }
 0x554   :  { %vm3044_vm4 = vcmp.ge.s32.totalorder %v13381_v58, 4  ;;  %v10107_v58 = vsel %vm3282_vm15, %v9766_v15, 0.0  ;;  %v10122_v15 = vsel %vm3257_vm5, %v9598_v45, 0.0 }
 0x555   :  { %v10081_v28 = vpop.permute.xlu0 %3849  ;;  %v10083_v11 = vpop.permute.xlu1 %3743  ;;  %vm3255_vm0 = vmand %vm3044_vm4, %vm3223_vm6  ;;  %13386 = vst [vmem:[#allocation227_spill] sm:$0xff] %v10107_v58 }
 0x556   :  { %13378 = vst [vmem:[#allocation33_spill] sm:$0xff] %v10081_v28  ;;  %v10104_v62 = vsel %vm3255_vm0, %v9592_v12, 0.0  ;;  %13391 = vst [vmem:[#allocation37_spill] sm:$0xff] %v10122_v15 }
 0x557   :  { %4424 = vperm.xlu0 %6697, %v10089_v37   ;;  %4343 = vperm.xlu1 %6696, %v10086_v19   ;;  %13385 = vst [vmem:[#allocation60_spill] sm:$0xff] %v10104_v62  ;;  %v13387_v37 = vld [vmem:[#allocation62_spill] sm:$0xff] }
 0x558   :  { %vm3073_vm1 = vcmp.ge.s32.totalorder %v13387_v37, 4 }
 0x559   :  { %v10099_v23 = vpop.permute.xlu0 %3857  ;;  %v10101_v16 = vpop.permute.xlu1 %3751  ;;  %vm3284_vm4 = vmand %vm3073_vm1, %vm3220_vm12  ;;  %vm3075_vm1 = vcmp.ge.s32.totalorder %v13394_v53, 4 }
 0x55a   :  { %13384 = vst [vmem:[#allocation35_spill] sm:$0xff] %v10099_v23  ;;  %v10125_v37 = vsel %vm3284_vm4, %v9779_v3, 0.0  ;;  %vm3286_vm7 = vmand %vm3075_vm1, %vm13395_vm13  ;;  %vm13400_vm1 = vcmp.ne.s32.totalorder %v9476_v55, 0 }
 0x55b   :  { %4430 = vperm.xlu0 %6697, %v10107_v58   ;;  %4349 = vperm.xlu1 %6696, %v10104_v62   ;;  %13392 = vst [vmem:[#allocation228_spill] sm:$0xff] %v10125_v37  ;;  %v13393_v58 = vld [vmem:[#allocation40_spill] sm:$0xff]  ;;  %v10141_v3 = vsel %vm3286_vm7, %v9792_v50, 0.0  ;;  %v13401_v50 = vld [vmem:[#allocation190_spill] sm:$0xff] }
 0x55c   :  { %vm3048_vm15 = vcmp.ge.s32.totalorder %v13393_v58, 4  ;;  %13397 = vst [vmem:[#allocation64_spill] sm:$0xff] %v10141_v3 }
 0x55d   :  { %v10117_v19 = vpop.permute.xlu0 %3865  ;;  %v10119_v12 = vpop.permute.xlu1 %3759  ;;  %vm3259_vm0 = vmand %vm3048_vm15, %vm3227_vm8  ;;  %vm3077_vm15 = vcmp.ge.s32.totalorder %v8714_v35, 4  ;;  %v13405_v35 = vld [vmem:[#allocation67_spill] sm:$0xff] }
 0x55e   :  { %13390 = vst [vmem:[#allocation62_spill] sm:$0xff] %v10117_v19  ;;  %v10138_v45 = vsel %vm3259_vm0, %v9604_v17, 0.0  ;;  %vm3288_vm0 = vmand %vm3077_vm15, %vm13400_vm1  ;;  %vm13407_vm15 = vcmp.ne.s32.totalorder %v9480_v4, 0 }
 0x55f   :  { %4436 = vperm.xlu0 %6697, %v10125_v37   ;;  %4355 = vperm.xlu1 %6696, %v10122_v15   ;;  %13396 = vst [vmem:[#allocation40_spill] sm:$0xff] %v10138_v45  ;;  %v13399_v37 = vld [vmem:[#allocation39_spill] sm:$0xff]  ;;  %v10159_v15 = vsel %vm3288_vm0, %v9801_v57, 0.0 }
 0x560   :  { %vm3050_vm4 = vcmp.ge.s32.totalorder %v13399_v37, 4  ;;  %13403 = vst [vmem:[#allocation190_spill] sm:$0xff] %v10159_v15  ;;  %v13404_v37 = vld [vmem:[#allocation41_spill] sm:$0xff]  ;;  %v13408_v57 = vld [vmem:[#allocation191_spill] sm:$0xff] }
 0x561   :  { %v10135_v62 = vpop.permute.xlu1 %3767  ;;  %v10143_v58 = vpop.permute.xlu0 %3873  ;;  %vm3261_vm5 = vmand %vm3050_vm4, %vm3229_vm11  ;;  %vm3052_vm13 = vcmp.ge.s32.totalorder %v13404_v37, 4  ;;  %vm3079_vm4 = vcmp.ge.s32.totalorder %v13405_v35, 4  ;;  %v13412_v35 = vld [vmem:[#allocation69_spill] sm:$0xff] }
 0x562   :  { %13398 = vst [vmem:[#allocation229_spill] sm:$0xff] %v10143_v58  ;;  %v10156_v53 = vsel %vm3261_vm5, %v13401_v50, 0.0  ;;  %vm3263_vm7 = vmand %vm3052_vm13, %vm3231_vm9  ;;  %vm3081_vm13 = vcmp.ge.s32.totalorder %v13412_v35, 4  ;;  %v13419_v35 = vld [vmem:[#allocation88_spill] sm:$0xff] }
 0x563   :  { %4442 = vperm.xlu0 %6697, %v10141_v3   ;;  %4361 = vperm.xlu1 %6696, %v10138_v45   ;;  %13402 = vst [vmem:[#allocation39_spill] sm:$0xff] %v10156_v53  ;;  %vm3290_vm5 = vmand %vm3079_vm4, %vm13407_vm15  ;;  %v10174_v45 = vsel %vm3263_vm7, %v13408_v57, 0.0  ;;  %vm13413_vm4 = vcmp.ne.s32.totalorder %v9484_v20, 0  ;;  %v13414_v57 = vld [vmem:[#allocation192_spill] sm:$0xff] }
 0x564   :  { %13409 = vst [vmem:[#allocation67_spill] sm:$0xff] %v10174_v45  ;;  %v10177_v37 = vsel %vm3290_vm5, %v9811_v41, 0.0  ;;  %vm3292_vm15 = vmand %vm3081_vm13, %vm13413_vm4 }
 0x565   :  { %v10153_v17 = vpop.permute.xlu1 %3778  ;;  %v10167_v3 = vpop.permute.xlu0 %3881  ;;  %13410 = vst [vmem:[#allocation191_spill] sm:$0xff] %v10177_v37  ;;  %v10193_v41 = vsel %vm3292_vm15, %v9824_v1, 0.0  ;;  %v13420_v1 = vld [vmem:[#allocation193_spill] sm:$0xff] }
 0x566   :  { %13406 = vst [vmem:[#allocation41_spill] sm:$0xff] %v10167_v3  ;;  %13416 = vst [vmem:[#allocation69_spill] sm:$0xff] %v10193_v41 }
 0x567   :  { %4448 = vperm.xlu0 %6697, %v10159_v15   ;;  %4367 = vperm.xlu1 %6696, %v10156_v53   ;;  %v13411_v15 = vld [vmem:[#allocation43_spill] sm:$0xff] }
 0x568   :  { %vm3054_vm1 = vcmp.ge.s32.totalorder %v13411_v15, 4 }
 0x569   :  { %v10171_v50 = vpop.permute.xlu1 %3786  ;;  %vm3265_vm0 = vmand %vm3054_vm1, %vm3233_vm10  ;;  %v10195_v15 = vpop.permute.xlu0 %3889  ;;  %vm3083_vm1 = vcmp.ge.s32.totalorder %v13419_v35, 4  ;;  %v13424_v35 = vld [vmem:[#allocation90_spill] sm:$0xff] }
 0x56a   :  { %v10190_v54 = vsel %vm3265_vm0, %v13414_v57, 0.0  ;;  %13417 = vst [vmem:[#allocation192_spill] sm:$0xff] %v10195_v15  ;;  %vm3294_vm0 = vmand %vm3083_vm1, %vm3230_vm3  ;;  %vm3085_vm15 = vcmp.ge.s32.totalorder %v13424_v35, 4  ;;  %v13431_v35 = vld [vmem:[#allocation71_spill] sm:$0xff] }
 0x56b   :  { %4454 = vperm.xlu0 %6697, %v10177_v37   ;;  %4373 = vperm.xlu1 %6696, %v10174_v45   ;;  %13415 = vst [vmem:[#allocation43_spill] sm:$0xff] %v10190_v54  ;;  %v13418_v37 = vld [vmem:[#allocation45_spill] sm:$0xff]  ;;  %v10211_v25 = vsel %vm3294_vm0, %v9837_v51, 0.0  ;;  %v13427_v51 = vld [vmem:[#allocation194_spill] sm:$0xff]  ;;  %v13474_v15 = vld [vmem:[#allocation75_spill] sm:$0xff] }
 0x56c   :  { %vm3056_vm7 = vcmp.ge.s32.totalorder %v13418_v37, 4  ;;  %13422 = vst [vmem:[#allocation88_spill] sm:$0xff] %v10211_v25  ;;  %v13423_v37 = vld [vmem:[#allocation47_spill] sm:$0xff] }
 0x56d   :  { %v10187_v53 = vpop.permute.xlu1 %3794  ;;  %vm3267_vm5 = vmand %vm3056_vm7, %vm3235_vm2  ;;  %vm3058_vm13 = vcmp.ge.s32.totalorder %v13423_v37, 4  ;;  %vm13426_vm7 = vcmp.ne.s32.totalorder %v9492_v26, 0 }
 0x56e   :  { %v10208_v45 = vsel %vm3267_vm5, %v13420_v1, 0.0  ;;  %vm3269_vm4 = vmand %vm3058_vm13, %vm3221_vm14  ;;  %vm3087_vm13 = vcmp.ge.s32.totalorder %v13431_v35, 4  ;;  %v13439_v35 = vld [vmem:[#allocation93_spill] sm:$0xff] }
 0x56f   :  { %4460 = vperm.xlu0 %6697, %v10193_v41   ;;  %4379 = vperm.xlu1 %6696, %v10190_v54   ;;  %13421 = vst [vmem:[#allocation45_spill] sm:$0xff] %v10208_v45  ;;  %v10219_v41 = vpop.permute.xlu0 %3897  ;;  %vm3296_vm5 = vmand %vm3085_vm15, %vm13426_vm7  ;;  %v10226_v54 = vsel %vm3269_vm4, %v13427_v51, 0.0  ;;  %vm13432_vm15 = vcmp.ne.s32.totalorder %v9496_v52, 0  ;;  %v13433_v51 = vld [vmem:[#allocation195_spill] sm:$0xff] }
 0x570   :  { %13425 = vst [vmem:[#allocation193_spill] sm:$0xff] %v10219_v41  ;;  %13428 = vst [vmem:[#allocation47_spill] sm:$0xff] %v10226_v54  ;;  %v10229_v37 = vsel %vm3296_vm5, %v9850_v24, 0.0  ;;  %vm13438_vm5 = vcmp.ne.s32.totalorder %v9546_v42, 0 }
 0x571   :  { %v10205_v57 = vpop.permute.xlu1 %3802  ;;  %13429 = vst [vmem:[#allocation90_spill] sm:$0xff] %v10229_v37  ;;  %vm3298_vm7 = vmand %vm3087_vm13, %vm13432_vm15  ;;  %vm3089_vm13 = vcmp.ge.s32.totalorder %v13439_v35, 4  ;;  %v13445_v35 = vld [vmem:[#allocation72_spill] sm:$0xff] }
 0x572   :  { %v10245_v24 = vsel %vm3298_vm7, %v9863_v60, 0.0  ;;  %v13440_v60 = vld [vmem:[#allocation196_spill] sm:$0xff] }
 0x573   :  { %4466 = vperm.xlu0 %6697, %v10211_v25   ;;  %4385 = vperm.xlu1 %6696, %v10208_v45   ;;  %v13430_v25 = vld [vmem:[#allocation50_spill] sm:$0xff] }
 0x574   :  { %vm3060_vm1 = vcmp.ge.s32.totalorder %v13430_v25, 4  ;;  %13435 = vst [vmem:[#allocation50_spill] sm:$0xff] %v10245_v24  ;;  %v10247_v25 = vpop.permute.xlu0 %3905 }
 0x575   :  { %v10223_v1 = vpop.permute.xlu1 %3810  ;;  %vm3271_vm0 = vmand %vm3060_vm1, %vm3223_vm6  ;;  %13436 = vst [vmem:[#allocation71_spill] sm:$0xff] %v10247_v25 }
 0x576   :  { %v10242_v41 = vsel %vm3271_vm0, %v13433_v51, 0.0  ;;  %vm3300_vm0 = vmand %vm3089_vm13, %vm3220_vm12 }
 0x577   :  { %4472 = vperm.xlu0 %6697, %v10229_v37   ;;  %4391 = vperm.xlu1 %6696, %v10226_v54   ;;  %13434 = vst [vmem:[#allocation194_spill] sm:$0xff] %v10242_v41  ;;  %v13437_v37 = vld [vmem:[#allocation53_spill] sm:$0xff]  ;;  %v10263_v25 = vsel %vm3300_vm0, %v9875_v39, 0.0 }
 0x578   :  { %vm3062_vm4 = vcmp.ge.s32.totalorder %v13437_v37, 4  ;;  %13442 = vst [vmem:[#allocation53_spill] sm:$0xff] %v10263_v25  ;;  %v13447_v39 = vld [vmem:[#allocation197_spill] sm:$0xff] }
 0x579   :  { %v10239_v45 = vpop.permute.xlu1 %3818  ;;  %vm3273_vm1 = vmand %vm3062_vm4, %vm13438_vm5  ;;  %vm3091_vm4 = vcmp.ge.s32.totalorder %v13445_v35, 4  ;;  %vm13446_vm5 = vcmp.ne.s32.totalorder %v9536_v14, 0  ;;  %v13452_v35 = vld [vmem:[#allocation96_spill] sm:$0xff] }
 0x57a   :  { %v10260_v54 = vsel %vm3273_vm1, %v13440_v60, 0.0  ;;  %vm3302_vm1 = vmand %vm3091_vm4, %vm13446_vm5  ;;  %vm13453_vm4 = vcmp.ne.s32.totalorder %v9476_v55, 0 }
 0x57b   :  { %4478 = vperm.xlu0 %6697, %v10245_v24   ;;  %4397 = vperm.xlu1 %6696, %v10242_v41   ;;  %13441 = vst [vmem:[#allocation195_spill] sm:$0xff] %v10260_v54  ;;  %v13444_v24 = vld [vmem:[#allocation55_spill] sm:$0xff] }
 0x57c   :  { %vm3064_vm15 = vcmp.ge.s32.totalorder %v13444_v24, 4 }
 0x57d   :  { %v10257_v51 = vpop.permute.xlu1 %3826  ;;  %vm3275_vm7 = vmand %vm3064_vm15, %vm3227_vm8  ;;  %vm3093_vm15 = vcmp.ge.s32.totalorder %v13452_v35, 4  ;;  %v13459_v35 = vld [vmem:[#allocation73_spill] sm:$0xff] }
 0x57e   :  { %v10265_v37 = vpop.permute.xlu0 %4295  ;;  %v10278_v41 = vsel %vm3275_vm7, %v13447_v39, 0.0  ;;  %vm3304_vm7 = vmand %vm3093_vm15, %vm13453_vm4  ;;  %vm13460_vm15 = vcmp.ne.s32.totalorder %v9480_v4, 0 }
 0x57f   :  { %13443 = vst [vmem:[#allocation93_spill] sm:$0xff] %v10265_v37  ;;  %4484 = vperm.xlu0 %6697, %v10263_v25   ;;  %4403 = vperm.xlu1 %6696, %v10260_v54   ;;  %13448 = vst [vmem:[#allocation196_spill] sm:$0xff] %v10278_v41  ;;  %v10281_v37 = vsel %vm3302_vm1, %v9887_v47, 0.0  ;;  %v13451_v25 = vld [vmem:[#allocation56_spill] sm:$0xff]  ;;  %v13454_v47 = vld [vmem:[#allocation198_spill] sm:$0xff] }
 0x580   :  { %13449 = vst [vmem:[#allocation55_spill] sm:$0xff] %v10281_v37  ;;  %vm3066_vm13 = vcmp.ge.s32.totalorder %v13451_v25, 4 }
 0x581   :  { %v10275_v60 = vpop.permute.xlu1 %3834  ;;  %vm3277_vm0 = vmand %vm3066_vm13, %vm3229_vm11  ;;  %vm3095_vm13 = vcmp.ge.s32.totalorder %v13459_v35, 4  ;;  %v13466_v35 = vld [vmem:[#allocation74_spill] sm:$0xff] }
 0x582   :  { %v10283_v24 = vpop.permute.xlu0 %4304  ;;  %v10296_v54 = vsel %vm3277_vm0, %v13454_v47, 0.0  ;;  %vm3306_vm0 = vmand %vm3095_vm13, %vm13460_vm15  ;;  %vm13467_vm13 = vcmp.ne.s32.totalorder %v9484_v20, 0 }
 0x583   :  { %13450 = vst [vmem:[#allocation72_spill] sm:$0xff] %v10283_v24  ;;  %4490 = vperm.xlu0 %6697, %v10281_v37   ;;  %4409 = vperm.xlu1 %6696, %v10278_v41   ;;  %13455 = vst [vmem:[#allocation197_spill] sm:$0xff] %v10296_v54  ;;  %v10299_v24 = vsel %vm3304_vm7, %v9899_v43, 0.0  ;;  %v13458_v37 = vld [vmem:[#allocation57_spill] sm:$0xff]  ;;  %v13461_v43 = vld [vmem:[#allocation199_spill] sm:$0xff] }
 0x584   :  { %13456 = vst [vmem:[#allocation56_spill] sm:$0xff] %v10299_v24  ;;  %vm3068_vm5 = vcmp.ge.s32.totalorder %v13458_v37, 4 }
 0x585   :  { %v10293_v39 = vpop.permute.xlu1 %3845  ;;  %vm3279_vm1 = vmand %vm3068_vm5, %vm3231_vm9  ;;  %vm3097_vm5 = vcmp.ge.s32.totalorder %v13466_v35, 4  ;;  %v13473_v35 = vld [vmem:[#allocation80_spill] sm:$0xff] }
 0x586   :  { %v10301_v25 = vpop.permute.xlu0 %4310  ;;  %v10314_v41 = vsel %vm3279_vm1, %v13461_v43, 0.0  ;;  %vm3308_vm1 = vmand %vm3097_vm5, %vm13467_vm13 }
 0x587   :  { %13457 = vst [vmem:[#allocation96_spill] sm:$0xff] %v10301_v25  ;;  %4496 = vperm.xlu0 %6697, %v10299_v24   ;;  %4415 = vperm.xlu1 %6696, %v10296_v54   ;;  %13462 = vst [vmem:[#allocation198_spill] sm:$0xff] %v10314_v41  ;;  %v10317_v25 = vsel %vm3306_vm0, %v9914_v21, 0.0  ;;  %v13465_v24 = vld [vmem:[#allocation59_spill] sm:$0xff]  ;;  %v13468_v21 = vld [vmem:[#allocation200_spill] sm:$0xff] }
 0x588   :  { %13463 = vst [vmem:[#allocation57_spill] sm:$0xff] %v10317_v25  ;;  %vm3070_vm4 = vcmp.ge.s32.totalorder %v13465_v24, 4 }
 0x589   :  { %v10311_v47 = vpop.permute.xlu1 %3853  ;;  %vm3281_vm7 = vmand %vm3070_vm4, %vm3233_vm10  ;;  %vm3099_vm4 = vcmp.ge.s32.totalorder %v13474_v15, 4 }
 0x58a   :  { %v10319_v37 = vpop.permute.xlu0 %4316  ;;  %v10332_v54 = vsel %vm3281_vm7, %v13468_v21, 0.0  ;;  %vm3310_vm7 = vmand %vm3099_vm4, %vm3230_vm3 }
 0x58b   :  { %13464 = vst [vmem:[#allocation73_spill] sm:$0xff] %v10319_v37  ;;  %4502 = vperm.xlu0 %6697, %v10317_v25   ;;  %4421 = vperm.xlu1 %6696, %v10314_v41   ;;  %13469 = vst [vmem:[#allocation199_spill] sm:$0xff] %v10332_v54  ;;  %v10335_v37 = vsel %vm3308_vm1, %v9933_v0, 0.0  ;;  %v13472_v25 = vld [vmem:[#allocation61_spill] sm:$0xff]  ;;  %v2458_v41 = vcvt.f32.s32 %v13473_v35  ;;  %v13480_v35 = vld [vmem:[#allocation82_spill] sm:$0xff] }
 0x58c   :  { %13470 = vst [vmem:[#allocation59_spill] sm:$0xff] %v10335_v37  ;;  %vm3072_vm15 = vcmp.ge.s32.totalorder %v13472_v25, 4  ;;  %v13475_v0 = vld [vmem:[#allocation201_spill] sm:$0xff]  ;;  %v2482_v3 = vcvt.f32.s32 %v13480_v35 }
 0x58d   :  { %v10329_v43 = vpop.permute.xlu1 %3861  ;;  %vm3283_vm0 = vmand %vm3072_vm15, %vm3235_vm2  ;;  %v2459_v15 = vshll.u32 %v2458_v41, 16  ;;  %vm13482_vm15 = vcmp.ne.s32.totalorder %v9492_v26, 0  ;;  %v13488_v41 = vld [vmem:[#allocation65_spill] sm:$0xff] }
 0x58e   :  { %v10337_v24 = vpop.permute.xlu0 %4322  ;;  %v10349_v21 = vsel %vm3283_vm0, %v13475_v0, 0.0  ;;  %v13481_v0 = vld [vmem:[#allocation77_spill] sm:$0xff]  ;;  %vm3076_vm4 = vcmp.ge.s32.totalorder %v13488_v41, 4  ;;  %v2483_v35 = vshll.u32 %v2482_v3, 16 }
 0x58f   :  { %13471 = vst [vmem:[#allocation74_spill] sm:$0xff] %v10337_v24  ;;  %4508 = vperm.xlu0 %6697, %v10335_v37   ;;  %4427 = vperm.xlu1 %6696, %v10332_v54   ;;  %13476 = vst [vmem:[#allocation200_spill] sm:$0xff] %v10349_v21  ;;  %v10352_v24 = vsel %vm3310_vm7, %v9951_v61, 0.0  ;;  %v13479_v54 = vld [vmem:[#allocation63_spill] sm:$0xff]  ;;  %vm3101_vm1 = vcmp.ge.s32.totalorder %v13481_v0, 4  ;;  %v13483_v61 = vld [vmem:[#allocation108_spill] sm:$0xff] }
 0x590   :  { %13477 = vst [vmem:[#allocation61_spill] sm:$0xff] %v10352_v24  ;;  %vm3074_vm5 = vcmp.ge.s32.totalorder %v13479_v54, 4  ;;  %vm3312_vm0 = vmand %vm3101_vm1, %vm13482_vm15  ;;  %v2457_v58 = vcvt.f32.s32 %v13483_v61  ;;  %v13489_v0 = vld [vmem:[#allocation84_spill] sm:$0xff] }
 0x591   :  { %v10354_v25 = vpop.permute.xlu1 %3869  ;;  %vm3285_vm13 = vmand %vm3074_vm5, %vm3221_vm14  ;;  %v10372_v54 = vsel %vm3312_vm0, %v9971_v49, 0.0  ;;  %v13490_v61 = vld [vmem:[#allocation100_spill] sm:$0xff]  ;;  %v13492_v49 = vld [vmem:[#allocation113_spill] sm:$0xff]  ;;  %vm13499_vm0 = vcmp.ne.s32.totalorder %v9546_v42, 0 }
 0x592   :  { %v10356_v37 = vpop.permute.xlu0 %4328  ;;  %13486 = vst [vmem:[#allocation201_spill] sm:$0xff] %v10372_v54  ;;  %vm3287_vm7 = vmand %vm3076_vm4, %vm3223_vm6  ;;  %vm3103_vm5 = vcmp.ge.s32.totalorder %v13490_v61, 4  ;;  %v2481_v41 = vcvt.f32.s32 %v13492_v49 }
 0x593   :  { %13478 = vst [vmem:[#allocation80_spill] sm:$0xff] %v10356_v37  ;;  %4514 = vperm.xlu0 %6697, %v10352_v24   ;;  %4433 = vperm.xlu1 %6696, %v10349_v21   ;;  %v13484_v37 = vld [vmem:[#allocation202_spill] sm:$0xff]  ;;  %v2506_v21 = vcvt.f32.s32 %v13489_v0 }
 0x594   :  { %v10369_v19 = vsel %vm3285_vm13, %v13484_v37, 0.0  ;;  %v2460_v37 = vadd.s32 %v2459_v15, %v2457_v58  ;;  %vm13491_vm13 = vcmp.ne.s32.totalorder %v9496_v52, 0  ;;  %v13498_v15 = vld [vmem:[#allocation86_spill] sm:$0xff] }
 0x595   :  { %13485 = vst [vmem:[#allocation75_spill] sm:$0xff] %v10369_v19  ;;  %v10383_v23 = vpop.permute.xlu1 %3877  ;;  %vm3314_vm1 = vmand %vm3103_vm5, %vm13491_vm13  ;;  %v2507_v58 = vshll.u32 %v2506_v21, 16  ;;  %v2530_v61 = vcvt.f32.s32 %v13498_v15  ;;  %v13505_v15 = vld [vmem:[#allocation68_spill] sm:$0xff] }
 0x596   :  { %v10374_v24 = vpop.permute.xlu0 %4334  ;;  %v10392_v3 = vsel %vm3314_vm1, %v9990_v34, 0.0  ;;  %vm3105_vm5 = vcmp.ge.s32.totalorder %v2460_v37, 4  ;;  %v13500_v34 = vld [vmem:[#allocation118_spill] sm:$0xff]  ;;  %vm3080_vm13 = vcmp.ge.s32.totalorder %v13505_v15, 4  ;;  %v13506_v37 = vld [vmem:[#allocation101_spill] sm:$0xff] }
 0x597   :  { %13487 = vst [vmem:[#allocation63_spill] sm:$0xff] %v10374_v24  ;;  %4520 = vperm.xlu0 %6697, %v10372_v54   ;;  %4439 = vperm.xlu1 %6696, %v10369_v19   ;;  %v13493_v24 = vld [vmem:[#allocation203_spill] sm:$0xff]  ;;  %13495 = vst [vmem:[#allocation77_spill] sm:$0xff] %v10392_v3  ;;  %v13497_v19 = vld [vmem:[#allocation66_spill] sm:$0xff]  ;;  %v2505_v49 = vcvt.f32.s32 %v13500_v34 }
 0x598   :  { %v10389_v54 = vsel %vm3287_vm7, %v13493_v24, 0.0  ;;  %vm3078_vm15 = vcmp.ge.s32.totalorder %v13497_v19, 4  ;;  %v2484_v24 = vadd.s32 %v2483_v35, %v2481_v41  ;;  %vm3316_vm7 = vmand %vm3105_vm5, %vm3220_vm12  ;;  %v2531_v35 = vshll.u32 %v2530_v61, 16  ;;  %v13513_v61 = vld [vmem:[#allocation70_spill] sm:$0xff] }
 0x599   :  { %13494 = vst [vmem:[#allocation82_spill] sm:$0xff] %v10389_v54  ;;  %vm3289_vm4 = vmand %vm3078_vm15, %vm13499_vm0  ;;  %v10409_v19 = vsel %vm3316_vm7, %v10009_v46, 0.0  ;;  %v2554_v41 = vcvt.f32.s32 %v13506_v37  ;;  %vm13507_vm0 = vcmp.ne.s32.totalorder %v9536_v14, 0  ;;  %v13508_v46 = vld [vmem:[#allocation123_spill] sm:$0xff]  ;;  %vm3082_vm5 = vcmp.ge.s32.totalorder %v13513_v61, 4  ;;  %v13517_v61 = vld [vmem:[#allocation206_spill] sm:$0xff] }
 0x59a   :  { %v10394_v0 = vpop.permute.xlu0 %4340  ;;  %13503 = vst [vmem:[#allocation65_spill] sm:$0xff] %v10409_v19  ;;  %vm3291_vm1 = vmand %vm3080_vm13, %vm3227_vm8  ;;  %vm3107_vm15 = vcmp.ge.s32.totalorder %v2484_v24, 4  ;;  %v2529_v34 = vcvt.f32.s32 %v13508_v46  ;;  %v13514_v24 = vld [vmem:[#allocation103_spill] sm:$0xff] }
 0x59b   :  { %13496 = vst [vmem:[#allocation108_spill] sm:$0xff] %v10394_v0  ;;  %4526 = vperm.xlu0 %6697, %v10392_v3   ;;  %4445 = vperm.xlu1 %6696, %v10389_v54   ;;  %v13501_v0 = vld [vmem:[#allocation204_spill] sm:$0xff]  ;;  %v10411_v3 = vpop.permute.xlu1 %3885  ;;  %v13509_v54 = vld [vmem:[#allocation205_spill] sm:$0xff]  ;;  %vm3293_vm7 = vmand %vm3082_vm5, %vm3229_vm11 }
 0x59c   :  { %v10406_v28 = vsel %vm3289_vm4, %v13501_v0, 0.0  ;;  %v2508_v0 = vadd.s32 %v2507_v58, %v2505_v49  ;;  %vm3318_vm4 = vmand %vm3107_vm15, %vm13507_vm0  ;;  %v2555_v58 = vshll.u32 %v2554_v41, 16  ;;  %v2578_v49 = vcvt.f32.s32 %v13514_v24  ;;  %v13521_v24 = vld [vmem:[#allocation89_spill] sm:$0xff] }
 0x59d   :  { %13502 = vst [vmem:[#allocation202_spill] sm:$0xff] %v10406_v28  ;;  %v10428_v15 = vsel %vm3318_vm4, %v10028_v5, 0.0  ;;  %v13516_v5 = vld [vmem:[#allocation129_spill] sm:$0xff]  ;;  %vm3084_vm0 = vcmp.ge.s32.totalorder %v13521_v24, 4 }
 0x59e   :  { %v10413_v21 = vpop.permute.xlu0 %4346  ;;  %13511 = vst [vmem:[#allocation113_spill] sm:$0xff] %v10428_v15  ;;  %vm3109_vm13 = vcmp.ge.s32.totalorder %v2508_v0, 4  ;;  %v2553_v46 = vcvt.f32.s32 %v13516_v5  ;;  %v13522_v0 = vld [vmem:[#allocation106_spill] sm:$0xff]  ;;  %vm3295_vm4 = vmand %vm3084_vm0, %vm3231_vm9 }
 0x59f   :  { %13504 = vst [vmem:[#allocation84_spill] sm:$0xff] %v10413_v21  ;;  %4532 = vperm.xlu0 %6697, %v10409_v19   ;;  %4451 = vperm.xlu1 %6696, %v10406_v28   ;;  %v10425_v21 = vsel %vm3291_vm1, %v13509_v54, 0.0  ;;  %v2532_v54 = vadd.s32 %v2531_v35, %v2529_v34  ;;  %v10438_v37 = vpop.permute.xlu1 %3893  ;;  %vm13515_vm1 = vcmp.ne.s32.totalorder %v9476_v55, 0  ;;  %v10444_v28 = vsel %vm3293_vm7, %v13517_v61, 0.0 }
 0x5a0   :  { %13510 = vst [vmem:[#allocation100_spill] sm:$0xff] %v10425_v21  ;;  %vm3320_vm15 = vmand %vm3109_vm13, %vm13515_vm1  ;;  %v2579_v35 = vshll.u32 %v2578_v49, 16  ;;  %v2602_v34 = vcvt.f32.s32 %v13522_v0  ;;  %v2556_v5 = vadd.s32 %v2555_v58, %v2553_v46  ;;  %vm13523_vm7 = vcmp.ne.s32.totalorder %v9480_v4, 0  ;;  %v13529_v0 = vld [vmem:[#allocation91_spill] sm:$0xff] }
 0x5a1   :  { %13518 = vst [vmem:[#allocation66_spill] sm:$0xff] %v10444_v28  ;;  %vm3111_vm5 = vcmp.ge.s32.totalorder %v2532_v54, 4  ;;  %vm3086_vm1 = vcmp.ge.s32.totalorder %v13529_v0, 4  ;;  %v13530_v54 = vld [vmem:[#allocation109_spill] sm:$0xff] }
 0x5a2   :  { %v10430_v19 = vpop.permute.xlu0 %4352  ;;  %vm3322_vm13 = vmand %vm3111_vm5, %vm13523_vm7  ;;  %v2603_v58 = vshll.u32 %v2602_v34, 16  ;;  %v2626_v46 = vcvt.f32.s32 %v13530_v54  ;;  %vm3113_vm0 = vcmp.ge.s32.totalorder %v2556_v5, 4  ;;  %v13537_v54 = vld [vmem:[#allocation92_spill] sm:$0xff] }
 0x5a3   :  { %13512 = vst [vmem:[#allocation203_spill] sm:$0xff] %v10430_v19  ;;  %4538 = vperm.xlu0 %6697, %v10428_v15   ;;  %4457 = vperm.xlu1 %6696, %v10425_v21   ;;  %v10447_v15 = vsel %vm3320_vm15, %v10047_v22, 0.0  ;;  %v13524_v22 = vld [vmem:[#allocation134_spill] sm:$0xff]  ;;  %v13525_v21 = vld [vmem:[#allocation207_spill] sm:$0xff]  ;;  %v10464_v24 = vsel %vm3322_vm13, %v10065_v36, 0.0  ;;  %vm3297_vm15 = vmand %vm3086_vm1, %vm3233_vm10  ;;  %vm3088_vm7 = vcmp.ge.s32.totalorder %v13537_v54, 4 }
 0x5a4   :  { %13519 = vst [vmem:[#allocation86_spill] sm:$0xff] %v10447_v15  ;;  %v2577_v61 = vcvt.f32.s32 %v13524_v22  ;;  %13527 = vst [vmem:[#allocation68_spill] sm:$0xff] %v10464_v24  ;;  %v13532_v36 = vld [vmem:[#allocation139_spill] sm:$0xff]  ;;  %v13538_v5 = vld [vmem:[#allocation112_spill] sm:$0xff] }
 0x5a5   :  { %v2601_v22 = vcvt.f32.s32 %v13532_v36  ;;  %vm3299_vm13 = vmand %vm3088_vm7, %vm3235_vm2  ;;  %vm13546_vm7 = vcmp.ne.s32.totalorder %v9492_v26, 0 }
 0x5a6   :  { %v10449_v41 = vpop.permute.xlu0 %4358 }
 0x5a7   :  { %13520 = vst [vmem:[#allocation118_spill] sm:$0xff] %v10449_v41  ;;  %4544 = vperm.xlu0 %6697, %v10447_v15   ;;  %4463 = vperm.xlu1 %6696, %v10444_v28   ;;  %v10461_v41 = vsel %vm3295_vm4, %v13525_v21, 0.0  ;;  %v10466_v15 = vpop.permute.xlu1 %3901  ;;  %v2580_v21 = vadd.s32 %v2579_v35, %v2577_v61  ;;  %vm13531_vm4 = vcmp.ne.s32.totalorder %v9484_v20, 0  ;;  %v13533_v28 = vld [vmem:[#allocation208_spill] sm:$0xff]  ;;  %v2627_v35 = vshll.u32 %v2626_v46, 16 }
 0x5a8   :  { %13526 = vst [vmem:[#allocation204_spill] sm:$0xff] %v10461_v41  ;;  %vm3324_vm5 = vmand %vm3113_vm0, %vm13531_vm4  ;;  %v2650_v61 = vcvt.f32.s32 %v13538_v5  ;;  %v13544_v5 = vld [vmem:[#allocation94_spill] sm:$0xff] }
 0x5a9   :  { %v10483_v0 = vsel %vm3324_vm5, %v10083_v11, 0.0  ;;  %vm3115_vm1 = vcmp.ge.s32.totalorder %v2580_v21, 4  ;;  %v13539_v11 = vld [vmem:[#allocation143_spill] sm:$0xff]  ;;  %vm3090_vm0 = vcmp.ge.s32.totalorder %v13544_v5, 4  ;;  %v13545_v21 = vld [vmem:[#allocation116_spill] sm:$0xff] }
 0x5aa   :  { %v10468_v49 = vpop.permute.xlu0 %4364  ;;  %13535 = vst [vmem:[#allocation205_spill] sm:$0xff] %v10483_v0  ;;  %v2625_v36 = vcvt.f32.s32 %v13539_v11  ;;  %vm3301_vm4 = vmand %vm3090_vm0, %vm3221_vm14 }
 0x5ab   :  { %13528 = vst [vmem:[#allocation101_spill] sm:$0xff] %v10468_v49  ;;  %4550 = vperm.xlu0 %6697, %v10464_v24   ;;  %4469 = vperm.xlu1 %6696, %v10461_v41   ;;  %v10480_v49 = vsel %vm3297_vm15, %v13533_v28, 0.0  ;;  %v2604_v28 = vadd.s32 %v2603_v58, %v2601_v22  ;;  %vm3326_vm15 = vmand %vm3115_vm1, %vm3230_vm3  ;;  %v13540_v41 = vld [vmem:[#allocation209_spill] sm:$0xff]  ;;  %v2651_v58 = vshll.u32 %v2650_v61, 16  ;;  %v2674_v22 = vcvt.f32.s32 %v13545_v21  ;;  %v13552_v21 = vld [vmem:[#allocation95_spill] sm:$0xff] }
 0x5ac   :  { %13534 = vst [vmem:[#allocation123_spill] sm:$0xff] %v10480_v49  ;;  %v10502_v54 = vsel %vm3326_vm15, %v10101_v16, 0.0  ;;  %v13547_v16 = vld [vmem:[#allocation147_spill] sm:$0xff]  ;;  %vm3092_vm1 = vcmp.ge.s32.totalorder %v13552_v21, 4 }
 0x5ad   :  { %13542 = vst [vmem:[#allocation129_spill] sm:$0xff] %v10502_v54  ;;  %vm3117_vm5 = vcmp.ge.s32.totalorder %v2604_v28, 4  ;;  %v2649_v11 = vcvt.f32.s32 %v13547_v16  ;;  %v13553_v28 = vld [vmem:[#allocation119_spill] sm:$0xff]  ;;  %vm3303_vm15 = vmand %vm3092_vm1, %vm3223_vm6 }
 0x5ae   :  { %v10485_v24 = vpop.permute.xlu0 %4370  ;;  %v10487_v34 = vpop.permute.xlu1 %4292 }
 0x5af   :  { %13536 = vst [vmem:[#allocation70_spill] sm:$0xff] %v10485_v24  ;;  %4556 = vperm.xlu0 %6697, %v10483_v0   ;;  %4475 = vperm.xlu1 %6696, %v10480_v49   ;;  %v10499_v24 = vsel %vm3299_vm13, %v13540_v41, 0.0  ;;  %v2628_v41 = vadd.s32 %v2627_v35, %v2625_v36  ;;  %vm3328_vm13 = vmand %vm3117_vm5, %vm13546_vm7  ;;  %v13548_v49 = vld [vmem:[#allocation210_spill] sm:$0xff]  ;;  %v2675_v35 = vshll.u32 %v2674_v22, 16  ;;  %v2698_v36 = vcvt.f32.s32 %v13553_v28  ;;  %v13559_v28 = vld [vmem:[#allocation97_spill] sm:$0xff] }
 0x5b0   :  { %13541 = vst [vmem:[#allocation103_spill] sm:$0xff] %v10499_v24  ;;  %v10521_v5 = vsel %vm3328_vm13, %v10119_v12, 0.0  ;;  %v13555_v12 = vld [vmem:[#allocation151_spill] sm:$0xff]  ;;  %vm3094_vm7 = vcmp.ge.s32.totalorder %v13559_v28, 4  ;;  %vm13561_vm13 = vcmp.ne.s32.totalorder %v9546_v42, 0 }
 0x5b1   :  { %13550 = vst [vmem:[#allocation106_spill] sm:$0xff] %v10521_v5  ;;  %vm3119_vm0 = vcmp.ge.s32.totalorder %v2628_v41, 4  ;;  %v2673_v16 = vcvt.f32.s32 %v13555_v12  ;;  %v13560_v41 = vld [vmem:[#allocation122_spill] sm:$0xff]  ;;  %vm3305_vm1 = vmand %vm3094_vm7, %vm13561_vm13  ;;  %vm13570_vm13 = vcmp.ne.s32.totalorder %v9536_v14, 0 }
 0x5b2   :  { %v10504_v0 = vpop.permute.xlu0 %4376  ;;  %v10506_v46 = vpop.permute.xlu1 %4298 }
 0x5b3   :  { %13543 = vst [vmem:[#allocation206_spill] sm:$0xff] %v10504_v0  ;;  %4562 = vperm.xlu0 %6697, %v10502_v54   ;;  %4481 = vperm.xlu1 %6696, %v10499_v24   ;;  %v10518_v0 = vsel %vm3301_vm4, %v13548_v49, 0.0  ;;  %v2652_v49 = vadd.s32 %v2651_v58, %v2649_v11  ;;  %vm13554_vm4 = vcmp.ne.s32.totalorder %v9496_v52, 0  ;;  %v13556_v24 = vld [vmem:[#allocation211_spill] sm:$0xff]  ;;  %v2699_v58 = vshll.u32 %v2698_v36, 16 }
 0x5b4   :  { %13549 = vst [vmem:[#allocation89_spill] sm:$0xff] %v10518_v0  ;;  %vm3330_vm5 = vmand %vm3119_vm0, %vm13554_vm4  ;;  %v2722_v11 = vcvt.f32.s32 %v13560_v41  ;;  %v13568_v41 = vld [vmem:[#allocation98_spill] sm:$0xff] }
 0x5b5   :  { %v10540_v21 = vsel %vm3330_vm5, %v10135_v62, 0.0  ;;  %v13562_v62 = vld [vmem:[#allocation155_spill] sm:$0xff]  ;;  %vm3096_vm4 = vcmp.ge.s32.totalorder %v13568_v41, 4 }
 0x5b6   :  { %v10523_v54 = vpop.permute.xlu0 %4382  ;;  %v10525_v61 = vpop.permute.xlu1 %4301  ;;  %13558 = vst [vmem:[#allocation91_spill] sm:$0xff] %v10540_v21  ;;  %v2697_v12 = vcvt.f32.s32 %v13562_v62  ;;  %vm3307_vm5 = vmand %vm3096_vm4, %vm3227_vm8 }
 0x5b7   :  { %13551 = vst [vmem:[#allocation134_spill] sm:$0xff] %v10523_v54  ;;  %4568 = vperm.xlu0 %6697, %v10521_v5   ;;  %4487 = vperm.xlu1 %6696, %v10518_v0   ;;  %v10537_v54 = vsel %vm3303_vm15, %v13556_v24, 0.0  ;;  %vm3121_vm15 = vcmp.ge.s32.totalorder %v2652_v49, 4  ;;  %v2676_v24 = vadd.s32 %v2675_v35, %v2673_v16  ;;  %v13563_v0 = vld [vmem:[#allocation212_spill] sm:$0xff]  ;;  %v2723_v35 = vshll.u32 %v2722_v11, 16  ;;  %v13569_v49 = vld [vmem:[#allocation126_spill] sm:$0xff] }
 0x5b8   :  { %13557 = vst [vmem:[#allocation207_spill] sm:$0xff] %v10537_v54  ;;  %vm3332_vm0 = vmand %vm3121_vm15, %vm3220_vm12  ;;  %v10556_v19 = vsel %vm3305_vm1, %v13563_v0, 0.0  ;;  %v2746_v16 = vcvt.f32.s32 %v13569_v49  ;;  %v2700_v0 = vadd.s32 %v2699_v58, %v2697_v12  ;;  %v13577_v49 = vld [vmem:[#allocation79_spill] sm:$0xff] }
 0x5b9   :  { %13564 = vst [vmem:[#allocation109_spill] sm:$0xff] %v10556_v19  ;;  %v10559_v28 = vsel %vm3332_vm0, %v10153_v17, 0.0  ;;  %vm3123_vm7 = vcmp.ge.s32.totalorder %v2676_v24, 4  ;;  %v13571_v17 = vld [vmem:[#allocation159_spill] sm:$0xff]  ;;  %v13579_v24 = vld [vmem:[#allocation128_spill] sm:$0xff] }
 0x5ba   :  { %v10542_v5 = vpop.permute.xlu0 %4388  ;;  %v10544_v22 = vpop.permute.xlu1 %4307  ;;  %13565 = vst [vmem:[#allocation139_spill] sm:$0xff] %v10559_v28  ;;  %vm3334_vm1 = vmand %vm3123_vm7, %vm13570_vm13  ;;  %v2721_v62 = vcvt.f32.s32 %v13571_v17  ;;  %v2747_v58 = vshll.u32 %v2746_v16, 16  ;;  %v2770_v12 = vcvt.f32.s32 %v13579_v24  ;;  %vm3125_vm4 = vcmp.ge.s32.totalorder %v2700_v0, 4  ;;  %v13588_v0 = vld [vmem:[#allocation76_spill] sm:$0xff] }
 0x5bb   :  { %4574 = vperm.xlu0 %6697, %v10540_v21   ;;  %4493 = vperm.xlu1 %6696, %v10537_v54   ;;  %v13572_v54 = vld [vmem:[#allocation16_spill] sm:$0xff]  ;;  %v10578_v41 = vsel %vm3334_vm1, %v10171_v50, 0.0  ;;  %vm3100_vm13 = vcmp.ge.s32.totalorder %v13588_v0, 4 }
 0x5bc   :  { %13574 = vst [vmem:[#allocation143_spill] sm:$0xff] %v10578_v41  ;;  %v2724_v50 = vadd.s32 %v2723_v35, %v2721_v62  ;;  %v2771_v35 = vshll.u32 %v2770_v12, 16  ;;  %v13589_v62 = vld [vmem:[#allocation131_spill] sm:$0xff]  ;;  %vm3311_vm1 = vmand %vm3100_vm13, %vm3231_vm9 }
 0x5bd   :  { %v10616_v0 = vsel %vm3311_vm1, %v9790_v44, 0.0  ;;  %v13599_v44 = vld [vmem:[#allocation135_spill] sm:$0xff]  ;;  %vm13601_vm1 = vcmp.ne.s32.totalorder %v9484_v20, 0 }
 0x5be   :  { %v10561_v21 = vpop.permute.xlu0 %4394  ;;  %v10563_v36 = vpop.permute.xlu1 %4313  ;;  %13593 = vst [vmem:[#allocation119_spill] sm:$0xff] %v10616_v0 }
 0x5bf   :  { %13566 = vst [vmem:[#allocation208_spill] sm:$0xff] %v10561_v21  ;;  %13567 = vst [vmem:[#allocation92_spill] sm:$0xff] %v10563_v36  ;;  %4580 = vperm.xlu0 %6697, %v10559_v28   ;;  %4499 = vperm.xlu1 %6696, %v10556_v19   ;;  %v10575_v36 = vsel %vm3307_vm5, %v13572_v54, 0.0  ;;  %v2446_v19 = vcvt.f32.s32 %v13577_v49  ;;  %v13578_v21 = vld [vmem:[#allocation99_spill] sm:$0xff]  ;;  %vm13580_vm5 = vcmp.ne.s32.totalorder %v9476_v55, 0  ;;  %v13582_v49 = vld [vmem:[#allocation21_spill] sm:$0xff] }
 0x5c0   :  { %13573 = vst [vmem:[#allocation112_spill] sm:$0xff] %v10575_v36  ;;  %vm3098_vm15 = vcmp.ge.s32.totalorder %v13578_v21, 4  ;;  %vm3336_vm7 = vmand %vm3125_vm4, %vm13580_vm5  ;;  %v13581_v54 = vld [vmem:[#allocation163_spill] sm:$0xff] }
 0x5c1   :  { %vm3309_vm0 = vmand %vm3098_vm15, %vm3229_vm11  ;;  %v2745_v17 = vcvt.f32.s32 %v13581_v54  ;;  %v10598_v21 = vsel %vm3336_vm7, %v10187_v53, 0.0  ;;  %v2447_v24 = vshll.u32 %v2446_v19, 16  ;;  %v2794_v54 = vcvt.f32.s32 %v13589_v62  ;;  %v13592_v19 = vld [vmem:[#allocation167_spill] sm:$0xff] }
 0x5c2   :  { %v10580_v28 = vpop.permute.xlu0 %4400  ;;  %v10582_v11 = vpop.permute.xlu1 %4319  ;;  %13584 = vst [vmem:[#allocation147_spill] sm:$0xff] %v10598_v21  ;;  %vm3127_vm15 = vcmp.ge.s32.totalorder %v2724_v50, 4  ;;  %v13597_v50 = vld [vmem:[#allocation83_spill] sm:$0xff] }
 0x5c3   :  { %13575 = vst [vmem:[#allocation209_spill] sm:$0xff] %v10580_v28  ;;  %13576 = vst [vmem:[#allocation94_spill] sm:$0xff] %v10582_v11  ;;  %4586 = vperm.xlu0 %6697, %v10578_v41   ;;  %4505 = vperm.xlu1 %6696, %v10575_v36   ;;  %v10595_v11 = vsel %vm3309_vm0, %v13582_v49, 0.0  ;;  %v13587_v36 = vld [vmem:[#allocation81_spill] sm:$0xff]  ;;  %v2748_v53 = vadd.s32 %v2747_v58, %v2745_v17  ;;  %vm13591_vm0 = vcmp.ne.s32.totalorder %v9480_v4, 0  ;;  %v2494_v58 = vcvt.f32.s32 %v13597_v50  ;;  %v13598_v17 = vld [vmem:[#allocation78_spill] sm:$0xff] }
 0x5c4   :  { %13583 = vst [vmem:[#allocation116_spill] sm:$0xff] %v10595_v11  ;;  %v2470_v28 = vcvt.f32.s32 %v13587_v36  ;;  %v13590_v49 = vld [vmem:[#allocation105_spill] sm:$0xff]  ;;  %vm3338_vm4 = vmand %vm3127_vm15, %vm13591_vm0  ;;  %v2769_v36 = vcvt.f32.s32 %v13592_v19  ;;  %vm3102_vm5 = vcmp.ge.s32.totalorder %v13598_v17, 4  ;;  %v2795_v19 = vshll.u32 %v2794_v54, 16 }
 0x5c5   :  { %vm3313_vm7 = vmand %vm3102_vm5, %vm3233_vm10  ;;  %vm3129_vm13 = vcmp.ge.s32.totalorder %v2748_v53, 4  ;;  %v13608_v53 = vld [vmem:[#allocation85_spill] sm:$0xff] }
 0x5c6   :  { %v10600_v41 = vpop.permute.xlu0 %4406  ;;  %v10602_v16 = vpop.permute.xlu1 %4325  ;;  %vm3340_vm15 = vmand %vm3129_vm13, %vm13601_vm1 }
 0x5c7   :  { %13585 = vst [vmem:[#allocation210_spill] sm:$0xff] %v10600_v41  ;;  %13586 = vst [vmem:[#allocation95_spill] sm:$0xff] %v10602_v16  ;;  %4592 = vperm.xlu0 %6697, %v10598_v21   ;;  %4511 = vperm.xlu1 %6696, %v10595_v11   ;;  %v2445_v41 = vcvt.f32.s32 %v13590_v49  ;;  %v10619_v21 = vsel %vm3338_vm4, %v10205_v57, 0.0  ;;  %v2471_v11 = vshll.u32 %v2470_v28, 16  ;;  %v2818_v16 = vcvt.f32.s32 %v13599_v44  ;;  %v13602_v28 = vld [vmem:[#allocation170_spill] sm:$0xff] }
 0x5c8   :  { %13594 = vst [vmem:[#allocation151_spill] sm:$0xff] %v10619_v21  ;;  %v2772_v57 = vadd.s32 %v2771_v35, %v2769_v36  ;;  %v2793_v50 = vcvt.f32.s32 %v13602_v28  ;;  %v10640_v17 = vsel %vm3340_vm15, %v10223_v1, 0.0  ;;  %v2518_v35 = vcvt.f32.s32 %v13608_v53  ;;  %v13609_v28 = vld [vmem:[#allocation138_spill] sm:$0xff] }
 0x5c9   :  { %v2448_v49 = vadd.s32 %v2447_v24, %v2445_v41  ;;  %v13603_v41 = vld [vmem:[#allocation215_spill] sm:$0xff]  ;;  %13605 = vst [vmem:[#allocation155_spill] sm:$0xff] %v10640_v17 }
 0x5ca   :  { %v10621_v12 = vpop.permute.xlu0 %4412  ;;  %v10623_v62 = vpop.permute.xlu1 %4331  ;;  %v10637_v24 = vsel %vm3313_vm7, %v13603_v41, 0.0  ;;  %v2842_v41 = vcvt.f32.s32 %v13609_v28  ;;  %vm3131_vm5 = vcmp.ge.s32.totalorder %v2772_v57, 4  ;;  %v2796_v1 = vadd.s32 %v2795_v19, %v2793_v50  ;;  %v13616_v57 = vld [vmem:[#allocation87_spill] sm:$0xff] }
 0x5cb   :  { %13595 = vst [vmem:[#allocation211_spill] sm:$0xff] %v10621_v12  ;;  %13596 = vst [vmem:[#allocation97_spill] sm:$0xff] %v10623_v62  ;;  %4598 = vperm.xlu0 %6697, %v10619_v21   ;;  %4517 = vperm.xlu1 %6696, %v10616_v0   ;;  %v13600_v12 = vld [vmem:[#allocation110_spill] sm:$0xff]  ;;  %v2495_v21 = vshll.u32 %v2494_v58, 16  ;;  %vm3104_vm0 = vcmp.ge.s32.totalorder %v2448_v49, 4  ;;  %v13610_v0 = vld [vmem:[#allocation115_spill] sm:$0xff]  ;;  %v2542_v19 = vcvt.f32.s32 %v13616_v57 }
 0x5cc   :  { %v2469_v62 = vcvt.f32.s32 %v13600_v12  ;;  %13604 = vst [vmem:[#allocation122_spill] sm:$0xff] %v10637_v24  ;;  %v2819_v12 = vshll.u32 %v2818_v16, 16  ;;  %vm3315_vm4 = vmand %vm3104_vm0, %vm3235_vm2  ;;  %v13611_v58 = vld [vmem:[#allocation172_spill] sm:$0xff]  ;;  %v2843_v50 = vshll.u32 %v2842_v41, 16  ;;  %vm3133_vm15 = vcmp.ge.s32.totalorder %v2796_v1, 4  ;;  %v13625_v1 = vld [vmem:[#allocation102_spill] sm:$0xff] }
 0x5cd   :  { %vm3342_vm7 = vmand %vm3131_vm5, %vm3230_vm3  ;;  %v2817_v49 = vcvt.f32.s32 %v13611_v58  ;;  %v13617_v58 = vld [vmem:[#allocation142_spill] sm:$0xff]  ;;  %vm13619_vm0 = vcmp.ne.s32.totalorder %v9492_v26, 0 }
 0x5ce   :  { %v10642_v54 = vpop.permute.xlu0 %4418  ;;  %v10644_v44 = vpop.permute.xlu1 %4337  ;;  %v2472_v36 = vadd.s32 %v2471_v11, %v2469_v62  ;;  %v13612_v11 = vld [vmem:[#allocation27_spill] sm:$0xff]  ;;  %v10660_v53 = vsel %vm3342_vm7, %v10239_v45, 0.0 }
 0x5cf   :  { %13606 = vst [vmem:[#allocation212_spill] sm:$0xff] %v10642_v54  ;;  %13607 = vst [vmem:[#allocation98_spill] sm:$0xff] %v10644_v44  ;;  %4604 = vperm.xlu0 %6697, %v10640_v17   ;;  %4523 = vperm.xlu1 %6696, %v10637_v24   ;;  %v2493_v54 = vcvt.f32.s32 %v13610_v0  ;;  %v10657_v62 = vsel %vm3315_vm4, %v13612_v11, 0.0  ;;  %v2519_v17 = vshll.u32 %v2518_v35, 16  ;;  %v2866_v11 = vcvt.f32.s32 %v13617_v58  ;;  %v13618_v24 = vld [vmem:[#allocation120_spill] sm:$0xff]  ;;  %v13620_v35 = vld [vmem:[#allocation174_spill] sm:$0xff] }
 0x5d0   :  { %13613 = vst [vmem:[#allocation126_spill] sm:$0xff] %v10657_v62  ;;  %13614 = vst [vmem:[#allocation159_spill] sm:$0xff] %v10660_v53  ;;  %vm3106_vm13 = vcmp.ge.s32.totalorder %v2472_v36, 4  ;;  %v2820_v45 = vadd.s32 %v2819_v12, %v2817_v49  ;;  %v2841_v36 = vcvt.f32.s32 %v13620_v35  ;;  %v2566_v12 = vcvt.f32.s32 %v13625_v1  ;;  %v13626_v35 = vld [vmem:[#allocation146_spill] sm:$0xff] }
 0x5d1   :  { %v2496_v0 = vadd.s32 %v2495_v21, %v2493_v54  ;;  %vm3317_vm1 = vmand %vm3106_vm13, %vm3221_vm14  ;;  %v13621_v21 = vld [vmem:[#allocation30_spill] sm:$0xff]  ;;  %v2867_v49 = vshll.u32 %v2866_v11, 16 }
 0x5d2   :  { %v10662_v16 = vpop.permute.xlu0 %4424  ;;  %v10664_v28 = vpop.permute.xlu1 %4343  ;;  %vm3344_vm4 = vmand %vm3133_vm15, %vm13619_vm0  ;;  %v10677_v54 = vsel %vm3317_vm1, %v13621_v21, 0.0  ;;  %v2890_v21 = vcvt.f32.s32 %v13626_v35  ;;  %vm3135_vm13 = vcmp.ge.s32.totalorder %v2820_v45, 4  ;;  %vm13628_vm1 = vcmp.ne.s32.totalorder %v9496_v52, 0  ;;  %v13633_v45 = vld [vmem:[#allocation104_spill] sm:$0xff] }
 0x5d3   :  { %13615 = vst [vmem:[#allocation16_spill] sm:$0xff] %v10662_v16  ;;  %4610 = vperm.xlu0 %6697, %v10660_v53   ;;  %4529 = vperm.xlu1 %6696, %v10657_v62   ;;  %v2517_v16 = vcvt.f32.s32 %v13618_v24  ;;  %13622 = vst [vmem:[#allocation79_spill] sm:$0xff] %v10677_v54  ;;  %v10680_v57 = vsel %vm3344_vm4, %v10257_v51, 0.0  ;;  %v2543_v53 = vshll.u32 %v2542_v19, 16  ;;  %vm3108_vm5 = vcmp.ge.s32.totalorder %v2496_v0, 4  ;;  %v13627_v62 = vld [vmem:[#allocation125_spill] sm:$0xff] }
 0x5d4   :  { %13623 = vst [vmem:[#allocation99_spill] sm:$0xff] %v10680_v57  ;;  %vm3319_vm7 = vmand %vm3108_vm5, %vm3223_vm6  ;;  %v2844_v51 = vadd.s32 %v2843_v50, %v2841_v36  ;;  %v13629_v19 = vld [vmem:[#allocation176_spill] sm:$0xff]  ;;  %v2590_v50 = vcvt.f32.s32 %v13633_v45  ;;  %v2891_v36 = vshll.u32 %v2890_v21, 16  ;;  %vm13635_vm4 = vcmp.ne.s32.totalorder %v9546_v42, 0 }
 0x5d5   :  { %v2520_v24 = vadd.s32 %v2519_v17, %v2517_v16  ;;  %vm3346_vm15 = vmand %vm3135_vm13, %vm13628_vm1  ;;  %v2865_v0 = vcvt.f32.s32 %v13629_v19  ;;  %v13630_v17 = vld [vmem:[#allocation32_spill] sm:$0xff]  ;;  %v13634_v19 = vld [vmem:[#allocation150_spill] sm:$0xff] }
 0x5d6   :  { %v10682_v41 = vpop.permute.xlu0 %4430  ;;  %v10684_v58 = vpop.permute.xlu1 %4349  ;;  %v10697_v16 = vsel %vm3319_vm7, %v13630_v17, 0.0  ;;  %v10700_v1 = vsel %vm3346_vm15, %v10275_v60, 0.0  ;;  %v2914_v17 = vcvt.f32.s32 %v13634_v19  ;;  %vm3137_vm7 = vcmp.ge.s32.totalorder %v2844_v51, 4  ;;  %v13641_v51 = vld [vmem:[#allocation107_spill] sm:$0xff] }
 0x5d7   :  { %13624 = vst [vmem:[#allocation128_spill] sm:$0xff] %v10682_v41  ;;  %4616 = vperm.xlu0 %6697, %v10680_v57   ;;  %4535 = vperm.xlu1 %6696, %v10677_v54   ;;  %v2541_v41 = vcvt.f32.s32 %v13627_v62  ;;  %13631 = vst [vmem:[#allocation163_spill] sm:$0xff] %v10697_v16  ;;  %v2567_v57 = vshll.u32 %v2566_v12, 16  ;;  %vm3110_vm0 = vcmp.ge.s32.totalorder %v2520_v24, 4  ;;  %v2868_v60 = vadd.s32 %v2867_v49, %v2865_v0  ;;  %v13636_v54 = vld [vmem:[#allocation132_spill] sm:$0xff]  ;;  %v13637_v12 = vld [vmem:[#allocation178_spill] sm:$0xff] }
 0x5d8   :  { %13632 = vst [vmem:[#allocation21_spill] sm:$0xff] %v10700_v1  ;;  %vm3321_vm5 = vmand %vm3110_vm0, %vm13635_vm4  ;;  %v2565_v44 = vcvt.f32.s32 %v13636_v54  ;;  %v2889_v24 = vcvt.f32.s32 %v13637_v12  ;;  %v2614_v49 = vcvt.f32.s32 %v13641_v51  ;;  %v2915_v31 = vshll.u32 %v2914_v17, 16  ;;  %v13642_v0 = vld [vmem:[#allocation154_spill] sm:$0xff] }
 0x5d9   :  { %v2544_v62 = vadd.s32 %v2543_v53, %v2541_v41  ;;  %vm3348_vm13 = vmand %vm3137_vm7, %vm3220_vm12  ;;  %v13638_v53 = vld [vmem:[#allocation34_spill] sm:$0xff]  ;;  %v2938_v12 = vcvt.f32.s32 %v13642_v0  ;;  %vm3139_vm15 = vcmp.ge.s32.totalorder %v2868_v60, 4  ;;  %vm13644_vm0 = vcmp.ne.s32.totalorder %v9536_v14, 0  ;;  %v13649_v60 = vld [vmem:[#allocation111_spill] sm:$0xff] }
 0x5da   :  { %v10702_v11 = vpop.permute.xlu0 %4436  ;;  %v10704_v35 = vpop.permute.xlu1 %4355  ;;  %v10717_v41 = vsel %vm3321_vm5, %v13638_v53, 0.0  ;;  %v10720_v45 = vsel %vm3348_vm13, %v10293_v39, 0.0  ;;  %v2568_v54 = vadd.s32 %v2567_v57, %v2565_v44  ;;  %v2892_v39 = vadd.s32 %v2891_v36, %v2889_v24  ;;  %v13643_v53 = vld [vmem:[#allocation137_spill] sm:$0xff]  ;;  %vm3350_vm4 = vmand %vm3139_vm15, %vm13644_vm0  ;;  %v13646_v44 = vld [vmem:[#allocation36_spill] sm:$0xff] }
 0x5db   :  { %4622 = vperm.xlu0 %6697, %v10700_v1   ;;  %4541 = vperm.xlu1 %6696, %v10697_v16   ;;  %13639 = vst [vmem:[#allocation81_spill] sm:$0xff] %v10717_v41  ;;  %13640 = vst [vmem:[#allocation76_spill] sm:$0xff] %v10720_v45  ;;  %v2591_v1 = vshll.u32 %v2590_v50, 16  ;;  %vm3112_vm1 = vcmp.ge.s32.totalorder %v2544_v62, 4  ;;  %v2589_v16 = vcvt.f32.s32 %v13643_v53  ;;  %v13645_v50 = vld [vmem:[#allocation180_spill] sm:$0xff]  ;;  %v10740_v51 = vsel %vm3350_vm4, %v10311_v47, 0.0 }
 0x5dc   :  { %vm3323_vm12 = vmand %vm3112_vm1, %vm3227_vm8  ;;  %v2913_v62 = vcvt.f32.s32 %v13645_v50  ;;  %13648 = vst [vmem:[#allocation105_spill] sm:$0xff] %v10740_v51  ;;  %v2638_v36 = vcvt.f32.s32 %v13649_v60  ;;  %vm3114_vm5 = vcmp.ge.s32.totalorder %v2568_v54, 4  ;;  %v2939_v14 = vshll.u32 %v2938_v12, 16  ;;  %v13650_v53 = vld [vmem:[#allocation158_spill] sm:$0xff] }
 0x5dd   :  { %v10737_v57 = vsel %vm3323_vm12, %v13646_v44, 0.0  ;;  %v2592_v24 = vadd.s32 %v2591_v1, %v2589_v16  ;;  %v2962_v50 = vcvt.f32.s32 %v13650_v53  ;;  %vm3325_vm7 = vmand %vm3114_vm5, %vm3229_vm11  ;;  %vm3141_vm13 = vcmp.ge.s32.totalorder %v2892_v39, 4  ;;  %v13651_v44 = vld [vmem:[#allocation141_spill] sm:$0xff]  ;;  %v13656_v39 = vld [vmem:[#allocation114_spill] sm:$0xff] }
 0x5de   :  { %v10722_v21 = vpop.permute.xlu0 %4442  ;;  %v10724_v19 = vpop.permute.xlu1 %4361  ;;  %13647 = vst [vmem:[#allocation131_spill] sm:$0xff] %v10737_v57  ;;  %v2916_v47 = vadd.s32 %v2915_v31, %v2913_v62  ;;  %vm13652_vm1 = vcmp.ne.s32.totalorder %v9476_v55, 0  ;;  %v10757_v16 = vsel %vm3325_vm7, %v9873_v10, 0.0  ;;  %v2639_v53 = vshll.u32 %v2638_v36, 16  ;;  %v13660_v36 = vld [vmem:[#allocation184_spill] sm:$0xff] }
 0x5df   :  { %4628 = vperm.xlu0 %6697, %v10720_v45   ;;  %4547 = vperm.xlu1 %6696, %v10717_v41   ;;  %v2615_v41 = vshll.u32 %v2614_v49, 16  ;;  %v2613_v45 = vcvt.f32.s32 %v13651_v44  ;;  %vm3352_vm12 = vmand %vm3141_vm13, %vm13652_vm1  ;;  %v13653_v49 = vld [vmem:[#allocation182_spill] sm:$0xff]  ;;  %13654 = vst [vmem:[#allocation167_spill] sm:$0xff] %v10757_v16  ;;  %v2662_v31 = vcvt.f32.s32 %v13656_v39  ;;  %vm3116_vm15 = vcmp.ge.s32.totalorder %v2592_v24, 4 }
 0x5e0   :  { %v2937_v54 = vcvt.f32.s32 %v13653_v49  ;;  %v10760_v1 = vsel %vm3352_vm12, %v10329_v43, 0.0  ;;  %v2963_v55 = vshll.u32 %v2962_v50, 16  ;;  %v13657_v44 = vld [vmem:[#allocation162_spill] sm:$0xff]  ;;  %vm3327_vm0 = vmand %vm3116_vm15, %vm3231_vm9  ;;  %vm3143_vm4 = vcmp.ge.s32.totalorder %v2916_v47, 4  ;;  %v13658_v49 = vld [vmem:[#allocation145_spill] sm:$0xff] }
 0x5e1   :  { %13655 = vst [vmem:[#allocation83_spill] sm:$0xff] %v10760_v1  ;;  %v2616_v62 = vadd.s32 %v2615_v41, %v2613_v45  ;;  %v2986_v10 = vcvt.f32.s32 %v13657_v44  ;;  %vm13659_vm5 = vcmp.ne.s32.totalorder %v9480_v4, 0  ;;  %v2961_v24 = vcvt.f32.s32 %v13660_v36  ;;  %v13661_v41 = vld [vmem:[#allocation221_spill] sm:$0xff] }
 0x5e2   :  { %v10742_v17 = vpop.permute.xlu0 %4448  ;;  %v10744_v0 = vpop.permute.xlu1 %4367  ;;  %v2940_v43 = vadd.s32 %v2939_v14, %v2937_v54  ;;  %vm3354_vm7 = vmand %vm3143_vm4, %vm13659_vm5  ;;  %v10777_v45 = vsel %vm3327_vm0, %v13661_v41, 0.0  ;;  %v13664_v47 = vld [vmem:[#allocation117_spill] sm:$0xff]  ;;  %vm13667_vm15 = vcmp.ne.s32.totalorder %v9484_v20, 0 }
 0x5e3   :  { %4634 = vperm.xlu0 %6697, %v10740_v51   ;;  %4553 = vperm.xlu1 %6696, %v10737_v57   ;;  %v2637_v57 = vcvt.f32.s32 %v13658_v49  ;;  %13662 = vst [vmem:[#allocation78_spill] sm:$0xff] %v10777_v45  ;;  %v10780_v39 = vsel %vm3354_vm7, %v10354_v25, 0.0  ;;  %v2686_v14 = vcvt.f32.s32 %v13664_v47  ;;  %vm3118_vm13 = vcmp.ge.s32.totalorder %v2616_v62, 4  ;;  %v13665_v49 = vld [vmem:[#allocation166_spill] sm:$0xff]  ;;  %v13666_v41 = vld [vmem:[#allocation149_spill] sm:$0xff] }
 0x5e4   :  { %13663 = vst [vmem:[#allocation135_spill] sm:$0xff] %v10780_v39  ;;  %v2987_v4 = vshll.u32 %v2986_v10, 16  ;;  %v3010_v36 = vcvt.f32.s32 %v13665_v49  ;;  %vm3329_vm1 = vmand %vm3118_vm13, %vm3233_vm10  ;;  %vm3145_vm12 = vcmp.ge.s32.totalorder %v2940_v43, 4  ;;  %v2964_v25 = vadd.s32 %v2963_v55, %v2961_v24  ;;  %v13671_v20 = vld [vmem:[#allocation121_spill] sm:$0xff] }
 0x5e5   :  { %v2640_v54 = vadd.s32 %v2639_v53, %v2637_v57  ;;  %vm3356_vm0 = vmand %vm3145_vm12, %vm13667_vm15  ;;  %v10797_v57 = vsel %vm3329_vm1, %v9897_v29, 0.0  ;;  %v2687_v49 = vshll.u32 %v2686_v14, 16  ;;  %v2710_v43 = vcvt.f32.s32 %v13671_v20  ;;  %v13673_v14 = vld [vmem:[#allocation188_spill] sm:$0xff] }
 0x5e6   :  { %v10762_v12 = vpop.permute.xlu0 %4454  ;;  %v10764_v60 = vpop.permute.xlu1 %4373  ;;  %13669 = vst [vmem:[#allocation110_spill] sm:$0xff] %v10797_v57  ;;  %v10800_v53 = vsel %vm3356_vm0, %v10383_v23, 0.0  ;;  %v3011_v24 = vshll.u32 %v3010_v36, 16  ;;  %vm3147_vm7 = vcmp.ge.s32.totalorder %v2964_v25, 4  ;;  %v13672_v23 = vld [vmem:[#allocation153_spill] sm:$0xff]  ;;  %vm13677_vm15 = vcmp.ne.s32.totalorder %v9492_v26, 0 }
 0x5e7   :  { %4640 = vperm.xlu0 %6697, %v10760_v1   ;;  %4559 = vperm.xlu1 %6696, %v10757_v16   ;;  %v2663_v16 = vshll.u32 %v2662_v31, 16  ;;  %v2661_v1 = vcvt.f32.s32 %v13666_v41  ;;  %v13668_v31 = vld [vmem:[#allocation186_spill] sm:$0xff]  ;;  %13670 = vst [vmem:[#allocation170_spill] sm:$0xff] %v10800_v53  ;;  %vm3120_vm4 = vcmp.ge.s32.totalorder %v2640_v54, 4  ;;  %v2685_v41 = vcvt.f32.s32 %v13672_v23  ;;  %vm3358_vm13 = vmand %vm3147_vm7, %vm3230_vm3  ;;  %v13681_v26 = vld [vmem:[#allocation127_spill] sm:$0xff] }
 0x5e8   :  { %v2985_v62 = vcvt.f32.s32 %v13668_v31  ;;  %vm3331_vm5 = vmand %vm3120_vm4, %vm3235_vm2  ;;  %v3009_v54 = vcvt.f32.s32 %v13673_v14  ;;  %v2711_v59 = vshll.u32 %v2710_v43, 16 }
 0x5e9   :  { %v2664_v55 = vadd.s32 %v2663_v16, %v2661_v1  ;;  %v10816_v16 = vsel %vm3331_vm5, %v9912_v6, 0.0  ;;  %v10819_v1 = vsel %vm3358_vm13, %v10411_v3, 0.0  ;;  %v2688_v25 = vadd.s32 %v2687_v49, %v2685_v41  ;;  %v13678_v3 = vld [vmem:[#allocation157_spill] sm:$0xff] }
 0x5ea   :  { %v10782_v50 = vpop.permute.xlu0 %4460  ;;  %v10784_v44 = vpop.permute.xlu1 %4379  ;;  %v2988_v29 = vadd.s32 %v2987_v4, %v2985_v62  ;;  %13674 = vst [vmem:[#allocation215_spill] sm:$0xff] %v10816_v16  ;;  %13675 = vst [vmem:[#allocation85_spill] sm:$0xff] %v10819_v1  ;;  %v13676_v4 = vld [vmem:[#allocation124_spill] sm:$0xff]  ;;  %v3012_v6 = vadd.s32 %v3011_v24, %v3009_v54  ;;  %v2709_v20 = vcvt.f32.s32 %v13678_v3  ;;  %vm13682_vm13 = vcmp.ne.s32.totalorder %v9496_v52, 0 }
 0x5eb   :  { %4646 = vperm.xlu0 %6697, %v10780_v39   ;;  %4565 = vperm.xlu1 %6696, %v10777_v45   ;;  %vm3122_vm1 = vcmp.ge.s32.totalorder %v2664_v55, 4  ;;  %v2734_v62 = vcvt.f32.s32 %v13676_v4  ;;  %vm3124_vm4 = vcmp.ge.s32.totalorder %v2688_v25, 4  ;;  %v13722_v45 = vld [vmem:[#allocation164_spill] sm:$0xff] }
 0x5ec   :  { %vm3333_vm3 = vmand %vm3122_vm1, %vm3221_vm14  ;;  %vm3149_vm12 = vcmp.ge.s32.totalorder %v2988_v29, 4  ;;  %v2758_v29 = vcvt.f32.s32 %v13681_v26  ;;  %vm3151_vm7 = vcmp.ge.s32.totalorder %v3012_v6, 4 }
 0x5ed   :  { %vm3360_vm0 = vmand %vm3149_vm12, %vm13677_vm15  ;;  %v10834_v55 = vsel %vm3333_vm3, %v9931_v40, 0.0  ;;  %v2735_v24 = vshll.u32 %v2734_v62, 16  ;;  %v2712_v40 = vadd.s32 %v2711_v59, %v2709_v20  ;;  %v13686_v62 = vld [vmem:[#allocation130_spill] sm:$0xff]  ;;  %vm13687_vm12 = vcmp.ne.s32.totalorder %v9546_v42, 0 }
 0x5ee   :  { %v10802_v10 = vpop.permute.xlu0 %4466  ;;  %v10804_v47 = vpop.permute.xlu1 %4385  ;;  %13679 = vst [vmem:[#allocation138_spill] sm:$0xff] %v10834_v55  ;;  %v10837_v49 = vsel %vm3360_vm0, %v10438_v37, 0.0  ;;  %vm3335_vm5 = vmand %vm3124_vm4, %vm3223_vm6  ;;  %v13683_v37 = vld [vmem:[#allocation161_spill] sm:$0xff]  ;;  %v2759_v59 = vshll.u32 %v2758_v29, 16  ;;  %v2782_v52 = vcvt.f32.s32 %v13686_v62 }
 0x5ef   :  { %4652 = vperm.xlu0 %6697, %v10800_v53   ;;  %4571 = vperm.xlu1 %6696, %v10797_v57   ;;  %13680 = vst [vmem:[#allocation115_spill] sm:$0xff] %v10837_v49  ;;  %vm3362_vm1 = vmand %vm3151_vm7, %vm13682_vm13  ;;  %v2733_v41 = vcvt.f32.s32 %v13683_v37  ;;  %v10852_v14 = vsel %vm3335_vm5, %v9949_v56, 0.0  ;;  %vm3126_vm3 = vcmp.ge.s32.totalorder %v2712_v40, 4  ;;  %v13688_v56 = vld [vmem:[#allocation165_spill] sm:$0xff] }
 0x5f0   :  { %13684 = vst [vmem:[#allocation172_spill] sm:$0xff] %v10852_v14  ;;  %v10855_v54 = vsel %vm3362_vm1, %v10466_v15, 0.0  ;;  %vm3337_vm15 = vmand %vm3126_vm3, %vm13687_vm12  ;;  %v2757_v3 = vcvt.f32.s32 %v13688_v56  ;;  %v2783_v37 = vshll.u32 %v2782_v52, 16  ;;  %v13690_v29 = vld [vmem:[#allocation133_spill] sm:$0xff]  ;;  %v13693_v52 = vld [vmem:[#allocation136_spill] sm:$0xff] }
 0x5f1   :  { %13685 = vst [vmem:[#allocation27_spill] sm:$0xff] %v10855_v54  ;;  %v2736_v6 = vadd.s32 %v2735_v24, %v2733_v41  ;;  %v10868_v15 = vsel %vm3337_vm15, %v9969_v27, 0.0  ;;  %v13691_v24 = vld [vmem:[#allocation169_spill] sm:$0xff] }
 0x5f2   :  { %v10821_v31 = vpop.permute.xlu0 %4472  ;;  %v10823_v36 = vpop.permute.xlu1 %4391  ;;  %13689 = vst [vmem:[#allocation87_spill] sm:$0xff] %v10868_v15  ;;  %v2760_v40 = vadd.s32 %v2759_v59, %v2757_v3  ;;  %v2781_v41 = vcvt.f32.s32 %v13691_v24  ;;  %v13694_v59 = vld [vmem:[#allocation171_spill] sm:$0xff] }
 0x5f3   :  { %4658 = vperm.xlu0 %6697, %v10819_v1   ;;  %4577 = vperm.xlu1 %6696, %v10816_v16   ;;  %vm3128_vm0 = vcmp.ge.s32.totalorder %v2736_v6, 4  ;;  %v2805_v3 = vcvt.f32.s32 %v13694_v59  ;;  %v13707_v1 = vld [vmem:[#allocation152_spill] sm:$0xff] }
 0x5f4   :  { %vm3339_vm4 = vmand %vm3128_vm0, %vm3227_vm8  ;;  %vm3130_vm5 = vcmp.ge.s32.totalorder %v2760_v40, 4  ;;  %v2784_v6 = vadd.s32 %v2783_v37, %v2781_v41  ;;  %v13697_v37 = vld [vmem:[#allocation173_spill] sm:$0xff] }
 0x5f5   :  { %v10880_v62 = vsel %vm3339_vm4, %v9988_v9, 0.0  ;;  %vm3341_vm7 = vmand %vm3130_vm5, %vm3229_vm11  ;;  %v2829_v41 = vcvt.f32.s32 %v13697_v37 }
 0x5f6   :  { %v10839_v23 = vpop.permute.xlu0 %4478  ;;  %v10841_v43 = vpop.permute.xlu1 %4397  ;;  %13692 = vst [vmem:[#allocation142_spill] sm:$0xff] %v10880_v62  ;;  %vm3132_vm13 = vcmp.ge.s32.totalorder %v2784_v6, 4 }
 0x5f7   :  { %4664 = vperm.xlu0 %6697, %v10837_v49   ;;  %4583 = vperm.xlu1 %6696, %v10834_v55   ;;  %vm3343_vm1 = vmand %vm3132_vm13, %vm3231_vm9 }
 0x5fa   :  { %v10857_v25 = vpop.permute.xlu0 %4484  ;;  %v10859_v4 = vpop.permute.xlu1 %4403 }
 0x5fb   :  { %4670 = vperm.xlu0 %6697, %v10855_v54   ;;  %4589 = vperm.xlu1 %6696, %v10852_v14   ;;  %v2806_v54 = vcvt.f32.s32 %v13690_v29  ;;  %v2830_v14 = vcvt.f32.s32 %v13693_v52  ;;  %v10892_v29 = vsel %vm3341_vm7, %v10007_v63, 0.0  ;;  %v10904_v52 = vsel %vm3343_vm1, %v10026_v7, 0.0 }
 0x5fc   :  { %13695 = vst [vmem:[#allocation120_spill] sm:$0xff] %v10892_v29  ;;  %13698 = vst [vmem:[#allocation174_spill] sm:$0xff] %v10904_v52  ;;  %vm13718_vm1 = vcmp.ne.s32.totalorder %v9546_v42, 0  ;;  %v13724_v42 = vld [vmem:[#allocation185_spill] sm:$0xff] }
 0x5fe   :  { %v10870_v20 = vpop.permute.xlu0 %4490  ;;  %v10872_v26 = vpop.permute.xlu1 %4409 }
 0x5ff   :  { %4595 = vperm.xlu1 %6696, %v10868_v15   ;;  %v2807_v15 = vshll.u32 %v2806_v54, 16  ;;  %v13696_v54 = vld [vmem:[#allocation140_spill] sm:$0xff] }
 0x600   :  { %v2854_v49 = vcvt.f32.s32 %v13696_v54 }
 0x601   :  { %v2808_v40 = vadd.s32 %v2807_v15, %v2805_v3  ;;  %v13701_v15 = vld [vmem:[#allocation175_spill] sm:$0xff] }
 0x602   :  { %v10882_v27 = vpop.permute.xlu0 %4496  ;;  %v10884_v56 = vpop.permute.xlu1 %4415  ;;  %v2853_v3 = vcvt.f32.s32 %v13701_v15 }
 0x603   :  { %4601 = vperm.xlu1 %6696, %v10880_v62   ;;  %v2831_v62 = vshll.u32 %v2830_v14, 16  ;;  %v13700_v14 = vld [vmem:[#allocation144_spill] sm:$0xff]  ;;  %vm3134_vm3 = vcmp.ge.s32.totalorder %v2808_v40, 4 }
 0x604   :  { %v2878_v55 = vcvt.f32.s32 %v13700_v14  ;;  %vm3345_vm12 = vmand %vm3134_vm3, %vm3233_vm10 }
 0x605   :  { %v2832_v6 = vadd.s32 %v2831_v62, %v2829_v41  ;;  %v10916_v54 = vsel %vm3345_vm12, %v10045_v32, 0.0  ;;  %v13705_v62 = vld [vmem:[#allocation177_spill] sm:$0xff] }
 0x606   :  { %v10894_v9 = vpop.permute.xlu0 %4502  ;;  %v10896_v24 = vpop.permute.xlu1 %4421  ;;  %13702 = vst [vmem:[#allocation102_spill] sm:$0xff] %v10916_v54  ;;  %v2877_v41 = vcvt.f32.s32 %v13705_v62 }
 0x607   :  { %4607 = vperm.xlu1 %6696, %v10892_v29   ;;  %v2855_v29 = vshll.u32 %v2854_v49, 16  ;;  %v13704_v49 = vld [vmem:[#allocation148_spill] sm:$0xff]  ;;  %vm3136_vm15 = vcmp.ge.s32.totalorder %v2832_v6, 4  ;;  %v13709_v6 = vld [vmem:[#allocation179_spill] sm:$0xff] }
 0x608   :  { %v2902_v16 = vcvt.f32.s32 %v13704_v49  ;;  %vm3347_vm0 = vmand %vm3136_vm15, %vm3235_vm2  ;;  %v13710_v49 = vld [vmem:[#allocation33_spill] sm:$0xff] }
 0x609   :  { %v2856_v40 = vadd.s32 %v2855_v29, %v2853_v3  ;;  %v10928_v14 = vsel %vm3347_vm0, %v10063_v48, 0.0  ;;  %v2901_v3 = vcvt.f32.s32 %v13709_v6 }
 0x60a   :  { %v10906_v63 = vpop.permute.xlu0 %4508  ;;  %v10908_v59 = vpop.permute.xlu1 %4427  ;;  %13706 = vst [vmem:[#allocation125_spill] sm:$0xff] %v10928_v14  ;;  %v2903_v15 = vshll.u32 %v2902_v16, 16  ;;  %v13712_v16 = vld [vmem:[#allocation156_spill] sm:$0xff] }
 0x60b   :  { %13699 = vst [vmem:[#allocation30_spill] sm:$0xff] %v10906_v63  ;;  %4613 = vperm.xlu1 %6696, %v10904_v52   ;;  %v2879_v52 = vshll.u32 %v2878_v55, 16  ;;  %vm3138_vm4 = vcmp.ge.s32.totalorder %v2856_v40, 4  ;;  %v2950_v57 = vcvt.f32.s32 %v13712_v16  ;;  %v13714_v40 = vld [vmem:[#allocation35_spill] sm:$0xff] }
 0x60c   :  { %vm3349_vm5 = vmand %vm3138_vm4, %vm3221_vm14 }
 0x60d   :  { %v2880_v55 = vadd.s32 %v2879_v52, %v2877_v41  ;;  %v10940_v62 = vsel %vm3349_vm5, %v13710_v49, 0.0  ;;  %v2925_v52 = vcvt.f32.s32 %v13713_v30 }
 0x60e   :  { %v10918_v7 = vpop.permute.xlu1 %4433  ;;  %v10920_v37 = vpop.permute.xlu0 %4514  ;;  %13711 = vst [vmem:[#allocation32_spill] sm:$0xff] %v10940_v62 }
 0x60f   :  { %13703 = vst [vmem:[#allocation146_spill] sm:$0xff] %v10920_v37  ;;  %4619 = vperm.xlu1 %6696, %v10916_v54   ;;  %v2926_v54 = vcvt.f32.s32 %v13707_v1  ;;  %vm3140_vm7 = vcmp.ge.s32.totalorder %v2880_v55, 4  ;;  %v2904_v1 = vadd.s32 %v2903_v15, %v2901_v3  ;;  %v2949_v15 = vcvt.f32.s32 %v13719_v8  ;;  %v13720_v3 = vld [vmem:[#allocation62_spill] sm:$0xff]  ;;  %v13770_v37 = vld [vmem:[#allocation84_spill] sm:$0xff] }
 0x610   :  { %vm3351_vm13 = vmand %vm3140_vm7, %vm3223_vm6 }
 0x611   :  { %v10950_v41 = vsel %vm3351_vm13, %v13714_v40, 0.0  ;;  %vm3142_vm14 = vcmp.ge.s32.totalorder %v2904_v1, 4  ;;  %v2973_v1 = vcvt.f32.s32 %v13724_v42  ;;  %vm4698_vm13 = vcmask 261312  }
 0x612   :  { %v10930_v32 = vpop.permute.xlu1 %4439  ;;  %v10936_v29 = vpop.permute.xlu0 %4520  ;;  %13715 = vst [vmem:[#allocation104_spill] sm:$0xff] %v10950_v41  ;;  %vm3353_vm3 = vmand %vm3142_vm14, %vm13718_vm1  ;;  %vm4705_vm14 = vcmask 326912   ;;  %vm4712_vm1 = vcmask 392512  }
 0x613   :  { %4625 = vperm.xlu1 %6696, %v10928_v14   ;;  %13708 = vst [vmem:[#allocation176_spill] sm:$0xff] %v10936_v29  ;;  %v2927_v14 = vshll.u32 %v2926_v54, 16  ;;  %v13717_v54 = vld [vmem:[#allocation160_spill] sm:$0xff]  ;;  %v10962_v16 = vsel %vm3353_vm3, %v13720_v3, 0.0  ;;  %vm4719_vm3 = vcmask 458112  }
 0x614   :  { %v2974_v53 = vcvt.f32.s32 %v13717_v54  ;;  %13721 = vst [vmem:[#allocation132_spill] sm:$0xff] %v10962_v16 }
 0x615   :  { %v2928_v55 = vadd.s32 %v2927_v14, %v2925_v52  ;;  %v13725_v52 = vld [vmem:[#allocation229_spill] sm:$0xff] }
 0x616   :  { %v10942_v48 = vpop.permute.xlu1 %4445  ;;  %v10954_v49 = vpop.permute.xlu0 %4526  ;;  %v2975_v40 = vshll.u32 %v2974_v53, 16  ;;  %v13727_v53 = vld [vmem:[#allocation168_spill] sm:$0xff] }
 0x617   :  { %4631 = vperm.xlu1 %6696, %v10940_v62   ;;  %13716 = vst [vmem:[#allocation150_spill] sm:$0xff] %v10954_v49  ;;  %v2951_v62 = vshll.u32 %v2950_v57, 16  ;;  %vm3144_vm6 = vcmp.ge.s32.totalorder %v2928_v55, 4  ;;  %v13729_v55 = vld [vmem:[#allocation41_spill] sm:$0xff] }
 0x618   :  { %vm3355_vm12 = vmand %vm3144_vm6, %vm3227_vm8  ;;  %vm12539_vm6 = vcmask 523712  }
 0x619   :  { %v2952_v57 = vadd.s32 %v2951_v62, %v2949_v15  ;;  %v10974_v54 = vsel %vm3355_vm12, %v13725_v52, 0.0  ;;  %v2997_v62 = vcvt.f32.s32 %v13728_v18  ;;  %vm4733_vm12 = vcmask 589312  }
 0x61a   :  { %v10952_v6 = vpop.permute.xlu1 %4451  ;;  %v10970_v14 = vpop.permute.xlu0 %4532  ;;  %13726 = vst [vmem:[#allocation34_spill] sm:$0xff] %v10974_v54 }
 0x61b   :  { %4637 = vperm.xlu1 %6696, %v10950_v41   ;;  %v2998_v41 = vcvt.f32.s32 %v13722_v45  ;;  %13723 = vst [vmem:[#allocation178_spill] sm:$0xff] %v10970_v14  ;;  %vm3146_vm15 = vcmp.ge.s32.totalorder %v2952_v57, 4  ;;  %v2976_v45 = vadd.s32 %v2975_v40, %v2973_v1  ;;  %v13733_v40 = vld [vmem:[#allocation189_spill] sm:$0xff]  ;;  %v13734_v57 = vld [vmem:[#allocation192_spill] sm:$0xff] }
 0x61c   :  { %vm3357_vm0 = vmand %vm3146_vm15, %vm3229_vm11  ;;  %v3021_v2 = vcvt.f32.s32 %v13733_v40  ;;  %vm4740_vm15 = vcmask 654912  }
 0x61d   :  { %v2999_v3 = vshll.u32 %v2998_v41, 16  ;;  %v10984_v15 = vsel %vm3357_vm0, %v13729_v55, 0.0  ;;  %vm3148_vm8 = vcmp.ge.s32.totalorder %v2976_v45, 4  ;;  %vm12540_vm0 = vcmask 720512  }
 0x61e   :  { %v10964_v30 = vpop.permute.xlu1 %4457  ;;  %13730 = vst [vmem:[#allocation107_spill] sm:$0xff] %v10984_v15  ;;  %v10988_v52 = vpop.permute.xlu0 %4538  ;;  %vm3359_vm4 = vmand %vm3148_vm8, %vm3231_vm9  ;;  %vm12536_vm8 = vcmask 786112  }
 0x61f   :  { %4643 = vperm.xlu1 %6696, %v10962_v16   ;;  %v3022_v16 = vcvt.f32.s32 %v13727_v53  ;;  %13732 = vst [vmem:[#allocation137_spill] sm:$0xff] %v10988_v52  ;;  %v3000_v41 = vadd.s32 %v2999_v3, %v2997_v62  ;;  %v10995_v1 = vsel %vm3359_vm4, %v13734_v57, 0.0  ;;  %v13738_v3 = vld [vmem:[#allocation193_spill] sm:$0xff]  ;;  %v13741_v62 = vld [vmem:[#allocation71_spill] sm:$0xff]  ;;  %vm12541_vm4 = vcmask 851712  }
 0x620   :  { %13735 = vst [vmem:[#allocation180_spill] sm:$0xff] %v10995_v1 }
 0x621   :  { %vm3150_vm11 = vcmp.ge.s32.totalorder %v3000_v41, 4 }
 0x622   :  { %v10976_v8 = vpop.permute.xlu1 %4463  ;;  %vm3361_vm5 = vmand %vm3150_vm11, %vm3233_vm10  ;;  %vm4684_vm10 = vcmask 130112   ;;  %vm4768_vm11 = vcmask 917312  }
 0x623   :  { %4649 = vperm.xlu1 %6696, %v10974_v54   ;;  %v3023_v54 = vshll.u32 %v3022_v16, 16  ;;  %v11002_v16 = vpop.permute.xlu0 %4544  ;;  %v11005_v45 = vsel %vm3361_vm5, %v13738_v3, 0.0  ;;  %vm4775_vm5 = vcmask 982912  }
 0x624   :  { %13737 = vst [vmem:[#allocation111_spill] sm:$0xff] %v11002_v16  ;;  %13739 = vst [vmem:[#allocation158_spill] sm:$0xff] %v11005_v45 }
 0x625   :  { %v3024_v18 = vadd.s32 %v3023_v54, %v3021_v2 }
 0x626   :  { %v10986_v42 = vpop.permute.xlu1 %4469 }
 0x627   :  { %13731 = vst [vmem:[#allocation154_spill] sm:$0xff] %v10986_v42  ;;  %4655 = vperm.xlu1 %6696, %v10984_v15   ;;  %vm3152_vm9 = vcmp.ge.s32.totalorder %v3024_v18, 4  ;;  %v11017_v13 = vpop.permute.xlu0 %4550 }
 0x628   :  { %vm3363_vm7 = vmand %vm3152_vm9, %vm3235_vm2  ;;  %13743 = vst [vmem:[#allocation114_spill] sm:$0xff] %v11017_v13  ;;  %vm4691_vm2 = vcmask 195712   ;;  %vm4782_vm9 = vcmask 1048512  }
 0x629   :  { %v11013_v55 = vsel %vm3363_vm7, %v13741_v62, 0.0  ;;  %vm12538_vm7 = vcmask 1041409  }
 0x62a   :  { %v10997_v53 = vpop.permute.xlu1 %4475  ;;  %13742 = vst [vmem:[#allocation182_spill] sm:$0xff] %v11013_v55 }
 0x62b   :  { %13736 = vst [vmem:[#allocation36_spill] sm:$0xff] %v10997_v53  ;;  %4661 = vperm.xlu1 %6696, %v10995_v1   ;;  %v11022_v40 = vpop.permute.xlu0 %4556 }
 0x62c   :  { %13745 = vst [vmem:[#allocation145_spill] sm:$0xff] %v11022_v40 }
 0x62e   :  { %v11007_v38 = vpop.permute.xlu1 %4481 }
 0x62f   :  { %13740 = vst [vmem:[#allocation141_spill] sm:$0xff] %v11007_v38  ;;  %4667 = vperm.xlu1 %6696, %v11005_v45   ;;  %v11028_v18 = vpop.permute.xlu0 %4562 }
 0x630   :  { %13748 = vst [vmem:[#allocation117_spill] sm:$0xff] %v11028_v18 }
 0x632   :  { %v11015_v54 = vpop.permute.xlu1 %4487 }
 0x633   :  { %4673 = vperm.xlu1 %6696, %v11013_v55   ;;  %v11032_v3 = vpop.permute.xlu0 %4568 }
 0x634   :  { %13750 = vst [vmem:[#allocation149_spill] sm:$0xff] %v11032_v3 }
 0x636   :  { %v11020_v41 = vpop.permute.xlu1 %4493 }
 0x637   :  { %13744 = vst [vmem:[#allocation162_spill] sm:$0xff] %v11020_v41  ;;  %v11038_v45 = vpop.permute.xlu0 %4574 }
 0x638   :  { %13753 = vst [vmem:[#allocation153_spill] sm:$0xff] %v11038_v45 }
 0x63a   :  { %v11024_v2 = vpop.permute.xlu1 %4499 }
 0x63b   :  { %13746 = vst [vmem:[#allocation184_spill] sm:$0xff] %v11024_v2  ;;  %v11042_v1 = vpop.permute.xlu0 %4580  ;;  %v13764_v2 = vld [vmem:[#allocation8_spill] sm:$0xff] }
 0x63c   :  { %13755 = vst [vmem:[#allocation124_spill] sm:$0xff] %v11042_v1 }
 0x63e   :  { %v11026_v57 = vpop.permute.xlu1 %4505 }
 0x63f   :  { %13747 = vst [vmem:[#allocation221_spill] sm:$0xff] %v11026_v57  ;;  %v11048_v38 = vpop.permute.xlu0 %4586 }
 0x640   :  { %13757 = vst [vmem:[#allocation127_spill] sm:$0xff] %v11048_v38 }
 0x642   :  { %v11030_v33 = vpop.permute.xlu1 %4511 }
 0x643   :  { %13749 = vst [vmem:[#allocation166_spill] sm:$0xff] %v11030_v33  ;;  %v11052_v40 = vpop.permute.xlu0 %4592 }
 0x644   :  { %13759 = vst [vmem:[#allocation130_spill] sm:$0xff] %v11052_v40 }
 0x646   :  { %v11034_v62 = vpop.permute.xlu1 %4517 }
 0x647   :  { %13751 = vst [vmem:[#allocation186_spill] sm:$0xff] %v11034_v62  ;;  %v13761_v62 = vld [vmem:[#allocation49_spill] sm:$0xff]  ;;  %v11062_v57 = vpop.permute.xlu0 %4598 }
 0x648   :  { %v4693_v45 = vadd.s32 4294967272, %v13761_v62  ;;  %v4686_v53 = vadd.s32 4294967280, %v13761_v62  ;;  %13763 = vst [vmem:[#allocation169_spill] sm:$0xff] %v11062_v57  ;;  %v4714_v13 = vadd.s32 4294967248, %v13761_v62  ;;  %v4742_v40 = vadd.s32 4294967216, %v13761_v62 }
 0x649   :  { %v11072_v38 = vsub.s32 %v13761_v62, %v13764_v2  ;;  %v4707_v42 = vadd.s32 4294967256, %v13761_v62 }
 0x64a   :  { %v11036_v15 = vpop.permute.xlu1 %4523  ;;  %v11085_v52 = vsub.s32 %v4686_v53, %v13764_v2  ;;  %v11090_v1 = vsub.s32 %v4714_v13, %v13764_v2  ;;  %v11096_v41 = vsub.s32 %v4742_v40, %v13764_v2 }
 0x64b   :  { %13752 = vst [vmem:[#allocation121_spill] sm:$0xff] %v11036_v15  ;;  %v4679_v15 = vadd.s32 4294967288, %v13761_v62  ;;  %v11105_v13 = vpop.permute.xlu0 %4604 }
 0x64c   :  { %v4690_v53 = vrot.slane %v10506_v46, %v11085_v52  ;;  %13767 = vst [vmem:[#allocation171_spill] sm:$0xff] %v11105_v13  ;;  %v4796_v63 = vrot.slane %v13770_v37, %v11085_v52 }
 0x64e   :  { %v11040_v55 = vpop.permute.xlu1 %4529 }
 0x64f   :  { %13754 = vst [vmem:[#allocation188_spill] sm:$0xff] %v11040_v55  ;;  %v4700_v55 = vadd.s32 4294967264, %v13761_v62 }
 0x651   :  { %v11081_v57 = vsub.s32 %v4700_v55, %v13764_v2  ;;  %v4678_v55 = vrot.slane %v10487_v34, %v11072_v38  ;;  %v11112_v34 = vsub.s32 %v4707_v42, %v13764_v2 }
 0x652   :  { %v11044_v39 = vpop.permute.xlu1 %4535 }
 0x653   :  { %v4711_v37 = vrot.slane %v10544_v22, %v11112_v34 }
 0x656   :  { %v11046_v51 = vpop.permute.xlu1 %4541 }
 0x657   :  { %13756 = vst [vmem:[#allocation157_spill] sm:$0xff] %v11046_v51  ;;  %v4756_v51 = vadd.s32 4294967200, %v13761_v62 }
 0x65a   :  { %v11050_v18 = vpop.permute.xlu1 %4547 }
 0x65b   :  { %13758 = vst [vmem:[#allocation161_spill] sm:$0xff] %v11050_v18  ;;  %v4728_v18 = vadd.s32 4294967232, %v13761_v62 }
 0x65e   :  { %v11054_v3 = vpop.permute.xlu1 %4553 }
 0x65f   :  { %13760 = vst [vmem:[#allocation165_spill] sm:$0xff] %v11054_v3  ;;  %v11068_v3 = vsub.s32 %v4679_v15, %v13764_v2 }
 0x661   :  { %v4791_v15 = vrot.slane %v10664_v28, %v11068_v3  ;;  %v4721_v28 = vadd.s32 4294967240, %v13761_v62  ;;  %v4870_v42 = vrot.slane %v10823_v36, %v11068_v3  ;;  %v13772_v36 = vld [vmem:[#allocation72_spill] sm:$0xff] }
 0x662   :  { %v11058_v33 = vpop.permute.xlu1 %4559 }
 0x663   :  { %13762 = vst [vmem:[#allocation133_spill] sm:$0xff] %v11058_v33  ;;  %v11075_v33 = vsub.s32 %v4693_v45, %v13764_v2  ;;  %v11093_v45 = vsub.s32 %v4728_v18, %v13764_v2  ;;  %v13768_v18 = vld [vmem:[#allocation93_spill] sm:$0xff] }
 0x664   :  { %v4683_v49 = vrot.slane %v13768_v18, %v11068_v3  ;;  %v4770_v18 = vadd.s32 4294967184, %v13761_v62 }
 0x665   :  { %v4697_v40 = vrot.slane %v10525_v61, %v11075_v33  ;;  %v4801_v13 = vrot.slane %v10684_v58, %v11075_v33 }
 0x666   :  { %v11078_v16 = vpop.permute.xlu1 %4565  ;;  %v4685_v61 = vsel %vm4684_vm10, %v4683_v49, %v4678_v55 }
 0x667   :  { %13765 = vst [vmem:[#allocation136_spill] sm:$0xff] %v11078_v16  ;;  %v13766_v16 = vld [vmem:[#allocation108_spill] sm:$0xff] }
 0x668   :  { %v4787_v14 = vrot.slane %v13766_v16, %v11072_v38  ;;  %v11117_v16 = vsub.s32 %v4756_v51, %v13764_v2  ;;  %v11130_v51 = vsub.s32 %v4721_v28, %v13764_v2 }
 0x66a   :  { %v11114_v29 = vpop.permute.xlu1 %4571  ;;  %v4792_v46 = vsel %vm4684_vm10, %v4791_v15, %v4787_v14  ;;  %v4735_v14 = vadd.s32 4294967224, %v13761_v62  ;;  %v4866_v15 = vrot.slane %v10542_v5, %v11072_v38  ;;  %v13774_v5 = vld [vmem:[#allocation203_spill] sm:$0xff] }
 0x66b   :  { %13769 = vst [vmem:[#allocation140_spill] sm:$0xff] %v11114_v29  ;;  %v4692_v29 = vsel %vm4691_vm2, %v4690_v53, %v4685_v61  ;;  %v4797_v49 = vsel %vm4691_vm2, %v4796_v63, %v4792_v46  ;;  %v4704_v53 = vrot.slane %v13772_v36, %v11081_v57  ;;  %v4811_v61 = vrot.slane %v10704_v35, %v11112_v34  ;;  %v13775_v36 = vld [vmem:[#allocation208_spill] sm:$0xff] }
 0x66c   :  { %v4699_v58 = vsel %vm4698_vm13, %v4697_v40, %v4692_v29  ;;  %v4802_v28 = vsel %vm4698_vm13, %v4801_v13, %v4797_v49  ;;  %v11146_v29 = vpop.permute.xlu0 %4610  ;;  %v4806_v40 = vrot.slane %v13774_v5, %v11081_v57  ;;  %v4871_v22 = vsel %vm4684_vm10, %v4870_v42, %v4866_v15  ;;  %v13776_v49 = vld [vmem:[#allocation92_spill] sm:$0xff] }
 0x66d   :  { %13773 = vst [vmem:[#allocation144_spill] sm:$0xff] %v11146_v29  ;;  %v4880_v63 = vrot.slane %v10841_v43, %v11075_v33  ;;  %v4706_v46 = vsel %vm4705_vm14, %v4704_v53, %v4699_v58  ;;  %v11157_v13 = vsub.s32 %v4735_v14, %v13764_v2  ;;  %v4725_v5 = vrot.slane %v13776_v49, %v11130_v51  ;;  %v13777_v43 = vld [vmem:[#allocation96_spill] sm:$0xff] }
 0x66e   :  { %v11139_v55 = vpop.permute.xlu1 %4577  ;;  %v4713_v35 = vsel %vm4712_vm1, %v4711_v37, %v4706_v46  ;;  %v4749_v29 = vadd.s32 4294967208, %v13761_v62  ;;  %v4807_v42 = vsel %vm4705_vm14, %v4806_v40, %v4802_v28  ;;  %v4718_v58 = vrot.slane %v13777_v43, %v11090_v1  ;;  %v13778_v46 = vld [vmem:[#allocation118_spill] sm:$0xff] }
 0x66f   :  { %13771 = vst [vmem:[#allocation173_spill] sm:$0xff] %v11139_v55  ;;  %v4875_v55 = vrot.slane %v13775_v36, %v11085_v52  ;;  %v4812_v53 = vsel %vm4712_vm1, %v4811_v61, %v4807_v42  ;;  %v4821_v14 = vrot.slane %v10724_v19, %v11130_v51  ;;  %v11173_v37 = vsub.s32 %v4770_v18, %v13764_v2  ;;  %v13779_v61 = vld [vmem:[#allocation209_spill] sm:$0xff] }
 0x670   :  { %v4816_v49 = vrot.slane %v13778_v46, %v11090_v1  ;;  %v4890_v40 = vrot.slane %v10859_v4, %v11112_v34  ;;  %v4720_v43 = vsel %vm4719_vm3, %v4718_v58, %v4713_v35  ;;  %v4885_v42 = vrot.slane %v13779_v61, %v11081_v57  ;;  %v13782_v4 = vld [vmem:[#allocation94_spill] sm:$0xff] }
 0x671   :  { %v4876_v36 = vsel %vm4691_vm2, %v4875_v55, %v4871_v22  ;;  %v4763_v19 = vadd.s32 4294967192, %v13761_v62  ;;  %v11184_v55 = vpop.permute.xlu0 %4616  ;;  %v4727_v18 = vsel %vm12539_vm6, %v4725_v5, %v4720_v43  ;;  %v11188_v22 = vsub.s32 %v4749_v29, %v13764_v2  ;;  %v13783_v5 = vld [vmem:[#allocation73_spill] sm:$0xff] }
 0x672   :  { %v11164_v15 = vpop.permute.xlu1 %4583  ;;  %v4881_v28 = vsel %vm4698_vm13, %v4880_v63, %v4876_v36  ;;  %13780 = vst [vmem:[#allocation175_spill] sm:$0xff] %v11184_v55  ;;  %v4817_v63 = vsel %vm4719_vm3, %v4816_v49, %v4812_v53  ;;  %v4739_v35 = vrot.slane %v13782_v4, %v11157_v13  ;;  %v4831_v46 = vrot.slane %v10744_v0, %v11157_v13  ;;  %v13784_v29 = vld [vmem:[#allocation101_spill] sm:$0xff]  ;;  %v13785_v4 = vld [vmem:[#allocation210_spill] sm:$0xff] }
 0x673   :  { %v4822_v58 = vsel %vm12539_vm6, %v4821_v14, %v4817_v63  ;;  %v4886_v61 = vsel %vm4705_vm14, %v4885_v42, %v4881_v28  ;;  %v4732_v43 = vrot.slane %v13783_v5, %v11093_v45  ;;  %v4826_v55 = vrot.slane %v13784_v29, %v11093_v45  ;;  %v13786_v14 = vld [vmem:[#allocation74_spill] sm:$0xff] }
 0x674   :  { %v4891_v53 = vsel %vm4712_vm1, %v4890_v40, %v4886_v61  ;;  %v4900_v49 = vrot.slane %v10872_v26, %v11130_v51  ;;  %v11209_v0 = vsub.s32 %v4763_v19, %v13764_v2  ;;  %v4746_v28 = vrot.slane %v13786_v14, %v11096_v41  ;;  %v13787_v14 = vld [vmem:[#allocation70_spill] sm:$0xff] }
 0x675   :  { %v4734_v42 = vsel %vm4733_vm12, %v4732_v43, %v4727_v18  ;;  %v4777_v63 = vadd.s32 4294967176, %v13761_v62  ;;  %v4827_v40 = vsel %vm4733_vm12, %v4826_v55, %v4822_v58  ;;  %v4841_v29 = vrot.slane %v10764_v60, %v11188_v22  ;;  %v13788_v62 = vld [vmem:[#allocation95_spill] sm:$0xff] }
 0x676   :  { %v11191_v36 = vpop.permute.xlu1 %4589  ;;  %v4741_v26 = vsel %vm4740_vm15, %v4739_v35, %v4734_v42  ;;  %v4832_v5 = vsel %vm4740_vm15, %v4831_v46, %v4827_v40  ;;  %v4836_v18 = vrot.slane %v13787_v14, %v11096_v41  ;;  %v4753_v43 = vrot.slane %v13788_v62, %v11188_v22  ;;  %v13789_v58 = vld [vmem:[#allocation211_spill] sm:$0xff] }
 0x677   :  { %13781 = vst [vmem:[#allocation148_spill] sm:$0xff] %v11191_v36  ;;  %v4895_v36 = vrot.slane %v13785_v4, %v11090_v1  ;;  %v11223_v4 = vpop.permute.xlu0 %4622  ;;  %v4910_v35 = vrot.slane %v10884_v56, %v11157_v13  ;;  %v4905_v46 = vrot.slane %v13789_v58, %v11093_v45  ;;  %v4949_v60 = vrot.slane %v10930_v32, %v11068_v3 }
 0x678   :  { %v4748_v42 = vsel %vm12540_vm0, %v4746_v28, %v4741_v26  ;;  %v11240_v40 = vsub.s32 %v4777_v63, %v13764_v2  ;;  %v4945_v56 = vrot.slane %v10702_v11, %v11072_v38  ;;  %v4851_v32 = vrot.slane %v10784_v44, %v11209_v0  ;;  %v13791_v28 = vld [vmem:[#allocation97_spill] sm:$0xff] }
 0x679   :  { %v4896_v19 = vsel %vm4719_vm3, %v4895_v36, %v4891_v53  ;;  %v13790_v36 = vld [vmem:[#allocation206_spill] sm:$0xff]  ;;  %v4755_v58 = vsel %vm12536_vm8, %v4753_v43, %v4748_v42  ;;  %v4767_v2 = vrot.slane %v13791_v28, %v11209_v0  ;;  %v4920_v26 = vrot.slane %v10896_v24, %v11188_v22 }
 0x67a   :  { %v11216_v61 = vpop.permute.xlu1 %4595  ;;  %v4901_v55 = vsel %vm12539_vm6, %v4900_v49, %v4896_v19  ;;  %v4846_v53 = vrot.slane %v13790_v36, %v11117_v16  ;;  %v4837_v49 = vsel %vm12540_vm0, %v4836_v18, %v4832_v5  ;;  %v13792_v5 = vld [vmem:[#allocation80_spill] sm:$0xff]  ;;  %v4950_v44 = vsel %vm4684_vm10, %v4949_v60, %v4945_v56 }
 0x67b   :  { %v4842_v14 = vsel %vm12536_vm8, %v4841_v29, %v4837_v49  ;;  %v4906_v62 = vsel %vm4733_vm12, %v4905_v46, %v4901_v55  ;;  %v4760_v11 = vrot.slane %v13792_v5, %v11117_v16  ;;  %v13793_v29 = vld [vmem:[#allocation212_spill] sm:$0xff]  ;;  %v4959_v55 = vrot.slane %v10942_v48, %v11075_v33  ;;  %v11264_v43 = vpop.permute.xlu0 %4628  ;;  %v13794_v46 = vld [vmem:[#allocation134_spill] sm:$0xff] }
 0x67c   :  { %v4911_v63 = vsel %vm4740_vm15, %v4910_v35, %v4906_v62  ;;  %v4915_v18 = vrot.slane %v13793_v29, %v11096_v41  ;;  %v4856_v36 = vrot.slane %v13794_v46, %v11173_v37  ;;  %v4954_v24 = vrot.slane %v10722_v21, %v11085_v52 }
 0x67d   :  { %v4847_v35 = vsel %vm12541_vm4, %v4846_v53, %v4842_v14  ;;  %v4762_v49 = vsel %vm12541_vm4, %v4760_v11, %v4755_v58  ;;  %v4861_v48 = vrot.slane %v10804_v47, %v11240_v40  ;;  %v4930_v21 = vrot.slane %v10908_v59, %v11209_v0  ;;  %v13795_v14 = vld [vmem:[#allocation98_spill] sm:$0xff]  ;;  %v13796_v58 = vld [vmem:[#allocation16_spill] sm:$0xff] }
 0x67e   :  { %v11243_v19 = vpop.permute.xlu1 %4601  ;;  %v4852_v60 = vsel %vm4768_vm11, %v4851_v32, %v4847_v35  ;;  %v4916_v56 = vsel %vm12540_vm0, %v4915_v18, %v4911_v63  ;;  %v4769_v62 = vsel %vm4768_vm11, %v4767_v2, %v4762_v49  ;;  %v4955_v53 = vsel %vm4691_vm2, %v4954_v24, %v4950_v44  ;;  %v13797_v2 = vld [vmem:[#allocation63_spill] sm:$0xff]  ;;  %v13798_v35 = vld [vmem:[#allocation128_spill] sm:$0xff] }
 0x67f   :  { %v4921_v28 = vsel %vm12536_vm8, %v4920_v26, %v4916_v56  ;;  %v4781_v5 = vrot.slane %v13795_v14, %v11240_v40  ;;  %v4925_v32 = vrot.slane %v13796_v58, %v11117_v16  ;;  %v4960_v11 = vsel %vm4698_vm13, %v4959_v55, %v4955_v53  ;;  %v11299_v55 = vpop.permute.xlu0 %4634 }
 0x680   :  { %v4969_v47 = vrot.slane %v10952_v6, %v11112_v34  ;;  %v4774_v63 = vrot.slane %v13797_v2, %v11173_v37  ;;  %v4964_v59 = vrot.slane %v10742_v17, %v11081_v57  ;;  %v4857_v26 = vsel %vm4775_vm5, %v4856_v36, %v4852_v60 }
 0x681   :  { %v4862_v18 = vsel %vm4782_vm9, %v4861_v48, %v4857_v26  ;;  %v4926_v44 = vsel %vm12541_vm4, %v4925_v32, %v4921_v28  ;;  %vm12537_vm8 = vcmask 1042434   ;;  %v4940_v24 = vrot.slane %v10918_v7, %v11240_v40 }
 0x682   :  { %v11271_v42 = vpop.permute.xlu1 %4607  ;;  %v4776_v6 = vsel %vm4775_vm5, %v4774_v63, %v4769_v62  ;;  %v4931_v46 = vsel %vm4768_vm11, %v4930_v21, %v4926_v44  ;;  %v4965_v17 = vsel %vm4705_vm14, %v4964_v59, %v4960_v11  ;;  %v4935_v49 = vrot.slane %v13798_v35, %v11173_v37  ;;  %v13799_v63 = vld [vmem:[#allocation30_spill] sm:$0xff] }
 0x683   :  { %v4783_v36 = vsel %vm4782_vm9, %v4781_v5, %v4776_v6  ;;  %v4970_v60 = vsel %vm4712_vm1, %v4969_v47, %v4965_v17  ;;  %v4979_v48 = vrot.slane %v10964_v30, %v11130_v51  ;;  %v4974_v56 = vrot.slane %v10762_v12, %v11090_v1  ;;  %v11341_v2 = vpop.permute.xlu0 %4640  ;;  %v13802_v6 = vld [vmem:[#allocation150_spill] sm:$0xff] }
 0x684   :  { %v4984_v62 = vrot.slane %v10782_v50, %v11093_v45  ;;  %v4994_v7 = vrot.slane %v10802_v10, %v11096_v41  ;;  %v5338_v28 = vsel %vm12538_vm7, %v4862_v18, %v4783_v36  ;;  %v5004_v53 = vrot.slane %v10821_v31, %v11117_v16 }
 0x685   :  { %v5014_v14 = vrot.slane %v10839_v23, %v11173_v37  ;;  %v5024_v30 = vrot.slane %v10857_v25, %v11072_v38  ;;  %v4936_v12 = vsel %vm4775_vm5, %v4935_v49, %v4931_v46  ;;  %v5033_v50 = vrot.slane %v10870_v20, %v11085_v52  ;;  %v13803_v46 = vld [vmem:[#allocation178_spill] sm:$0xff]  ;;  %v13805_v49 = vld [vmem:[#allocation124_spill] sm:$0xff] }
 0x686   :  { %v11295_v29 = vpop.permute.xlu1 %4613  ;;  %v4941_v10 = vsel %vm4782_vm9, %v4940_v24, %v4936_v12  ;;  %v4975_v5 = vsel %vm4719_vm3, %v4974_v56, %v4970_v60  ;;  %v5028_v58 = vrot.slane %v11015_v54, %v11068_v3  ;;  %v5043_v32 = vrot.slane %v10882_v27, %v11081_v57  ;;  %v13800_v54 = vld [vmem:[#allocation146_spill] sm:$0xff] }
 0x687   :  { %v4980_v11 = vsel %vm12539_vm6, %v4979_v48, %v4975_v5  ;;  %v4989_v25 = vrot.slane %v10976_v8, %v11157_v13  ;;  %v5107_v47 = vrot.slane %v11044_v39, %v11068_v3  ;;  %v5053_v20 = vrot.slane %v10894_v9, %v11090_v1  ;;  %v13801_v39 = vld [vmem:[#allocation176_spill] sm:$0xff]  ;;  %v13806_v48 = vld [vmem:[#allocation137_spill] sm:$0xff] }
 0x688   :  { %v5063_v59 = vrot.slane %v13799_v63, %v11093_v45  ;;  %v5186_v27 = vrot.slane %v11164_v15, %v11068_v3  ;;  %v11354_v8 = vsel %vm12537_vm8, %v4941_v10, %v5338_v28  ;;  %v5103_v24 = vrot.slane %v13803_v46, %v11072_v38  ;;  %v13804_v15 = vld [vmem:[#allocation162_spill] sm:$0xff]  ;;  %v13807_v10 = vld [vmem:[#allocation157_spill] sm:$0xff]  ;;  %v13826_v63 = vld [vmem:[#allocation136_spill] sm:$0xff] }
 0x689   :  { %v4985_v17 = vsel %vm4733_vm12, %v4984_v62, %v4980_v11  ;;  %v5029_v36 = vsel %vm4684_vm10, %v5028_v58, %v5024_v30  ;;  %v5038_v35 = vrot.slane %v13804_v15, %v11075_v33  ;;  %v5182_v60 = vrot.slane %v13805_v49, %v11072_v38  ;;  %v13808_v62 = vld [vmem:[#allocation111_spill] sm:$0xff]  ;;  %v13809_v30 = vld [vmem:[#allocation154_spill] sm:$0xff]  ;;  %v13810_v15 = vld [vmem:[#allocation148_spill] sm:$0xff] }
 0x68a   :  { %v11319_v21 = vpop.permute.xlu1 %4619  ;;  %v5112_v56 = vrot.slane %v13806_v48, %v11085_v52  ;;  %v4990_v28 = vsel %vm4740_vm15, %v4989_v25, %v4985_v17  ;;  %v5108_v12 = vsel %vm4684_vm10, %v5107_v47, %v5103_v24  ;;  %v5117_v5 = vrot.slane %v13807_v10, %v11075_v33  ;;  %v13811_v25 = vld [vmem:[#allocation127_spill] sm:$0xff]  ;;  %v4647_v17 = vpop.permute.xlu0 %4646 }
 0x68b   :  { %v5122_v11 = vrot.slane %v13808_v62, %v11081_v57  ;;  %v4999_v58 = vrot.slane %v13809_v30, %v11188_v22  ;;  %v5187_v46 = vsel %vm4684_vm10, %v5186_v27, %v5182_v60  ;;  %v5196_v49 = vrot.slane %v13810_v15, %v11075_v33  ;;  %v13812_v27 = vld [vmem:[#allocation184_spill] sm:$0xff] }
 0x68c   :  { %v5034_v48 = vsel %vm4691_vm2, %v5033_v50, %v5029_v36  ;;  %v5191_v47 = vrot.slane %v13811_v25, %v11085_v52  ;;  %v5261_v24 = vrot.slane %v11264_v43, %v11072_v38  ;;  %v4995_v62 = vsel %vm12540_vm0, %v4994_v7, %v4990_v28  ;;  %v13813_v36 = vld [vmem:[#allocation161_spill] sm:$0xff] }
 0x68d   :  { %v5039_v30 = vsel %vm4698_vm13, %v5038_v35, %v5034_v48  ;;  %v5048_v60 = vrot.slane %v13812_v27, %v11112_v34  ;;  %v5113_v15 = vsel %vm4691_vm2, %v5112_v56, %v5108_v12  ;;  %v5127_v25 = vrot.slane %v13813_v36, %v11112_v34 }
 0x68e   :  { %v11351_v18 = vpop.permute.xlu1 %4625  ;;  %v5118_v50 = vsel %vm4698_vm13, %v5117_v5, %v5113_v15  ;;  %v5192_v44 = vsel %vm4691_vm2, %v5191_v47, %v5187_v46  ;;  %v5270_v7 = vrot.slane %v11299_v55, %v11085_v52  ;;  %v5206_v56 = vrot.slane %v11216_v61, %v11112_v34  ;;  %v13816_v46 = vld [vmem:[#allocation130_spill] sm:$0xff] }
 0x68f   :  { %v5197_v35 = vsel %vm4698_vm13, %v5196_v49, %v5192_v44  ;;  %vm13815_vm8 = vcmask 786112   ;;  %v5044_v5 = vsel %vm4705_vm14, %v5043_v32, %v5039_v30  ;;  %v5201_v48 = vrot.slane %v13816_v46, %v11081_v57  ;;  %v4653_v32 = vpop.permute.xlu0 %4652 }
 0x690   :  { %v5000_v12 = vsel %vm13815_vm8, %v4999_v58, %v4995_v62  ;;  %v5123_v44 = vsel %vm4705_vm14, %v5122_v11, %v5118_v50  ;;  %v13818_v58 = vld [vmem:[#allocation165_spill] sm:$0xff]  ;;  %v5280_v11 = vrot.slane %v11341_v2, %v11081_v57  ;;  %v5216_v50 = vrot.slane %v11243_v19, %v11130_v51  ;;  %v13821_v2 = vld [vmem:[#allocation166_spill] sm:$0xff] }
 0x691   :  { %v5128_v61 = vsel %vm4712_vm1, %v5127_v25, %v5123_v44  ;;  %v5137_v62 = vrot.slane %v13818_v58, %v11130_v51  ;;  %v5202_v30 = vsel %vm4705_vm14, %v5201_v48, %v5197_v35  ;;  %v13819_v25 = vld [vmem:[#allocation36_spill] sm:$0xff]  ;;  %v13824_v58 = vld [vmem:[#allocation171_spill] sm:$0xff]  ;;  %vm12546_vm8 = vcmask 1043459  }
 0x692   :  { %v4632_v9 = vpop.permute.xlu1 %4631  ;;  %v5207_v15 = vsel %vm4712_vm1, %v5206_v56, %v5202_v30  ;;  %vm13830_vm7 = vcmask 786112  }
 0x693   :  { %v5265_v10 = vrot.slane %v4632_v9, %v11068_v3  ;;  %v13814_v9 = vld [vmem:[#allocation114_spill] sm:$0xff]  ;;  %v4659_v30 = vpop.permute.xlu0 %4658 }
 0x694   :  { %v5132_v26 = vrot.slane %v13814_v9, %v11090_v1 }
 0x695   :  { %v5266_v43 = vsel %vm4684_vm10, %v5265_v10, %v5261_v24  ;;  %v5049_v24 = vsel %vm4712_vm1, %v5048_v60, %v5044_v5  ;;  %v13817_v10 = vld [vmem:[#allocation221_spill] sm:$0xff]  ;;  %v5005_v60 = vsel %vm12541_vm4, %v5004_v53, %v5000_v12 }
 0x696   :  { %v4638_v28 = vpop.permute.xlu1 %4637  ;;  %v5058_v55 = vrot.slane %v13817_v10, %v11130_v51  ;;  %v5271_v49 = vsel %vm4691_vm2, %v5270_v7, %v5266_v43  ;;  %v5009_v43 = vrot.slane %v13819_v25, %v11209_v0  ;;  %v5054_v9 = vsel %vm4719_vm3, %v5053_v20, %v5049_v24  ;;  %v13820_v7 = vld [vmem:[#allocation169_spill] sm:$0xff] }
 0x697   :  { %v5275_v47 = vrot.slane %v4638_v28, %v11075_v33  ;;  %v5211_v35 = vrot.slane %v13820_v7, %v11090_v1  ;;  %v5068_v28 = vrot.slane %v13821_v2, %v11157_v13  ;;  %v5133_v56 = vsel %vm4719_vm3, %v5132_v26, %v5128_v61  ;;  %v13822_v5 = vld [vmem:[#allocation133_spill] sm:$0xff] }
 0x698   :  { %v5059_v53 = vsel %vm12539_vm6, %v5058_v55, %v5054_v9  ;;  %v5138_v12 = vsel %vm12539_vm6, %v5137_v62, %v5133_v56  ;;  %v5147_v46 = vrot.slane %v13822_v5, %v11157_v13  ;;  %v5290_v10 = vrot.slane %v4647_v17, %v11090_v1 }
 0x699   :  { %v5276_v27 = vsel %vm4698_vm13, %v5275_v47, %v5271_v49  ;;  %v5212_v20 = vsel %vm4719_vm3, %v5211_v35, %v5207_v15  ;;  %v13823_v47 = vld [vmem:[#allocation145_spill] sm:$0xff]  ;;  %v5226_v26 = vrot.slane %v11271_v42, %v11157_v13  ;;  %v5010_v49 = vsel %vm4768_vm11, %v5009_v43, %v5005_v60 }
 0x69a   :  { %v4644_v36 = vpop.permute.xlu1 %4643  ;;  %v5281_v19 = vsel %vm4705_vm14, %v5280_v11, %v5276_v27  ;;  %v5142_v24 = vrot.slane %v13823_v47, %v11093_v45  ;;  %v5217_v55 = vsel %vm12539_vm6, %v5216_v50, %v5212_v20  ;;  %v5064_v61 = vsel %vm4733_vm12, %v5063_v59, %v5059_v53  ;;  %v13825_v11 = vld [vmem:[#allocation186_spill] sm:$0xff]  ;;  %v13827_v43 = vld [vmem:[#allocation117_spill] sm:$0xff]  ;;  %v4665_v47 = vpop.permute.xlu0 %4664 }
 0x69b   :  { %v5285_v31 = vrot.slane %v4644_v36, %v11112_v34  ;;  %v5221_v62 = vrot.slane %v13824_v58, %v11093_v45  ;;  %v5069_v17 = vsel %vm4740_vm15, %v5068_v28, %v5064_v61  ;;  %v5078_v15 = vrot.slane %v13825_v11, %v11188_v22 }
 0x69c   :  { %v5143_v42 = vsel %vm4733_vm12, %v5142_v24, %v5138_v12  ;;  %v5157_v59 = vrot.slane %v13826_v63, %v11188_v22  ;;  %v5152_v9 = vrot.slane %v13827_v43, %v11096_v41  ;;  %v5300_v7 = vrot.slane %v4653_v32, %v11093_v45 }
 0x69d   :  { %v5286_v48 = vsel %vm4712_vm1, %v5285_v31, %v5281_v19  ;;  %v5148_v50 = vsel %vm4740_vm15, %v5147_v46, %v5143_v42  ;;  %v5222_v36 = vsel %vm4733_vm12, %v5221_v62, %v5217_v55  ;;  %v5236_v31 = vrot.slane %v11295_v29, %v11188_v22  ;;  %v13829_v19 = vld [vmem:[#allocation144_spill] sm:$0xff]  ;;  %v13831_v29 = vld [vmem:[#allocation121_spill] sm:$0xff] }
 0x69e   :  { %v4650_v44 = vpop.permute.xlu1 %4649  ;;  %v5291_v60 = vsel %vm4719_vm3, %v5290_v10, %v5286_v48  ;;  %v5227_v35 = vsel %vm4740_vm15, %v5226_v26, %v5222_v36  ;;  %v5015_v2 = vsel %vm4775_vm5, %v5014_v14, %v5010_v49  ;;  %v13828_v28 = vrot.slane %v13800_v54, %v11096_v41  ;;  %v13833_v54 = vld [vmem:[#allocation140_spill] sm:$0xff]  ;;  %v13834_v55 = vld [vmem:[#allocation149_spill] sm:$0xff] }
 0x69f   :  { %v5295_v27 = vrot.slane %v4650_v44, %v11130_v51  ;;  %v5231_v32 = vrot.slane %v13829_v19, %v11096_v41  ;;  %v5088_v46 = vrot.slane %v13831_v29, %v11209_v0  ;;  %v5153_v23 = vsel %vm12540_vm0, %v5152_v9, %v5148_v50  ;;  %v13836_v62 = vld [vmem:[#allocation141_spill] sm:$0xff]  ;;  %v13839_v50 = vld [vmem:[#allocation188_spill] sm:$0xff]  ;;  %v4671_v29 = vpop.permute.xlu0 %4670 }
 0x6a0   :  { %v5074_v56 = vsel %vm12540_vm0, %v13828_v28, %v5069_v17  ;;  %v5167_v48 = vrot.slane %v13833_v54, %v11209_v0  ;;  %v5162_v26 = vrot.slane %v13834_v55, %v11117_v16  ;;  %v5310_v44 = vrot.slane %v4659_v30, %v11096_v41 }
 0x6a1   :  { %v5296_v25 = vsel %vm12539_vm6, %v5295_v27, %v5291_v60  ;;  %v5079_v5 = vsel %vm13830_vm7, %v5078_v15, %v5074_v56  ;;  %vm13832_vm6 = vmmov %vm13830_vm7  ;;  %v5232_v24 = vsel %vm12540_vm0, %v5231_v32, %v5227_v35  ;;  %v5246_v61 = vrot.slane %v11319_v21, %v11209_v0  ;;  %v13838_v15 = vld [vmem:[#allocation175_spill] sm:$0xff] }
 0x6a2   :  { %v4656_v53 = vpop.permute.xlu1 %4655  ;;  %v5301_v14 = vsel %vm4733_vm12, %v5300_v7, %v5296_v25  ;;  %v5158_v20 = vsel %vm13832_vm6, %v5157_v59, %v5153_v23  ;;  %vm13835_vm7 = vmmov %vm13832_vm6  ;;  %v5019_v27 = vrot.slane %v13836_v62, %v11240_v40  ;;  %v13837_v17 = vrot.slane %v13801_v39, %v11117_v16  ;;  %v13840_v39 = vld [vmem:[#allocation173_spill] sm:$0xff] }
 0x6a3   :  { %v5305_v12 = vrot.slane %v4656_v53, %v11157_v13  ;;  %v5237_v49 = vsel %vm13835_vm7, %v5236_v31, %v5232_v24  ;;  %v5241_v42 = vrot.slane %v13838_v15, %v11117_v16  ;;  %v5098_v63 = vrot.slane %v13839_v50, %v11240_v40  ;;  %v13841_v7 = vld [vmem:[#allocation153_spill] sm:$0xff] }
 0x6a4   :  { %v5084_v11 = vsel %vm12541_vm4, %v13837_v17, %v5079_v5  ;;  %v5163_v21 = vsel %vm12541_vm4, %v5162_v26, %v5158_v20  ;;  %v5177_v25 = vrot.slane %v13840_v39, %v11240_v40  ;;  %v5172_v35 = vrot.slane %v13841_v7, %v11173_v37  ;;  %v13843_v62 = vld [vmem:[#allocation9_spill] sm:$0xff]  ;;  %v13844_v17 = vld [vmem:[#allocation22_spill] sm:$0xff] }
 0x6a5   :  { %v5306_v10 = vsel %vm4740_vm15, %v5305_v12, %v5301_v14  ;;  %v5089_v30 = vsel %vm4768_vm11, %v5088_v46, %v5084_v11  ;;  %v5168_v36 = vsel %vm4768_vm11, %v5167_v48, %v5163_v21  ;;  %v5242_v43 = vsel %vm12541_vm4, %v5241_v42, %v5237_v49  ;;  %v13845_v15 = vld [vmem:[#allocation17_spill] sm:$0xff]  ;;  %v13848_v21 = vld [vmem:[#allocation10_spill] sm:$0xff] }
 0x6a6   :  { %v4662_v58 = vpop.permute.xlu1 %4661  ;;  %v5311_v59 = vsel %vm12540_vm0, %v5310_v44, %v5306_v10  ;;  %v5320_v31 = vrot.slane %v4665_v47, %v11117_v16  ;;  %v5247_v53 = vsel %vm4768_vm11, %v5246_v61, %v5242_v43  ;;  %v5256_v28 = vrot.slane %v11351_v18, %v11240_v40  ;;  %v13847_v50 = vld [vmem:[#allocation213_spill] sm:$0xff] }
 0x6a7   :  { %v5315_v60 = vrot.slane %v4662_v58, %v11188_v22  ;;  %v5020_v19 = vsel %vm4782_vm9, %v5019_v27, %v5015_v2  ;;  %v13842_v32 = vrot.slane %v13802_v6, %v11173_v37  ;;  %v5251_v5 = vrot.slane %v11223_v4, %v11173_v37 }
 0x6a8   :  { %v5173_v14 = vsel %vm4775_vm5, %v5172_v35, %v5168_v36  ;;  %vm12545_vm7 = vcmask 1044484   ;;  %v5342_v4 = vsel %vm12546_vm8, %v5020_v19, %v11354_v8  ;;  %v5330_v54 = vrot.slane %v4671_v29, %v11173_v37  ;;  %v13849_v36 = vld [vmem:[#allocation219_spill] sm:$0xff]  ;;  %v13852_v35 = vld [vmem:[#allocation18_spill] sm:$0xff] }
 0x6a9   :  { %v5316_v9 = vsel %vm13832_vm6, %v5315_v60, %v5311_v59  ;;  %v5094_v12 = vsel %vm4775_vm5, %v13842_v32, %v5089_v30  ;;  %v5178_v2 = vsel %vm4782_vm9, %v5177_v25, %v5173_v14  ;;  %v5252_v6 = vsel %vm4775_vm5, %v5251_v5, %v5247_v53  ;;  %v13846_v60 = vld [vmem:[#allocation218_spill] sm:$0xff]  ;;  %v13850_v25 = vld [vmem:[#allocation19_spill] sm:$0xff]  ;;  %v13856_v5 = vld [vmem:[#allocation48_spill] sm:$0xff] }
 0x6aa   :  { %v4668_v56 = vpop.permute.xlu1 %4667  ;;  %v5099_v23 = vsel %vm4782_vm9, %v5098_v63, %v5094_v12  ;;  %v5321_v18 = vsel %vm12541_vm4, %v5320_v31, %v5316_v9  ;;  %vm12544_vm6 = vcmask 1045509   ;;  %v5257_v47 = vsel %vm4782_vm9, %v5256_v28, %v5252_v6  ;;  %v13851_v9 = vld [vmem:[#allocation220_spill] sm:$0xff]  ;;  %v13853_v53 = vld [vmem:[#allocation38_spill] sm:$0xff]  ;;  %v13858_v14 = vld [vmem:[#allocation23_spill] sm:$0xff] }
 0x6ab   :  { %v5325_v46 = vrot.slane %v4668_v56, %v11209_v0  ;;  %vm12543_vm0 = vcmask 1046534   ;;  %v5344_v10 = vsel %vm12545_vm7, %v5099_v23, %v5342_v4  ;;  %vm12542_vm4 = vcmask 1047559   ;;  %v13854_v56 = vld [vmem:[#allocation214_spill] sm:$0xff]  ;;  %v13860_v6 = vld [vmem:[#allocation25_spill] sm:$0xff] }
 0x6ac   :  { %v5346_v26 = vsel %vm12544_vm6, %v5178_v2, %v5344_v10  ;;  %v13855_v32 = vld [vmem:[#allocation222_spill] sm:$0xff]  ;;  %vm13958_vm6 = vcmask 851712   ;;  %vm13978_vm7 = vcmask 851712  }
 0x6ad   :  { %v5326_v20 = vsel %vm4768_vm11, %v5325_v46, %v5321_v18  ;;  %v5348_v49 = vsel %vm12543_vm0, %v5257_v47, %v5346_v26  ;;  %v13857_v46 = vld [vmem:[#allocation223_spill] sm:$0xff]  ;;  %v13859_v2 = vld [vmem:[#allocation42_spill] sm:$0xff]  ;;  %v13862_v47 = vld [vmem:[#allocation24_spill] sm:$0xff]  ;;  %vm13955_vm0 = vcmask 786112  }
 0x6ae   :  { %v4674_v48 = vpop.permute.xlu1 %4673  ;;  %v5331_v55 = vsel %vm4775_vm5, %v5330_v54, %v5326_v20  ;;  %v13861_v54 = vld [vmem:[#allocation44_spill] sm:$0xff]  ;;  %v13863_v10 = vld [vmem:[#allocation46_spill] sm:$0xff]  ;;  %vm13979_vm8 = vmmov %vm13978_vm7 }
 0x6af   :  { %v5335_v24 = vrot.slane %v4674_v48, %v11240_v40  ;;  %v13864_v26 = vld [vmem:[#allocation216_spill] sm:$0xff] }
 0x6b1   :  { %v5336_v44 = vsel %vm4782_vm9, %v5335_v24, %v5331_v55 }
 0x6b2   :  { %v5350_v8 = vsel %vm12542_vm4, %v5336_v44, %v5348_v49  ;;  %v13865_v49 = vld [vmem:[#allocation11_spill] sm:$0xff]  ;;  %vm13949_vm4 = vcmask 523712  }
 0x6b3   :  { %5352 = vadd.xlane.f32.xlu0 %v5350_v8 }
 0x73c   :  { %v5353_v61 = vpop.xlane.xlu0 %5352 }
 0x73d   :  { %6701 = vrcp.f32 %v5353_v61  ;;  %v13866_v61 = vld [vmem:[#allocation20_spill] sm:$0xff] }
 0x74a   :  { %v11551_v58 = vpop.eup %6701 }
 0x74b   :  { %v5359_v27 = vrot.slane %v11551_v58, %v13843_v62  ;;  %v11561_v59 = vrot.slane %v11551_v58, %v13848_v21  ;;  %v11589_v8 = vrot.slane %v11551_v58, %v13865_v49  ;;  %v13871_v21 = vld [vmem:[#allocation29_spill] sm:$0xff]  ;;  %v13888_v49 = vld [vmem:[#allocation43_spill] sm:$0xff] }
 0x74d   :  { %v5403_v11 = vmul.f32 %v5359_v27, %v13844_v17  ;;  %v5396_v42 = vmul.f32 %v5359_v27, %v13845_v15  ;;  %v5410_v30 = vmul.f32 %v5359_v27, %v13846_v60  ;;  %v5397_v63 = vmul.f32 %v5359_v27, %v13847_v50  ;;  %v13867_v17 = vld [vmem:[#allocation26_spill] sm:$0xff]  ;;  %v13868_v15 = vld [vmem:[#allocation51_spill] sm:$0xff]  ;;  %v13869_v60 = vld [vmem:[#allocation217_spill] sm:$0xff] }
 0x74e   :  { %v5412_v39 = vmul.f32 %v11561_v59, %v13849_v36  ;;  %v5398_v43 = vmul.f32 %v5359_v27, %v13850_v25  ;;  %v5414_v7 = vmul.f32 %v11561_v59, %v13851_v9  ;;  %v5399_v31 = vmul.f32 %v5359_v27, %v13852_v35  ;;  %v13870_v50 = vld [vmem:[#allocation52_spill] sm:$0xff] }
 0x74f   :  { %5674 = vperm.xlu0 %6697, %v5403_v11   ;;  %5653 = vperm.xlu1 %6696, %v5396_v42   ;;  %v5416_v28 = vmul.f32 %v11561_v59, %v13853_v53  ;;  %v5400_v19 = vmul.f32 %v5359_v27, %v13854_v56  ;;  %v5418_v12 = vmul.f32 %v11561_v59, %v13855_v32 }
 0x750   :  { %v5401_v29 = vmul.f32 %v5359_v27, %v13856_v5  ;;  %v5420_v23 = vmul.f32 %v11561_v59, %v13857_v46  ;;  %v5402_v18 = vmul.f32 %v5359_v27, %v13858_v14  ;;  %v5422_v20 = vmul.f32 %v11561_v59, %v13859_v2  ;;  %v13879_v5 = vld [vmem:[#allocation37_spill] sm:$0xff]  ;;  %v13880_v46 = vld [vmem:[#allocation227_spill] sm:$0xff]  ;;  %v13881_v14 = vld [vmem:[#allocation40_spill] sm:$0xff] }
 0x751   :  { %v5404_v4 = vmul.f32 %v5359_v27, %v13860_v6  ;;  %v5424_v48 = vmul.f32 %v11561_v59, %v13861_v54  ;;  %v5405_v24 = vmul.f32 %v5359_v27, %v13862_v47  ;;  %v5426_v55 = vmul.f32 %v11561_v59, %v13863_v10  ;;  %v13882_v2 = vld [vmem:[#allocation12_spill] sm:$0xff]  ;;  %v13884_v54 = vld [vmem:[#allocation39_spill] sm:$0xff] }
 0x752   :  { %v5406_v44 = vmul.f32 %v5359_v27, %v13864_v26  ;;  %v5428_v62 = vmul.f32 %v11589_v8, %v13866_v61  ;;  %v5407_v11 = vmul.f32 %v5359_v27, %v13867_v17  ;;  %v5430_v42 = vmul.f32 %v11589_v8, %v13868_v15  ;;  %v13883_v6 = vld [vmem:[#allocation228_spill] sm:$0xff]  ;;  %v13886_v10 = vld [vmem:[#allocation67_spill] sm:$0xff]  ;;  %v13887_v26 = vld [vmem:[#allocation190_spill] sm:$0xff] }
 0x753   :  { %5695 = vperm.xlu0 %6697, %v5410_v30   ;;  %5656 = vperm.xlu1 %6696, %v5397_v63   ;;  %v5408_v30 = vmul.f32 %v5359_v27, %v13869_v60  ;;  %v5432_v63 = vmul.f32 %v11589_v8, %v13870_v50  ;;  %v5409_v36 = vmul.f32 %v5359_v27, %v13871_v21  ;;  %v13885_v47 = vld [vmem:[#allocation64_spill] sm:$0xff] }
 0x754   :  { %v5425_v61 = vmul.f32 %v11561_v59, %v13888_v49 }
 0x757   :  { %5701 = vperm.xlu0 %6697, %v5412_v39   ;;  %5659 = vperm.xlu1 %6696, %v5398_v43   ;;  %v13872_v39 = vld [vmem:[#allocation54_spill] sm:$0xff]  ;;  %v13873_v43 = vld [vmem:[#allocation31_spill] sm:$0xff] }
 0x758   :  { %v5434_v25 = vmul.f32 %v11589_v8, %v13872_v39  ;;  %v5411_v9 = vmul.f32 %v5359_v27, %v13873_v43  ;;  %v13896_v43 = vld [vmem:[#allocation195_spill] sm:$0xff] }
 0x75b   :  { %5707 = vperm.xlu0 %6697, %v5414_v7   ;;  %5662 = vperm.xlu1 %6696, %v5399_v31   ;;  %v13874_v7 = vld [vmem:[#allocation224_spill] sm:$0xff]  ;;  %v13875_v31 = vld [vmem:[#allocation58_spill] sm:$0xff] }
 0x75c   :  { %v5436_v35 = vmul.f32 %v11589_v8, %v13874_v7  ;;  %v5413_v53 = vmul.f32 %v11561_v59, %v13875_v31  ;;  %v13897_v7 = vld [vmem:[#allocation50_spill] sm:$0xff]  ;;  %v13898_v31 = vld [vmem:[#allocation196_spill] sm:$0xff] }
 0x75f   :  { %5713 = vperm.xlu0 %6697, %v5416_v28   ;;  %5665 = vperm.xlu1 %6696, %v5400_v19   ;;  %v13876_v28 = vld [vmem:[#allocation225_spill] sm:$0xff]  ;;  %v13877_v19 = vld [vmem:[#allocation60_spill] sm:$0xff] }
 0x760   :  { %v5438_v56 = vmul.f32 %v11589_v8, %v13876_v28  ;;  %v5415_v32 = vmul.f32 %v11561_v59, %v13877_v19  ;;  %v13899_v28 = vld [vmem:[#allocation13_spill] sm:$0xff] }
 0x761   :  { %v13900_v19 = vld [vmem:[#allocation53_spill] sm:$0xff] }
 0x763   :  { %5719 = vperm.xlu0 %6697, %v5418_v12   ;;  %5668 = vperm.xlu1 %6696, %v5401_v29   ;;  %v13878_v12 = vld [vmem:[#allocation226_spill] sm:$0xff]  ;;  %v5417_v29 = vmul.f32 %v11561_v59, %v13879_v5  ;;  %v13902_v5 = vld [vmem:[#allocation55_spill] sm:$0xff] }
 0x764   :  { %v5440_v27 = vmul.f32 %v11589_v8, %v13878_v12  ;;  %v13901_v12 = vld [vmem:[#allocation197_spill] sm:$0xff] }
 0x767   :  { %5725 = vperm.xlu0 %6697, %v5420_v23   ;;  %5671 = vperm.xlu1 %6696, %v5402_v18   ;;  %v5442_v23 = vmul.f32 %v11589_v8, %v13880_v46  ;;  %v5419_v18 = vmul.f32 %v11561_v59, %v13881_v14  ;;  %v13903_v46 = vld [vmem:[#allocation198_spill] sm:$0xff]  ;;  %v13904_v14 = vld [vmem:[#allocation56_spill] sm:$0xff] }
 0x76b   :  { %5731 = vperm.xlu0 %6697, %v5422_v20   ;;  %5677 = vperm.xlu1 %6696, %v5404_v4   ;;  %v11621_v20 = vrot.slane %v11551_v58, %v13882_v2  ;;  %v13905_v2 = vld [vmem:[#allocation199_spill] sm:$0xff] }
 0x76d   :  { %v5444_v4 = vmul.f32 %v11621_v20, %v13883_v6  ;;  %v5441_v6 = vmul.f32 %v11589_v8, %v13905_v2 }
 0x76f   :  { %5737 = vperm.xlu0 %6697, %v5424_v48   ;;  %5680 = vperm.xlu1 %6696, %v5405_v24   ;;  %v5421_v48 = vmul.f32 %v11561_v59, %v13884_v54  ;;  %v5446_v24 = vmul.f32 %v11621_v20, %v13885_v47 }
 0x773   :  { %5743 = vperm.xlu0 %6697, %v5426_v55   ;;  %5683 = vperm.xlu1 %6696, %v5406_v44   ;;  %v5423_v55 = vmul.f32 %v11561_v59, %v13886_v10  ;;  %v5448_v44 = vmul.f32 %v11621_v20, %v13887_v26 }
 0x777   :  { %5749 = vperm.xlu0 %6697, %v5428_v62   ;;  %5686 = vperm.xlu1 %6696, %v5407_v11   ;;  %v13889_v62 = vld [vmem:[#allocation191_spill] sm:$0xff]  ;;  %v13890_v11 = vld [vmem:[#allocation45_spill] sm:$0xff] }
 0x778   :  { %v5450_v17 = vmul.f32 %v11621_v20, %v13889_v62  ;;  %v5427_v15 = vmul.f32 %v11561_v59, %v13890_v11 }
 0x77b   :  { %5755 = vperm.xlu0 %6697, %v5430_v42   ;;  %5689 = vperm.xlu1 %6696, %v5408_v30   ;;  %v13891_v42 = vld [vmem:[#allocation69_spill] sm:$0xff]  ;;  %v13892_v30 = vld [vmem:[#allocation47_spill] sm:$0xff] }
 0x77c   :  { %v5452_v60 = vmul.f32 %v11621_v20, %v13891_v42  ;;  %v5429_v50 = vmul.f32 %v11589_v8, %v13892_v30  ;;  %v13913_v42 = vld [vmem:[#allocation202_spill] sm:$0xff] }
 0x77f   :  { %5761 = vperm.xlu0 %6697, %v5432_v63   ;;  %5692 = vperm.xlu1 %6696, %v5409_v36   ;;  %v13893_v63 = vld [vmem:[#allocation88_spill] sm:$0xff]  ;;  %v13894_v36 = vld [vmem:[#allocation194_spill] sm:$0xff] }
 0x780   :  { %v5454_v21 = vmul.f32 %v11621_v20, %v13893_v63  ;;  %v5431_v39 = vmul.f32 %v11589_v8, %v13894_v36  ;;  %v13914_v63 = vld [vmem:[#allocation77_spill] sm:$0xff]  ;;  %v13915_v36 = vld [vmem:[#allocation100_spill] sm:$0xff] }
 0x783   :  { %5767 = vperm.xlu0 %6697, %v5434_v25   ;;  %5698 = vperm.xlu1 %6696, %v5411_v9   ;;  %v13895_v25 = vld [vmem:[#allocation90_spill] sm:$0xff]  ;;  %v5433_v9 = vmul.f32 %v11589_v8, %v13896_v43 }
 0x784   :  { %v5456_v59 = vmul.f32 %v11621_v20, %v13895_v25  ;;  %v13916_v25 = vld [vmem:[#allocation14_spill] sm:$0xff] }
 0x787   :  { %5773 = vperm.xlu0 %6697, %v5436_v35   ;;  %5704 = vperm.xlu1 %6696, %v5413_v53   ;;  %v5458_v35 = vmul.f32 %v11621_v20, %v13897_v7  ;;  %v5435_v53 = vmul.f32 %v11589_v8, %v13898_v31  ;;  %v13917_v7 = vld [vmem:[#allocation65_spill] sm:$0xff]  ;;  %v13918_v31 = vld [vmem:[#allocation66_spill] sm:$0xff] }
 0x78b   :  { %5779 = vperm.xlu0 %6697, %v5438_v56   ;;  %5710 = vperm.xlu1 %6696, %v5415_v32   ;;  %v11657_v56 = vrot.slane %v11551_v58, %v13899_v28 }
 0x78d   :  { %v5460_v32 = vmul.f32 %v11657_v56, %v13900_v19 }
 0x78f   :  { %5785 = vperm.xlu0 %6697, %v5440_v27   ;;  %5716 = vperm.xlu1 %6696, %v5417_v29   ;;  %v5437_v27 = vmul.f32 %v11589_v8, %v13901_v12  ;;  %v5462_v29 = vmul.f32 %v11657_v56, %v13902_v5 }
 0x793   :  { %5791 = vperm.xlu0 %6697, %v5442_v23   ;;  %5722 = vperm.xlu1 %6696, %v5419_v18   ;;  %v5439_v23 = vmul.f32 %v11589_v8, %v13903_v46  ;;  %v5464_v18 = vmul.f32 %v11657_v56, %v13904_v14 }
 0x797   :  { %5797 = vperm.xlu0 %6697, %v5444_v4   ;;  %5728 = vperm.xlu1 %6696, %v5421_v48   ;;  %v13906_v4 = vld [vmem:[#allocation57_spill] sm:$0xff]  ;;  %v13907_v48 = vld [vmem:[#allocation200_spill] sm:$0xff] }
 0x798   :  { %v5466_v54 = vmul.f32 %v11657_v56, %v13906_v4  ;;  %v5443_v47 = vmul.f32 %v11589_v8, %v13907_v48  ;;  %v13912_v8 = vld [vmem:[#allocation201_spill] sm:$0xff] }
 0x79b   :  { %5803 = vperm.xlu0 %6697, %v5446_v24   ;;  %5734 = vperm.xlu1 %6696, %v5423_v55   ;;  %v13908_v24 = vld [vmem:[#allocation59_spill] sm:$0xff] }
 0x79c   :  { %v5468_v10 = vmul.f32 %v11657_v56, %v13908_v24  ;;  %v13909_v55 = vld [vmem:[#allocation75_spill] sm:$0xff] }
 0x79d   :  { %v5445_v26 = vmul.f32 %v11621_v20, %v13909_v55 }
 0x79f   :  { %5809 = vperm.xlu0 %6697, %v5448_v44   ;;  %5740 = vperm.xlu1 %6696, %v5425_v61   ;;  %v13910_v44 = vld [vmem:[#allocation61_spill] sm:$0xff]  ;;  %v13911_v61 = vld [vmem:[#allocation82_spill] sm:$0xff] }
 0x7a0   :  { %v5470_v49 = vmul.f32 %v11657_v56, %v13910_v44  ;;  %v5447_v62 = vmul.f32 %v11621_v20, %v13911_v61 }
 0x7a3   :  { %5815 = vperm.xlu0 %6697, %v5450_v17   ;;  %5746 = vperm.xlu1 %6696, %v5427_v15   ;;  %v5472_v15 = vmul.f32 %v11657_v56, %v13912_v8 }
 0x7a7   :  { %5821 = vperm.xlu0 %6697, %v5452_v60   ;;  %5752 = vperm.xlu1 %6696, %v5429_v50   ;;  %v5449_v60 = vmul.f32 %v11621_v20, %v13913_v42  ;;  %v13928_v42 = vld [vmem:[#allocation207_spill] sm:$0xff] }
 0x7ab   :  { %5827 = vperm.xlu0 %6697, %v5454_v21   ;;  %5758 = vperm.xlu1 %6696, %v5431_v39   ;;  %v5474_v21 = vmul.f32 %v11657_v56, %v13914_v63  ;;  %v5451_v39 = vmul.f32 %v11621_v20, %v13915_v36  ;;  %v13929_v36 = vld [vmem:[#allocation106_spill] sm:$0xff] }
 0x7af   :  { %5833 = vperm.xlu0 %6697, %v5456_v59   ;;  %5764 = vperm.xlu1 %6696, %v5433_v9   ;;  %v11701_v59 = vrot.slane %v11551_v58, %v13916_v25  ;;  %v13930_v25 = vld [vmem:[#allocation109_spill] sm:$0xff] }
 0x7b3   :  { %5839 = vperm.xlu0 %6697, %v5458_v35   ;;  %5770 = vperm.xlu1 %6696, %v5435_v53   ;;  %v5476_v35 = vmul.f32 %v11701_v59, %v13917_v7  ;;  %v5453_v53 = vmul.f32 %v11621_v20, %v13918_v31  ;;  %v5465_v7 = vmul.f32 %v11657_v56, %v13930_v25 }
 0x7b7   :  { %5845 = vperm.xlu0 %6697, %v5460_v32   ;;  %5776 = vperm.xlu1 %6696, %v5437_v27   ;;  %v13919_v32 = vld [vmem:[#allocation113_spill] sm:$0xff]  ;;  %v13920_v27 = vld [vmem:[#allocation204_spill] sm:$0xff] }
 0x7b8   :  { %v5478_v12 = vmul.f32 %v11701_v59, %v13919_v32  ;;  %v5455_v5 = vmul.f32 %v11621_v20, %v13920_v27 }
 0x7bb   :  { %5851 = vperm.xlu0 %6697, %v5462_v29   ;;  %5782 = vperm.xlu1 %6696, %v5439_v23   ;;  %v13921_v23 = vld [vmem:[#allocation86_spill] sm:$0xff] }
 0x7bc   :  { %v5480_v14 = vmul.f32 %v11701_v59, %v13921_v23 }
 0x7bf   :  { %5857 = vperm.xlu0 %6697, %v5464_v18   ;;  %5788 = vperm.xlu1 %6696, %v5441_v6   ;;  %v13922_v18 = vld [vmem:[#allocation123_spill] sm:$0xff] }
 0x7c0   :  { %v5457_v2 = vmul.f32 %v11621_v20, %v13922_v18 }
 0x7c3   :  { %5863 = vperm.xlu0 %6697, %v5466_v54   ;;  %5794 = vperm.xlu1 %6696, %v5443_v47   ;;  %v13923_v54 = vld [vmem:[#allocation68_spill] sm:$0xff]  ;;  %v13924_v47 = vld [vmem:[#allocation103_spill] sm:$0xff] }
 0x7c4   :  { %v5482_v48 = vmul.f32 %v11701_v59, %v13923_v54  ;;  %v5459_v24 = vmul.f32 %v11621_v20, %v13924_v47 }
 0x7c7   :  { %5869 = vperm.xlu0 %6697, %v5468_v10   ;;  %5800 = vperm.xlu1 %6696, %v5445_v26   ;;  %v13925_v26 = vld [vmem:[#allocation205_spill] sm:$0xff] }
 0x7c8   :  { %v5484_v44 = vmul.f32 %v11701_v59, %v13925_v26 }
 0x7ca   :  { %v11683_v17 = vpop.permute.xlu0 %5674  ;;  %v11685_v11 = vpop.permute.xlu1 %5653 }
 0x7cb   :  { %5875 = vperm.xlu0 %6697, %v5470_v49   ;;  %5806 = vperm.xlu1 %6696, %v5447_v62   ;;  %v13926_v49 = vld [vmem:[#allocation89_spill] sm:$0xff] }
 0x7cc   :  { %v5461_v61 = vmul.f32 %v11657_v56, %v13926_v49 }
 0x7ce   :  { %v11691_v30 = vpop.permute.xlu0 %5695  ;;  %v11693_v50 = vpop.permute.xlu1 %5656 }
 0x7cf   :  { %5881 = vperm.xlu0 %6697, %v5472_v15   ;;  %5812 = vperm.xlu1 %6696, %v5449_v60   ;;  %v13927_v15 = vld [vmem:[#allocation129_spill] sm:$0xff]  ;;  %v5463_v60 = vmul.f32 %v11657_v56, %v13928_v42 }
 0x7d0   :  { %v5486_v20 = vmul.f32 %v11701_v59, %v13927_v15 }
 0x7d2   :  { %v11703_v43 = vpop.permute.xlu0 %5701  ;;  %v11705_v9 = vpop.permute.xlu1 %5659 }
 0x7d3   :  { %5887 = vperm.xlu0 %6697, %v5474_v21   ;;  %5818 = vperm.xlu1 %6696, %v5451_v39   ;;  %v5488_v39 = vmul.f32 %v11701_v59, %v13929_v36 }
 0x7d6   :  { %v11711_v28 = vpop.permute.xlu0 %5707  ;;  %v11713_v19 = vpop.permute.xlu1 %5662 }
 0x7d7   :  { %5893 = vperm.xlu0 %6697, %v5476_v35   ;;  %5824 = vperm.xlu1 %6696, %v5453_v53   ;;  %v13931_v53 = vld [vmem:[#allocation91_spill] sm:$0xff] }
 0x7d8   :  { %v5490_v32 = vmul.f32 %v11701_v59, %v13931_v53 }
 0x7da   :  { %v11719_v29 = vpop.permute.xlu0 %5713  ;;  %v11721_v46 = vpop.permute.xlu1 %5665 }
 0x7db   :  { %5899 = vperm.xlu0 %6697, %v5478_v12   ;;  %5830 = vperm.xlu1 %6696, %v5455_v5   ;;  %v13932_v12 = vld [vmem:[#allocation112_spill] sm:$0xff]  ;;  %v13933_v5 = vld [vmem:[#allocation15_spill] sm:$0xff] }
 0x7dc   :  { %v5467_v27 = vmul.f32 %v11657_v56, %v13932_v12  ;;  %v11769_v23 = vrot.slane %v11551_v58, %v13933_v5 }
 0x7de   :  { %v11727_v6 = vpop.permute.xlu0 %5719  ;;  %v11729_v4 = vpop.permute.xlu1 %5668 }
 0x7df   :  { %5905 = vperm.xlu0 %6697, %v5480_v14   ;;  %5836 = vperm.xlu1 %6696, %v5457_v2   ;;  %v13934_v2 = vld [vmem:[#allocation139_spill] sm:$0xff] }
 0x7e0   :  { %v5492_v54 = vmul.f32 %v11769_v23, %v13934_v2 }
 0x7e2   :  { %v11735_v10 = vpop.permute.xlu0 %5725  ;;  %v11737_v55 = vpop.permute.xlu1 %5671 }
 0x7e3   :  { %5911 = vperm.xlu0 %6697, %v5482_v48   ;;  %5842 = vperm.xlu1 %6696, %v5459_v24   ;;  %v13935_v48 = vld [vmem:[#allocation116_spill] sm:$0xff] }
 0x7e4   :  { %v5469_v47 = vmul.f32 %v11657_v56, %v13935_v48  ;;  %v6118_v48 = vrot.slane %v11703_v43, %v11072_v38 }
 0x7e6   :  { %v11743_v62 = vpop.permute.xlu0 %5731  ;;  %v11745_v8 = vpop.permute.xlu1 %5677 }
 0x7e7   :  { %5917 = vperm.xlu0 %6697, %v5484_v44   ;;  %5848 = vperm.xlu1 %6696, %v5461_v61   ;;  %v13936_v44 = vld [vmem:[#allocation143_spill] sm:$0xff] }
 0x7e8   :  { %v5494_v49 = vmul.f32 %v11769_v23, %v13936_v44  ;;  %v13937_v61 = vld [vmem:[#allocation119_spill] sm:$0xff] }
 0x7e9   :  { %v5471_v15 = vmul.f32 %v11657_v56, %v13937_v61 }
 0x7ea   :  { %v11751_v63 = vpop.permute.xlu0 %5737  ;;  %v11753_v21 = vpop.permute.xlu1 %5680 }
 0x7eb   :  { %5923 = vperm.xlu0 %6697, %v5486_v20   ;;  %5854 = vperm.xlu1 %6696, %v5463_v60   ;;  %v13938_v60 = vld [vmem:[#allocation147_spill] sm:$0xff] }
 0x7ec   :  { %v5496_v36 = vmul.f32 %v11769_v23, %v13938_v60 }
 0x7ee   :  { %v11759_v35 = vpop.permute.xlu0 %5743  ;;  %v11761_v31 = vpop.permute.xlu1 %5683 }
 0x7ef   :  { %5929 = vperm.xlu0 %6697, %v5488_v39   ;;  %5860 = vperm.xlu1 %6696, %v5465_v7   ;;  %v13939_v39 = vld [vmem:[#allocation122_spill] sm:$0xff] }
 0x7f0   :  { %v5473_v25 = vmul.f32 %v11657_v56, %v13939_v39 }
 0x7f2   :  { %v11771_v14 = vpop.permute.xlu0 %5749  ;;  %v11773_v18 = vpop.permute.xlu1 %5686 }
 0x7f3   :  { %5935 = vperm.xlu0 %6697, %v5490_v32   ;;  %5866 = vperm.xlu1 %6696, %v5467_v27   ;;  %v13940_v32 = vld [vmem:[#allocation151_spill] sm:$0xff]  ;;  %v13941_v27 = vld [vmem:[#allocation126_spill] sm:$0xff] }
 0x7f4   :  { %v5498_v12 = vmul.f32 %v11769_v23, %v13940_v32  ;;  %v5475_v5 = vmul.f32 %v11657_v56, %v13941_v27  ;;  %v6127_v56 = vrot.slane %v11711_v28, %v11085_v52 }
 0x7f6   :  { %v11779_v24 = vpop.permute.xlu0 %5755  ;;  %v11781_v26 = vpop.permute.xlu1 %5689 }
 0x7f7   :  { %5941 = vperm.xlu0 %6697, %v5492_v54   ;;  %5872 = vperm.xlu1 %6696, %v5469_v47  }
 0x7fa   :  { %v11787_v20 = vpop.permute.xlu0 %5761  ;;  %v11789_v42 = vpop.permute.xlu1 %5692 }
 0x7fb   :  { %5947 = vperm.xlu0 %6697, %v5494_v49   ;;  %5878 = vperm.xlu1 %6696, %v5471_v15   ;;  %v13942_v49 = vld [vmem:[#allocation155_spill] sm:$0xff] }
 0x7fc   :  { %v5500_v61 = vmul.f32 %v11769_v23, %v13942_v49  ;;  %v13943_v15 = vld [vmem:[#allocation79_spill] sm:$0xff] }
 0x7fd   :  { %v5477_v60 = vmul.f32 %v11701_v59, %v13943_v15 }
 0x7fe   :  { %v11795_v7 = vpop.permute.xlu0 %5767  ;;  %v11797_v53 = vpop.permute.xlu1 %5698 }
 0x7ff   :  { %5953 = vperm.xlu0 %6697, %v5496_v36   ;;  %5884 = vperm.xlu1 %6696, %v5473_v25  }
 0x802   :  { %v11803_v2 = vpop.permute.xlu0 %5773  ;;  %v5705_v54 = vpop.permute.xlu1 %5704 }
 0x803   :  { %v6122_v47 = vrot.slane %v5705_v54, %v11068_v3  ;;  %5959 = vperm.xlu0 %6697, %v5498_v12   ;;  %5890 = vperm.xlu1 %6696, %v5475_v5   ;;  %v13944_v12 = vld [vmem:[#allocation159_spill] sm:$0xff] }
 0x804   :  { %v5502_v27 = vmul.f32 %v11769_v23, %v13944_v12  ;;  %v13945_v5 = vld [vmem:[#allocation163_spill] sm:$0xff] }
 0x805   :  { %v6123_v44 = vsel %vm4684_vm10, %v6122_v47, %v6118_v48  ;;  %v5479_v54 = vmul.f32 %v11701_v59, %v13945_v5  ;;  %v13946_v48 = vld [vmem:[#allocation28_spill] sm:$0xff]  ;;  %v6137_v47 = vrot.slane %v11719_v29, %v11081_v57  ;;  %v6147_v29 = vrot.slane %v11727_v6, %v11090_v1 }
 0x806   :  { %v11815_v36 = vpop.permute.xlu0 %5779  ;;  %v5711_v39 = vpop.permute.xlu1 %5710  ;;  %v6128_v25 = vsel %vm4691_vm2, %v6127_v56, %v6123_v44  ;;  %v11826_v28 = vrot.slane %v11551_v58, %v13946_v48  ;;  %v13947_v56 = vld [vmem:[#allocation76_spill] sm:$0xff]  ;;  %v6157_v6 = vrot.slane %v11735_v10, %v11093_v45  ;;  %v6167_v10 = vrot.slane %v11743_v62, %v11096_v41 }
 0x807   :  { %v6132_v43 = vrot.slane %v5711_v39, %v11075_v33  ;;  %5965 = vperm.xlu0 %6697, %v5500_v61   ;;  %5896 = vperm.xlu1 %6696, %v5477_v60   ;;  %v6177_v62 = vrot.slane %v11751_v63, %v11117_v16  ;;  %v6187_v63 = vrot.slane %v11759_v35, %v11173_v37 }
 0x808   :  { %v5508_v39 = vmul.f32 %v11826_v28, %v13947_v56 }
 0x809   :  { %v6133_v32 = vsel %vm4698_vm13, %v6132_v43, %v6128_v25  ;;  %v13948_v43 = vld [vmem:[#allocation81_spill] sm:$0xff] }
 0x80a   :  { %v11830_v49 = vpop.permute.xlu0 %5785  ;;  %v5717_v61 = vpop.permute.xlu1 %5716  ;;  %v6138_v15 = vsel %vm4705_vm14, %v6137_v47, %v6133_v32  ;;  %v5481_v58 = vmul.f32 %v11701_v59, %v13948_v43  ;;  %v13951_v47 = vld [vmem:[#allocation131_spill] sm:$0xff] }
 0x80b   :  { %v6142_v44 = vrot.slane %v5717_v61, %v11112_v34  ;;  %5971 = vperm.xlu0 %6697, %v5502_v27   ;;  %5902 = vperm.xlu1 %6696, %v5479_v54   ;;  %v13950_v54 = vld [vmem:[#allocation105_spill] sm:$0xff]  ;;  %v5483_v61 = vmul.f32 %v11701_v59, %v13951_v47  ;;  %v13952_v43 = vld [vmem:[#allocation83_spill] sm:$0xff] }
 0x80c   :  { %v5510_v48 = vmul.f32 %v11826_v28, %v13950_v54  ;;  %v13956_v47 = vld [vmem:[#allocation135_spill] sm:$0xff] }
 0x80d   :  { %v6143_v60 = vsel %vm4712_vm1, %v6142_v44, %v6138_v15 }
 0x80e   :  { %v11841_v25 = vpop.permute.xlu0 %5791  ;;  %v5723_v12 = vpop.permute.xlu1 %5722  ;;  %v6148_v32 = vsel %vm4719_vm3, %v6147_v29, %v6143_v60  ;;  %v13953_v29 = vld [vmem:[#allocation167_spill] sm:$0xff] }
 0x80f   :  { %v6152_v5 = vrot.slane %v5723_v12, %v11130_v51  ;;  %5989 = vperm.xlu0 %6697, %v5508_v39   ;;  %5908 = vperm.xlu1 %6696, %v5481_v58   ;;  %v5512_v58 = vmul.f32 %v11826_v28, %v13952_v43  ;;  %v5485_v12 = vmul.f32 %v11701_v59, %v13953_v29  ;;  %v13959_v29 = vld [vmem:[#allocation170_spill] sm:$0xff] }
 0x811   :  { %v6153_v27 = vsel %vm13949_vm4, %v6152_v5, %v6148_v32  ;;  %vm13954_vm4 = vcmask 720512  }
 0x812   :  { %v11852_v44 = vpop.permute.xlu0 %5797  ;;  %v5729_v15 = vpop.permute.xlu1 %5728  ;;  %v6158_v60 = vsel %vm4733_vm12, %v6157_v6, %v6153_v27  ;;  %v13957_v6 = vld [vmem:[#allocation78_spill] sm:$0xff] }
 0x813   :  { %v6162_v56 = vrot.slane %v5729_v15, %v11157_v13  ;;  %5995 = vperm.xlu0 %6697, %v5510_v48   ;;  %5914 = vperm.xlu1 %6696, %v5483_v61   ;;  %v5514_v61 = vmul.f32 %v11826_v28, %v13956_v47  ;;  %v5487_v15 = vmul.f32 %v11701_v59, %v13957_v6  ;;  %v13961_v6 = vld [vmem:[#allocation85_spill] sm:$0xff] }
 0x815   :  { %v6163_v39 = vsel %vm4740_vm15, %v6162_v56, %v6158_v60 }
 0x816   :  { %v11863_v5 = vpop.permute.xlu0 %5803  ;;  %v5735_v32 = vpop.permute.xlu1 %5734  ;;  %v6168_v27 = vsel %vm13954_vm4, %v6167_v10, %v6163_v39  ;;  %v13960_v10 = vld [vmem:[#allocation110_spill] sm:$0xff] }
 0x817   :  { %v6172_v54 = vrot.slane %v5735_v32, %v11188_v22  ;;  %6001 = vperm.xlu0 %6697, %v5512_v58   ;;  %5920 = vperm.xlu1 %6696, %v5485_v12   ;;  %v5516_v12 = vmul.f32 %v11826_v28, %v13959_v29  ;;  %v5489_v32 = vmul.f32 %v11701_v59, %v13960_v10  ;;  %v13963_v10 = vld [vmem:[#allocation180_spill] sm:$0xff] }
 0x819   :  { %v6173_v48 = vsel %vm13955_vm0, %v6172_v54, %v6168_v27  ;;  %vm13969_vm0 = vcmask 523712  }
 0x81a   :  { %v11874_v56 = vpop.permute.xlu0 %5809  ;;  %v5741_v60 = vpop.permute.xlu1 %5740  ;;  %v6178_v39 = vsel %vm13958_vm6, %v6177_v62, %v6173_v48  ;;  %v13962_v62 = vld [vmem:[#allocation215_spill] sm:$0xff]  ;;  %vm13973_vm6 = vmmov %vm13969_vm0 }
 0x81b   :  { %v6182_v43 = vrot.slane %v5741_v60, %v11209_v0  ;;  %6007 = vperm.xlu0 %6697, %v5514_v61   ;;  %5926 = vperm.xlu1 %6696, %v5487_v15   ;;  %v5518_v15 = vmul.f32 %v11826_v28, %v13961_v6  ;;  %v5491_v60 = vmul.f32 %v11701_v59, %v13962_v62 }
 0x81d   :  { %v6183_v58 = vsel %vm4768_vm11, %v6182_v43, %v6178_v39  ;;  %v6197_v39 = vrot.slane %v11771_v14, %v11072_v38 }
 0x81e   :  { %v11885_v54 = vpop.permute.xlu0 %5815  ;;  %v5747_v27 = vpop.permute.xlu1 %5746  ;;  %v6188_v48 = vsel %vm4775_vm5, %v6187_v63, %v6183_v58  ;;  %v6206_v58 = vrot.slane %v11779_v24, %v11085_v52  ;;  %v13964_v63 = vld [vmem:[#allocation138_spill] sm:$0xff]  ;;  %v6216_v24 = vrot.slane %v11787_v20, %v11081_v57 }
 0x81f   :  { %v6192_v47 = vrot.slane %v5747_v27, %v11240_v40  ;;  %6013 = vperm.xlu0 %6697, %v5516_v12   ;;  %5932 = vperm.xlu1 %6696, %v5489_v32   ;;  %v5519_v32 = vmul.f32 %v11826_v28, %v13963_v10  ;;  %v5493_v59 = vmul.f32 %v11769_v23, %v13964_v63 }
 0x820   :  { %v6048_v10 = vrot.slane %v11705_v9, %v11085_v52  ;;  %v6053_v63 = vrot.slane %v11713_v19, %v11075_v33 }
 0x821   :  { %v11890_v61 = vsel %vm4782_vm9, %v6192_v47, %v6188_v48 }
 0x822   :  { %v11896_v43 = vpop.permute.xlu0 %5821  ;;  %v5753_v35 = vpop.permute.xlu1 %5752 }
 0x823   :  { %v6201_v29 = vrot.slane %v5753_v35, %v11068_v3  ;;  %6019 = vperm.xlu0 %6697, %v5518_v15   ;;  %5938 = vperm.xlu1 %6696, %v5491_v60   ;;  %v13965_v15 = vld [vmem:[#allocation115_spill] sm:$0xff]  ;;  %v13966_v60 = vld [vmem:[#allocation172_spill] sm:$0xff] }
 0x824   :  { %v5520_v62 = vmul.f32 %v11826_v28, %v13965_v15  ;;  %v5495_v35 = vmul.f32 %v11769_v23, %v13966_v60 }
 0x825   :  { %v6202_v12 = vsel %vm4684_vm10, %v6201_v29, %v6197_v39  ;;  %v6043_v39 = vrot.slane %v11693_v50, %v11068_v3  ;;  %v6226_v50 = vrot.slane %v11795_v7, %v11090_v1 }
 0x826   :  { %v11908_v27 = vpop.permute.xlu0 %5827  ;;  %v6207_v47 = vsel %vm4691_vm2, %v6206_v58, %v6202_v12  ;;  %v5759_v14 = vpop.permute.xlu1 %5758 }
 0x827   :  { %v6211_v48 = vrot.slane %v5759_v14, %v11075_v33  ;;  %6022 = vperm.xlu0 %6697, %v5519_v32   ;;  %5944 = vperm.xlu1 %6696, %v5493_v59   ;;  %v6039_v32 = vrot.slane %v11685_v11, %v11072_v38  ;;  %v6058_v59 = vrot.slane %v11721_v46, %v11081_v57  ;;  %v13967_v14 = vld [vmem:[#allocation158_spill] sm:$0xff] }
 0x828   :  { %v5521_v9 = vmul.f32 %v11826_v28, %v13967_v14  ;;  %v6063_v11 = vrot.slane %v11729_v4, %v11112_v34 }
 0x829   :  { %v6212_v6 = vsel %vm4698_vm13, %v6211_v48, %v6207_v47  ;;  %v13968_v48 = vld [vmem:[#allocation87_spill] sm:$0xff] }
 0x82a   :  { %v11921_v29 = vpop.permute.xlu0 %5833  ;;  %v6217_v58 = vsel %vm4705_vm14, %v6216_v24, %v6212_v6  ;;  %v5765_v12 = vpop.permute.xlu1 %5764  ;;  %v5497_v24 = vmul.f32 %v11769_v23, %v13968_v48  ;;  %v6044_v6 = vsel %vm4684_vm10, %v6043_v39, %v6039_v32  ;;  %v6236_v39 = vrot.slane %v11803_v2, %v11093_v45 }
 0x82b   :  { %v6221_v20 = vrot.slane %v5765_v12, %v11112_v34  ;;  %6025 = vperm.xlu0 %6697, %v5520_v62   ;;  %5950 = vperm.xlu1 %6696, %v5495_v35   ;;  %v6049_v46 = vsel %vm4691_vm2, %v6048_v10, %v6044_v6  ;;  %v6068_v62 = vrot.slane %v11737_v55, %v11090_v1  ;;  %v13970_v12 = vld [vmem:[#allocation27_spill] sm:$0xff]  ;;  %v13971_v10 = vld [vmem:[#allocation142_spill] sm:$0xff] }
 0x82c   :  { %v6054_v35 = vsel %vm4698_vm13, %v6053_v63, %v6049_v46  ;;  %v5499_v32 = vmul.f32 %v11769_v23, %v13971_v10  ;;  %v6078_v2 = vrot.slane %v11745_v8, %v11093_v45  ;;  %v6083_v48 = vrot.slane %v11753_v21, %v11157_v13 }
 0x82d   :  { %v6222_v47 = vsel %vm4712_vm1, %v6221_v20, %v6217_v58  ;;  %v6059_v4 = vsel %vm4705_vm14, %v6058_v59, %v6054_v35  ;;  %v5522_v20 = vmul.f32 %v11826_v28, %v13970_v12  ;;  %v6088_v6 = vrot.slane %v11761_v31, %v11096_v41  ;;  %v13976_v12 = vld [vmem:[#allocation174_spill] sm:$0xff] }
 0x82e   :  { %v11943_v19 = vpop.permute.xlu0 %5839  ;;  %v6227_v7 = vsel %vm4719_vm3, %v6226_v50, %v6222_v47  ;;  %v5771_v15 = vpop.permute.xlu1 %5770  ;;  %v6064_v55 = vsel %vm4712_vm1, %v6063_v11, %v6059_v4  ;;  %v6093_v46 = vrot.slane %v11773_v18, %v11188_v22  ;;  %v6098_v31 = vrot.slane %v11781_v26, %v11117_v16 }
 0x82f   :  { %v6231_v60 = vrot.slane %v5771_v15, %v11130_v51  ;;  %6028 = vperm.xlu0 %6697, %v5521_v9   ;;  %5956 = vperm.xlu1 %6696, %v5497_v24   ;;  %v6069_v14 = vsel %vm4719_vm3, %v6068_v62, %v6064_v55  ;;  %v6073_v9 = vrot.slane %v11683_v17, %v11130_v51 }
 0x830   :  { %v6246_v24 = vrot.slane %v11815_v36, %v11096_v41  ;;  %v6256_v18 = vrot.slane %v11830_v49, %v11117_v16 }
 0x831   :  { %v6232_v58 = vsel %vm13969_vm0, %v6231_v60, %v6227_v7  ;;  %v13972_v7 = vld [vmem:[#allocation120_spill] sm:$0xff]  ;;  %v6074_v15 = vsel %vm13973_vm6, %v6073_v9, %v6069_v14  ;;  %vm13974_vm0 = vmmov %vm13954_vm4  ;;  %vm13975_vm6 = vcmask 786112   ;;  %v6266_v14 = vrot.slane %v11841_v25, %v11173_v37 }
 0x832   :  { %v11960_v50 = vpop.permute.xlu0 %5845  ;;  %v6237_v47 = vsel %vm4733_vm12, %v6236_v39, %v6232_v58  ;;  %v5777_v63 = vpop.permute.xlu1 %5776  ;;  %v5501_v8 = vmul.f32 %v11769_v23, %v13972_v7  ;;  %v6079_v36 = vsel %vm4733_vm12, %v6078_v2, %v6074_v15  ;;  %v6103_v39 = vrot.slane %v11789_v42, %v11209_v0  ;;  %v13980_v9 = vld [vmem:[#allocation32_spill] sm:$0xff] }
 0x833   :  { %v6241_v59 = vrot.slane %v5777_v63, %v11157_v13  ;;  %6031 = vperm.xlu0 %6697, %v5522_v20   ;;  %5962 = vperm.xlu1 %6696, %v5499_v32   ;;  %v6084_v35 = vsel %vm4740_vm15, %v6083_v48, %v6079_v36  ;;  %v5503_v20 = vmul.f32 %v11769_v23, %v13976_v12  ;;  %v13982_v15 = vld [vmem:[#allocation104_spill] sm:$0xff] }
 0x834   :  { %v6089_v4 = vsel %vm13974_vm0, %v6088_v6, %v6084_v35  ;;  %v6113_v63 = vrot.slane %v11797_v53, %v11240_v40  ;;  %v6108_v2 = vrot.slane %v11691_v30, %v11173_v37  ;;  %v5509_v48 = vmul.f32 %v11826_v28, %v13980_v9 }
 0x835   :  { %v6242_v11 = vsel %vm4740_vm15, %v6241_v59, %v6237_v47  ;;  %vm13987_vm0 = vcmask 523712  }
 0x836   :  { %v11981_v17 = vpop.permute.xlu0 %5851  ;;  %v6247_v21 = vsel %vm13954_vm4, %v6246_v24, %v6242_v11  ;;  %v5783_v62 = vpop.permute.xlu1 %5782  ;;  %vm13977_vm4 = vmmov %vm13975_vm6 }
 0x837   :  { %v6251_v60 = vrot.slane %v5783_v62, %v11188_v22  ;;  %5968 = vperm.xlu1 %6696, %v5501_v8   ;;  %v6094_v26 = vsel %vm13977_vm4, %v6093_v46, %v6089_v4  ;;  %v5511_v46 = vmul.f32 %v11826_v28, %v13982_v15 }
 0x838   :  { %v6099_v47 = vsel %vm13979_vm8, %v6098_v31, %v6094_v26  ;;  %vm13981_vm8 = vcmask 1041409   ;;  %v6276_v31 = vrot.slane %v11852_v44, %v11072_v38  ;;  %v6295_v44 = vrot.slane %v11874_v56, %v11081_v57 }
 0x839   :  { %v6252_v58 = vsel %vm13975_vm6, %v6251_v60, %v6247_v21  ;;  %v6104_v49 = vsel %vm4768_vm11, %v6103_v39, %v6099_v47  ;;  %v13984_v39 = vld [vmem:[#allocation132_spill] sm:$0xff]  ;;  %vm13990_vm6 = vcmask 720512  }
 0x83a   :  { %v11998_v10 = vpop.permute.xlu0 %5857  ;;  %v6257_v32 = vsel %vm13978_vm7, %v6256_v18, %v6252_v58  ;;  %v5789_v55 = vpop.permute.xlu1 %5788  ;;  %v6109_v7 = vsel %vm4775_vm5, %v6108_v2, %v6104_v49  ;;  %vm13983_vm7 = vcmask 1042434   ;;  %v5513_v18 = vmul.f32 %v11826_v28, %v13984_v39  ;;  %v13986_v2 = vld [vmem:[#allocation107_spill] sm:$0xff] }
 0x83b   :  { %v6261_v42 = vrot.slane %v5789_v55, %v11209_v0  ;;  %5974 = vperm.xlu1 %6696, %v5503_v20   ;;  %v6114_v25 = vsel %vm4782_vm9, %v6113_v63, %v6109_v7  ;;  %v6305_v63 = vrot.slane %v11885_v54, %v11090_v1  ;;  %v5517_v56 = vmul.f32 %v11826_v28, %v13986_v2 }
 0x83c   :  { %v6668_v30 = vsel %vm13981_vm8, %v11890_v61, %v6114_v25  ;;  %v6285_v61 = vrot.slane %v11863_v5, %v11085_v52  ;;  %vm13992_vm8 = vcmask 851712  }
 0x83d   :  { %v6262_v59 = vsel %vm4768_vm11, %v6261_v42, %v6257_v32  ;;  %v13985_v32 = vld [vmem:[#allocation34_spill] sm:$0xff] }
 0x83e   :  { %v12013_v24 = vpop.permute.xlu0 %5863  ;;  %v6267_v6 = vsel %vm4775_vm5, %v6266_v14, %v6262_v59  ;;  %v5795_v11 = vpop.permute.xlu1 %5794  ;;  %v5515_v5 = vmul.f32 %v11826_v28, %v13985_v32  ;;  %v6345_v32 = vrot.slane %v11943_v19, %v11173_v37 }
 0x83f   :  { %v6271_v53 = vrot.slane %v5795_v11, %v11240_v40  ;;  %5992 = vperm.xlu1 %6696, %v5509_v48   ;;  %v6315_v11 = vrot.slane %v11896_v43, %v11093_v45 }
 0x841   :  { %v6272_v8 = vsel %vm4782_vm9, %v6271_v53, %v6267_v6  ;;  %v13988_v53 = vld [vmem:[#allocation99_spill] sm:$0xff] }
 0x842   :  { %v12025_v21 = vsel %vm13983_vm7, %v6272_v8, %v6668_v30  ;;  %v12027_v62 = vpop.permute.xlu0 %5869  ;;  %v5801_v36 = vpop.permute.xlu1 %5800  ;;  %v5504_v54 = vmul.f32 %v11769_v23, %v13988_v53  ;;  %vm13995_vm7 = vcmask 1043459  }
 0x843   :  { %v6280_v60 = vrot.slane %v5801_v36, %v11068_v3  ;;  %5998 = vperm.xlu1 %6696, %v5511_v46   ;;  %v6325_v46 = vrot.slane %v11908_v27, %v11096_v41 }
 0x845   :  { %v6281_v35 = vsel %vm4684_vm10, %v6280_v60, %v6276_v31  ;;  %v13989_v31 = vld [vmem:[#allocation102_spill] sm:$0xff] }
 0x846   :  { %v12037_v4 = vpop.permute.xlu0 %5875  ;;  %v6286_v58 = vsel %vm4691_vm2, %v6285_v61, %v6281_v35  ;;  %v5807_v12 = vpop.permute.xlu1 %5806  ;;  %v5505_v43 = vmul.f32 %v11769_v23, %v13989_v31 }
 0x847   :  { %v6290_v20 = vrot.slane %v5807_v12, %v11075_v33  ;;  %6004 = vperm.xlu1 %6696, %v5513_v18   ;;  %v6335_v18 = vrot.slane %v11921_v29, %v11117_v16  ;;  %v13991_v12 = vld [vmem:[#allocation21_spill] sm:$0xff] }
 0x848   :  { %v5506_v27 = vmul.f32 %v11769_v23, %v13991_v12 }
 0x849   :  { %v6291_v26 = vsel %vm4698_vm13, %v6290_v20, %v6286_v58 }
 0x84a   :  { %v12046_v55 = vpop.permute.xlu0 %5881  ;;  %v6296_v47 = vsel %vm4705_vm14, %v6295_v44, %v6291_v26  ;;  %v5813_v42 = vpop.permute.xlu1 %5812 }
 0x84b   :  { %v6300_v49 = vrot.slane %v5813_v42, %v11112_v34  ;;  %6010 = vperm.xlu1 %6696, %v5515_v5   ;;  %v13993_v42 = vld [vmem:[#allocation125_spill] sm:$0xff] }
 0x84c   :  { %v5507_v29 = vmul.f32 %v11769_v23, %v13993_v42 }
 0x84d   :  { %v6301_v14 = vsel %vm4712_vm1, %v6300_v49, %v6296_v47 }
 0x84e   :  { %v12055_v59 = vpop.permute.xlu0 %5887  ;;  %v6306_v9 = vsel %vm4719_vm3, %v6305_v63, %v6301_v14  ;;  %v5819_v48 = vpop.permute.xlu1 %5818 }
 0x84f   :  { %v6310_v6 = vrot.slane %v5819_v48, %v11130_v51  ;;  %6016 = vperm.xlu1 %6696, %v5517_v56   ;;  %v13994_v56 = vld [vmem:[#allocation182_spill] sm:$0xff] }
 0x851   :  { %v6311_v7 = vsel %vm13987_vm0, %v6310_v6, %v6306_v9  ;;  %v5523_v9 = vmul.f32 %v11826_v28, %v13994_v56  ;;  %v6355_v6 = vrot.slane %v11960_v50, %v11072_v38 }
 0x852   :  { %v12064_v25 = vpop.permute.xlu0 %5893  ;;  %v6316_v30 = vsel %vm4733_vm12, %v6315_v11, %v6311_v7  ;;  %v5825_v8 = vpop.permute.xlu1 %5824  ;;  %v6364_v7 = vrot.slane %v11981_v17, %v11085_v52  ;;  %v6384_v17 = vrot.slane %v12013_v24, %v11090_v1  ;;  %v6404_v24 = vrot.slane %v12037_v4, %v11096_v41 }
 0x853   :  { %v6320_v15 = vrot.slane %v5825_v8, %v11157_v13  ;;  %5977 = vperm.xlu1 %6696, %v5504_v54   ;;  %v6424_v4 = vrot.slane %v12055_v59, %v11173_v37 }
 0x855   :  { %v6321_v36 = vsel %vm4740_vm15, %v6320_v15, %v6316_v30 }
 0x856   :  { %v6326_v60 = vsel %vm13990_vm6, %v6325_v46, %v6321_v36  ;;  %v5831_v61 = vpop.permute.xlu1 %5830  ;;  %v12074_v35 = vpop.permute.xlu0 %5899 }
 0x857   :  { %v6330_v39 = vrot.slane %v5831_v61, %v11188_v22  ;;  %5980 = vperm.xlu1 %6696, %v5505_v43   ;;  %v6443_v59 = vrot.slane %v12074_v35, %v11085_v52 }
 0x859   :  { %v6331_v58 = vsel %vm13977_vm4, %v6330_v39, %v6326_v60 }
 0x85a   :  { %v6336_v20 = vsel %vm13992_vm8, %v6335_v18, %v6331_v58  ;;  %v5837_v44 = vpop.permute.xlu1 %5836  ;;  %v12086_v5 = vpop.permute.xlu0 %5905 }
 0x85b   :  { %v6340_v26 = vrot.slane %v5837_v44, %v11209_v0  ;;  %5983 = vperm.xlu1 %6696, %v5506_v27  }
 0x85d   :  { %v6341_v47 = vsel %vm4768_vm11, %v6340_v26, %v6336_v20 }
 0x85e   :  { %v6346_v49 = vsel %vm4775_vm5, %v6345_v32, %v6341_v47  ;;  %v5843_v63 = vpop.permute.xlu1 %5842  ;;  %v12100_v11 = vpop.permute.xlu0 %5911 }
 0x85f   :  { %v6350_v14 = vrot.slane %v5843_v63, %v11240_v40  ;;  %5986 = vperm.xlu1 %6696, %v5507_v29   ;;  %v6463_v35 = vrot.slane %v12100_v11, %v11090_v1 }
 0x861   :  { %v6351_v2 = vsel %vm4782_vm9, %v6350_v14, %v6346_v49 }
 0x862   :  { %v6670_v19 = vsel %vm13995_vm7, %v6351_v2, %v12025_v21  ;;  %v5849_v48 = vpop.permute.xlu1 %5848  ;;  %v6374_v21 = vrot.slane %v11998_v10, %v11081_v57  ;;  %v5918_v8 = vpop.permute.xlu0 %5917  ;;  %v6394_v10 = vrot.slane %v12027_v62, %v11093_v45  ;;  %v6414_v62 = vrot.slane %v12046_v55, %v11117_v16 }
 0x863   :  { %v6359_v23 = vrot.slane %v5849_v48, %v11068_v3  ;;  %6034 = vperm.xlu1 %6696, %v5523_v9   ;;  %vm13996_vm7 = vcmask 1044484  }
 0x865   :  { %v6360_v53 = vsel %vm4684_vm10, %v6359_v23, %v6355_v6 }
 0x866   :  { %v6365_v54 = vsel %vm4691_vm2, %v6364_v7, %v6360_v53  ;;  %v5855_v28 = vpop.permute.xlu1 %5854  ;;  %v5924_v61 = vpop.permute.xlu0 %5923  ;;  %v6434_v53 = vrot.slane %v12064_v25, %v11072_v38 }
 0x867   :  { %v6369_v30 = vrot.slane %v5855_v28, %v11075_v33 }
 0x869   :  { %v6370_v50 = vsel %vm4698_vm13, %v6369_v30, %v6365_v54 }
 0x86a   :  { %v6375_v15 = vsel %vm4705_vm14, %v6374_v21, %v6370_v50  ;;  %v5861_v46 = vpop.permute.xlu1 %5860  ;;  %v5930_v20 = vpop.permute.xlu0 %5929 }
 0x86b   :  { %v6379_v36 = vrot.slane %v5861_v46, %v11112_v34 }
 0x86d   :  { %v6380_v31 = vsel %vm4712_vm1, %v6379_v36, %v6375_v15 }
 0x86e   :  { %v6385_v43 = vsel %vm4719_vm3, %v6384_v17, %v6380_v31  ;;  %v5867_v60 = vpop.permute.xlu1 %5866  ;;  %v5936_v63 = vpop.permute.xlu0 %5935 }
 0x86f   :  { %v6389_v39 = vrot.slane %v5867_v60, %v11130_v51 }
 0x871   :  { %v6390_v18 = vsel %vm13987_vm0, %v6389_v39, %v6385_v43 }
 0x872   :  { %v6395_v58 = vsel %vm4733_vm12, %v6394_v10, %v6390_v18  ;;  %v5873_v12 = vpop.permute.xlu1 %5872  ;;  %v12138_v6 = vpop.permute.xlu0 %5941 }
 0x873   :  { %v6399_v27 = vrot.slane %v5873_v12, %v11157_v13 }
 0x875   :  { %v6400_v44 = vsel %vm4740_vm15, %v6399_v27, %v6395_v58 }
 0x876   :  { %v6405_v26 = vsel %vm13990_vm6, %v6404_v24, %v6400_v44  ;;  %v5879_v32 = vpop.permute.xlu1 %5878  ;;  %v12149_v50 = vpop.permute.xlu0 %5947  ;;  %v6483_v24 = vrot.slane %v5924_v61, %v11096_v41 }
 0x877   :  { %v6409_v47 = vrot.slane %v5879_v32, %v11188_v22 }
 0x879   :  { %v6410_v42 = vsel %vm13977_vm4, %v6409_v47, %v6405_v26 }
 0x87a   :  { %v6415_v29 = vsel %vm13992_vm8, %v6414_v62, %v6410_v42  ;;  %v5885_v49 = vpop.permute.xlu1 %5884  ;;  %v12159_v31 = vpop.permute.xlu0 %5953 }
 0x87b   :  { %v6419_v14 = vrot.slane %v5885_v49, %v11209_v0 }
 0x87d   :  { %v6420_v2 = vsel %vm4768_vm11, %v6419_v14, %v6415_v29 }
 0x87e   :  { %v6425_v56 = vsel %vm4775_vm5, %v6424_v4, %v6420_v2  ;;  %v5891_v9 = vpop.permute.xlu1 %5890  ;;  %v12167_v27 = vpop.permute.xlu0 %5959  ;;  %v6503_v4 = vrot.slane %v5936_v63, %v11173_v37 }
 0x87f   :  { %v6429_v48 = vrot.slane %v5891_v9, %v11240_v40 }
 0x881   :  { %v6430_v55 = vsel %vm4782_vm9, %v6429_v48, %v6425_v56 }
 0x882   :  { %v6671_v23 = vsel %vm13996_vm7, %v6430_v55, %v6670_v19  ;;  %v5897_v7 = vpop.permute.xlu1 %5896  ;;  %v6453_v19 = vrot.slane %v12086_v5, %v11081_v57  ;;  %v6473_v5 = vrot.slane %v5918_v8, %v11093_v45  ;;  %v6493_v8 = vrot.slane %v5930_v20, %v11117_v16  ;;  %v12175_v62 = vpop.permute.xlu0 %5965 }
 0x883   :  { %v6438_v54 = vrot.slane %v5897_v7, %v11068_v3  ;;  %vm13997_vm7 = vcmask 1045509  }
 0x885   :  { %v6439_v28 = vsel %vm4684_vm10, %v6438_v54, %v6434_v53 }
 0x886   :  { %v6444_v30 = vsel %vm4691_vm2, %v6443_v59, %v6439_v28  ;;  %v5903_v21 = vpop.permute.xlu1 %5902  ;;  %v12182_v56 = vpop.permute.xlu0 %5971 }
 0x887   :  { %v6448_v15 = vrot.slane %v5903_v21, %v11075_v33 }
 0x889   :  { %v6449_v46 = vsel %vm4698_vm13, %v6448_v15, %v6444_v30 }
 0x88a   :  { %v6454_v25 = vsel %vm4705_vm14, %v6453_v19, %v6449_v46  ;;  %v5909_v36 = vpop.permute.xlu1 %5908  ;;  %v5990_v53 = vpop.permute.xlu0 %5989 }
 0x88b   :  { %v6458_v17 = vrot.slane %v5909_v36, %v11112_v34 }
 0x88d   :  { %v6459_v43 = vsel %vm4712_vm1, %v6458_v17, %v6454_v25 }
 0x88e   :  { %v6464_v60 = vsel %vm4719_vm3, %v6463_v35, %v6459_v43  ;;  %v5915_v39 = vpop.permute.xlu1 %5914  ;;  %v5996_v28 = vpop.permute.xlu0 %5995  ;;  %v6592_v35 = vrot.slane %v5990_v53, %v11072_v38 }
 0x88f   :  { %v6468_v10 = vrot.slane %v5915_v39, %v11130_v51 }
 0x891   :  { %v6469_v18 = vsel %vm13987_vm0, %v6468_v10, %v6464_v60  ;;  %v6601_v60 = vrot.slane %v5996_v28, %v11085_v52 }
 0x892   :  { %v6474_v58 = vsel %vm4733_vm12, %v6473_v5, %v6469_v18  ;;  %v5921_v12 = vpop.permute.xlu1 %5920  ;;  %v6002_v21 = vpop.permute.xlu0 %6001  ;;  %v6513_v18 = vrot.slane %v12138_v6, %v11072_v38 }
 0x893   :  { %v6478_v11 = vrot.slane %v5921_v12, %v11157_v13 }
 0x895   :  { %v6479_v44 = vsel %vm4740_vm15, %v6478_v11, %v6474_v58 }
 0x896   :  { %v6484_v26 = vsel %vm13990_vm6, %v6483_v24, %v6479_v44  ;;  %v5927_v32 = vpop.permute.xlu1 %5926  ;;  %v6008_v19 = vpop.permute.xlu0 %6007  ;;  %v6611_v24 = vrot.slane %v6002_v21, %v11081_v57 }
 0x897   :  { %v6488_v47 = vrot.slane %v5927_v32, %v11188_v22 }
 0x899   :  { %v6489_v42 = vsel %vm13977_vm4, %v6488_v47, %v6484_v26 }
 0x89a   :  { %v6494_v29 = vsel %vm13992_vm8, %v6493_v8, %v6489_v42  ;;  %v5933_v49 = vpop.permute.xlu1 %5932  ;;  %v6014_v25 = vpop.permute.xlu0 %6013 }
 0x89b   :  { %v6498_v14 = vrot.slane %v5933_v49, %v11209_v0 }
 0x89d   :  { %v6499_v61 = vsel %vm4768_vm11, %v6498_v14, %v6494_v29  ;;  %v6621_v29 = vrot.slane %v6008_v19, %v11090_v1 }
 0x89e   :  { %v5939_v2 = vpop.permute.xlu1 %5938  ;;  %v6504_v20 = vsel %vm4775_vm5, %v6503_v4, %v6499_v61  ;;  %v6020_v5 = vpop.permute.xlu0 %6019  ;;  %v6532_v61 = vrot.slane %v12159_v31, %v11081_v57 }
 0x89f   :  { %v6508_v9 = vrot.slane %v5939_v2, %v11240_v40 }
 0x8a1   :  { %v6509_v48 = vsel %vm4782_vm9, %v6508_v9, %v6504_v20  ;;  %v6631_v9 = vrot.slane %v6014_v25, %v11093_v45 }
 0x8a2   :  { %v5945_v55 = vpop.permute.xlu1 %5944  ;;  %v12188_v7 = vsel %vm13997_vm7, %v6509_v48, %v6671_v23  ;;  %v6023_v8 = vpop.permute.xlu0 %6022 }
 0x8a3   :  { %v6517_v39 = vrot.slane %v5945_v55, %v11068_v3 }
 0x8a5   :  { %v6518_v44 = vsel %vm4684_vm10, %v6517_v39, %v6513_v18 }
 0x8a6   :  { %v5951_v54 = vpop.permute.xlu1 %5950  ;;  %v6026_v53 = vpop.permute.xlu0 %6025 }
 0x8a7   :  { %v6527_v26 = vrot.slane %v5951_v54, %v11075_v33 }
 0x8aa   :  { %v5957_v59 = vpop.permute.xlu1 %5956 }
 0x8ab   :  { %v6537_v14 = vrot.slane %v5957_v59, %v11112_v34  ;;  %v6641_v59 = vrot.slane %v6020_v5, %v11096_v41 }
 0x8ae   :  { %v5963_v30 = vpop.permute.xlu1 %5962 }
 0x8af   :  { %v6547_v48 = vrot.slane %v5963_v30, %v11130_v51 }
 0x8b2   :  { %v5969_v63 = vpop.permute.xlu1 %5968 }
 0x8b3   :  { %v6557_v21 = vrot.slane %v5969_v63, %v11157_v13 }
 0x8b6   :  { %v12190_v15 = vpop.permute.xlu1 %5974 }
 0x8ba   :  { %v5993_v46 = vpop.permute.xlu1 %5992 }
 0x8bb   :  { %v6596_v36 = vrot.slane %v5993_v46, %v11068_v3  ;;  %v6522_v3 = vrot.slane %v12149_v50, %v11085_v52 }
 0x8bd   :  { %v6597_v23 = vsel %vm4684_vm10, %v6596_v36, %v6592_v35  ;;  %v6523_v38 = vsel %vm4691_vm2, %v6522_v3, %v6518_v44  ;;  %vm13998_vm10 = vmmov %vm13987_vm0  ;;  %v6567_v36 = vrot.slane %v12190_v15, %v11188_v22 }
 0x8be   :  { %v5999_v17 = vpop.permute.xlu1 %5998  ;;  %v6602_v58 = vsel %vm4691_vm2, %v6601_v60, %v6597_v23  ;;  %v6528_v49 = vsel %vm4698_vm13, %v6527_v26, %v6523_v38  ;;  %vm13999_vm2 = vmmov %vm13987_vm0  ;;  %vm14006_vm0 = vcmask 1046534  }
 0x8bf   :  { %v6606_v43 = vrot.slane %v5999_v17, %v11075_v33  ;;  %v6533_v50 = vsel %vm4705_vm14, %v6532_v61, %v6528_v49 }
 0x8c0   :  { %v6538_v20 = vsel %vm4712_vm1, %v6537_v14, %v6533_v50 }
 0x8c1   :  { %v6607_v12 = vsel %vm4698_vm13, %v6606_v43, %v6602_v58  ;;  %vm14000_vm13 = vmmov %vm13990_vm6 }
 0x8c2   :  { %v6005_v10 = vpop.permute.xlu1 %6004  ;;  %v6612_v47 = vsel %vm4705_vm14, %v6611_v24, %v6607_v12  ;;  %vm14001_vm14 = vmmov %vm13977_vm4 }
 0x8c3   :  { %v6616_v11 = vrot.slane %v6005_v10, %v11112_v34  ;;  %v6542_v34 = vrot.slane %v12167_v27, %v11090_v1  ;;  %v6646_v1 = vrot.slane %v6023_v8, %v11188_v22  ;;  %v6029_v27 = vpop.permute.xlu0 %6028 }
 0x8c4   :  { %v6656_v15 = vrot.slane %v6029_v27, %v11209_v0 }
 0x8c5   :  { %v6617_v6 = vsel %vm4712_vm1, %v6616_v11, %v6612_v47  ;;  %v6543_v31 = vsel %vm4719_vm3, %v6542_v34, %v6538_v20  ;;  %vm14002_vm1 = vmmov %vm13990_vm6  ;;  %vm14007_vm6 = vcmask 1047559  }
 0x8c6   :  { %v6011_v32 = vpop.permute.xlu1 %6010  ;;  %v6622_v52 = vsel %vm4719_vm3, %v6621_v29, %v6617_v6  ;;  %v6548_v28 = vsel %vm13999_vm2, %v6547_v48, %v6543_v31  ;;  %vm14003_vm3 = vmmov %vm13977_vm4 }
 0x8c7   :  { %v6626_v42 = vrot.slane %v6011_v32, %v11130_v51  ;;  %v6552_v51 = vrot.slane %v12175_v62, %v11093_v45  ;;  %v6651_v62 = vrot.slane %v6026_v53, %v11117_v16 }
 0x8c9   :  { %v6627_v4 = vsel %vm13998_vm10, %v6626_v42, %v6622_v52  ;;  %v6553_v46 = vsel %vm4733_vm12, %v6552_v51, %v6548_v28 }
 0x8ca   :  { %v6017_v33 = vpop.permute.xlu1 %6016  ;;  %v6632_v57 = vsel %vm4733_vm12, %v6631_v9, %v6627_v4  ;;  %v6558_v25 = vsel %vm4740_vm15, %v6557_v21, %v6553_v46  ;;  %vm14004_vm12 = vmmov %vm13992_vm8 }
 0x8cb   :  { %v6636_v2 = vrot.slane %v6017_v33, %v11157_v13  ;;  %v6562_v13 = vrot.slane %v12182_v56, %v11096_v41  ;;  %v6032_v41 = vpop.permute.xlu0 %6031 }
 0x8cc   :  { %v6661_v58 = vrot.slane %v6032_v41, %v11173_v37 }
 0x8cd   :  { %v6637_v54 = vsel %vm4740_vm15, %v6636_v2, %v6632_v57  ;;  %v6563_v23 = vsel %vm14002_vm1, %v6562_v13, %v6558_v25  ;;  %vm14005_vm15 = vmmov %vm13992_vm8 }
 0x8ce   :  { %v5978_v55 = vpop.permute.xlu1 %5977  ;;  %v6642_v30 = vsel %vm14000_vm13, %v6641_v59, %v6637_v54  ;;  %v6568_v60 = vsel %vm14003_vm3, %v6567_v36, %v6563_v23 }
 0x8cf   :  { %v6647_v63 = vsel %vm14001_vm14, %v6646_v1, %v6642_v30  ;;  %v6572_v45 = vrot.slane %v5978_v55, %v11117_v16 }
 0x8d0   :  { %v6652_v22 = vsel %vm14004_vm12, %v6651_v62, %v6647_v63 }
 0x8d1   :  { %v6573_v56 = vsel %vm14005_vm15, %v6572_v45, %v6568_v60  ;;  %v6657_v18 = vsel %vm4768_vm11, %v6656_v15, %v6652_v22 }
 0x8d2   :  { %v5981_v19 = vpop.permute.xlu1 %5980  ;;  %v6662_v24 = vsel %vm4775_vm5, %v6661_v58, %v6657_v18 }
 0x8d3   :  { %v6577_v35 = vrot.slane %v5981_v19, %v11209_v0 }
 0x8d5   :  { %v6578_v16 = vsel %vm4768_vm11, %v6577_v35, %v6573_v56 }
 0x8d6   :  { %v5984_v17 = vpop.permute.xlu1 %5983 }
 0x8d7   :  { %v6582_v43 = vrot.slane %v5984_v17, %v11173_v37 }
 0x8d9   :  { %v6583_v5 = vsel %vm4775_vm5, %v6582_v43, %v6578_v16 }
 0x8da   :  { %v5987_v39 = vpop.permute.xlu1 %5986 }
 0x8db   :  { %v6587_v10 = vrot.slane %v5987_v39, %v11240_v40 }
 0x8dd   :  { %v6588_v12 = vsel %vm4782_vm9, %v6587_v10, %v6583_v5 }
 0x8de   :  { %v6035_v11 = vpop.permute.xlu1 %6034  ;;  %v6673_v26 = vsel %vm14006_vm0, %v6588_v12, %v12188_v7 }
 0x8df   :  { %v6666_v0 = vrot.slane %v6035_v11, %v11240_v40 }
 0x8e1   :  { %v6667_v44 = vsel %vm4782_vm9, %v6666_v0, %v6662_v24 }
 0x8e2   :  { %v6674_v32 = vsel %vm14007_vm6, %v6667_v44, %v6673_v26 }
 0x8e3   :  { %6676 = vst [vmem:[#allocation5] sm:$0xff] %v6674_v32 }
 0x8e4   :  { %6736 = shalt.err (!%p6733_p9)
}
 0x8e5   :  { %6686 = dma.vmem_to_hbm [thread:$0]  %s6684_s11, 128, %s12268_s1, [#allocation4]  }
 0x8e6   :  { %6747 = dma.done.wait [#allocation4], 128  }
 0x8e7   :  { %6748 = vsyncadd [#allocation4], 4294967168 }
 0x8e8   :  { %6690 = vsyncpa [#allocation3], 1 }
 0x8e9   :  { %6691 = vsyncpa [#allocation4], 1 }

</bundles_post_ra>
